<compile_context>
chip_gen: v6e
topology: v6e:2x2x1
jax: 0.10.0
libtpu: 0.0.40
codegen_flags: <defaults>
</compile_context>

<pallas_src>
import math

import jax
import jax.numpy as jnp
from jax import lax
from jax.experimental import pallas as pl
from jax.experimental.pallas import tpu as pltpu

_EPS = 1e-5
_NEG_SLOPE = 0.1
_LANE = 128                      # lane-dense channel padding


def _round_up(v, m):
    return (v + m - 1) // m * m


def _pad_last(a, to):
    c = a.shape[-1]
    if c == to:
        return a
    return jnp.pad(a, [(0, 0)] * (a.ndim - 1) + [(0, to - c)])


def _vmem_limit_bytes():
    # ~75% of physical VMEM: ~96 MiB on 128-MiB parts (v5e/v6e), 48 MiB on v7x.
    try:
        cap = int(pltpu.get_tpu_info().vmem_capacity_bytes)
    except Exception:
        cap = 64 * 1024 * 1024
    return (cap * 3) // 4


def _interior_mask(hp, wp):
    """(hp*wp, 1) f32 mask: 1 on the interior, 0 on the 1-px border."""
    m = jnp.zeros((hp, wp), jnp.float32).at[1:hp - 1, 1:wp - 1].set(1.0)
    return m.reshape(hp * wp, 1)


# ---------------------------------------------------------------------------
# Fused kernel:  BN affine + leaky_relu  ->  3x3 conv (9 contiguous-band MXU dots)
#                [+ residual | + fused 1x1-conv shortcut] [+ batch stats]
# ---------------------------------------------------------------------------
def _make_fused_conv_kernel(*, hp, wp, hy, wy, cin, cn,
                            with_stats, with_residual, with_shortcut, pad_output):
    hw = hp * wp
    m_rows = hy * wp             # matmul rows: flat over the padded width
    m_out = hy * wy

    def kernel(*refs):
        it = iter(refs)
        x_ref = next(it)
        m_ref = next(it)
        s_ref = next(it)
        b_ref = next(it)
        w_ref = next(it)
        r_ref = next(it) if with_residual else None
        if with_shortcut:
            xs_ref = next(it)
            s1_ref = next(it)
            b1_ref = next(it)
            ws_ref = next(it)
        o_ref = next(it)
        if with_stats:
            sum_ref = next(it)
            ssq_ref = next(it)
        act0 = next(it)
        act1 = next(it)
        act2 = next(it)
        acc = next(it)
        xs_act = next(it) if with_shortcut else None
        acts = (act0, act1, act2)

        j = pl.program_id(1)

        # --- prologue, once per batch element (inner j axis is "arbitrary"):
        #     BN affine + leaky_relu on the flat padded slab, border zeroed
        #     (== the conv's zero padding), stored as bf16 in three W-shifted
        #     copies so every tap reads at a pair-aligned sublane offset.
        @pl.when(j == 0)
        def _():
            a = x_ref[0].astype(jnp.float32)                     # (hw, cin)
            a = a * s_ref[...] + b_ref[...]
            a = jnp.where(a >= 0, a, _NEG_SLOPE * a)
            a = a * m_ref[...]                                    # zero the border
            for k in range(3):
                L = (hw - k) & ~1                                 # even row count (bf16 sublane pairs)
                acts[k][0:L, :] = a[k:k + L, :].astype(jnp.bfloat16)
                if L < hw:                                        # tail is border / beyond-image -> 0
                    acts[k][L:hw, :] = jnp.zeros((hw - L, cin), jnp.bfloat16)
            if with_shortcut:
                xs = xs_ref[0].astype(jnp.float32)                # raw strided x block
                xs = xs * s1_ref[...] + b1_ref[...]
                xs = jnp.where(xs >= 0, xs, _NEG_SLOPE * xs)      # o1 = lrelu(bn1(x)) recomputed
                xs_act[...] = xs.reshape(m_out, xs.shape[-1]).astype(jnp.bfloat16)

        # --- 3x3 conv: 9 taps, each a contiguous row-band slice of the flat
        #     activation (dw handled by the pre-shifted copies), bf16 in /
        #     f32 acc into a VMEM scratch accumulator.
        acc[...] = jnp.dot(acts[0][pl.ds(0, m_rows), :], w_ref[0],
                           preferred_element_type=jnp.float32)
        for t in range(1, 9):
            dh, dw = divmod(t, 3)
            acc[...] += jnp.dot(acts[dw][pl.ds(dh * wp, m_rows), :], w_ref[t],
                                preferred_element_type=jnp.float32)

        y3 = acc[...].reshape(hy, wp, cn)[:, :wy, :]              # drop junk columns

        # --- fused per-channel batch statistics for the *next* BatchNorm -----
        if with_stats:
            yr = y3.reshape(m_out // 8, 8, cn)
            sum_ref[0] = jnp.sum(yr, axis=0)
            ssq_ref[0] = jnp.sum(yr * yr, axis=0)

        out3 = y3
        if with_residual:                      # identity shortcut: z + x
            out3 = out3 + r_ref[0]
        if with_shortcut:                      # conv shortcut: z + (1x1 conv)(o1)
            sc = jnp.dot(xs_act[...], ws_ref[...], preferred_element_type=jnp.float32)
            out3 = out3 + sc.reshape(hy, wy, cn)

        if pad_output:
            # write straight into the spatially padded layout the next conv reads
            zr = jnp.zeros((1, wy + 2, cn), o_ref.dtype)
            zc = jnp.zeros((hy, 1, cn), o_ref.dtype)
            o_ref[0, 1:hy + 1, 1:wy + 1, :] = out3.astype(o_ref.dtype)
            o_ref[0, 0:1, :, :] = zr
            o_ref[0, hy + 1:hy + 2, :, :] = zr
            o_ref[0, 1:hy + 1, 0:1, :] = zc
            o_ref[0, 1:hy + 1, wy + 1:wy + 2, :] = zc
        else:
            o_ref[0] = out3.astype(o_ref.dtype)

    return kernel


def _fused_conv3x3(x_flat, hp, wp, scale, shift, w9, mask, *, residual=None,
                   shortcut=None, stats=False, pad_output=False,
                   out_dtype=jnp.float32):
    """Fused bn+lrelu -> 3x3 conv (stride 1 over the padded slab) [+residual /
    +1x1 shortcut] [+stats].
      x_flat: (N, Hp*Wp, Cin) spatially padded, flattened activation
      w9:     (9, Cin, Cout) bf16
    """
    N, HW, Cin = x_flat.shape
    assert HW == hp * wp
    assert wp % 2 == 0, "padded width must be even (bf16 sublane pairing)"
    hy, wy = hp - 2, wp - 2
    Cout = w9.shape[-1]
    CN = 256 if Cout % 256 == 0 else 128   # 256 fills v6e/v7x 256x256 MXUs; v5e prefers 128
    CN = min(CN, Cout)
    assert Cout % CN == 0 and Cin % _LANE == 0
    if stats:
        assert (hy * wy) % 8 == 0
    if pad_output:
        # padded interior stores land at odd sublane offsets -> keep them 32-bit
        assert out_dtype == jnp.float32
    J = Cout // CN
    m_rows = hy * wp
    m_out = hy * wy

    with_residual = residual is not None
    with_shortcut = shortcut is not None
    kernel = _make_fused_conv_kernel(
        hp=hp, wp=wp, hy=hy, wy=wy, cin=Cin, cn=CN,
        with_stats=stats, with_residual=with_residual,
        with_shortcut=with_shortcut, pad_output=pad_output)

    in_specs = [
        pl.BlockSpec((1, HW, Cin), lambda n, j: (n, 0, 0)),
        pl.BlockSpec((HW, 1), lambda n, j: (0, 0)),
        pl.BlockSpec((1, Cin), lambda n, j: (0, 0)),
        pl.BlockSpec((1, Cin), lambda n, j: (0, 0)),
        pl.BlockSpec((9, Cin, CN), lambda n, j: (0, 0, j)),
    ]
    args = [x_flat, mask, scale, shift, w9]
    if with_residual:
        in_specs.append(pl.BlockSpec((1, hy, wy, CN), lambda n, j: (n, 0, 0, j)))
        args.append(residual)
    if with_shortcut:
        xs, s1, b1, ws = shortcut
        Cs = xs.shape[-1]
        in_specs += [
            pl.BlockSpec((1, hy, wy, Cs), lambda n, j: (n, 0, 0, 0)),
            pl.BlockSpec((1, Cs), lambda n, j: (0, 0)),
            pl.BlockSpec((1, Cs), lambda n, j: (0, 0)),
            pl.BlockSpec((Cs, CN), lambda n, j: (0, j)),
        ]
        args += [xs, s1, b1, ws]

    ho, wo = (hy + 2, wy + 2) if pad_output else (hy, wy)
    out_shape = [jax.ShapeDtypeStruct((N, ho, wo, Cout), out_dtype)]
    out_specs = [pl.BlockSpec((1, ho, wo, CN), lambda n, j: (n, 0, 0, j))]
    if stats:
        out_shape += [jax.ShapeDtypeStruct((N, 8, Cout), jnp.float32)] * 2
        out_specs += [pl.BlockSpec((1, 8, CN), lambda n, j: (n, 0, j))] * 2

    scratch = [pltpu.VMEM((HW, Cin), jnp.bfloat16) for _ in range(3)]   # W-shifted bf16 act copies
    scratch.append(pltpu.VMEM((m_rows, CN), jnp.float32))               # f32 accumulator
    if with_shortcut:
        scratch.append(pltpu.VMEM((m_out, shortcut[0].shape[-1]), jnp.bfloat16))

    flops = 2 * N * m_rows * 9 * Cin * Cout
    if with_shortcut:
        flops += 2 * N * m_out * shortcut[0].shape[-1] * Cout
    bytes_accessed = sum(int(a.size) * a.dtype.itemsize for a in args)
    bytes_accessed += sum(math.prod(s.shape) * s.dtype.itemsize for s in out_shape)

    outs = pl.pallas_call(
        kernel,
        grid=(N, J),
        in_specs=in_specs,
        out_specs=out_specs,
        out_shape=out_shape,
        scratch_shapes=scratch,
        compiler_params=pltpu.CompilerParams(
            dimension_semantics=("parallel", "arbitrary"),
            vmem_limit_bytes=_vmem_limit_bytes()),
        cost_estimate=pl.CostEstimate(flops=flops, transcendentals=0,
                                      bytes_accessed=bytes_accessed),
    )(*args)
    return tuple(outs) if stats else outs[0]


# ---------------------------------------------------------------------------
# Glue: BN affine folding, weight layout, parameter init
# ---------------------------------------------------------------------------
def _bn_affine(gamma, beta, mean, var):
    s = gamma / jnp.sqrt(var + _EPS)
    return s, beta - mean * s


def _prep_w3x3(w_oihw, cin_p, cout_p):
    o, i, kh, kw = w_oihw.shape
    w9 = jnp.transpose(w_oihw, (2, 3, 1, 0)).reshape(kh * kw, i, o)
    w9 = jnp.pad(w9, ((0, 0), (0, cin_p - i), (0, cout_p - o)))
    return w9.astype(jnp.bfloat16)


def _prep_w1x1(w_oihw, cin_p, cout_p):
    o, i = w_oihw.shape[0], w_oihw.shape[1]
    ws = jnp.transpose(w_oihw[:, :, 0, 0], (1, 0))
    ws = jnp.pad(ws, ((0, cin_p - i), (0, cout_p - o)))
    return ws.astype(jnp.bfloat16)


def init_params(key, in_planes, planes, stride):
    ks = jax.random.split(key, 7)
    p = {
        "bn1_gamma": 1.0 + 0.1 * jax.random.normal(ks[0], (in_planes,), jnp.float32),
        "bn1_beta": 0.1 * jax.random.normal(ks[1], (in_planes,), jnp.float32),
        "conv1_w": 0.1 * jax.random.normal(ks[2], (planes, in_planes, 3, 3), jnp.float32),
        "bn2_gamma": 1.0 + 0.1 * jax.random.normal(ks[3], (planes,), jnp.float32),
        "bn2_beta": 0.1 * jax.random.normal(ks[4], (planes,), jnp.float32),
        "conv2_w": 0.1 * jax.random.normal(ks[5], (planes, planes, 3, 3), jnp.float32),
    }
    if stride != 1 or in_planes != planes:
        p["shortcut_w"] = 0.1 * jax.random.normal(
            ks[6], (planes, in_planes, 1, 1), jnp.float32
        )
    return p


# ---------------------------------------------------------------------------
# Forward pass (matches WideBasicBlock.forward, training-mode BatchNorm2d)
# ---------------------------------------------------------------------------
def wide_basic_block_forward(x_nchw, params, stride):
    xf = jnp.transpose(x_nchw, (0, 2, 3, 1)).astype(jnp.float32)     # NHWC
    N, H, W, Cin = xf.shape
    planes = params["conv1_w"].shape[0]
    cin_p = _round_up(Cin, _LANE)
    cout_p = _round_up(planes, _LANE)

    # bn1 batch statistics (TODO(synk): fuse into the producer / previous block's
    # stats epilogue instead of an extra read of x)
    m1 = jnp.mean(xf, axis=(0, 1, 2))
    v1 = jnp.mean(jnp.square(xf - m1), axis=(0, 1, 2))
    s1, b1 = _bn_affine(params["bn1_gamma"], params["bn1_beta"], m1, v1)
    s1p = _pad_last(s1.reshape(1, -1), cin_p)
    b1p = _pad_last(b1.reshape(1, -1), cin_p)

    # lane-dense channel padding; +1px spatial zero padding for conv1's input
    x_cp = _pad_last(xf, cin_p)                                      # residual / shortcut operand
    x_sp = jnp.pad(x_cp, ((0, 0), (1, 1), (1, 1), (0, 0)))
    hp1, wp1 = H + 2, W + 2
    x_flat = x_sp.reshape(N, hp1 * wp1, cin_p)
    mask1 = _interior_mask(hp1, wp1)

    w1p = _prep_w3x3(params["conv1_w"], cin_p, cout_p)

    if stride == 1:
        # conv1 fused with bn1+lrelu prologue and the bn2 sum/ssq epilogue; it
        # writes directly into the spatially padded layout conv2 consumes.
        y_sp, ysum, yssq = _fused_conv3x3(
            x_flat, hp1, wp1, s1p, b1p, w1p, mask1,
            stats=True, pad_output=True, out_dtype=jnp.float32)
        cnt = N * H * W
        m2 = jnp.sum(ysum, axis=(0, 1))[:planes] / cnt
        v2 = jnp.sum(yssq, axis=(0, 1))[:planes] / cnt - m2 * m2
        Ho, Wo = H, W
        hp2, wp2 = Ho + 2, Wo + 2
        y_flat = y_sp.reshape(N, hp2 * wp2, cout_p)                  # free reshape in HBM
    else:
        # TODO(synk): fold the output stride into the kernel (strided pl.ds LHS
        # slices + fused stats) instead of dense conv + wrapper subsample.
        y_full = _fused_conv3x3(x_flat, hp1, wp1, s1p, b1p, w1p, mask1,
                                out_dtype=jnp.bfloat16)
        y = y_full[:, ::stride, ::stride, :]
        yr = y[..., :planes].astype(jnp.float32)
        m2 = jnp.mean(yr, axis=(0, 1, 2))
        v2 = jnp.mean(jnp.square(yr - m2), axis=(0, 1, 2))
        Ho, Wo = y.shape[1], y.shape[2]
        hp2, wp2 = Ho + 2, Wo + 2
        y_flat = jnp.pad(y, ((0, 0), (1, 1), (1, 1), (0, 0))).reshape(
            N, hp2 * wp2, cout_p)

    s2, b2 = _bn_affine(params["bn2_gamma"], params["bn2_beta"], m2, v2)
    s2p = _pad_last(s2.reshape(1, -1), cout_p)
    b2p = _pad_last(b2.reshape(1, -1), cout_p)

    w2p = _prep_w3x3(params["conv2_w"], cout_p, cout_p)
    mask2 = _interior_mask(hp2, wp2)

    if "shortcut_w" in params:
        # shortcut = (1x1 conv, stride)(o1); o1 is recomputed in-kernel from the
        # raw strided input, so o1 never round-trips through HBM.
        xs = x_cp[:, ::stride, ::stride, :]
        wsp = _prep_w1x1(params["shortcut_w"], cin_p, cout_p)
        out_p = _fused_conv3x3(y_flat, hp2, wp2, s2p, b2p, w2p, mask2,
                               shortcut=(xs, s1p, b1p, wsp))
    else:
        out_p = _fused_conv3x3(y_flat, hp2, wp2, s2p, b2p, w2p, mask2,
                               residual=x_cp)

    out = out_p[..., :planes]
    return jnp.transpose(out, (0, 3, 1, 2))                          # back to NCHW


# ---------------------------------------------------------------------------
# Pure-JAX reference (for correctness check only)
# ---------------------------------------------------------------------------
def _ref_forward(x_nchw, params, stride):
    x = x_nchw.astype(jnp.float32)

    def bn_lrelu(t, gamma, beta):
        mean = jnp.mean(t, axis=(0, 2, 3), keepdims=True)
        var = jnp.mean((t - mean) ** 2, axis=(0, 2, 3), keepdims=True)
        yv = (t - mean) / jnp.sqrt(var + _EPS)
        yv = yv * gamma.reshape(1, -1, 1, 1) + beta.reshape(1, -1, 1, 1)
        return jnp.where(yv >= 0, yv, _NEG_SLOPE * yv)

    def conv(t, w, s, pad):
        return lax.conv_general_dilated(
            t, w, window_strides=(s, s), padding=[(pad, pad), (pad, pad)],
            dimension_numbers=("NCHW", "OIHW", "NCHW"))

    o1 = bn_lrelu(x, params["bn1_gamma"], params["bn1_beta"])
    y = conv(o1, params["conv1_w"], stride, 1)
    o2 = bn_lrelu(y, params["bn2_gamma"], params["bn2_beta"])
    z = conv(o2, params["conv2_w"], 1, 1)
    if "shortcut_w" in params:
        return z + conv(o1, params["shortcut_w"], stride, 0)
    return z + x


# ---------------------------------------------------------------------------
if __name__ == "__main__":
    key = jax.random.PRNGKey(0)
    kx, kp1, kp2 = jax.random.split(key, 3)
    x = jax.random.normal(kx, (2, 4, 16, 16), jnp.float32)           # NCHW like PyTorch

    fwd = jax.jit(wide_basic_block_forward, static_argnums=(2,))

    # Case 1: identity shortcut (in_planes == planes, stride == 1)
    p_id = init_params(kp1, in_planes=4, planes=4, stride=1)
    out_id = jax.block_until_ready(fwd(x, p_id, 1))
    ref_id = jax.block_until_ready(_ref_forward(x, p_id, 1))
    assert out_id.shape == (2, 4, 16, 16)
    err_id = float(jnp.max(jnp.abs(out_id - ref_id)))
    # bf16 MXU operands / bf16 activation storage (f32 accumulation) -> loose tol
    assert jnp.allclose(out_id, ref_id, rtol=5e-2, atol=5e-2), err_id

    # Case 2: conv shortcut (planes != in_planes, stride == 2)
    p_sc = init_params(kp2, in_planes=4, planes=8, stride=2)
    out_sc = jax.block_until_ready(fwd(x, p_sc, 2))
    ref_sc = jax.block_until_ready(_ref_forward(x, p_sc, 2))
    assert out_sc.shape == (2, 8, 8, 8)
    err_sc = float(jnp.max(jnp.abs(out_sc - ref_sc)))
    assert jnp.allclose(out_sc, ref_sc, rtol=5e-2, atol=5e-2), err_sc

    print("KERNEL_OK")
</pallas_src>

<mosaic_0001>
module attributes {stable_mosaic.version = 11 : i64} {
  func.func @kernel(%arg0: i32, %arg1: i32, %arg2: memref<1x324x128xf32, #tpu.memory_space<vmem>>, %arg3: memref<324x1xf32, #tpu.memory_space<vmem>>, %arg4: memref<1x128xf32, #tpu.memory_space<vmem>>, %arg5: memref<1x128xf32, #tpu.memory_space<vmem>>, %arg6: memref<9x128x128xbf16, #tpu.memory_space<vmem>>, %arg7: memref<1x18x18x128xf32, #tpu.memory_space<vmem>>, %arg8: memref<1x8x128xf32, #tpu.memory_space<vmem>>, %arg9: memref<1x8x128xf32, #tpu.memory_space<vmem>>, %arg10: memref<324x128xbf16, #tpu.memory_space<vmem>>, %arg11: memref<324x128xbf16, #tpu.memory_space<vmem>>, %arg12: memref<324x128xbf16, #tpu.memory_space<vmem>>, %arg13: memref<288x128xf32, #tpu.memory_space<vmem>>) attributes {dimension_semantics = [#tpu.dimension_semantics<parallel>, #tpu.dimension_semantics<arbitrary>], iteration_bounds = array<i64: 2, 1>, scalar_prefetch = 0 : i64, scratch_operands = 4 : i64, tpu.core_type = #tpu.core_type<tc>, window_params = [{transform_indices = @transform_0, window_bounds = array<i64: 1, 324, 128>}, {pipeline_mode = #tpu.pipeline_mode<synchronous>, transform_indices = @transform_1, window_bounds = array<i64: 324, 1>}, {pipeline_mode = #tpu.pipeline_mode<synchronous>, transform_indices = @transform_2, window_bounds = array<i64: 1, 128>}, {pipeline_mode = #tpu.pipeline_mode<synchronous>, transform_indices = @transform_3, window_bounds = array<i64: 1, 128>}, {transform_indices = @transform_4, window_bounds = array<i64: 9, 128, 128>}, {transform_indices = @transform_5, window_bounds = array<i64: 1, 18, 18, 128>}, {transform_indices = @transform_6, window_bounds = array<i64: 1, 8, 128>}, {transform_indices = @transform_7, window_bounds = array<i64: 1, 8, 128>}]} {
    %c0_i32 = arith.constant 0 : i32
    %0 = arith.cmpi eq, %arg1, %c0_i32 : i32
    %1 = arith.extui %0 : i1 to i32
    %c0_i32_0 = arith.constant 0 : i32
    %2 = arith.cmpi ne, %1, %c0_i32_0 : i32
    scf.if %2 {
      %c0_108 = arith.constant 0 : index
      %c0_109 = arith.constant 0 : index
      %c0_110 = arith.constant 0 : index
      %94 = vector.load %arg2[%c0_108, %c0_109, %c0_110] : memref<1x324x128xf32, #tpu.memory_space<vmem>>, vector<1x324x128xf32>
      %95 = vector.shape_cast %94 : vector<1x324x128xf32> to vector<324x128xf32>
      %c0_111 = arith.constant 0 : index
      %c0_112 = arith.constant 0 : index
      %96 = vector.load %arg4[%c0_111, %c0_112] : memref<1x128xf32, #tpu.memory_space<vmem>>, vector<1x128xf32>
      %97 = vector.broadcast %96 : vector<1x128xf32> to vector<324x128xf32>
      %98 = arith.mulf %95, %97 : vector<324x128xf32>
      %c0_113 = arith.constant 0 : index
      %c0_114 = arith.constant 0 : index
      %99 = vector.load %arg5[%c0_113, %c0_114] : memref<1x128xf32, #tpu.memory_space<vmem>>, vector<1x128xf32>
      %100 = vector.broadcast %99 : vector<1x128xf32> to vector<324x128xf32>
      %101 = arith.addf %98, %100 : vector<324x128xf32>
      %cst_115 = arith.constant 0.000000e+00 : f32
      %102 = vector.broadcast %cst_115 : f32 to vector<324x128xf32>
      %103 = arith.cmpf oge, %101, %102 : vector<324x128xf32>
      %cst_116 = arith.constant 1.000000e-01 : f32
      %104 = vector.broadcast %cst_116 : f32 to vector<324x128xf32>
      %105 = arith.mulf %104, %101 : vector<324x128xf32>
      %106 = arith.select %103, %101, %105 : vector<324x128xi1>, vector<324x128xf32>
      %c0_117 = arith.constant 0 : index
      %c0_118 = arith.constant 0 : index
      %107 = vector.load %arg3[%c0_117, %c0_118] : memref<324x1xf32, #tpu.memory_space<vmem>>, vector<324x1xf32>
      %108 = vector.broadcast %107 : vector<324x1xf32> to vector<324x128xf32>
      %109 = arith.mulf %106, %108 : vector<324x128xf32>
      %110 = arith.truncf %109 : vector<324x128xf32> to vector<324x128xbf16>
      %c0_119 = arith.constant 0 : index
      %c0_120 = arith.constant 0 : index
      %111 = vector.load %arg10[%c0_119, %c0_120] : memref<324x128xbf16, #tpu.memory_space<vmem>>, vector<324x128xbf16>
      tpu.vector_store %arg10[%c0_119, %c0_120], %110 {strides = array<i32>} : memref<324x128xbf16, #tpu.memory_space<vmem>>, vector<324x128xbf16>,
      %112 = vector.extract_strided_slice %109 {offsets = [1, 0], sizes = [322, 128], strides = [1, 1]} : vector<324x128xf32> to vector<322x128xf32>
      %113 = arith.truncf %112 : vector<322x128xf32> to vector<322x128xbf16>
      %c0_121 = arith.constant 0 : index
      %c0_122 = arith.constant 0 : index
      %114 = vector.load %arg11[%c0_121, %c0_122] : memref<324x128xbf16, #tpu.memory_space<vmem>>, vector<322x128xbf16>
      tpu.vector_store %arg11[%c0_121, %c0_122], %113 {strides = array<i32>} : memref<324x128xbf16, #tpu.memory_space<vmem>>, vector<322x128xbf16>,
      %cst_123 = arith.constant 0.000000e+00 : bf16
      %115 = vector.broadcast %cst_123 : bf16 to vector<2x128xbf16>
      %c322 = arith.constant 322 : index
      %c0_124 = arith.constant 0 : index
      %116 = vector.load %arg11[%c322, %c0_124] : memref<324x128xbf16, #tpu.memory_space<vmem>>, vector<2x128xbf16>
      tpu.vector_store %arg11[%c322, %c0_124], %115 {strides = array<i32>} : memref<324x128xbf16, #tpu.memory_space<vmem>>, vector<2x128xbf16>,
      %117 = vector.extract_strided_slice %109 {offsets = [2, 0], sizes = [322, 128], strides = [1, 1]} : vector<324x128xf32> to vector<322x128xf32>
      %118 = arith.truncf %117 : vector<322x128xf32> to vector<322x128xbf16>
      %c0_125 = arith.constant 0 : index
      %c0_126 = arith.constant 0 : index
      %119 = vector.load %arg12[%c0_125, %c0_126] : memref<324x128xbf16, #tpu.memory_space<vmem>>, vector<322x128xbf16>
      tpu.vector_store %arg12[%c0_125, %c0_126], %118 {strides = array<i32>} : memref<324x128xbf16, #tpu.memory_space<vmem>>, vector<322x128xbf16>,
      %cst_127 = arith.constant 0.000000e+00 : bf16
      %120 = vector.broadcast %cst_127 : bf16 to vector<2x128xbf16>
      %c322_128 = arith.constant 322 : index
      %c0_129 = arith.constant 0 : index
      %121 = vector.load %arg12[%c322_128, %c0_129] : memref<324x128xbf16, #tpu.memory_space<vmem>>, vector<2x128xbf16>
      tpu.vector_store %arg12[%c322_128, %c0_129], %120 {strides = array<i32>} : memref<324x128xbf16, #tpu.memory_space<vmem>>, vector<2x128xbf16>,
    } else {
    }
    %c0 = arith.constant 0 : index
    %c0_1 = arith.constant 0 : index
    %3 = vector.load %arg10[%c0, %c0_1] : memref<324x128xbf16, #tpu.memory_space<vmem>>, vector<288x128xbf16>
    %c0_2 = arith.constant 0 : index
    %c0_3 = arith.constant 0 : index
    %c0_4 = arith.constant 0 : index
    %4 = vector.load %arg6[%c0_2, %c0_3, %c0_4] : memref<9x128x128xbf16, #tpu.memory_space<vmem>>, vector<1x128x128xbf16>
    %5 = vector.shape_cast %4 : vector<1x128x128xbf16> to vector<128x128xbf16>
    %cst = arith.constant dense<0.000000e+00> : vector<288x128xf32>
    %6 = tpu.matmul %3, %5, %cst {dimension_numbers = #tpu.dot_dimension_numbers<[1], [0], [0], [1], [0, 0, 1, 1], [], []>} : vector<288x128xbf16>, vector<128x128xbf16>, vector<288x128xf32> -> vector<288x128xf32>
    %c0_5 = arith.constant 0 : index
    %c0_6 = arith.constant 0 : index
    %7 = vector.load %arg13[%c0_5, %c0_6] : memref<288x128xf32, #tpu.memory_space<vmem>>, vector<288x128xf32>
    tpu.vector_store %arg13[%c0_5, %c0_6], %6 {strides = array<i32>} : memref<288x128xf32, #tpu.memory_space<vmem>>, vector<288x128xf32>,
    %c0_7 = arith.constant 0 : index
    %c0_8 = arith.constant 0 : index
    %8 = vector.load %arg13[%c0_7, %c0_8] : memref<288x128xf32, #tpu.memory_space<vmem>>, vector<288x128xf32>
    %c0_9 = arith.constant 0 : index
    %c0_10 = arith.constant 0 : index
    %9 = vector.load %arg11[%c0_9, %c0_10] : memref<324x128xbf16, #tpu.memory_space<vmem>>, vector<288x128xbf16>
    %c1 = arith.constant 1 : index
    %c0_11 = arith.constant 0 : index
    %c0_12 = arith.constant 0 : index
    %10 = vector.load %arg6[%c1, %c0_11, %c0_12] : memref<9x128x128xbf16, #tpu.memory_space<vmem>>, vector<1x128x128xbf16>
    %11 = vector.shape_cast %10 : vector<1x128x128xbf16> to vector<128x128xbf16>
    %cst_13 = arith.constant dense<0.000000e+00> : vector<288x128xf32>
    %12 = tpu.matmul %9, %11, %cst_13 {dimension_numbers = #tpu.dot_dimension_numbers<[1], [0], [0], [1], [0, 0, 1, 1], [], []>} : vector<288x128xbf16>, vector<128x128xbf16>, vector<288x128xf32> -> vector<288x128xf32>
    %13 = arith.addf %8, %12 : vector<288x128xf32>
    %c0_14 = arith.constant 0 : index
    %c0_15 = arith.constant 0 : index
    %14 = vector.load %arg13[%c0_14, %c0_15] : memref<288x128xf32, #tpu.memory_space<vmem>>, vector<288x128xf32>
    tpu.vector_store %arg13[%c0_14, %c0_15], %13 {strides = array<i32>} : memref<288x128xf32, #tpu.memory_space<vmem>>, vector<288x128xf32>,
    %c0_16 = arith.constant 0 : index
    %c0_17 = arith.constant 0 : index
    %15 = vector.load %arg13[%c0_16, %c0_17] : memref<288x128xf32, #tpu.memory_space<vmem>>, vector<288x128xf32>
    %c0_18 = arith.constant 0 : index
    %c0_19 = arith.constant 0 : index
    %16 = vector.load %arg12[%c0_18, %c0_19] : memref<324x128xbf16, #tpu.memory_space<vmem>>, vector<288x128xbf16>
    %c2 = arith.constant 2 : index
    %c0_20 = arith.constant 0 : index
    %c0_21 = arith.constant 0 : index
    %17 = vector.load %arg6[%c2, %c0_20, %c0_21] : memref<9x128x128xbf16, #tpu.memory_space<vmem>>, vector<1x128x128xbf16>
    %18 = vector.shape_cast %17 : vector<1x128x128xbf16> to vector<128x128xbf16>
    %cst_22 = arith.constant dense<0.000000e+00> : vector<288x128xf32>
    %19 = tpu.matmul %16, %18, %cst_22 {dimension_numbers = #tpu.dot_dimension_numbers<[1], [0], [0], [1], [0, 0, 1, 1], [], []>} : vector<288x128xbf16>, vector<128x128xbf16>, vector<288x128xf32> -> vector<288x128xf32>
    %20 = arith.addf %15, %19 : vector<288x128xf32>
    %c0_23 = arith.constant 0 : index
    %c0_24 = arith.constant 0 : index
    %21 = vector.load %arg13[%c0_23, %c0_24] : memref<288x128xf32, #tpu.memory_space<vmem>>, vector<288x128xf32>
    tpu.vector_store %arg13[%c0_23, %c0_24], %20 {strides = array<i32>} : memref<288x128xf32, #tpu.memory_space<vmem>>, vector<288x128xf32>,
    %c0_25 = arith.constant 0 : index
    %c0_26 = arith.constant 0 : index
    %22 = vector.load %arg13[%c0_25, %c0_26] : memref<288x128xf32, #tpu.memory_space<vmem>>, vector<288x128xf32>
    %c18 = arith.constant 18 : index
    %c0_27 = arith.constant 0 : index
    %23 = vector.load %arg10[%c18, %c0_27] : memref<324x128xbf16, #tpu.memory_space<vmem>>, vector<288x128xbf16>
    %c3 = arith.constant 3 : index
    %c0_28 = arith.constant 0 : index
    %c0_29 = arith.constant 0 : index
    %24 = vector.load %arg6[%c3, %c0_28, %c0_29] : memref<9x128x128xbf16, #tpu.memory_space<vmem>>, vector<1x128x128xbf16>
    %25 = vector.shape_cast %24 : vector<1x128x128xbf16> to vector<128x128xbf16>
    %cst_30 = arith.constant dense<0.000000e+00> : vector<288x128xf32>
    %26 = tpu.matmul %23, %25, %cst_30 {dimension_numbers = #tpu.dot_dimension_numbers<[1], [0], [0], [1], [0, 0, 1, 1], [], []>} : vector<288x128xbf16>, vector<128x128xbf16>, vector<288x128xf32> -> vector<288x128xf32>
    %27 = arith.addf %22, %26 : vector<288x128xf32>
    %c0_31 = arith.constant 0 : index
    %c0_32 = arith.constant 0 : index
    %28 = vector.load %arg13[%c0_31, %c0_32] : memref<288x128xf32, #tpu.memory_space<vmem>>, vector<288x128xf32>
    tpu.vector_store %arg13[%c0_31, %c0_32], %27 {strides = array<i32>} : memref<288x128xf32, #tpu.memory_space<vmem>>, vector<288x128xf32>,
    %c0_33 = arith.constant 0 : index
    %c0_34 = arith.constant 0 : index
    %29 = vector.load %arg13[%c0_33, %c0_34] : memref<288x128xf32, #tpu.memory_space<vmem>>, vector<288x128xf32>
    %c18_35 = arith.constant 18 : index
    %c0_36 = arith.constant 0 : index
    %30 = vector.load %arg11[%c18_35, %c0_36] : memref<324x128xbf16, #tpu.memory_space<vmem>>, vector<288x128xbf16>
    %c4 = arith.constant 4 : index
    %c0_37 = arith.constant 0 : index
    %c0_38 = arith.constant 0 : index
    %31 = vector.load %arg6[%c4, %c0_37, %c0_38] : memref<9x128x128xbf16, #tpu.memory_space<vmem>>, vector<1x128x128xbf16>
    %32 = vector.shape_cast %31 : vector<1x128x128xbf16> to vector<128x128xbf16>
    %cst_39 = arith.constant dense<0.000000e+00> : vector<288x128xf32>
    %33 = tpu.matmul %30, %32, %cst_39 {dimension_numbers = #tpu.dot_dimension_numbers<[1], [0], [0], [1], [0, 0, 1, 1], [], []>} : vector<288x128xbf16>, vector<128x128xbf16>, vector<288x128xf32> -> vector<288x128xf32>
    %34 = arith.addf %29, %33 : vector<288x128xf32>
    %c0_40 = arith.constant 0 : index
    %c0_41 = arith.constant 0 : index
    %35 = vector.load %arg13[%c0_40, %c0_41] : memref<288x128xf32, #tpu.memory_space<vmem>>, vector<288x128xf32>
    tpu.vector_store %arg13[%c0_40, %c0_41], %34 {strides = array<i32>} : memref<288x128xf32, #tpu.memory_space<vmem>>, vector<288x128xf32>,
    %c0_42 = arith.constant 0 : index
    %c0_43 = arith.constant 0 : index
    %36 = vector.load %arg13[%c0_42, %c0_43] : memref<288x128xf32, #tpu.memory_space<vmem>>, vector<288x128xf32>
    %c18_44 = arith.constant 18 : index
    %c0_45 = arith.constant 0 : index
    %37 = vector.load %arg12[%c18_44, %c0_45] : memref<324x128xbf16, #tpu.memory_space<vmem>>, vector<288x128xbf16>
    %c5 = arith.constant 5 : index
    %c0_46 = arith.constant 0 : index
    %c0_47 = arith.constant 0 : index
    %38 = vector.load %arg6[%c5, %c0_46, %c0_47] : memref<9x128x128xbf16, #tpu.memory_space<vmem>>, vector<1x128x128xbf16>
    %39 = vector.shape_cast %38 : vector<1x128x128xbf16> to vector<128x128xbf16>
    %cst_48 = arith.constant dense<0.000000e+00> : vector<288x128xf32>
    %40 = tpu.matmul %37, %39, %cst_48 {dimension_numbers = #tpu.dot_dimension_numbers<[1], [0], [0], [1], [0, 0, 1, 1], [], []>} : vector<288x128xbf16>, vector<128x128xbf16>, vector<288x128xf32> -> vector<288x128xf32>
    %41 = arith.addf %36, %40 : vector<288x128xf32>
    %c0_49 = arith.constant 0 : index
    %c0_50 = arith.constant 0 : index
    %42 = vector.load %arg13[%c0_49, %c0_50] : memref<288x128xf32, #tpu.memory_space<vmem>>, vector<288x128xf32>
    tpu.vector_store %arg13[%c0_49, %c0_50], %41 {strides = array<i32>} : memref<288x128xf32, #tpu.memory_space<vmem>>, vector<288x128xf32>,
    %c0_51 = arith.constant 0 : index
    %c0_52 = arith.constant 0 : index
    %43 = vector.load %arg13[%c0_51, %c0_52] : memref<288x128xf32, #tpu.memory_space<vmem>>, vector<288x128xf32>
    %c36 = arith.constant 36 : index
    %c0_53 = arith.constant 0 : index
    %44 = vector.load %arg10[%c36, %c0_53] : memref<324x128xbf16, #tpu.memory_space<vmem>>, vector<288x128xbf16>
    %c6 = arith.constant 6 : index
    %c0_54 = arith.constant 0 : index
    %c0_55 = arith.constant 0 : index
    %45 = vector.load %arg6[%c6, %c0_54, %c0_55] : memref<9x128x128xbf16, #tpu.memory_space<vmem>>, vector<1x128x128xbf16>
    %46 = vector.shape_cast %45 : vector<1x128x128xbf16> to vector<128x128xbf16>
    %cst_56 = arith.constant dense<0.000000e+00> : vector<288x128xf32>
    %47 = tpu.matmul %44, %46, %cst_56 {dimension_numbers = #tpu.dot_dimension_numbers<[1], [0], [0], [1], [0, 0, 1, 1], [], []>} : vector<288x128xbf16>, vector<128x128xbf16>, vector<288x128xf32> -> vector<288x128xf32>
    %48 = arith.addf %43, %47 : vector<288x128xf32>
    %c0_57 = arith.constant 0 : index
    %c0_58 = arith.constant 0 : index
    %49 = vector.load %arg13[%c0_57, %c0_58] : memref<288x128xf32, #tpu.memory_space<vmem>>, vector<288x128xf32>
    tpu.vector_store %arg13[%c0_57, %c0_58], %48 {strides = array<i32>} : memref<288x128xf32, #tpu.memory_space<vmem>>, vector<288x128xf32>,
    %c0_59 = arith.constant 0 : index
    %c0_60 = arith.constant 0 : index
    %50 = vector.load %arg13[%c0_59, %c0_60] : memref<288x128xf32, #tpu.memory_space<vmem>>, vector<288x128xf32>
    %c36_61 = arith.constant 36 : index
    %c0_62 = arith.constant 0 : index
    %51 = vector.load %arg11[%c36_61, %c0_62] : memref<324x128xbf16, #tpu.memory_space<vmem>>, vector<288x128xbf16>
    %c7 = arith.constant 7 : index
    %c0_63 = arith.constant 0 : index
    %c0_64 = arith.constant 0 : index
    %52 = vector.load %arg6[%c7, %c0_63, %c0_64] : memref<9x128x128xbf16, #tpu.memory_space<vmem>>, vector<1x128x128xbf16>
    %53 = vector.shape_cast %52 : vector<1x128x128xbf16> to vector<128x128xbf16>
    %cst_65 = arith.constant dense<0.000000e+00> : vector<288x128xf32>
    %54 = tpu.matmul %51, %53, %cst_65 {dimension_numbers = #tpu.dot_dimension_numbers<[1], [0], [0], [1], [0, 0, 1, 1], [], []>} : vector<288x128xbf16>, vector<128x128xbf16>, vector<288x128xf32> -> vector<288x128xf32>
    %55 = arith.addf %50, %54 : vector<288x128xf32>
    %c0_66 = arith.constant 0 : index
    %c0_67 = arith.constant 0 : index
    %56 = vector.load %arg13[%c0_66, %c0_67] : memref<288x128xf32, #tpu.memory_space<vmem>>, vector<288x128xf32>
    tpu.vector_store %arg13[%c0_66, %c0_67], %55 {strides = array<i32>} : memref<288x128xf32, #tpu.memory_space<vmem>>, vector<288x128xf32>,
    %c0_68 = arith.constant 0 : index
    %c0_69 = arith.constant 0 : index
    %57 = vector.load %arg13[%c0_68, %c0_69] : memref<288x128xf32, #tpu.memory_space<vmem>>, vector<288x128xf32>
    %c36_70 = arith.constant 36 : index
    %c0_71 = arith.constant 0 : index
    %58 = vector.load %arg12[%c36_70, %c0_71] : memref<324x128xbf16, #tpu.memory_space<vmem>>, vector<288x128xbf16>
    %c8 = arith.constant 8 : index
    %c0_72 = arith.constant 0 : index
    %c0_73 = arith.constant 0 : index
    %59 = vector.load %arg6[%c8, %c0_72, %c0_73] : memref<9x128x128xbf16, #tpu.memory_space<vmem>>, vector<1x128x128xbf16>
    %60 = vector.shape_cast %59 : vector<1x128x128xbf16> to vector<128x128xbf16>
    %cst_74 = arith.constant dense<0.000000e+00> : vector<288x128xf32>
    %61 = tpu.matmul %58, %60, %cst_74 {dimension_numbers = #tpu.dot_dimension_numbers<[1], [0], [0], [1], [0, 0, 1, 1], [], []>} : vector<288x128xbf16>, vector<128x128xbf16>, vector<288x128xf32> -> vector<288x128xf32>
    %62 = arith.addf %57, %61 : vector<288x128xf32>
    %c0_75 = arith.constant 0 : index
    %c0_76 = arith.constant 0 : index
    %63 = vector.load %arg13[%c0_75, %c0_76] : memref<288x128xf32, #tpu.memory_space<vmem>>, vector<288x128xf32>
    tpu.vector_store %arg13[%c0_75, %c0_76], %62 {strides = array<i32>} : memref<288x128xf32, #tpu.memory_space<vmem>>, vector<288x128xf32>,
    %c0_77 = arith.constant 0 : index
    %c0_78 = arith.constant 0 : index
    %64 = vector.load %arg13[%c0_77, %c0_78] : memref<288x128xf32, #tpu.memory_space<vmem>>, vector<288x128xf32>
    %65 = vector.shape_cast %64 : vector<288x128xf32> to vector<16x18x128xf32>
    %66 = vector.extract_strided_slice %65 {offsets = [0, 0, 0], sizes = [16, 16, 128], strides = [1, 1, 1]} : vector<16x18x128xf32> to vector<16x16x128xf32>
    %67 = vector.shape_cast %66 : vector<16x16x128xf32> to vector<32x8x128xf32>
    %cst_79 = arith.constant dense<0.000000e+00> : vector<8x128xf32>
    %68 = vector.multi_reduction <add>, %67, %cst_79 [0] : vector<32x8x128xf32> to vector<8x128xf32>
    %c0_80 = arith.constant 0 : index
    %c0_81 = arith.constant 0 : index
    %c0_82 = arith.constant 0 : index
    %69 = vector.load %arg8[%c0_80, %c0_81, %c0_82] : memref<1x8x128xf32, #tpu.memory_space<vmem>>, vector<1x8x128xf32>
    %70 = vector.shape_cast %69 : vector<1x8x128xf32> to vector<8x128xf32>
    %71 = vector.shape_cast %68 : vector<8x128xf32> to vector<1x8x128xf32>
    tpu.vector_store %arg8[%c0_80, %c0_81, %c0_82], %71 {strides = array<i32>} : memref<1x8x128xf32, #tpu.memory_space<vmem>>, vector<1x8x128xf32>,
    %72 = arith.mulf %67, %67 : vector<32x8x128xf32>
    %cst_83 = arith.constant dense<0.000000e+00> : vector<8x128xf32>
    %73 = vector.multi_reduction <add>, %72, %cst_83 [0] : vector<32x8x128xf32> to vector<8x128xf32>
    %c0_84 = arith.constant 0 : index
    %c0_85 = arith.constant 0 : index
    %c0_86 = arith.constant 0 : index
    %74 = vector.load %arg9[%c0_84, %c0_85, %c0_86] : memref<1x8x128xf32, #tpu.memory_space<vmem>>, vector<1x8x128xf32>
    %75 = vector.shape_cast %74 : vector<1x8x128xf32> to vector<8x128xf32>
    %76 = vector.shape_cast %73 : vector<8x128xf32> to vector<1x8x128xf32>
    tpu.vector_store %arg9[%c0_84, %c0_85, %c0_86], %76 {strides = array<i32>} : memref<1x8x128xf32, #tpu.memory_space<vmem>>, vector<1x8x128xf32>,
    %cst_87 = arith.constant 0.000000e+00 : f32
    %77 = vector.broadcast %cst_87 : f32 to vector<1x18x128xf32>
    %cst_88 = arith.constant 0.000000e+00 : f32
    %78 = vector.broadcast %cst_88 : f32 to vector<16x1x128xf32>
    %c0_89 = arith.constant 0 : index
    %c1_90 = arith.constant 1 : index
    %c1_91 = arith.constant 1 : index
    %c0_92 = arith.constant 0 : index
    %79 = vector.load %arg7[%c0_89, %c1_90, %c1_91, %c0_92] : memref<1x18x18x128xf32, #tpu.memory_space<vmem>>, vector<1x16x16x128xf32>
    %80 = vector.shape_cast %79 : vector<1x16x16x128xf32> to vector<16x16x128xf32>
    %81 = vector.shape_cast %66 : vector<16x16x128xf32> to vector<1x16x16x128xf32>
    tpu.vector_store %arg7[%c0_89, %c1_90, %c1_91, %c0_92], %81 {strides = array<i32>} : memref<1x18x18x128xf32, #tpu.memory_space<vmem>>, vector<1x16x16x128xf32>,
    %c0_93 = arith.constant 0 : index
    %c0_94 = arith.constant 0 : index
    %c0_95 = arith.constant 0 : index
    %c0_96 = arith.constant 0 : index
    %82 = vector.load %arg7[%c0_93, %c0_94, %c0_95, %c0_96] : memref<1x18x18x128xf32, #tpu.memory_space<vmem>>, vector<1x1x18x128xf32>
    %83 = vector.shape_cast %82 : vector<1x1x18x128xf32> to vector<1x18x128xf32>
    %84 = vector.shape_cast %77 : vector<1x18x128xf32> to vector<1x1x18x128xf32>
    tpu.vector_store %arg7[%c0_93, %c0_94, %c0_95, %c0_96], %84 {strides = array<i32>} : memref<1x18x18x128xf32, #tpu.memory_space<vmem>>, vector<1x1x18x128xf32>,
    %c0_97 = arith.constant 0 : index
    %c17 = arith.constant 17 : index
    %c0_98 = arith.constant 0 : index
    %c0_99 = arith.constant 0 : index
    %85 = vector.load %arg7[%c0_97, %c17, %c0_98, %c0_99] : memref<1x18x18x128xf32, #tpu.memory_space<vmem>>, vector<1x1x18x128xf32>
    %86 = vector.shape_cast %85 : vector<1x1x18x128xf32> to vector<1x18x128xf32>
    %87 = vector.shape_cast %77 : vector<1x18x128xf32> to vector<1x1x18x128xf32>
    tpu.vector_store %arg7[%c0_97, %c17, %c0_98, %c0_99], %87 {strides = array<i32>} : memref<1x18x18x128xf32, #tpu.memory_space<vmem>>, vector<1x1x18x128xf32>,
    %c0_100 = arith.constant 0 : index
    %c1_101 = arith.constant 1 : index
    %c0_102 = arith.constant 0 : index
    %c0_103 = arith.constant 0 : index
    %88 = vector.load %arg7[%c0_100, %c1_101, %c0_102, %c0_103] : memref<1x18x18x128xf32, #tpu.memory_space<vmem>>, vector<1x16x1x128xf32>
    %89 = vector.shape_cast %88 : vector<1x16x1x128xf32> to vector<16x1x128xf32>
    %90 = vector.shape_cast %78 : vector<16x1x128xf32> to vector<1x16x1x128xf32>
    tpu.vector_store %arg7[%c0_100, %c1_101, %c0_102, %c0_103], %90 {strides = array<i32>} : memref<1x18x18x128xf32, #tpu.memory_space<vmem>>, vector<1x16x1x128xf32>,
    %c0_104 = arith.constant 0 : index
    %c1_105 = arith.constant 1 : index
    %c17_106 = arith.constant 17 : index
    %c0_107 = arith.constant 0 : index
    %91 = vector.load %arg7[%c0_104, %c1_105, %c17_106, %c0_107] : memref<1x18x18x128xf32, #tpu.memory_space<vmem>>, vector<1x16x1x128xf32>
    %92 = vector.shape_cast %91 : vector<1x16x1x128xf32> to vector<16x1x128xf32>
    %93 = vector.shape_cast %78 : vector<16x1x128xf32> to vector<1x16x1x128xf32>
    tpu.vector_store %arg7[%c0_104, %c1_105, %c17_106, %c0_107], %93 {strides = array<i32>} : memref<1x18x18x128xf32, #tpu.memory_space<vmem>>, vector<1x16x1x128xf32>,
    return
  }
  func.func @transform_0(%arg0: i32, %arg1: i32) -> (i32, i32, i32) {
    %c0_i32 = arith.constant 0 : i32
    %c0_i32_0 = arith.constant 0 : i32
    %c0_i32_1 = arith.constant 0 : i32
    return %arg0, %c0_i32, %c0_i32_0 : i32, i32, i32
  }
  func.func @transform_1(%arg0: i32, %arg1: i32) -> (i32, i32) {
    %c0_i32 = arith.constant 0 : i32
    %c0_i32_0 = arith.constant 0 : i32
    %c0_i32_1 = arith.constant 0 : i32
    return %c0_i32, %c0_i32_0 : i32, i32
  }
  func.func @transform_2(%arg0: i32, %arg1: i32) -> (i32, i32) {
    %c0_i32 = arith.constant 0 : i32
    %c0_i32_0 = arith.constant 0 : i32
    %c0_i32_1 = arith.constant 0 : i32
    return %c0_i32, %c0_i32_0 : i32, i32
  }
  func.func @transform_3(%arg0: i32, %arg1: i32) -> (i32, i32) {
    %c0_i32 = arith.constant 0 : i32
    %c0_i32_0 = arith.constant 0 : i32
    %c0_i32_1 = arith.constant 0 : i32
    return %c0_i32, %c0_i32_0 : i32, i32
  }
  func.func @transform_4(%arg0: i32, %arg1: i32) -> (i32, i32, i32) {
    %c0_i32 = arith.constant 0 : i32
    %c0_i32_0 = arith.constant 0 : i32
    %c0_i32_1 = arith.constant 0 : i32
    return %c0_i32, %c0_i32_0, %arg1 : i32, i32, i32
  }
  func.func @transform_5(%arg0: i32, %arg1: i32) -> (i32, i32, i32, i32) {
    %c0_i32 = arith.constant 0 : i32
    %c0_i32_0 = arith.constant 0 : i32
    %c0_i32_1 = arith.constant 0 : i32
    return %arg0, %c0_i32, %c0_i32_0, %arg1 : i32, i32, i32, i32
  }
  func.func @transform_6(%arg0: i32, %arg1: i32) -> (i32, i32, i32) {
    %c0_i32 = arith.constant 0 : i32
    %c0_i32_0 = arith.constant 0 : i32
    return %arg0, %c0_i32, %arg1 : i32, i32, i32
  }
  func.func @transform_7(%arg0: i32, %arg1: i32) -> (i32, i32, i32) {
    %c0_i32 = arith.constant 0 : i32
    %c0_i32_0 = arith.constant 0 : i32
    return %arg0, %c0_i32, %arg1 : i32, i32, i32
  }
}

module attributes {stable_mosaic.version = 11 : i64} {
  func.func @kernel(%arg0: i32, %arg1: i32, %arg2: memref<1x324x128xf32, #tpu.memory_space<vmem>>, %arg3: memref<324x1xf32, #tpu.memory_space<vmem>>, %arg4: memref<1x128xf32, #tpu.memory_space<vmem>>, %arg5: memref<1x128xf32, #tpu.memory_space<vmem>>, %arg6: memref<9x128x128xbf16, #tpu.memory_space<vmem>>, %arg7: memref<1x16x16x128xf32, #tpu.memory_space<vmem>>, %arg8: memref<1x16x16x128xf32, #tpu.memory_space<vmem>>, %arg9: memref<324x128xbf16, #tpu.memory_space<vmem>>, %arg10: memref<324x128xbf16, #tpu.memory_space<vmem>>, %arg11: memref<324x128xbf16, #tpu.memory_space<vmem>>, %arg12: memref<288x128xf32, #tpu.memory_space<vmem>>) attributes {dimension_semantics = [#tpu.dimension_semantics<parallel>, #tpu.dimension_semantics<arbitrary>], iteration_bounds = array<i64: 2, 1>, scalar_prefetch = 0 : i64, scratch_operands = 4 : i64, tpu.core_type = #tpu.core_type<tc>, window_params = [{transform_indices = @transform_0, window_bounds = array<i64: 1, 324, 128>}, {pipeline_mode = #tpu.pipeline_mode<synchronous>, transform_indices = @transform_1, window_bounds = array<i64: 324, 1>}, {pipeline_mode = #tpu.pipeline_mode<synchronous>, transform_indices = @transform_2, window_bounds = array<i64: 1, 128>}, {pipeline_mode = #tpu.pipeline_mode<synchronous>, transform_indices = @transform_3, window_bounds = array<i64: 1, 128>}, {transform_indices = @transform_4, window_bounds = array<i64: 9, 128, 128>}, {transform_indices = @transform_5, window_bounds = array<i64: 1, 16, 16, 128>}, {transform_indices = @transform_6, window_bounds = array<i64: 1, 16, 16, 128>}]} {
    %c0_i32 = arith.constant 0 : i32
    %0 = arith.cmpi eq, %arg1, %c0_i32 : i32
    %1 = arith.extui %0 : i1 to i32
    %c0_i32_0 = arith.constant 0 : i32
    %2 = arith.cmpi ne, %1, %c0_i32_0 : i32
    scf.if %2 {
      %c0_87 = arith.constant 0 : index
      %c0_88 = arith.constant 0 : index
      %c0_89 = arith.constant 0 : index
      %73 = vector.load %arg2[%c0_87, %c0_88, %c0_89] : memref<1x324x128xf32, #tpu.memory_space<vmem>>, vector<1x324x128xf32>
      %74 = vector.shape_cast %73 : vector<1x324x128xf32> to vector<324x128xf32>
      %c0_90 = arith.constant 0 : index
      %c0_91 = arith.constant 0 : index
      %75 = vector.load %arg4[%c0_90, %c0_91] : memref<1x128xf32, #tpu.memory_space<vmem>>, vector<1x128xf32>
      %76 = vector.broadcast %75 : vector<1x128xf32> to vector<324x128xf32>
      %77 = arith.mulf %74, %76 : vector<324x128xf32>
      %c0_92 = arith.constant 0 : index
      %c0_93 = arith.constant 0 : index
      %78 = vector.load %arg5[%c0_92, %c0_93] : memref<1x128xf32, #tpu.memory_space<vmem>>, vector<1x128xf32>
      %79 = vector.broadcast %78 : vector<1x128xf32> to vector<324x128xf32>
      %80 = arith.addf %77, %79 : vector<324x128xf32>
      %cst_94 = arith.constant 0.000000e+00 : f32
      %81 = vector.broadcast %cst_94 : f32 to vector<324x128xf32>
      %82 = arith.cmpf oge, %80, %81 : vector<324x128xf32>
      %cst_95 = arith.constant 1.000000e-01 : f32
      %83 = vector.broadcast %cst_95 : f32 to vector<324x128xf32>
      %84 = arith.mulf %83, %80 : vector<324x128xf32>
      %85 = arith.select %82, %80, %84 : vector<324x128xi1>, vector<324x128xf32>
      %c0_96 = arith.constant 0 : index
      %c0_97 = arith.constant 0 : index
      %86 = vector.load %arg3[%c0_96, %c0_97] : memref<324x1xf32, #tpu.memory_space<vmem>>, vector<324x1xf32>
      %87 = vector.broadcast %86 : vector<324x1xf32> to vector<324x128xf32>
      %88 = arith.mulf %85, %87 : vector<324x128xf32>
      %89 = arith.truncf %88 : vector<324x128xf32> to vector<324x128xbf16>
      %c0_98 = arith.constant 0 : index
      %c0_99 = arith.constant 0 : index
      %90 = vector.load %arg9[%c0_98, %c0_99] : memref<324x128xbf16, #tpu.memory_space<vmem>>, vector<324x128xbf16>
      tpu.vector_store %arg9[%c0_98, %c0_99], %89 {strides = array<i32>} : memref<324x128xbf16, #tpu.memory_space<vmem>>, vector<324x128xbf16>,
      %91 = vector.extract_strided_slice %88 {offsets = [1, 0], sizes = [322, 128], strides = [1, 1]} : vector<324x128xf32> to vector<322x128xf32>
      %92 = arith.truncf %91 : vector<322x128xf32> to vector<322x128xbf16>
      %c0_100 = arith.constant 0 : index
      %c0_101 = arith.constant 0 : index
      %93 = vector.load %arg10[%c0_100, %c0_101] : memref<324x128xbf16, #tpu.memory_space<vmem>>, vector<322x128xbf16>
      tpu.vector_store %arg10[%c0_100, %c0_101], %92 {strides = array<i32>} : memref<324x128xbf16, #tpu.memory_space<vmem>>, vector<322x128xbf16>,
      %cst_102 = arith.constant 0.000000e+00 : bf16
      %94 = vector.broadcast %cst_102 : bf16 to vector<2x128xbf16>
      %c322 = arith.constant 322 : index
      %c0_103 = arith.constant 0 : index
      %95 = vector.load %arg10[%c322, %c0_103] : memref<324x128xbf16, #tpu.memory_space<vmem>>, vector<2x128xbf16>
      tpu.vector_store %arg10[%c322, %c0_103], %94 {strides = array<i32>} : memref<324x128xbf16, #tpu.memory_space<vmem>>, vector<2x128xbf16>,
      %96 = vector.extract_strided_slice %88 {offsets = [2, 0], sizes = [322, 128], strides = [1, 1]} : vector<324x128xf32> to vector<322x128xf32>
      %97 = arith.truncf %96 : vector<322x128xf32> to vector<322x128xbf16>
      %c0_104 = arith.constant 0 : index
      %c0_105 = arith.constant 0 : index
      %98 = vector.load %arg11[%c0_104, %c0_105] : memref<324x128xbf16, #tpu.memory_space<vmem>>, vector<322x128xbf16>
      tpu.vector_store %arg11[%c0_104, %c0_105], %97 {strides = array<i32>} : memref<324x128xbf16, #tpu.memory_space<vmem>>, vector<322x128xbf16>,
      %cst_106 = arith.constant 0.000000e+00 : bf16
      %99 = vector.broadcast %cst_106 : bf16 to vector<2x128xbf16>
      %c322_107 = arith.constant 322 : index
      %c0_108 = arith.constant 0 : index
      %100 = vector.load %arg11[%c322_107, %c0_108] : memref<324x128xbf16, #tpu.memory_space<vmem>>, vector<2x128xbf16>
      tpu.vector_store %arg11[%c322_107, %c0_108], %99 {strides = array<i32>} : memref<324x128xbf16, #tpu.memory_space<vmem>>, vector<2x128xbf16>,
    } else {
    }
    %c0 = arith.constant 0 : index
    %c0_1 = arith.constant 0 : index
    %3 = vector.load %arg9[%c0, %c0_1] : memref<324x128xbf16, #tpu.memory_space<vmem>>, vector<288x128xbf16>
    %c0_2 = arith.constant 0 : index
    %c0_3 = arith.constant 0 : index
    %c0_4 = arith.constant 0 : index
    %4 = vector.load %arg6[%c0_2, %c0_3, %c0_4] : memref<9x128x128xbf16, #tpu.memory_space<vmem>>, vector<1x128x128xbf16>
    %5 = vector.shape_cast %4 : vector<1x128x128xbf16> to vector<128x128xbf16>
    %cst = arith.constant dense<0.000000e+00> : vector<288x128xf32>
    %6 = tpu.matmul %3, %5, %cst {dimension_numbers = #tpu.dot_dimension_numbers<[1], [0], [0], [1], [0, 0, 1, 1], [], []>} : vector<288x128xbf16>, vector<128x128xbf16>, vector<288x128xf32> -> vector<288x128xf32>
    %c0_5 = arith.constant 0 : index
    %c0_6 = arith.constant 0 : index
    %7 = vector.load %arg12[%c0_5, %c0_6] : memref<288x128xf32, #tpu.memory_space<vmem>>, vector<288x128xf32>
    tpu.vector_store %arg12[%c0_5, %c0_6], %6 {strides = array<i32>} : memref<288x128xf32, #tpu.memory_space<vmem>>, vector<288x128xf32>,
    %c0_7 = arith.constant 0 : index
    %c0_8 = arith.constant 0 : index
    %8 = vector.load %arg12[%c0_7, %c0_8] : memref<288x128xf32, #tpu.memory_space<vmem>>, vector<288x128xf32>
    %c0_9 = arith.constant 0 : index
    %c0_10 = arith.constant 0 : index
    %9 = vector.load %arg10[%c0_9, %c0_10] : memref<324x128xbf16, #tpu.memory_space<vmem>>, vector<288x128xbf16>
    %c1 = arith.constant 1 : index
    %c0_11 = arith.constant 0 : index
    %c0_12 = arith.constant 0 : index
    %10 = vector.load %arg6[%c1, %c0_11, %c0_12] : memref<9x128x128xbf16, #tpu.memory_space<vmem>>, vector<1x128x128xbf16>
    %11 = vector.shape_cast %10 : vector<1x128x128xbf16> to vector<128x128xbf16>
    %cst_13 = arith.constant dense<0.000000e+00> : vector<288x128xf32>
    %12 = tpu.matmul %9, %11, %cst_13 {dimension_numbers = #tpu.dot_dimension_numbers<[1], [0], [0], [1], [0, 0, 1, 1], [], []>} : vector<288x128xbf16>, vector<128x128xbf16>, vector<288x128xf32> -> vector<288x128xf32>
    %13 = arith.addf %8, %12 : vector<288x128xf32>
    %c0_14 = arith.constant 0 : index
    %c0_15 = arith.constant 0 : index
    %14 = vector.load %arg12[%c0_14, %c0_15] : memref<288x128xf32, #tpu.memory_space<vmem>>, vector<288x128xf32>
    tpu.vector_store %arg12[%c0_14, %c0_15], %13 {strides = array<i32>} : memref<288x128xf32, #tpu.memory_space<vmem>>, vector<288x128xf32>,
    %c0_16 = arith.constant 0 : index
    %c0_17 = arith.constant 0 : index
    %15 = vector.load %arg12[%c0_16, %c0_17] : memref<288x128xf32, #tpu.memory_space<vmem>>, vector<288x128xf32>
    %c0_18 = arith.constant 0 : index
    %c0_19 = arith.constant 0 : index
    %16 = vector.load %arg11[%c0_18, %c0_19] : memref<324x128xbf16, #tpu.memory_space<vmem>>, vector<288x128xbf16>
    %c2 = arith.constant 2 : index
    %c0_20 = arith.constant 0 : index
    %c0_21 = arith.constant 0 : index
    %17 = vector.load %arg6[%c2, %c0_20, %c0_21] : memref<9x128x128xbf16, #tpu.memory_space<vmem>>, vector<1x128x128xbf16>
    %18 = vector.shape_cast %17 : vector<1x128x128xbf16> to vector<128x128xbf16>
    %cst_22 = arith.constant dense<0.000000e+00> : vector<288x128xf32>
    %19 = tpu.matmul %16, %18, %cst_22 {dimension_numbers = #tpu.dot_dimension_numbers<[1], [0], [0], [1], [0, 0, 1, 1], [], []>} : vector<288x128xbf16>, vector<128x128xbf16>, vector<288x128xf32> -> vector<288x128xf32>
    %20 = arith.addf %15, %19 : vector<288x128xf32>
    %c0_23 = arith.constant 0 : index
    %c0_24 = arith.constant 0 : index
    %21 = vector.load %arg12[%c0_23, %c0_24] : memref<288x128xf32, #tpu.memory_space<vmem>>, vector<288x128xf32>
    tpu.vector_store %arg12[%c0_23, %c0_24], %20 {strides = array<i32>} : memref<288x128xf32, #tpu.memory_space<vmem>>, vector<288x128xf32>,
    %c0_25 = arith.constant 0 : index
    %c0_26 = arith.constant 0 : index
    %22 = vector.load %arg12[%c0_25, %c0_26] : memref<288x128xf32, #tpu.memory_space<vmem>>, vector<288x128xf32>
    %c18 = arith.constant 18 : index
    %c0_27 = arith.constant 0 : index
    %23 = vector.load %arg9[%c18, %c0_27] : memref<324x128xbf16, #tpu.memory_space<vmem>>, vector<288x128xbf16>
    %c3 = arith.constant 3 : index
    %c0_28 = arith.constant 0 : index
    %c0_29 = arith.constant 0 : index
    %24 = vector.load %arg6[%c3, %c0_28, %c0_29] : memref<9x128x128xbf16, #tpu.memory_space<vmem>>, vector<1x128x128xbf16>
    %25 = vector.shape_cast %24 : vector<1x128x128xbf16> to vector<128x128xbf16>
    %cst_30 = arith.constant dense<0.000000e+00> : vector<288x128xf32>
    %26 = tpu.matmul %23, %25, %cst_30 {dimension_numbers = #tpu.dot_dimension_numbers<[1], [0], [0], [1], [0, 0, 1, 1], [], []>} : vector<288x128xbf16>, vector<128x128xbf16>, vector<288x128xf32> -> vector<288x128xf32>
    %27 = arith.addf %22, %26 : vector<288x128xf32>
    %c0_31 = arith.constant 0 : index
    %c0_32 = arith.constant 0 : index
    %28 = vector.load %arg12[%c0_31, %c0_32] : memref<288x128xf32, #tpu.memory_space<vmem>>, vector<288x128xf32>
    tpu.vector_store %arg12[%c0_31, %c0_32], %27 {strides = array<i32>} : memref<288x128xf32, #tpu.memory_space<vmem>>, vector<288x128xf32>,
    %c0_33 = arith.constant 0 : index
    %c0_34 = arith.constant 0 : index
    %29 = vector.load %arg12[%c0_33, %c0_34] : memref<288x128xf32, #tpu.memory_space<vmem>>, vector<288x128xf32>
    %c18_35 = arith.constant 18 : index
    %c0_36 = arith.constant 0 : index
    %30 = vector.load %arg10[%c18_35, %c0_36] : memref<324x128xbf16, #tpu.memory_space<vmem>>, vector<288x128xbf16>
    %c4 = arith.constant 4 : index
    %c0_37 = arith.constant 0 : index
    %c0_38 = arith.constant 0 : index
    %31 = vector.load %arg6[%c4, %c0_37, %c0_38] : memref<9x128x128xbf16, #tpu.memory_space<vmem>>, vector<1x128x128xbf16>
    %32 = vector.shape_cast %31 : vector<1x128x128xbf16> to vector<128x128xbf16>
    %cst_39 = arith.constant dense<0.000000e+00> : vector<288x128xf32>
    %33 = tpu.matmul %30, %32, %cst_39 {dimension_numbers = #tpu.dot_dimension_numbers<[1], [0], [0], [1], [0, 0, 1, 1], [], []>} : vector<288x128xbf16>, vector<128x128xbf16>, vector<288x128xf32> -> vector<288x128xf32>
    %34 = arith.addf %29, %33 : vector<288x128xf32>
    %c0_40 = arith.constant 0 : index
    %c0_41 = arith.constant 0 : index
    %35 = vector.load %arg12[%c0_40, %c0_41] : memref<288x128xf32, #tpu.memory_space<vmem>>, vector<288x128xf32>
    tpu.vector_store %arg12[%c0_40, %c0_41], %34 {strides = array<i32>} : memref<288x128xf32, #tpu.memory_space<vmem>>, vector<288x128xf32>,
    %c0_42 = arith.constant 0 : index
    %c0_43 = arith.constant 0 : index
    %36 = vector.load %arg12[%c0_42, %c0_43] : memref<288x128xf32, #tpu.memory_space<vmem>>, vector<288x128xf32>
    %c18_44 = arith.constant 18 : index
    %c0_45 = arith.constant 0 : index
    %37 = vector.load %arg11[%c18_44, %c0_45] : memref<324x128xbf16, #tpu.memory_space<vmem>>, vector<288x128xbf16>
    %c5 = arith.constant 5 : index
    %c0_46 = arith.constant 0 : index
    %c0_47 = arith.constant 0 : index
    %38 = vector.load %arg6[%c5, %c0_46, %c0_47] : memref<9x128x128xbf16, #tpu.memory_space<vmem>>, vector<1x128x128xbf16>
    %39 = vector.shape_cast %38 : vector<1x128x128xbf16> to vector<128x128xbf16>
    %cst_48 = arith.constant dense<0.000000e+00> : vector<288x128xf32>
    %40 = tpu.matmul %37, %39, %cst_48 {dimension_numbers = #tpu.dot_dimension_numbers<[1], [0], [0], [1], [0, 0, 1, 1], [], []>} : vector<288x128xbf16>, vector<128x128xbf16>, vector<288x128xf32> -> vector<288x128xf32>
    %41 = arith.addf %36, %40 : vector<288x128xf32>
    %c0_49 = arith.constant 0 : index
    %c0_50 = arith.constant 0 : index
    %42 = vector.load %arg12[%c0_49, %c0_50] : memref<288x128xf32, #tpu.memory_space<vmem>>, vector<288x128xf32>
    tpu.vector_store %arg12[%c0_49, %c0_50], %41 {strides = array<i32>} : memref<288x128xf32, #tpu.memory_space<vmem>>, vector<288x128xf32>,
    %c0_51 = arith.constant 0 : index
    %c0_52 = arith.constant 0 : index
    %43 = vector.load %arg12[%c0_51, %c0_52] : memref<288x128xf32, #tpu.memory_space<vmem>>, vector<288x128xf32>
    %c36 = arith.constant 36 : index
    %c0_53 = arith.constant 0 : index
    %44 = vector.load %arg9[%c36, %c0_53] : memref<324x128xbf16, #tpu.memory_space<vmem>>, vector<288x128xbf16>
    %c6 = arith.constant 6 : index
    %c0_54 = arith.constant 0 : index
    %c0_55 = arith.constant 0 : index
    %45 = vector.load %arg6[%c6, %c0_54, %c0_55] : memref<9x128x128xbf16, #tpu.memory_space<vmem>>, vector<1x128x128xbf16>
    %46 = vector.shape_cast %45 : vector<1x128x128xbf16> to vector<128x128xbf16>
    %cst_56 = arith.constant dense<0.000000e+00> : vector<288x128xf32>
    %47 = tpu.matmul %44, %46, %cst_56 {dimension_numbers = #tpu.dot_dimension_numbers<[1], [0], [0], [1], [0, 0, 1, 1], [], []>} : vector<288x128xbf16>, vector<128x128xbf16>, vector<288x128xf32> -> vector<288x128xf32>
    %48 = arith.addf %43, %47 : vector<288x128xf32>
    %c0_57 = arith.constant 0 : index
    %c0_58 = arith.constant 0 : index
    %49 = vector.load %arg12[%c0_57, %c0_58] : memref<288x128xf32, #tpu.memory_space<vmem>>, vector<288x128xf32>
    tpu.vector_store %arg12[%c0_57, %c0_58], %48 {strides = array<i32>} : memref<288x128xf32, #tpu.memory_space<vmem>>, vector<288x128xf32>,
    %c0_59 = arith.constant 0 : index
    %c0_60 = arith.constant 0 : index
    %50 = vector.load %arg12[%c0_59, %c0_60] : memref<288x128xf32, #tpu.memory_space<vmem>>, vector<288x128xf32>
    %c36_61 = arith.constant 36 : index
    %c0_62 = arith.constant 0 : index
    %51 = vector.load %arg10[%c36_61, %c0_62] : memref<324x128xbf16, #tpu.memory_space<vmem>>, vector<288x128xbf16>
    %c7 = arith.constant 7 : index
    %c0_63 = arith.constant 0 : index
    %c0_64 = arith.constant 0 : index
    %52 = vector.load %arg6[%c7, %c0_63, %c0_64] : memref<9x128x128xbf16, #tpu.memory_space<vmem>>, vector<1x128x128xbf16>
    %53 = vector.shape_cast %52 : vector<1x128x128xbf16> to vector<128x128xbf16>
    %cst_65 = arith.constant dense<0.000000e+00> : vector<288x128xf32>
    %54 = tpu.matmul %51, %53, %cst_65 {dimension_numbers = #tpu.dot_dimension_numbers<[1], [0], [0], [1], [0, 0, 1, 1], [], []>} : vector<288x128xbf16>, vector<128x128xbf16>, vector<288x128xf32> -> vector<288x128xf32>
    %55 = arith.addf %50, %54 : vector<288x128xf32>
    %c0_66 = arith.constant 0 : index
    %c0_67 = arith.constant 0 : index
    %56 = vector.load %arg12[%c0_66, %c0_67] : memref<288x128xf32, #tpu.memory_space<vmem>>, vector<288x128xf32>
    tpu.vector_store %arg12[%c0_66, %c0_67], %55 {strides = array<i32>} : memref<288x128xf32, #tpu.memory_space<vmem>>, vector<288x128xf32>,
    %c0_68 = arith.constant 0 : index
    %c0_69 = arith.constant 0 : index
    %57 = vector.load %arg12[%c0_68, %c0_69] : memref<288x128xf32, #tpu.memory_space<vmem>>, vector<288x128xf32>
    %c36_70 = arith.constant 36 : index
    %c0_71 = arith.constant 0 : index
    %58 = vector.load %arg11[%c36_70, %c0_71] : memref<324x128xbf16, #tpu.memory_space<vmem>>, vector<288x128xbf16>
    %c8 = arith.constant 8 : index
    %c0_72 = arith.constant 0 : index
    %c0_73 = arith.constant 0 : index
    %59 = vector.load %arg6[%c8, %c0_72, %c0_73] : memref<9x128x128xbf16, #tpu.memory_space<vmem>>, vector<1x128x128xbf16>
    %60 = vector.shape_cast %59 : vector<1x128x128xbf16> to vector<128x128xbf16>
    %cst_74 = arith.constant dense<0.000000e+00> : vector<288x128xf32>
    %61 = tpu.matmul %58, %60, %cst_74 {dimension_numbers = #tpu.dot_dimension_numbers<[1], [0], [0], [1], [0, 0, 1, 1], [], []>} : vector<288x128xbf16>, vector<128x128xbf16>, vector<288x128xf32> -> vector<288x128xf32>
    %62 = arith.addf %57, %61 : vector<288x128xf32>
    %c0_75 = arith.constant 0 : index
    %c0_76 = arith.constant 0 : index
    %63 = vector.load %arg12[%c0_75, %c0_76] : memref<288x128xf32, #tpu.memory_space<vmem>>, vector<288x128xf32>
    tpu.vector_store %arg12[%c0_75, %c0_76], %62 {strides = array<i32>} : memref<288x128xf32, #tpu.memory_space<vmem>>, vector<288x128xf32>,
    %c0_77 = arith.constant 0 : index
    %c0_78 = arith.constant 0 : index
    %64 = vector.load %arg12[%c0_77, %c0_78] : memref<288x128xf32, #tpu.memory_space<vmem>>, vector<288x128xf32>
    %65 = vector.shape_cast %64 : vector<288x128xf32> to vector<16x18x128xf32>
    %66 = vector.extract_strided_slice %65 {offsets = [0, 0, 0], sizes = [16, 16, 128], strides = [1, 1, 1]} : vector<16x18x128xf32> to vector<16x16x128xf32>
    %c0_79 = arith.constant 0 : index
    %c0_80 = arith.constant 0 : index
    %c0_81 = arith.constant 0 : index
    %c0_82 = arith.constant 0 : index
    %67 = vector.load %arg7[%c0_79, %c0_80, %c0_81, %c0_82] : memref<1x16x16x128xf32, #tpu.memory_space<vmem>>, vector<1x16x16x128xf32>
    %68 = vector.shape_cast %67 : vector<1x16x16x128xf32> to vector<16x16x128xf32>
    %69 = arith.addf %66, %68 : vector<16x16x128xf32>
    %c0_83 = arith.constant 0 : index
    %c0_84 = arith.constant 0 : index
    %c0_85 = arith.constant 0 : index
    %c0_86 = arith.constant 0 : index
    %70 = vector.load %arg8[%c0_83, %c0_84, %c0_85, %c0_86] : memref<1x16x16x128xf32, #tpu.memory_space<vmem>>, vector<1x16x16x128xf32>
    %71 = vector.shape_cast %70 : vector<1x16x16x128xf32> to vector<16x16x128xf32>
    %72 = vector.shape_cast %69 : vector<16x16x128xf32> to vector<1x16x16x128xf32>
    tpu.vector_store %arg8[%c0_83, %c0_84, %c0_85, %c0_86], %72 {strides = array<i32>} : memref<1x16x16x128xf32, #tpu.memory_space<vmem>>, vector<1x16x16x128xf32>,
    return
  }
  func.func @transform_0(%arg0: i32, %arg1: i32) -> (i32, i32, i32) {
    %c0_i32 = arith.constant 0 : i32
    %c0_i32_0 = arith.constant 0 : i32
    %c0_i32_1 = arith.constant 0 : i32
    return %arg0, %c0_i32, %c0_i32_0 : i32, i32, i32
  }
  func.func @transform_1(%arg0: i32, %arg1: i32) -> (i32, i32) {
    %c0_i32 = arith.constant 0 : i32
    %c0_i32_0 = arith.constant 0 : i32
    %c0_i32_1 = arith.constant 0 : i32
    return %c0_i32, %c0_i32_0 : i32, i32
  }
  func.func @transform_2(%arg0: i32, %arg1: i32) -> (i32, i32) {
    %c0_i32 = arith.constant 0 : i32
    %c0_i32_0 = arith.constant 0 : i32
    %c0_i32_1 = arith.constant 0 : i32
    return %c0_i32, %c0_i32_0 : i32, i32
  }
  func.func @transform_3(%arg0: i32, %arg1: i32) -> (i32, i32) {
    %c0_i32 = arith.constant 0 : i32
    %c0_i32_0 = arith.constant 0 : i32
    %c0_i32_1 = arith.constant 0 : i32
    return %c0_i32, %c0_i32_0 : i32, i32
  }
  func.func @transform_4(%arg0: i32, %arg1: i32) -> (i32, i32, i32) {
    %c0_i32 = arith.constant 0 : i32
    %c0_i32_0 = arith.constant 0 : i32
    %c0_i32_1 = arith.constant 0 : i32
    return %c0_i32, %c0_i32_0, %arg1 : i32, i32, i32
  }
  func.func @transform_5(%arg0: i32, %arg1: i32) -> (i32, i32, i32, i32) {
    %c0_i32 = arith.constant 0 : i32
    %c0_i32_0 = arith.constant 0 : i32
    %c0_i32_1 = arith.constant 0 : i32
    return %arg0, %c0_i32, %c0_i32_0, %arg1 : i32, i32, i32, i32
  }
  func.func @transform_6(%arg0: i32, %arg1: i32) -> (i32, i32, i32, i32) {
    %c0_i32 = arith.constant 0 : i32
    %c0_i32_0 = arith.constant 0 : i32
    %c0_i32_1 = arith.constant 0 : i32
    return %arg0, %c0_i32, %c0_i32_0, %arg1 : i32, i32, i32, i32
  }
}

</mosaic_0001>

<bundles_post_ra>
// kernel: wide_basic_block_forward.3
= control target key start
LH: loop header
LB: loop body
LE: loop exit
PB: predicated region body
PF: predicated region fallthrough
CT: control target
= control target key end

     0   :  { %s10585_s21 = smov 0   ;;  %s10587_s22 = smov 0   ;;  %s13116_s0 = inlined_call_operand.vmem [shape: f32[2,324,128], index: 0, kind: input, shape index: {}]   ;;  %s13117_s1 = inlined_call_operand.vmem [shape: f32[324,1], index: 1, kind: input, shape index: {}]   ;;  %s13118_s2 = inlined_call_operand.vmem [shape: f32[1,128], index: 2, kind: input, shape index: {}]   ;;  %s13119_s3 = inlined_call_operand.vmem [shape: f32[1,128], index: 3, kind: input, shape index: {}]   ;;  %s13120_s4 = inlined_call_operand.vmem [shape: bf16[9,128,128], index: 4, kind: input, shape index: {}]   ;;  %s13121_s5 = inlined_call_operand.vmem [shape: f32[2,16,16,128], index: 5, kind: input, shape index: {}]   ;;  %s13122_s6 = inlined_call_operand.vmem [shape: f32[2,16,16,128], index: 6, kind: output, shape index: {}]  }
   0x1   :  { %s10589_s23 = smov 0  }
   0x2 LB: > { %s28_s24 = sadd.s32 1, %s10542_s22  ;;  %p8922_p0 = scmp.ge.s32.totalorder %s10546_s23, 1  ;;  %s10546_s23 = sphi %s10589_s23, %s16_s23   ;;  %s10542_s22 = sphi %s10587_s22, %s13365_s22   ;;  %s10538_s21 = sphi %s10585_s21, %s13364_s21  }
   0x3   : > { %p30_p1 = scmp.ge.s32.totalorder %s28_s24, 2  ;;  %p250_p2 = scmp.lt.s32.totalorder %s10546_s23, 3 }
   0x5   : > { %s13367_s24 = smov (%p30_p1, %s28_s24), 0  ;;  %p251_p3 = pnand %p8922_p0, %p250_p2 }
   0x7   : > { %254 = sbr.rel (%p251_p3) target bundleno = 836 (0x344), region = 44 }
   0xc   : > { %v603_v0 = vld [vmem:[%s13117_s1 + $0x90] sm:$0xff]  ;;  %v601_v1 = vld [vmem:[%s13117_s1 + $0x80] sm:$0xff]  ;;  %v10548_v2 = vmov 0   ;;  %v604_v3 = vld [vmem:[%s13117_s1 + $0x98] sm:$0xff]  ;;  %p295_p4 = scmp.lt.s32.totalorder %s10538_s21, 1 }
   0xd   : > { %10250 = vset.pattern.permute.xlu1 %v10548_v2  ;;  %10249 = vset.pattern.permute.xlu0 %v10548_v2  ;;  %v602_v4 = vld [vmem:[%s13117_s1 + $0x88] sm:$0xff]  ;;  %v605_v6 = vld [vmem:[%s13117_s1 + $0xa0] sm:$0xff]  ;;  %v608_v7 = vld [vmem:[%s13117_s1 + $0xb8] sm:$0xff] }
   0xe   : > { %718 = vperm.xlu1 %10250, %v603_v0   ;;  %708 = vperm.xlu0 %10249, %v601_v1   ;;  %v606_v5 = vld [vmem:[%s13117_s1 + $0xa8] sm:$0xff]  ;;  %v607_v8 = vld [vmem:[%s13117_s1 + $0xb0] sm:$0xff]  ;;  %v585_v10 = vld [vmem:[%s13117_s1] sm:$0xff]  ;;  %s13369_s21 = smov (!%p295_p4, %s10538_s21), 1 }
   0xf   : > { %v586_v9 = vld [vmem:[%s13117_s1 + $0x8] sm:$0xff]  ;;  %v10251_v11 = vld [vmem:[%s13120_s4 + $0x38] sm:$0xff]   ;;  %v10252_v12 = vld [vmem:[%s13120_s4 + $0x30] sm:$0xff]   ;;  %s10222_s13 = smul.u32 328, %s13369_s21  ;;  %s9342_s17 = sshll.u32 %s13369_s21, 8 }
  0x10   : > { %10206 = vmatprep.subr.bf16.mxu1 %v10251_v11  ;;  %9738 = vmatprep.subr.bf16.mxu0 %v10251_v11  ;;  %v588_v13 = vld [vmem:[%s13117_s1 + $0x18] sm:$0xff]  ;;  %v587_v14 = vld [vmem:[%s13117_s1 + $0x10] sm:$0xff]  ;;  %v10253_v15 = vld [vmem:[%s13120_s4 + $0x28] sm:$0xff]   ;;  %s12120_s25 = scalar_lea.vmem %s13121_s5, %s9342_s17  ;;  %s12636_s28 = scalar_lea.vmem %s13122_s6, %s9342_s17 }
  0x11   : > { %10214 = vmatpush3.bf16.msra.mxu1 %v10251_v11  ;;  %9739 = vmatpush3.bf16.msra.mxu0 %v10251_v11  ;;  %v610_v16 = vld [vmem:[%s13117_s1 + $0xc8] sm:$0xff]  ;;  %v609_v17 = vld [vmem:[%s13117_s1 + $0xc0] sm:$0xff]  ;;  %v612_v19 = vld [vmem:[%s13117_s1 + $0xd8] sm:$0xff]  ;;  %s10727_s20 = scalar_lea.vmem %s13116_s0, %s10222_s13 }
  0x12   : > { %723 = vperm.xlu1 %10250, %v604_v3   ;;  %713 = vperm.xlu0 %10249, %v602_v4   ;;  %v10254_v18 = vld [vmem:[%s13120_s4 + $0x20] sm:$0xff]   ;;  %v611_v20 = vld [vmem:[%s13117_s1 + $0xd0] sm:$0xff]  ;;  %v10255_v21 = vld [vmem:[%s13120_s4 + $0x18] sm:$0xff]  }
  0x13   : > { %10207 = vmatprep.subr.bf16.mxu1 %v10252_v12  ;;  %9740 = vmatprep.subr.bf16.mxu0 %v10252_v12  ;;  %v590_v22 = vld [vmem:[%s13117_s1 + $0x28] sm:$0xff]  ;;  %v589_v23 = vld [vmem:[%s13117_s1 + $0x20] sm:$0xff]  ;;  %v10256_v24 = vld [vmem:[%s13120_s4 + $0x10] sm:$0xff]  }
  0x14   : > { %v592_v25 = vld [vmem:[%s13117_s1 + $0x38] sm:$0xff]  ;;  %v591_v26 = vld [vmem:[%s13117_s1 + $0x30] sm:$0xff]  ;;  %v10257_v27 = vld [vmem:[%s13120_s4 + $0x8] sm:$0xff]  }
  0x15   : > { %10215 = vmatpush3.bf16.msra.mxu1 %v10252_v12  ;;  %9741 = vmatpush3.bf16.msra.mxu0 %v10252_v12  ;;  %v614_v28 = vld [vmem:[%s13117_s1 + $0xe8] sm:$0xff]  ;;  %v613_v29 = vld [vmem:[%s13117_s1 + $0xe0] sm:$0xff]  ;;  %v616_v31 = vld [vmem:[%s13117_s1 + $0xf8] sm:$0xff] }
  0x16   : > { %733 = vperm.xlu1 %10250, %v606_v5   ;;  %728 = vperm.xlu0 %10249, %v605_v6   ;;  %v10258_v30 = vld [vmem:[%s13120_s4] sm:$0xff]   ;;  %v615_v32 = vld [vmem:[%s13117_s1 + $0xf0] sm:$0xff]  ;;  %v594_v33 = vld [vmem:[%s13117_s1 + $0x48] sm:$0xff] }
  0x17   : > { %10208 = vmatprep.subr.bf16.mxu1 %v10253_v15  ;;  %9742 = vmatprep.subr.bf16.mxu0 %v10253_v15  ;;  %v593_v34 = vld [vmem:[%s13117_s1 + $0x40] sm:$0xff]  ;;  %v596_v35 = vld [vmem:[%s13117_s1 + $0x58] sm:$0xff]  ;;  %v595_v36 = vld [vmem:[%s13117_s1 + $0x50] sm:$0xff] }
  0x18   : > { %v618_v37 = vld [vmem:[%s13117_s1 + $0x108] sm:$0xff]  ;;  %v617_v38 = vld [vmem:[%s13117_s1 + $0x100] sm:$0xff]  ;;  %v620_v39 = vld [vmem:[%s13117_s1 + $0x118] sm:$0xff] }
  0x19   : > { %10216 = vmatpush3.bf16.msra.mxu1 %v10253_v15  ;;  %9743 = vmatpush3.bf16.msra.mxu0 %v10253_v15  ;;  %v619_v40 = vld [vmem:[%s13117_s1 + $0x110] sm:$0xff]  ;;  %v10739_v42 = vld [vmem:[%s13118_s2] ss:$0 sm:$0xff]  ;;  %v598_v43 = vld [vmem:[%s13117_s1 + $0x68] sm:$0xff] }
  0x1a   : > { %743 = vperm.xlu1 %10250, %v608_v7   ;;  %738 = vperm.xlu0 %10249, %v607_v8   ;;  %v343_v41 = vld [vmem:[%s10727_s20 + $0x90] sm:$0xff]  ;;  %v597_v44 = vld [vmem:[%s13117_s1 + $0x60] sm:$0xff]  ;;  %v344_v48 = vld [vmem:[%s10727_s20 + $0x98] sm:$0xff] }
  0x1b   : > { %10209 = vmatprep.subr.bf16.mxu1 %v10254_v18  ;;  %9744 = vmatprep.subr.bf16.mxu0 %v10254_v18  ;;  %v391_v45 = vmul.f32 %v10739_v42, %v343_v41  ;;  %v10751_v46 = vld [vmem:[%s13119_s3] ss:$0 sm:$0xff]  ;;  %v342_v49 = vld [vmem:[%s10727_s20 + $0x88] sm:$0xff]  ;;  %v600_v50 = vld [vmem:[%s13117_s1 + $0x78] sm:$0xff]  ;;  %v392_v54 = vmul.f32 %v10739_v42, %v344_v48 }
  0x1c   : > { %v341_v47 = vld [vmem:[%s10727_s20 + $0x80] sm:$0xff]  ;;  %v599_v51 = vld [vmem:[%s13117_s1 + $0x70] sm:$0xff]  ;;  %v390_v55 = vmul.f32 %v10739_v42, %v342_v49  ;;  %v622_v56 = vld [vmem:[%s13117_s1 + $0x128] sm:$0xff] }
  0x1d   : > { %10217 = vmatpush3.bf16.msra.mxu1 %v10254_v18  ;;  %9745 = vmatpush3.bf16.msra.mxu0 %v10254_v18  ;;  %v10763_v52 = vadd.f32 %v10751_v46, %v391_v45  ;;  %v389_v53 = vmul.f32 %v10739_v42, %v341_v47  ;;  %v621_v57 = vld [vmem:[%s13117_s1 + $0x120] sm:$0xff]  ;;  %v346_v58 = vld [vmem:[%s10727_s20 + $0xa8] sm:$0xff]  ;;  %v348_v61 = vld [vmem:[%s10727_s20 + $0xb8] sm:$0xff]  ;;  %v10784_v63 = vadd.f32 %v10751_v46, %v392_v54 }
  0x1e   : > { %633 = vperm.xlu1 %10250, %v586_v9   ;;  %628 = vperm.xlu0 %10249, %v585_v10   ;;  %v345_v60 = vld [vmem:[%s10727_s20 + $0xa0] sm:$0xff]  ;;  %v347_v0 = vld [vmem:[%s10727_s20 + $0xb0] sm:$0xff]  ;;  %v326_v1 = vld [vmem:[%s10727_s20 + $0x8] sm:$0xff]  ;;  %v10794_v3 = vadd.f32 %v10751_v46, %v390_v55  ;;  %v394_v6 = vmul.f32 %v10739_v42, %v346_v58  ;;  %v396_v8 = vmul.f32 %v10739_v42, %v348_v61 }
  0x1f   : > { %10210 = vmatprep.subr.bf16.mxu1 %v10255_v21  ;;  %9746 = vmatprep.subr.bf16.mxu0 %v10255_v21  ;;  %v10776_v59 = vmul.f32 0.1, %v10763_v52  ;;  %v10781_v62 = vadd.f32 %v10751_v46, %v389_v53  ;;  %v10791_v2 = vld [vmem:[%s13120_s4 + $0x78] sm:$0xff]   ;;  %v623_v5 = vld [vmem:[%s13117_s1 + $0x130] sm:$0xff]  ;;  %v393_v7 = vmul.f32 %v10739_v42, %v345_v60  ;;  %v522_v10 = vmul.f32 0.1, %v10784_v63 }
  0x20   : > { %v624_v4 = vld [vmem:[%s13117_s1 + $0x138] sm:$0xff]  ;;  %v520_v11 = vmul.f32 0.1, %v10794_v3  ;;  %v395_v12 = vmul.f32 %v10739_v42, %v347_v0  ;;  %vm480_vm0 = vcmp.ge.f32.partialorder %v10763_v52, 0.0  ;;  %vm481_vm2 = vcmp.ge.f32.partialorder %v10784_v63, 0.0  ;;  %v329_v47 = vld [vmem:[%s10727_s20 + $0x20] sm:$0xff] }
  0x21   : > { %10218 = vmatpush3.bf16.msra.mxu1 %v10255_v21  ;;  %9747 = vmatpush3.bf16.msra.mxu0 %v10255_v21  ;;  %v519_v9 = vmul.f32 0.1, %v10781_v62  ;;  %v328_v15 = vld [vmem:[%s10727_s20 + $0x18] sm:$0xff]  ;;  %v441_v18 = vadd.f32 %v10751_v46, %v393_v7  ;;  %vm478_vm1 = vcmp.ge.f32.partialorder %v10781_v62, 0.0  ;;  %vm479_vm3 = vcmp.ge.f32.partialorder %v10794_v3, 0.0 }
  0x22   : > { %643 = vperm.xlu1 %10250, %v588_v13   ;;  %638 = vperm.xlu0 %10249, %v587_v14   ;;  %v374_v13 = vmul.f32 %v10739_v42, %v326_v1  ;;  %v325_v14 = vld [vmem:[%s10727_s20] sm:$0xff]  ;;  %v443_v21 = vadd.f32 %v10751_v46, %v395_v12  ;;  %v10848_v48 = vsel %vm480_vm0, %v10763_v52, %v10776_v59 }
  0x23   : > { %10211 = vmatprep.subr.bf16.mxu1 %v10256_v24  ;;  %9748 = vmatprep.subr.bf16.mxu0 %v10256_v24  ;;  %vm482_vm5 = vcmp.ge.f32.partialorder %v441_v18, 0.0  ;;  %v10853_v49 = vsel %vm478_vm1, %v10781_v62, %v519_v9  ;;  %v10860_v53 = vsel %vm481_vm2, %v10784_v63, %v522_v10  ;;  %v10865_v52 = vsel %vm479_vm3, %v10794_v3, %v520_v11  ;;  %v331_v3 = vld [vmem:[%s10727_s20 + $0x30] sm:$0xff]  ;;  %v353_v12 = vld [vmem:[%s10727_s20 + $0xe0] sm:$0xff] }
  0x24   : > { %vm484_vm7 = vcmp.ge.f32.partialorder %v443_v21, 0.0 }
  0x25   : > { %10219 = vmatpush3.bf16.msra.mxu1 %v10256_v24  ;;  %9749 = vmatpush3.bf16.msra.mxu0 %v10256_v24  ;;  %v523_v24 = vmul.f32 0.1, %v441_v18 }
  0x26   : > { %753 = vperm.xlu1 %10250, %v610_v16   ;;  %748 = vperm.xlu0 %10249, %v609_v17   ;;  %v625_v16 = vld [vmem:[%s13117_s1 + $0x140] sm:$0xf]  ;;  %v442_v17 = vadd.f32 %v10751_v46, %v394_v6 }
  0x27   : > { %10212 = vmatprep.subr.bf16.mxu1 %v10257_v27  ;;  %9750 = vmatprep.subr.bf16.mxu0 %v10257_v27  ;;  %v10874_v59 = vsel %vm482_vm5, %v441_v18, %v523_v24 }
  0x28   : > { %vm483_vm4 = vcmp.ge.f32.partialorder %v442_v17, 0.0 }
  0x29   : > { %10220 = vmatpush3.bf16.msra.mxu1 %v10257_v27  ;;  %9751 = vmatpush3.bf16.msra.mxu0 %v10257_v27 }
  0x2a   : > { %763 = vperm.xlu1 %10250, %v612_v19   ;;  %758 = vperm.xlu0 %10249, %v611_v20   ;;  %v444_v19 = vadd.f32 %v10751_v46, %v396_v8  ;;  %v327_v20 = vld [vmem:[%s10727_s20 + $0x10] sm:$0xff]  ;;  %v354_v8 = vld [vmem:[%s10727_s20 + $0xe8] sm:$0xff] }
  0x2b   : > { %10213 = vmatprep.subr.bf16.mxu1 %v10258_v30  ;;  %9752 = vmatprep.subr.bf16.mxu0 %v10258_v30 }
  0x2c   : > { %v526_v27 = vmul.f32 0.1, %v444_v19  ;;  %vm485_vm6 = vcmp.ge.f32.partialorder %v444_v19, 0.0 }
  0x2d   : > { %10221 = vmatpush3.bf16.msra.mxu1 %v10258_v30  ;;  %9753 = vmatpush3.bf16.msra.mxu0 %v10258_v30  ;;  %v375_v30 = vmul.f32 %v10739_v42, %v327_v20  ;;  %v334_v20 = vld [vmem:[%s10727_s20 + $0x48] sm:$0xff] }
  0x2e   : > { %653 = vperm.xlu1 %10250, %v590_v22   ;;  %648 = vperm.xlu0 %10249, %v589_v23   ;;  %v422_v22 = vadd.f32 %v10751_v46, %v374_v13  ;;  %v524_v23 = vmul.f32 0.1, %v442_v17  ;;  %v10879_v62 = vsel %vm485_vm6, %v444_v19, %v526_v27  ;;  %v402_v19 = vmul.f32 %v10739_v42, %v354_v8 }
  0x2f   : > { %9790 = vmatprep.subr.bf16.mxu1 %v10791_v2 }
  0x30   : > { %vm463_vm8 = vcmp.ge.f32.partialorder %v422_v22, 0.0  ;;  %v10871_v58 = vsel %vm483_vm4, %v442_v17, %v524_v23 }
  0x32   : > { %663 = vperm.xlu1 %10250, %v592_v25   ;;  %658 = vperm.xlu0 %10249, %v591_v26   ;;  %v373_v25 = vmul.f32 %v10739_v42, %v325_v14  ;;  %v376_v26 = vmul.f32 %v10739_v42, %v328_v15  ;;  %v379_v14 = vmul.f32 %v10739_v42, %v331_v3  ;;  %v356_v15 = vld [vmem:[%s10727_s20 + $0xf8] sm:$0xff] }
  0x33   : > { %v404_v27 = vmul.f32 %v10739_v42, %v356_v15  ;;  %v360_v3 = vld [vmem:[%s10727_s20 + $0x118] sm:$0xff] }
  0x36   : > { %773 = vperm.xlu1 %10250, %v614_v28   ;;  %768 = vperm.xlu0 %10249, %v613_v29   ;;  %v350_v28 = vld [vmem:[%s10727_s20 + $0xc8] sm:$0xff]  ;;  %v525_v29 = vmul.f32 0.1, %v443_v21 }
  0x38   : > { %v10882_v63 = vsel %vm484_vm7, %v443_v21, %v525_v29  ;;  %v333_v21 = vld [vmem:[%s10727_s20 + $0x40] sm:$0xff]  ;;  %v427_v29 = vadd.f32 %v10751_v46, %v379_v14  ;;  %v359_v14 = vld [vmem:[%s10727_s20 + $0x110] sm:$0xff] }
  0x3a   : > { %783 = vperm.xlu1 %10250, %v616_v31   ;;  %778 = vperm.xlu0 %10249, %v615_v32   ;;  %v349_v31 = vld [vmem:[%s10727_s20 + $0xc0] sm:$0xff]  ;;  %v352_v32 = vld [vmem:[%s10727_s20 + $0xd8] sm:$0xff]  ;;  %vm468_vm3 = vcmp.ge.f32.partialorder %v427_v29, 0.0 }
  0x3b   : > { %v400_v45 = vmul.f32 %v10739_v42, %v352_v32  ;;  %v336_v32 = vld [vmem:[%s10727_s20 + $0x58] sm:$0xff] }
  0x3d   : > { %v448_v61 = vadd.f32 %v10751_v46, %v400_v45  ;;  %v384_v45 = vmul.f32 %v10739_v42, %v336_v32 }
  0x3e   : > { %673 = vperm.xlu1 %10250, %v594_v33   ;;  %668 = vperm.xlu0 %10249, %v593_v34   ;;  %v421_v33 = vadd.f32 %v10751_v46, %v373_v25  ;;  %v424_v34 = vadd.f32 %v10751_v46, %v376_v26  ;;  %v401_v25 = vmul.f32 %v10739_v42, %v353_v12 }
  0x3f   : > { %vm489_vm14 = vcmp.ge.f32.partialorder %v448_v61, 0.0  ;;  %v530_v17 = vmul.f32 0.1, %v448_v61  ;;  %v432_v8 = vadd.f32 %v10751_v46, %v384_v45  ;;  %v363_v45 = vld [vmem:[%s10727_s20 + $0x130] sm:$0xff] }
  0x40   : > { %v503_v41 = vmul.f32 0.1, %v421_v33  ;;  %vm462_vm9 = vcmp.ge.f32.partialorder %v421_v33, 0.0  ;;  %vm465_vm10 = vcmp.ge.f32.partialorder %v424_v34, 0.0 }
  0x42   : > { %683 = vperm.xlu1 %10250, %v596_v35   ;;  %678 = vperm.xlu0 %10249, %v595_v36   ;;  %v351_v35 = vld [vmem:[%s10727_s20 + $0xd0] sm:$0xff]  ;;  %v504_v36 = vmul.f32 0.1, %v422_v22 }
  0x46   : > { %793 = vperm.xlu1 %10250, %v618_v37   ;;  %788 = vperm.xlu0 %10249, %v617_v38   ;;  %v398_v37 = vmul.f32 %v10739_v42, %v350_v28  ;;  %v330_v38 = vld [vmem:[%s10727_s20 + $0x28] sm:$0xff] }
  0x47   : > { %v378_v55 = vmul.f32 %v10739_v42, %v330_v38 }
  0x48   : > { %v446_v54 = vadd.f32 %v10751_v46, %v398_v37  ;;  %v335_v37 = vld [vmem:[%s10727_s20 + $0x50] sm:$0xff] }
  0x49   : > { %v426_v7 = vadd.f32 %v10751_v46, %v378_v55  ;;  %v383_v55 = vmul.f32 %v10739_v42, %v335_v37 }
  0x4a   : > { %803 = vperm.xlu1 %10250, %v620_v39   ;;  %798 = vperm.xlu0 %10249, %v619_v40   ;;  %v10273_v39 = vld [vmem:[%s13120_s4 + $0xb8] sm:$0xff]   ;;  %v423_v40 = vadd.f32 %v10751_v46, %v375_v30  ;;  %v528_v6 = vmul.f32 0.1, %v446_v54  ;;  %vm487_vm12 = vcmp.ge.f32.partialorder %v446_v54, 0.0  ;;  %v382_v30 = vmul.f32 %v10739_v42, %v334_v20 }
  0x4b   : > { %9842 = vmatprep.subr.bf16.mxu0 %v10273_v39  ;;  %v508_v24 = vmul.f32 0.1, %v426_v7  ;;  %vm467_vm0 = vcmp.ge.f32.partialorder %v426_v7, 0.0 }
  0x4c   : > { %vm464_vm11 = vcmp.ge.f32.partialorder %v423_v40, 0.0 }
  0x4d   : > { %v10930_v39 = vsel %vm467_vm0, %v426_v7, %v508_v24 }
  0x4e   : > { %693 = vperm.xlu1 %10250, %v598_v43   ;;  %688 = vperm.xlu0 %10249, %v597_v44   ;;  %v506_v43 = vmul.f32 0.1, %v424_v34  ;;  %v397_v44 = vmul.f32 %v10739_v42, %v349_v31  ;;  %v381_v31 = vmul.f32 %v10739_v42, %v333_v21  ;;  %v338_v21 = vld [vmem:[%s10727_s20 + $0x68] sm:$0xff] }
  0x50   : > { %v445_v60 = vadd.f32 %v10751_v46, %v397_v44  ;;  %v10896_v9 = vsel %vm465_vm10, %v424_v34, %v506_v43  ;;  %v10923_v34 = vsel %vm489_vm14, %v448_v61, %v530_v17  ;;  %v452_v43 = vadd.f32 %v10751_v46, %v404_v27 }
  0x51   : > { %v407_v27 = vmul.f32 %v10739_v42, %v359_v14  ;;  %vm473_vm10 = vcmp.ge.f32.partialorder %v432_v8, 0.0 }
  0x52   : > { %703 = vperm.xlu1 %10250, %v600_v50   ;;  %698 = vperm.xlu0 %10249, %v599_v51   ;;  %v399_v50 = vmul.f32 %v10739_v42, %v351_v35  ;;  %v332_v51 = vld [vmem:[%s10727_s20 + $0x38] sm:$0xff]  ;;  %vm486_vm13 = vcmp.ge.f32.partialorder %v445_v60, 0.0  ;;  %v527_v13 = vmul.f32 0.1, %v445_v60  ;;  %vm493_vm6 = vcmp.ge.f32.partialorder %v452_v43, 0.0 }
  0x53   : > { %v380_v1 = vmul.f32 %v10739_v42, %v332_v51  ;;  %v430_v51 = vadd.f32 %v10751_v46, %v382_v30 }
  0x54   : > { %v447_v0 = vadd.f32 %v10751_v46, %v399_v50  ;;  %v357_v50 = vld [vmem:[%s10727_s20 + $0x100] sm:$0xff] }
  0x55   : > { %v428_v18 = vadd.f32 %v10751_v46, %v380_v1  ;;  %v405_v1 = vmul.f32 %v10739_v42, %v357_v50 }
  0x56   : > { %813 = vperm.xlu1 %10250, %v622_v56   ;;  %808 = vperm.xlu0 %10249, %v621_v57   ;;  %v505_v56 = vmul.f32 0.1, %v423_v40  ;;  %v377_v57 = vmul.f32 %v10739_v42, %v329_v47  ;;  %vm488_vm15 = vcmp.ge.f32.partialorder %v447_v0, 0.0  ;;  %v529_v23 = vmul.f32 0.1, %v447_v0  ;;  %v358_v47 = vld [vmem:[%s10727_s20 + $0x108] sm:$0xff] }
  0x57   : > { %v510_v35 = vmul.f32 0.1, %v428_v18  ;;  %vm469_vm2 = vcmp.ge.f32.partialorder %v428_v18, 0.0  ;;  %v453_v20 = vadd.f32 %v10751_v46, %v405_v1  ;;  %v411_v1 = vmul.f32 %v10739_v42, %v363_v45 }
  0x58   : > { %v10899_v10 = vsel %vm464_vm11, %v423_v40, %v505_v56  ;;  %v425_v11 = vadd.f32 %v10751_v46, %v377_v57  ;;  %v10928_v38 = vsel %vm488_vm15, %v447_v0, %v529_v23  ;;  %v449_v40 = vadd.f32 %v10751_v46, %v401_v25  ;;  %v337_v23 = vld [vmem:[%s10727_s20 + $0x60] sm:$0xff] }
  0x59   : > { %v10943_v56 = vsel %vm469_vm2, %v428_v18, %v510_v35  ;;  %v509_v57 = vmul.f32 0.1, %v427_v29  ;;  %v406_v0 = vmul.f32 %v10739_v42, %v358_v47  ;;  %v362_v35 = vld [vmem:[%s10727_s20 + $0x128] sm:$0xff]  ;;  %v535_v50 = vmul.f32 0.1, %v453_v20 }
  0x5a   : > { %823 = vperm.xlu1 %10250, %v624_v4   ;;  %818 = vperm.xlu0 %10249, %v623_v5   ;;  %v10888_v4 = vsel %vm463_vm8, %v422_v22, %v504_v36  ;;  %v10891_v5 = vsel %vm462_vm9, %v421_v33, %v503_v41  ;;  %v10910_v22 = vsel %vm487_vm12, %v446_v54, %v528_v6  ;;  %v507_v26 = vmul.f32 0.1, %v425_v11 }
  0x5b   : > { %vm466_vm1 = vcmp.ge.f32.partialorder %v425_v11, 0.0  ;;  %v10920_v33 = vsel %vm486_vm13, %v445_v60, %v527_v13  ;;  %v450_v36 = vadd.f32 %v10751_v46, %v402_v19  ;;  %v429_v54 = vadd.f32 %v10751_v46, %v381_v31 }
  0x5c   : > { %v10933_v41 = vsel %vm466_vm1, %v425_v11, %v507_v26  ;;  %vm490_vm5 = vcmp.ge.f32.partialorder %v449_v40, 0.0  ;;  %v531_v61 = vmul.f32 0.1, %v449_v40  ;;  %v534_v6 = vmul.f32 0.1, %v452_v43 }
  0x5d   : > { %vm491_vm4 = vcmp.ge.f32.partialorder %v450_v36, 0.0  ;;  %v532_v60 = vmul.f32 0.1, %v450_v36  ;;  %v512_v11 = vmul.f32 0.1, %v430_v51  ;;  %v431_v13 = vadd.f32 %v10751_v46, %v383_v55 }
  0x5e   : > { %828 = vperm.xlu0 %10249, %v625_v16   ;;  %v355_v16 = vld [vmem:[%s10727_s20 + $0xf0] sm:$0xff]  ;;  %v511_v12 = vmul.f32 0.1, %v429_v54  ;;  %v10952_v15 = vsel %vm468_vm3, %v427_v29, %v509_v57  ;;  %vm471_vm8 = vcmp.ge.f32.partialorder %v430_v51, 0.0  ;;  %vm470_vm9 = vcmp.ge.f32.partialorder %v429_v54, 0.0 }
  0x5f   : > { %v403_v28 = vmul.f32 %v10739_v42, %v355_v16  ;;  %v408_v16 = vmul.f32 %v10739_v42, %v360_v3  ;;  %v10956_v17 = vsel %vm491_vm4, %v450_v36, %v532_v60  ;;  %v10959_v18 = vsel %vm490_vm5, %v449_v40, %v531_v61  ;;  %v339_v29 = vld [vmem:[%s10727_s20 + $0x70] sm:$0xff]  ;;  %v361_v36 = vld [vmem:[%s10727_s20 + $0x120] sm:$0xff] }
  0x60   : > { %v454_v19 = vadd.f32 %v10751_v46, %v406_v0  ;;  %v10966_v24 = vsel %vm493_vm6, %v452_v43, %v534_v6  ;;  %v514_v26 = vmul.f32 0.1, %v432_v8  ;;  %v10974_v30 = vsel %vm471_vm8, %v430_v51, %v512_v11 }
  0x61   : > { %v451_v44 = vadd.f32 %v10751_v46, %v403_v28  ;;  %v340_v28 = vld [vmem:[%s10727_s20 + $0x78] sm:$0xff]  ;;  %v10976_v31 = vsel %vm470_vm9, %v429_v54, %v511_v12  ;;  %v513_v32 = vmul.f32 0.1, %v431_v13  ;;  %vm472_vm11 = vcmp.ge.f32.partialorder %v431_v13, 0.0  ;;  %v365_v12 = vld [vmem:[%s10727_s20 + $0x140] sm:$0xf] }
  0x62   : > { %v456_v37 = vadd.f32 %v10751_v46, %v408_v16  ;;  %v386_v40 = vmul.f32 %v10739_v42, %v338_v21  ;;  %v385_v43 = vmul.f32 %v10739_v42, %v337_v23  ;;  %v536_v47 = vmul.f32 0.1, %v454_v19 }
  0x63   : > { %v533_v7 = vmul.f32 0.1, %v451_v44  ;;  %vm492_vm7 = vcmp.ge.f32.partialorder %v451_v44, 0.0  ;;  %v388_v51 = vmul.f32 %v10739_v42, %v340_v28  ;;  %v387_v54 = vmul.f32 %v10739_v42, %v339_v29 }
  0x64   : > { %vm495_vm12 = vcmp.ge.f32.partialorder %v454_v19, 0.0  ;;  %v455_v55 = vadd.f32 %v10751_v46, %v407_v27  ;;  %v410_v57 = vmul.f32 %v10739_v42, %v362_v35  ;;  %v409_v60 = vmul.f32 %v10739_v42, %v361_v36 }
  0x65   : > { %v10969_v25 = vsel %vm492_vm7, %v451_v44, %v533_v7  ;;  %v364_v44 = vld [vmem:[%s10727_s20 + $0x138] sm:$0xff]  ;;  %v10991_v61 = vsel %vm473_vm10, %v432_v8, %v514_v26  ;;  %vm494_vm13 = vcmp.ge.f32.partialorder %v453_v20, 0.0  ;;  %v10996_v3 = vsel %vm472_vm11, %v431_v13, %v513_v32 }
  0x66   : > { %v412_v0 = vmul.f32 %v10739_v42, %v364_v44  ;;  %v538_v6 = vmul.f32 0.1, %v456_v37  ;;  %v434_v7 = vadd.f32 %v10751_v46, %v386_v40  ;;  %v433_v11 = vadd.f32 %v10751_v46, %v385_v43 }
  0x67   : > { %v11001_v14 = vsel %vm495_vm12, %v454_v19, %v536_v47  ;;  %vm497_vm14 = vcmp.ge.f32.partialorder %v456_v37, 0.0  ;;  %v436_v8 = vadd.f32 %v10751_v46, %v388_v51  ;;  %v435_v16 = vadd.f32 %v10751_v46, %v387_v54 }
  0x68   : > { %v11005_v21 = vsel %vm494_vm13, %v453_v20, %v535_v50  ;;  %v537_v23 = vmul.f32 0.1, %v455_v55  ;;  %v458_v26 = vadd.f32 %v10751_v46, %v410_v57  ;;  %v457_v13 = vadd.f32 %v10751_v46, %v409_v60 }
  0x69   : > { %vm496_vm15 = vcmp.ge.f32.partialorder %v455_v55, 0.0  ;;  %v460_v27 = vadd.f32 %v10751_v46, %v412_v0  ;;  %v459_v28 = vadd.f32 %v10751_v46, %v411_v1  ;;  %v413_v19 = vmul.f32 %v10739_v42, %v365_v12 }
  0x6a   : > { %v11012_v29 = vsel %vm497_vm14, %v456_v37, %v538_v6  ;;  %vm475_vm0 = vcmp.ge.f32.partialorder %v434_v7, 0.0  ;;  %v516_v32 = vmul.f32 0.1, %v434_v7  ;;  %v515_v35 = vmul.f32 0.1, %v433_v11 }
  0x6b   : > { %vm1573_vm1 = vcmask 1042432   ;;  %vm1574_vm2 = vcmask 1046532   ;;  %vm474_vm3 = vcmp.ge.f32.partialorder %v433_v11, 0.0  ;;  %vm477_vm4 = vcmp.ge.f32.partialorder %v436_v8, 0.0 }
  0x6c   : > { %v518_v20 = vmul.f32 0.1, %v436_v8  ;;  %v517_v36 = vmul.f32 0.1, %v435_v16  ;;  %vm476_vm5 = vcmp.ge.f32.partialorder %v435_v16, 0.0  ;;  %vm499_vm6 = vcmp.ge.f32.partialorder %v458_v26, 0.0  ;;  %vm11068_vm12 = vmor %vm1573_vm1, %vm1574_vm2 }
  0x6d   : > { %v540_v40 = vmul.f32 0.1, %v458_v26  ;;  %v539_v43 = vmul.f32 0.1, %v457_v13  ;;  %vm1078_vm7 = vsmask.f32 3328  ;;  %v11015_v47 = vadd.f32 %v10751_v46, %v413_v19 }
  0x6e   : > { %vm1079_vm8 = vsmask.f32 7440  ;;  %vm498_vm9 = vcmp.ge.f32.partialorder %v457_v13, 0.0  ;;  %v542_v42 = vmul.f32 0.1, %v460_v27  ;;  %vm501_vm10 = vcmp.ge.f32.partialorder %v460_v27, 0.0 }
  0x6f   : > { %v541_v37 = vmul.f32 0.1, %v459_v28  ;;  %vm500_vm11 = vcmp.ge.f32.partialorder %v459_v28, 0.0  ;;  %v11020_v54 = vsel %vm496_vm15, %v455_v55, %v537_v23  ;;  %v11023_v57 = vsel %vm475_vm0, %v434_v7, %v516_v32  ;;  %vm11076_vm13 = vmor %vm1078_vm7, %vm1079_vm8 }
  0x70   : > { %v11026_v60 = vsel %vm474_vm3, %v433_v11, %v515_v35  ;;  %v11029_v0 = vsel %vm477_vm4, %v436_v8, %v518_v20  ;;  %v11042_v7 = vsel %vm498_vm9, %v457_v13, %v539_v43  ;;  %v11044_v11 = vsel %vm501_vm10, %v460_v27, %v542_v42 }
  0x71   : > { %13185 = vst [vmem:[#allocation7_spill] sm:$0xff] %v11042_v7  ;;  %13186 = vst [vmem:[#allocation8_spill] sm:$0xff] %v11044_v11  ;;  %v11046_v12 = vsel %vm500_vm11, %v459_v28, %v541_v37  ;;  %v11049_v8 = vmul.f32 0.1, %v11015_v47  ;;  %vm502_vm14 = vcmp.ge.f32.partialorder %v11015_v47, 0.0  ;;  %vm3373_vm15 = vcmask 1046528  }
  0x72   : > { %13187 = vst [vmem:[#allocation9_spill] sm:$0xff] %v11046_v12  ;;  %vm4979_vm0 = vcmask 1045504  }
  0x89   : > { %v719_v44 = vpop.permute.xlu1 %718  ;;  %v709_v45 = vpop.permute.xlu0 %708 }
  0x8a   : > { %v849_v50 = vmul.f32 %v719_v44, %v10848_v48  ;;  %v847_v51 = vmul.f32 %v709_v45, %v10853_v49  ;;  %v11036_v48 = vsel %vm476_vm5, %v435_v16, %v517_v36  ;;  %v11039_v49 = vsel %vm499_vm6, %v458_v26, %v540_v40 }
  0x8c   : > { %v11031_v46 = vpack.c.bf16 %v849_v50, %v849_v50  ;;  %v11033_v1 = vpack.c.bf16 %v847_v51, %v847_v51 }
  0x8d   : > { %v724_v55 = vpop.permute.xlu1 %723  ;;  %v714_v6 = vpop.permute.xlu0 %713 }
  0x8e   : > { %13184 = vst [vmem:[#allocation6_spill] sm:$0xff] %v11033_v1  ;;  %v1261_v23 = vshll.u32 %v11031_v46, 16  ;;  %v1265_v16 = vshrl.u32 %v11031_v46, 16  ;;  %v1629_v19 = vrot.slane %v11031_v46, 5  ;;  %v1241_v26 = vshll.u32 %v11033_v1, 16 }
  0x8f   : > { %v1245_v32 = vshrl.u32 %v11033_v1, 16  ;;  %v13123_v13 = vrot.slane %v11033_v1, 5  ;;  %v850_v27 = vmul.f32 %v724_v55, %v10860_v53  ;;  %v848_v28 = vmul.f32 %v714_v6, %v10865_v52  ;;  %v10320_v53 = vld [vmem:[%s13120_s4 + $0x120] sm:$0xff]  }
  0x90   : > { %v11059_v35 = vrot.slane %v1261_v23, 5  ;;  %v1267_v20 = vrot.slane %v1265_v16, 4  ;;  %v1631_v36 = vrot.slane %v1629_v19, 4  ;;  %v11061_v40 = vrot.slane %v1241_v26, 5 }
  0x91   : > { %v1247_v43 = vrot.slane %v1245_v32, 4  ;;  %v1625_v44 = vrot.slane %v13123_v13, 4  ;;  %v9363_v45 = vpack.c.bf16 %v850_v27, %v850_v27  ;;  %v9433_v42 = vpack.c.bf16 %v850_v27, %v849_v50  ;;  %v734_v37 = vpop.permute.xlu1 %733  ;;  %v729_v46 = vpop.permute.xlu0 %728 }
  0x92   : > { %13188 = vst [vmem:[#allocation10_spill] sm:$0xff] %v11061_v40  ;;  %v1268_v12 = vor.u32 %v1267_v20, %v11059_v35  ;;  %v9361_v52 = vpack.c.bf16 %v848_v28, %v848_v28  ;;  %v9428_v55 = vpack.c.bf16 %v848_v28, %v847_v51  ;;  %v852_v6 = vmul.f32 %v734_v37, %v10871_v58 }
  0x93   : > { %v1248_v23 = vor.u32 %v1247_v43, %v11061_v40  ;;  %9493 = vst [vmem:[#allocation2 + $0x48] sm:$0xff] %v9433_v42   ;;  %v1271_v16 = vshll.u32 %v9363_v45, 16  ;;  %v1275_v26 = vshrl.u32 %v9363_v45, 16  ;;  %v1632_v50 = vrot.slane %v9363_v45, 5 }
  0x94   : > { %v1269_v32 = vrot.slane %v1268_v12, 4  ;;  %9492 = vst [vmem:[#allocation2 + $0x40] sm:$0xff] %v9428_v55   ;;  %v1251_v20 = vshll.u32 %v9361_v52, 16  ;;  %v1255_v13 = vshrl.u32 %v9361_v52, 16  ;;  %v1626_v11 = vrot.slane %v9361_v52, 5 }
  0x95   : > { %v1249_v51 = vrot.slane %v1248_v23, 4  ;;  %v1273_v28 = vrot.slane %v1271_v16, 5  ;;  %v1277_v58 = vrot.slane %v1275_v26, 4  ;;  %v1633_v43 = vsel %vm11068_vm12, %v1631_v36, %v1632_v50  ;;  %v744_v42 = vpop.permute.xlu1 %743  ;;  %v739_v37 = vpop.permute.xlu0 %738 }
  0x96   : > { %v1634_v45 = vrot.slane %v1632_v50, 4  ;;  %1757 = vst [vmem:[#allocation4 + $0x48] sm:$0xf] %v1633_v43  ;;  %v1253_v12 = vrot.slane %v1251_v20, 5  ;;  %v1257_v40 = vrot.slane %v1255_v13, 4  ;;  %v1627_v7 = vsel %vm11068_vm12, %v1625_v44, %v1626_v11 }
  0x97   : > { %v1274_v55 = vsel %vm11076_vm13, %v1269_v32, %v1273_v28  ;;  %v1278_v1 = vor.u32 %v1277_v58, %v1273_v28  ;;  %v1628_v52 = vrot.slane %v1626_v11, 4  ;;  %1755 = vst [vmem:[#allocation4 + $0x40] sm:$0xf] %v1627_v7  ;;  %v9365_v23 = vpack.c.bf16 %v852_v6, %v852_v6 }
  0x98   : > { %1549 = vst [vmem:[#allocation3 + $0x48] sm:$0xf] %v1274_v55  ;;  %v1254_v36 = vsel %vm11076_vm13, %v1249_v51, %v1253_v12  ;;  %v1258_v16 = vor.u32 %v1257_v40, %v1253_v12  ;;  %v851_v26 = vmul.f32 %v729_v46, %v10874_v59  ;;  %v854_v50 = vmul.f32 %v744_v42, %v10879_v62 }
  0x99   : > { %v1279_v13 = vrot.slane %v1278_v1, 4  ;;  %1547 = vst [vmem:[#allocation3 + $0x40] sm:$0xf] %v1254_v36  ;;  %v1630_v44 = vsel %vm11068_vm12, %v1628_v52, %v1629_v19  ;;  %v1291_v20 = vshll.u32 %v9365_v23, 16  ;;  %v1295_v32 = vshrl.u32 %v9365_v23, 16  ;;  %v634_v43 = vpop.permute.xlu1 %633  ;;  %v629_v62 = vpop.permute.xlu0 %628 }
  0x9a   : > { %v1259_v28 = vrot.slane %v1258_v16, 4  ;;  %1756 = vst [vmem:[#allocation4 + $0x44] sm:$0xf] %v1630_v44  ;;  %v1638_v7 = vrot.slane %v9365_v23, 5  ;;  %v9364_v11 = vpack.c.bf16 %v851_v26, %v851_v26  ;;  %v9438_v58 = vpack.c.bf16 %v852_v6, %v851_v26  ;;  %v10260_v52 = vld [vmem:[#allocation2 + $0x48] sm:$0xff]  }
  0x9b   : > { %v1293_v55 = vrot.slane %v1291_v20, 5  ;;  %v1297_v51 = vrot.slane %v1295_v32, 4  ;;  %v11092_v40 = vpack.c.bf16 %v854_v50, %v854_v50  ;;  %v853_v59 = vmul.f32 %v739_v37, %v10882_v63  ;;  %v10259_v12 = vld [vmem:[#allocation2 + $0x40] sm:$0xff]   ;;  %v10270_v63 = vld [vmem:[%s13120_s4 + $0x70] sm:$0xff]  }
  0x9c   : > { %v1264_v1 = vsel %vm11076_vm13, %v1259_v28, %v11059_v35  ;;  %v1640_v19 = vrot.slane %v1638_v7, 4  ;;  %9494 = vst [vmem:[#allocation2 + $0x50] sm:$0xff] %v9438_v58   ;;  %v1281_v46 = vshll.u32 %v9364_v11, 16  ;;  %v1285_v42 = vshrl.u32 %v9364_v11, 16  ;;  %9770 = vmatprep.mubr.bf16.mxu1 %v10259_v12 }
  0x9d   : > { %1548 = vst [vmem:[#allocation3 + $0x44] sm:$0xf] %v1264_v1  ;;  %v1298_v6 = vor.u32 %v1297_v51, %v1293_v55  ;;  %v1635_v23 = vrot.slane %v9364_v11, 5  ;;  %v1311_v36 = vshll.u32 %v11092_v40, 16  ;;  %v1315_v16 = vshrl.u32 %v11092_v40, 16  ;;  %9771 = vmatmul.mubr.bf16.vlgmr.msra.gmra.mxu1 %v10260_v52 }
  0x9e   : > { %v1283_v37 = vrot.slane %v1281_v46, 5  ;;  %v1287_v26 = vrot.slane %v1285_v42, 4  ;;  %v1644_v35 = vrot.slane %v11092_v40, 5  ;;  %v9366_v44 = vpack.c.bf16 %v853_v59, %v853_v59  ;;  %v644_v42 = vpop.permute.xlu1 %643  ;;  %9791 = vmatpush3.bf16.msra.mxu1 %v10791_v2 }
  0x9f   : > { %v1299_v20 = vrot.slane %v1298_v6, 4  ;;  %v1636_v32 = vsel %vm11068_vm12, %v1634_v45, %v1635_v23  ;;  %v1637_v28 = vrot.slane %v1635_v23, 4  ;;  %v11106_v11 = vrot.slane %v1311_v36, 5  ;;  %v639_v23 = vpop.permute.xlu0 %638  ;;  %9792 = vmatprep.subr.bf16.mxu1 %v10270_v63 }
  0xa0   : > { %v1284_v58 = vsel %vm11076_vm13, %v1279_v13, %v1283_v37  ;;  %v1288_v51 = vor.u32 %v1287_v26, %v1283_v37  ;;  %1758 = vst [vmem:[#allocation4 + $0x4c] sm:$0xf] %v1636_v32  ;;  %v1317_v1 = vrot.slane %v1315_v16, 4  ;;  %v11110_v46 = vrot.slane %v1644_v35, 4  ;;  %v10272_v13 = vld [vmem:[%s13120_s4 + $0x68] sm:$0xff]  }
  0xa1   : > { %1550 = vst [vmem:[#allocation3 + $0x4c] sm:$0xf] %v1284_v58  ;;  %v1639_v40 = vsel %vm11068_vm12, %v1637_v28, %v1638_v7  ;;  %v9443_v45 = vpack.c.bf16 %v854_v50, %v853_v59  ;;  %v1301_v12 = vshll.u32 %v9366_v44, 16  ;;  %v1305_v6 = vshrl.u32 %v9366_v44, 16 }
  0xa2   : > { %v1289_v52 = vrot.slane %v1288_v51, 4  ;;  %1759 = vst [vmem:[#allocation4 + $0x50] sm:$0xf] %v1639_v40  ;;  %v1318_v36 = vor.u32 %v1317_v1, %v11106_v11  ;;  %v1641_v16 = vrot.slane %v9366_v44, 5  ;;  %v832_v2 = vmul.f32 %v634_v43, %v10888_v4  ;;  %9793 = vmatpush3.bf16.msra.mxu1 %v10270_v63  ;;  %v10277_v4 = vld [vmem:[%s13120_s4 + $0x60] sm:$0xff]   ;;  %v754_v1 = vpop.permute.xlu1 %753 }
  0xa3   : > { %9495 = vst [vmem:[#allocation2 + $0x58] sm:$0xff] %v9443_v45   ;;  %v1303_v37 = vrot.slane %v1301_v12, 5  ;;  %v1307_v26 = vrot.slane %v1305_v6, 4  ;;  %v831_v50 = vmul.f32 %v629_v62, %v10891_v5  ;;  %v11122_v7 = vmul.f32 %v644_v42, %v10896_v9  ;;  %v10261_v44 = vld [vmem:[#allocation2 + $0x50] sm:$0xff]   ;;  %9794 = vmatprep.subr.bf16.mxu1 %v10272_v13  ;;  %v749_v12 = vpop.permute.xlu0 %748 }
  0xa4   : > { %v1294_v59 = vsel %vm11076_vm13, %v1289_v52, %v1293_v55  ;;  %v11126_v32 = vrot.slane %v1318_v36, 4  ;;  %v1642_v28 = vsel %vm11068_vm12, %v1640_v19, %v1641_v16  ;;  %v1643_v58 = vrot.slane %v1641_v16, 4  ;;  %9774 = vmatprep.mubr.bf16.mxu1 %v10261_v44 }
  0xa5   : > { %1551 = vst [vmem:[#allocation3 + $0x50] sm:$0xf] %v1294_v59  ;;  %v1304_v5 = vsel %vm11076_vm13, %v1299_v20, %v1303_v37  ;;  %v1308_v9 = vor.u32 %v1307_v26, %v1303_v37  ;;  %1760 = vst [vmem:[#allocation4 + $0x54] sm:$0xf] %v1642_v28  ;;  %v9345_v43 = vpack.c.bf16 %v832_v2, %v832_v2  ;;  %v10280_v37 = vld [vmem:[%s13120_s4 + $0x58] sm:$0xff]  }
  0xa6   : > { %v9344_v55 = vpack.c.bf16 %v831_v50, %v831_v50  ;;  %1552 = vst [vmem:[#allocation3 + $0x54] sm:$0xf] %v1304_v5  ;;  %v1645_v62 = vsel %vm11068_vm12, %v1643_v58, %v1644_v35  ;;  %v9388_v19 = vpack.c.bf16 %v832_v2, %v831_v50  ;;  %v11139_v63 = vpack.c.bf16 %v11122_v7, %v11122_v7 }
  0xa7   : > { %v833_v51 = vmul.f32 %v639_v23, %v10899_v10  ;;  %v1309_v42 = vrot.slane %v1308_v9, 4  ;;  %1761 = vst [vmem:[#allocation4 + $0x58] sm:$0xf] %v1645_v62  ;;  %v1091_v20 = vshll.u32 %v9345_v43, 16  ;;  %v1095_v40 = vshrl.u32 %v9345_v43, 16  ;;  %9795 = vmatpush3.bf16.msra.mxu1 %v10272_v13 }
  0xa8   : > { %v1578_v45 = vrot.slane %v9345_v43, 5  ;;  %9389 = vst [vmem:[#allocation2] sm:$0xff] %v9388_v19   ;;  %v1082_v6 = vshrl.u32 %v9344_v55, 16  ;;  %v1085_v52 = vshll.u32 %v9344_v55, 16  ;;  %v8971_v36 = vrot.slane %v9344_v55, 9  ;;  %9796 = vmatprep.subr.bf16.mxu1 %v10277_v4  ;;  %v764_v19 = vpop.permute.xlu1 %763 }
  0xa9   : > { %v1111_v35 = vshll.u32 %v11139_v63, 16  ;;  %v1314_v16 = vsel %vm11076_vm13, %v1309_v42, %v11106_v11  ;;  %v1093_v10 = vrot.slane %v1091_v20, 5  ;;  %v1097_v23 = vrot.slane %v1095_v40, 4 }
  0xaa   : > { %v1580_v2 = vrot.slane %v1578_v45, 4  ;;  %1553 = vst [vmem:[#allocation3 + $0x58] sm:$0xf] %v1314_v16  ;;  %v1084_v26 = vrot.slane %v1082_v6, 4  ;;  %v1087_v50 = vrot.slane %v1085_v52, 5  ;;  %v1579_v59 = vsel %vm11068_vm12, %v8971_v36, %v1578_v45  ;;  %v10262_v13 = vld [vmem:[#allocation2 + $0x58] sm:$0xff]   ;;  %v759_v6 = vpop.permute.xlu0 %758 }
  0xab   : > { %v11151_v28 = vrot.slane %v1111_v35, 5  ;;  %v1098_v58 = vor.u32 %v1097_v23, %v1093_v10  ;;  %1739 = vst [vmem:[#allocation4] sm:$0xf] %v1579_v59  ;;  %v1115_v11 = vshrl.u32 %v11139_v63, 16  ;;  %v1584_v44 = vrot.slane %v11139_v63, 5  ;;  %9775 = vmatmul.mubr.bf16.gmra.mxu1 %v10262_v13 }
  0xac   : > { %v9346_v5 = vpack.c.bf16 %v833_v51, %v833_v51  ;;  %v1088_v9 = vor.u32 %v1087_v50, %v1084_v26  ;;  %v9393_v43 = vpack.c.bf16 %v11122_v7, %v833_v51  ;;  %v856_v55 = vmul.f32 %v754_v1, %v10910_v22  ;;  %9797 = vmatpush3.bf16.msra.mxu1 %v10277_v4  ;;  %v10283_v22 = vld [vmem:[%s13120_s4 + $0x50] sm:$0xff]  }
  0xad   : > { %v855_v62 = vmul.f32 %v749_v12, %v10920_v33  ;;  %v1099_v42 = vrot.slane %v1098_v58, 4  ;;  %v1117_v20 = vrot.slane %v1115_v11, 4  ;;  %v11158_v40 = vrot.slane %v1584_v44, 4  ;;  %9798 = vmatprep.subr.bf16.mxu1 %v10280_v37 }
  0xae   : > { %v1101_v45 = vshll.u32 %v9346_v5, 16  ;;  %v1089_v52 = vrot.slane %v1088_v9, 4  ;;  %9485 = vst [vmem:[#allocation2 + $0x8] sm:$0xff] %v9393_v43   ;;  %v1105_v63 = vshrl.u32 %v9346_v5, 16  ;;  %v1581_v36 = vrot.slane %v9346_v5, 5  ;;  %v654_v9 = vpop.permute.xlu1 %653  ;;  %v10286_v43 = vld [vmem:[%s13120_s4 + $0x48] sm:$0xff]  }
  0xaf   : > { %v9369_v35 = vpack.c.bf16 %v856_v55, %v856_v55  ;;  %v1118_v33 = vor.u32 %v1117_v20, %v11151_v28  ;;  %v9368_v51 = vpack.c.bf16 %v855_v62, %v855_v62  ;;  %v9448_v1 = vpack.c.bf16 %v856_v55, %v855_v62  ;;  %v10263_v12 = vld [vmem:[#allocation2] sm:$0xff]  }
  0xb0   : > { %v1103_v7 = vrot.slane %v1101_v45, 5  ;;  %v1094_v16 = vsel %vm11076_vm13, %v1089_v52, %v1093_v10  ;;  %v1107_v4 = vrot.slane %v1105_v63, 4  ;;  %v1582_v23 = vsel %vm11068_vm12, %v1580_v2, %v1581_v36  ;;  %9754 = vmatprep.mubr.bf16.mxu0 %v10263_v12  ;;  %9799 = vmatpush3.bf16.msra.mxu1 %v10280_v37  ;;  %v649_v45 = vpop.permute.xlu0 %648 }
  0xb1   : > { %v1583_v26 = vrot.slane %v1581_v36, 4  ;;  %1531 = vst [vmem:[#allocation3] sm:$0xf] %v1094_v16  ;;  %v11168_v50 = vrot.slane %v1118_v33, 4  ;;  %1740 = vst [vmem:[#allocation4 + $0x4] sm:$0xf] %v1582_v23  ;;  %9800 = vmatprep.subr.bf16.mxu1 %v10283_v22  ;;  %v858_v36 = vmul.f32 %v764_v19, %v10923_v34  ;;  %v857_v12 = vmul.f32 %v759_v6, %v10928_v38 }
  0xb2   : > { %v1104_v59 = vsel %vm11076_vm13, %v1099_v42, %v1103_v7  ;;  %v1331_v13 = vshll.u32 %v9369_v35, 16  ;;  %v1335_v58 = vshrl.u32 %v9369_v35, 16  ;;  %9496 = vst [vmem:[#allocation2 + $0x60] sm:$0xff] %v9448_v1   ;;  %v1108_v11 = vor.u32 %v1107_v4, %v1103_v7 }
  0xb3   : > { %1532 = vst [vmem:[#allocation3 + $0x4] sm:$0xf] %v1104_v59  ;;  %v1585_v10 = vsel %vm11068_vm12, %v1583_v26, %v1584_v44  ;;  %v1650_v5 = vrot.slane %v9369_v35, 5  ;;  %v1321_v2 = vshll.u32 %v9368_v51, 16  ;;  %v1325_v42 = vshrl.u32 %v9368_v51, 16  ;;  %v10275_v44 = vld [vmem:[%s13120_s4 + $0xb0] sm:$0xff]   ;;  %v664_v59 = vpop.permute.xlu1 %663 }
  0xb4   : > { %1741 = vst [vmem:[#allocation4 + $0x8] sm:$0xf] %v1585_v10  ;;  %v1333_v55 = vrot.slane %v1331_v13, 5  ;;  %v1337_v62 = vrot.slane %v1335_v58, 4  ;;  %v1647_v20 = vrot.slane %v9368_v51, 5  ;;  %v1109_v37 = vrot.slane %v1108_v11, 4  ;;  %9801 = vmatpush3.bf16.msra.mxu1 %v10283_v22 }
  0xb5   : > { %v1652_v52 = vrot.slane %v1650_v5, 4  ;;  %v1323_v63 = vrot.slane %v1321_v2, 5  ;;  %v1327_v33 = vrot.slane %v1325_v42, 4  ;;  %v11191_v19 = vpack.c.bf16 %v858_v36, %v858_v36  ;;  %v10264_v16 = vld [vmem:[#allocation2 + $0x8] sm:$0xff]   ;;  %9802 = vmatprep.subr.bf16.mxu1 %v10286_v43  ;;  %v659_v2 = vpop.permute.xlu0 %658 }
  0xb6   : > { %v1338_v35 = vor.u32 %v1337_v62, %v1333_v55  ;;  %v1648_v7 = vsel %vm11068_vm12, %v11110_v46, %v1647_v20  ;;  %v1649_v1 = vrot.slane %v1647_v20, 4  ;;  %v1114_v51 = vsel %vm11076_vm13, %v1109_v37, %v11151_v28  ;;  %9755 = vmatmul.mubr.bf16.vlgmr.msra.gmra.mxu0 %v10264_v16  ;;  %v11219_v62 = vld [vmem:[%s13120_s4 + $0xf8] sm:$0xff]  }
  0xb7   : > { %v1324_v34 = vsel %vm11076_vm13, %v11126_v32, %v1323_v63  ;;  %1762 = vst [vmem:[#allocation4 + $0x5c] sm:$0xf] %v1648_v7  ;;  %1533 = vst [vmem:[#allocation3 + $0x8] sm:$0xf] %v1114_v51  ;;  %v1328_v22 = vor.u32 %v1327_v33, %v1323_v63  ;;  %v11197_v28 = vmul.f32 %v654_v9, %v10930_v39  ;;  %v10290_v32 = vld [vmem:[%s13120_s4 + $0x40] sm:$0xff]   ;;  %v1351_v23 = vshll.u32 %v11191_v19, 16 }
  0xb8   : > { %v1339_v46 = vrot.slane %v1338_v35, 4  ;;  %1554 = vst [vmem:[#allocation3 + $0x5c] sm:$0xf] %v1324_v34  ;;  %v1651_v4 = vsel %vm11068_vm12, %v1649_v1, %v1650_v5  ;;  %v1355_v38 = vshrl.u32 %v11191_v19, 16  ;;  %v1656_v6 = vrot.slane %v11191_v19, 5  ;;  %v10278_v39 = vld [vmem:[%s13120_s4 + $0xa8] sm:$0xff]   ;;  %9803 = vmatpush3.bf16.msra.mxu1 %v10286_v43 }
  0xb9   : > { %1763 = vst [vmem:[#allocation4 + $0x60] sm:$0xf] %v1651_v4  ;;  %v9370_v26 = vpack.c.bf16 %v857_v12, %v857_v12  ;;  %v10265_v13 = vld [vmem:[#allocation2 + $0x60] sm:$0xff]   ;;  %v1329_v58 = vrot.slane %v1328_v22, 4  ;;  %v9453_v11 = vpack.c.bf16 %v858_v36, %v857_v12  ;;  %v11210_v10 = vpack.c.bf16 %v11197_v28, %v11197_v28  ;;  %v10523_v9 = vld [vmem:[%s13120_s4 + $0xb8] sm:$0xff]   ;;  %9804 = vmatprep.subr.bf16.mxu1 %v10290_v32 }
  0xba   : > { %v835_v5 = vmul.f32 %v649_v45, %v10933_v41  ;;  %9843 = vmatpush3.bf16.msra.mxu0 %v10523_v9  ;;  %v1353_v42 = vrot.slane %v1351_v23, 5  ;;  %v1357_v20 = vrot.slane %v1355_v38, 4  ;;  %v11221_v37 = vrot.slane %v1656_v6, 4  ;;  %9778 = vmatprep.mubr.bf16.mxu1 %v10265_v13  ;;  %v774_v23 = vpop.permute.xlu1 %773 }
  0xbb   : > { %v1341_v63 = vshll.u32 %v9370_v26, 16  ;;  %9844 = vmatprep.subr.bf16.mxu0 %v10275_v44  ;;  %v1334_v41 = vsel %vm11076_vm13, %v1329_v58, %v1333_v55  ;;  %9497 = vst [vmem:[#allocation2 + $0x68] sm:$0xff] %v9453_v11   ;;  %v1345_v45 = vshrl.u32 %v9370_v26, 16  ;;  %v1653_v36 = vrot.slane %v9370_v26, 5  ;;  %v769_v26 = vpop.permute.xlu0 %768 }
  0xbc   : > { %v1131_v43 = vshll.u32 %v11210_v10, 16  ;;  %1555 = vst [vmem:[#allocation3 + $0x60] sm:$0xf] %v1334_v41  ;;  %v1358_v35 = vor.u32 %v1357_v20, %v1353_v42  ;;  %v1135_v7 = vshrl.u32 %v11210_v10, 16  ;;  %v1590_v1 = vrot.slane %v11210_v10, 5  ;;  %9805 = vmatpush3.bf16.msra.mxu1 %v10290_v32  ;;  %v10284_v10 = vld [vmem:[%s13120_s4 + $0x98] sm:$0xff]  }
  0xbd   : > { %v1343_v33 = vrot.slane %v1341_v63, 5  ;;  %v1347_v51 = vrot.slane %v1345_v45, 4  ;;  %v1654_v34 = vsel %vm11068_vm12, %v1652_v52, %v1653_v36  ;;  %v1655_v19 = vrot.slane %v1653_v36, 4  ;;  %v10281_v52 = vld [vmem:[%s13120_s4 + $0xa0] sm:$0xff]   ;;  %9894 = vmatprep.subr.bf16.mxu1 %v11219_v62 }
  0xbe   : > { %v11230_v12 = vrot.slane %v1131_v43, 5  ;;  %9845 = vmatpush3.bf16.msra.mxu0 %v10275_v44  ;;  %v11232_v55 = vrot.slane %v1358_v35, 4  ;;  %1764 = vst [vmem:[#allocation4 + $0x64] sm:$0xf] %v1654_v34  ;;  %v1137_v22 = vrot.slane %v1135_v7, 4  ;;  %v11236_v4 = vrot.slane %v1590_v1, 4  ;;  %v784_v35 = vpop.permute.xlu1 %783 }
  0xbf   : > { %v1344_v16 = vsel %vm11076_vm13, %v1339_v46, %v1343_v33  ;;  %9846 = vmatprep.subr.bf16.mxu0 %v10278_v39  ;;  %v1348_v38 = vor.u32 %v1347_v51, %v1343_v33  ;;  %v1657_v44 = vsel %vm11068_vm12, %v1655_v19, %v1656_v6  ;;  %v9348_v32 = vpack.c.bf16 %v835_v5, %v835_v5  ;;  %v11272_v34 = vpop.permute.xlu0 %778 }
  0xc0   : > { %1556 = vst [vmem:[#allocation3 + $0x64] sm:$0xf] %v1344_v16  ;;  %v9398_v46 = vpack.c.bf16 %v11197_v28, %v835_v5  ;;  %1765 = vst [vmem:[#allocation4 + $0x68] sm:$0xf] %v1657_v44  ;;  %v1138_v13 = vor.u32 %v1137_v22, %v11230_v12  ;;  %v838_v58 = vmul.f32 %v664_v59, %v10943_v56 }
  0xc1   : > { %v837_v11 = vmul.f32 %v659_v2, %v10952_v15  ;;  %v11255_v6 = vsel %vm502_vm14, %v11015_v47, %v11049_v8  ;;  %v1349_v9 = vrot.slane %v1348_v38, 4  ;;  %v1121_v28 = vshll.u32 %v9348_v32, 16 }
  0xc2   : > { %9486 = vst [vmem:[#allocation2 + $0x10] sm:$0xff] %v9398_v46   ;;  %v1125_v5 = vshrl.u32 %v9348_v32, 16  ;;  %v1587_v20 = vrot.slane %v9348_v32, 5  ;;  %9847 = vmatpush3.bf16.msra.mxu0 %v10278_v39  ;;  %v11257_v63 = vpack.c.bf16 %v838_v58, %v838_v58  ;;  %v11260_v59 = vmul.f32 %v774_v23, %v10956_v17  ;;  %v10266_v2 = vld [vmem:[#allocation2 + $0x68] sm:$0xff]   ;;  %v10288_v23 = vld [vmem:[%s13120_s4 + $0x90] sm:$0xff]  }
  0xc3   : > { %v9350_v56 = vpack.c.bf16 %v837_v11, %v837_v11  ;;  %v9403_v15 = vpack.c.bf16 %v838_v58, %v837_v11  ;;  %9848 = vmatprep.subr.bf16.mxu0 %v10281_v52  ;;  %v1354_v41 = vsel %vm11076_vm13, %v1349_v9, %v1353_v42  ;;  %v1123_v47 = vrot.slane %v1121_v28, 5  ;;  %9779 = vmatmul.mubr.bf16.gmra.mxu1 %v10266_v2  ;;  %v669_v2 = vpop.permute.xlu0 %668 }
  0xc4   : > { %v1127_v8 = vrot.slane %v1125_v5, 4  ;;  %v1588_v45 = vsel %vm11068_vm12, %v11158_v40, %v1587_v20  ;;  %1557 = vst [vmem:[#allocation3 + $0x68] sm:$0xf] %v1354_v41  ;;  %v1139_v39 = vrot.slane %v1138_v13, 4  ;;  %v1589_v36 = vrot.slane %v1587_v20, 4 }
  0xc5   : > { %1742 = vst [vmem:[#allocation4 + $0xc] sm:$0xf] %v1588_v45  ;;  %v1151_v43 = vshll.u32 %v11257_v63, 16  ;;  %v1155_v17 = vshrl.u32 %v11257_v63, 16  ;;  %9487 = vst [vmem:[#allocation2 + $0x18] sm:$0xff] %v9403_v15   ;;  %v1124_v42 = vsel %vm11076_vm13, %v11168_v50, %v1123_v47  ;;  %v1141_v7 = vshll.u32 %v9350_v56, 16 }
  0xc6   : > { %v1128_v33 = vor.u32 %v1127_v8, %v1123_v47  ;;  %v1145_v51 = vshrl.u32 %v9350_v56, 16  ;;  %9849 = vmatpush3.bf16.msra.mxu0 %v10281_v52  ;;  %1534 = vst [vmem:[#allocation3 + $0xc] sm:$0xf] %v1124_v42  ;;  %v1591_v40 = vsel %vm11068_vm12, %v1589_v36, %v1590_v1  ;;  %v1596_v22 = vrot.slane %v11257_v63, 5  ;;  %v10291_v63 = vld [vmem:[%s13120_s4 + $0x88] sm:$0xff]  }
  0xc7   : > { %v1153_v19 = vrot.slane %v1151_v43, 5  ;;  %v1157_v16 = vrot.slane %v1155_v17, 4  ;;  %9850 = vmatprep.subr.bf16.mxu0 %v10284_v10  ;;  %1743 = vst [vmem:[#allocation4 + $0x10] sm:$0xf] %v1591_v40  ;;  %v1143_v38 = vrot.slane %v1141_v7, 5  ;;  %v1593_v32 = vrot.slane %v9350_v56, 5 }
  0xc8   : > { %v1129_v50 = vrot.slane %v1128_v33, 4  ;;  %v1147_v44 = vrot.slane %v1145_v51, 4  ;;  %v11282_v52 = vpack.c.bf16 %v11260_v59, %v11260_v59  ;;  %v859_v1 = vmul.f32 %v769_v26, %v10959_v18  ;;  %v10296_v51 = vld [vmem:[%s13120_s4 + $0x80] sm:$0xff]  }
  0xc9   : > { %v1158_v46 = vor.u32 %v1157_v16, %v1153_v19  ;;  %v11286_v13 = vmul.f32 %v784_v35, %v10966_v24  ;;  %v10267_v58 = vld [vmem:[#allocation2 + $0x10] sm:$0xff]   ;;  %v1144_v9 = vsel %vm11076_vm13, %v1139_v39, %v1143_v38  ;;  %v1594_v5 = vsel %vm11068_vm12, %v11236_v4, %v1593_v32 }
  0xca   : > { %v1134_v11 = vsel %vm11076_vm13, %v1129_v50, %v11230_v12  ;;  %v1148_v28 = vor.u32 %v1147_v44, %v1143_v38  ;;  %9851 = vmatpush3.bf16.msra.mxu0 %v10284_v10  ;;  %v11296_v20 = vrot.slane %v1596_v22, 4  ;;  %1536 = vst [vmem:[#allocation3 + $0x14] sm:$0xf] %v1144_v9  ;;  %v1595_v18 = vrot.slane %v1593_v32, 4  ;;  %1744 = vst [vmem:[#allocation4 + $0x14] sm:$0xf] %v1594_v5  ;;  %v674_v12 = vpop.permute.xlu1 %673 }
  0xcb   : > { %1535 = vst [vmem:[#allocation3 + $0x10] sm:$0xf] %v1134_v11  ;;  %v1371_v24 = vshll.u32 %v11282_v52, 16  ;;  %v1375_v26 = vshrl.u32 %v11282_v52, 16  ;;  %9758 = vmatprep.mubr.bf16.mxu0 %v10267_v58  ;;  %9852 = vmatprep.subr.bf16.mxu0 %v10288_v23  ;;  %v1662_v4 = vrot.slane %v11282_v52, 5  ;;  %v9372_v10 = vpack.c.bf16 %v859_v1, %v859_v1  ;;  %v679_v11 = vpop.permute.xlu0 %678 }
  0xcc   : > { %v1149_v56 = vrot.slane %v1148_v28, 4  ;;  %v9458_v15 = vpack.c.bf16 %v11260_v59, %v859_v1  ;;  %v1597_v41 = vsel %vm11068_vm12, %v1595_v18, %v1596_v22  ;;  %v11309_v45 = vpack.c.bf16 %v11286_v13, %v11286_v13  ;;  %v10269_v39 = vld [vmem:[#allocation2 + $0x18] sm:$0xff]  }
  0xcd   : > { %v1373_v47 = vrot.slane %v1371_v24, 5  ;;  %v1377_v8 = vrot.slane %v1375_v26, 4  ;;  %v11311_v36 = vrot.slane %v1158_v46, 4  ;;  %1745 = vst [vmem:[#allocation4 + $0x18] sm:$0xf] %v1597_v41  ;;  %v1361_v17 = vshll.u32 %v9372_v10, 16  ;;  %9759 = vmatmul.mubr.bf16.gmra.mxu0 %v10269_v39 }
  0xce   : > { %v1154_v43 = vsel %vm11076_vm13, %v1149_v56, %v1153_v19  ;;  %9498 = vst [vmem:[#allocation2 + $0x70] sm:$0xff] %v9458_v15   ;;  %v1365_v59 = vshrl.u32 %v9372_v10, 16  ;;  %9853 = vmatpush3.bf16.msra.mxu0 %v10288_v23  ;;  %v1659_v42 = vrot.slane %v9372_v10, 5  ;;  %v1391_v33 = vshll.u32 %v11309_v45, 16  ;;  %v684_v32 = vpop.permute.xlu1 %683  ;;  %v11338_v28 = vld [vmem:[%s13120_s4 + $0x138] sm:$0xff]  }
  0xcf   : > { %1537 = vst [vmem:[#allocation3 + $0x18] sm:$0xf] %v1154_v43  ;;  %v1378_v35 = vor.u32 %v1377_v8, %v1373_v47  ;;  %v1395_v7 = vshrl.u32 %v11309_v45, 16  ;;  %9854 = vmatprep.subr.bf16.mxu0 %v10291_v63  ;;  %v1363_v40 = vrot.slane %v1361_v17, 5  ;;  %v1668_v16 = vrot.slane %v11309_v45, 5 }
  0xd0   : > { %v1367_v19 = vrot.slane %v1365_v59, 4  ;;  %v861_v22 = vmul.f32 %v11272_v34, %v10969_v25  ;;  %v1664_v23 = vrot.slane %v1662_v4, 4  ;;  %v1660_v50 = vsel %vm11068_vm12, %v11221_v37, %v1659_v42 }
  0xd1   : > { %v1661_v38 = vrot.slane %v1659_v42, 4  ;;  %v11326_v44 = vrot.slane %v1391_v33, 5  ;;  %v1379_v46 = vrot.slane %v1378_v35, 4  ;;  %v1364_v52 = vsel %vm11076_vm13, %v11232_v55, %v1363_v40  ;;  %1766 = vst [vmem:[#allocation4 + $0x6c] sm:$0xf] %v1660_v50 }
  0xd2   : > { %v1368_v1 = vor.u32 %v1367_v19, %v1363_v40  ;;  %v1397_v58 = vrot.slane %v1395_v7, 4  ;;  %9855 = vmatpush3.bf16.msra.mxu0 %v10291_v63  ;;  %1558 = vst [vmem:[#allocation3 + $0x6c] sm:$0xf] %v1364_v52  ;;  %v9374_v34 = vpack.c.bf16 %v861_v22, %v861_v22  ;;  %v9463_v37 = vpack.c.bf16 %v11286_v13, %v861_v22  ;;  %v794_v45 = vpop.permute.xlu1 %793 }
  0xd3   : > { %v1663_v25 = vsel %vm11068_vm12, %v1661_v38, %v1662_v4  ;;  %v840_v9 = vmul.f32 %v674_v12, %v10974_v30  ;;  %9856 = vmatprep.subr.bf16.mxu0 %v10296_v51  ;;  %v11341_v18 = vrot.slane %v1668_v16, 4  ;;  %v839_v24 = vmul.f32 %v669_v2, %v10976_v31 }
  0xd4   : > { %v1369_v55 = vrot.slane %v1368_v1, 4  ;;  %1767 = vst [vmem:[#allocation4 + $0x70] sm:$0xf] %v1663_v25  ;;  %v1398_v5 = vor.u32 %v1397_v58, %v11326_v44  ;;  %9499 = vst [vmem:[#allocation2 + $0x78] sm:$0xff] %v9463_v37   ;;  %v1381_v26 = vshll.u32 %v9374_v34, 16  ;;  %v1385_v63 = vshrl.u32 %v9374_v34, 16 }
  0xd5   : > { %v1665_v13 = vrot.slane %v9374_v34, 5  ;;  %v9353_v56 = vpack.c.bf16 %v840_v9, %v840_v9  ;;  %v10271_v30 = vld [vmem:[#allocation2 + $0x70] sm:$0xff]   ;;  %v9352_v4 = vpack.c.bf16 %v839_v24, %v839_v24  ;;  %v9408_v10 = vpack.c.bf16 %v840_v9, %v839_v24 }
  0xd6   : > { %v1374_v12 = vsel %vm11076_vm13, %v1369_v55, %v1373_v47  ;;  %v842_v15 = vmul.f32 %v684_v32, %v10991_v61  ;;  %9857 = vmatpush3.bf16.msra.mxu0 %v10296_v51  ;;  %v1383_v41 = vrot.slane %v1381_v26, 5  ;;  %v1387_v8 = vrot.slane %v1385_v63, 4  ;;  %9782 = vmatprep.mubr.bf16.mxu1 %v10271_v30  ;;  %v11352_v61 = vpop.permute.xlu0 %788  ;;  %v804_v9 = vpop.permute.xlu1 %803 }
  0xd7   : > { %1559 = vst [vmem:[#allocation3 + $0x70] sm:$0xf] %v1374_v12  ;;  %v1666_v31 = vsel %vm11068_vm12, %v1664_v23, %v1665_v13  ;;  %v1667_v2 = vrot.slane %v1665_v13, 4  ;;  %9946 = vmatprep.subr.bf16.mxu0 %v11338_v28  ;;  %v11350_v39 = vrot.slane %v1398_v5, 4  ;;  %v1171_v47 = vshll.u32 %v9353_v56, 16  ;;  %9488 = vst [vmem:[#allocation2 + $0x20] sm:$0xff] %v9408_v10  }
  0xd8   : > { %1768 = vst [vmem:[#allocation4 + $0x74] sm:$0xf] %v1666_v31  ;;  %v1175_v43 = vshrl.u32 %v9353_v56, 16  ;;  %v1161_v17 = vshll.u32 %v9352_v4, 16  ;;  %v1384_v59 = vsel %vm11076_vm13, %v1379_v46, %v1383_v41  ;;  %v1388_v35 = vor.u32 %v1387_v8, %v1383_v41 }
  0xd9   : > { %v1669_v42 = vsel %vm11068_vm12, %v1667_v2, %v1668_v16  ;;  %v1165_v33 = vshrl.u32 %v9352_v4, 16  ;;  %1560 = vst [vmem:[#allocation3 + $0x74] sm:$0xf] %v1384_v59  ;;  %v1173_v7 = vrot.slane %v1171_v47, 5  ;;  %v1602_v40 = vrot.slane %v9353_v56, 5 }
  0xda   : > { %1769 = vst [vmem:[#allocation4 + $0x78] sm:$0xf] %v1669_v42  ;;  %v1177_v51 = vrot.slane %v1175_v43, 4  ;;  %v1163_v19 = vrot.slane %v1161_v17, 5  ;;  %v1389_v22 = vrot.slane %v1388_v35, 4  ;;  %v1599_v50 = vrot.slane %v9352_v4, 5  ;;  %v799_v55 = vpop.permute.xlu0 %798  ;;  %v694_v59 = vpop.permute.xlu1 %693 }
  0xdb   : > { %v1167_v23 = vrot.slane %v1165_v33, 4  ;;  %v9355_v38 = vpack.c.bf16 %v842_v15, %v842_v15  ;;  %v841_v52 = vmul.f32 %v679_v11, %v10996_v3  ;;  %v11363_v16 = vmul.f32 %v794_v45, %v11001_v14  ;;  %v10274_v1 = vld [vmem:[#allocation2 + $0x78] sm:$0xff]  }
  0xdc   : > { %v1178_v32 = vor.u32 %v1177_v51, %v1173_v7  ;;  %v1164_v46 = vsel %vm11076_vm13, %v11311_v36, %v1163_v19  ;;  %v1394_v58 = vsel %vm11076_vm13, %v1389_v22, %v11326_v44  ;;  %v1600_v34 = vsel %vm11068_vm12, %v11296_v20, %v1599_v50  ;;  %9783 = vmatmul.mubr.bf16.gmra.mxu1 %v10274_v1 }
  0xdd   : > { %v1168_v25 = vor.u32 %v1167_v23, %v1163_v19  ;;  %1538 = vst [vmem:[#allocation3 + $0x1c] sm:$0xf] %v1164_v46  ;;  %v1601_v37 = vrot.slane %v1599_v50, 4  ;;  %1561 = vst [vmem:[#allocation3 + $0x78] sm:$0xf] %v1394_v58  ;;  %v1604_v36 = vrot.slane %v1602_v40, 4  ;;  %v9354_v24 = vpack.c.bf16 %v841_v52, %v841_v52 }
  0xde   : > { %1746 = vst [vmem:[#allocation4 + $0x1c] sm:$0xf] %v1600_v34  ;;  %v1191_v3 = vshll.u32 %v9355_v38, 16  ;;  %v1195_v11 = vshrl.u32 %v9355_v38, 16  ;;  %v1608_v14 = vrot.slane %v9355_v38, 5  ;;  %v9413_v26 = vpack.c.bf16 %v842_v15, %v841_v52  ;;  %v10276_v63 = vld [vmem:[#allocation2 + $0x20] sm:$0xff]   ;;  %v689_v51 = vpop.permute.xlu0 %688 }
  0xdf   : > { %v1169_v5 = vrot.slane %v1168_v25, 4  ;;  %v1603_v44 = vsel %vm11068_vm12, %v1601_v37, %v1602_v40  ;;  %v1179_v13 = vrot.slane %v1178_v32, 4  ;;  %v11375_v30 = vpack.c.bf16 %v11363_v16, %v11363_v16  ;;  %9762 = vmatprep.mubr.bf16.mxu0 %v10276_v63 }
  0xe0   : > { %1747 = vst [vmem:[#allocation4 + $0x20] sm:$0xf] %v1603_v44  ;;  %v1193_v20 = vrot.slane %v1191_v3, 5  ;;  %v1197_v56 = vrot.slane %v1195_v11, 4  ;;  %9489 = vst [vmem:[#allocation2 + $0x28] sm:$0xff] %v9413_v26   ;;  %v1181_v4 = vshll.u32 %v9354_v24, 16  ;;  %v863_v23 = vmul.f32 %v11352_v61, %v11005_v21 }
  0xe1   : > { %v1174_v12 = vsel %vm11076_vm13, %v1169_v5, %v1173_v7  ;;  %v1185_v10 = vshrl.u32 %v9354_v24, 16  ;;  %v1605_v41 = vrot.slane %v9354_v24, 5  ;;  %v11379_v15 = vrot.slane %v1608_v14, 4 }
  0xe2   : > { %1539 = vst [vmem:[#allocation3 + $0x20] sm:$0xf] %v1174_v12  ;;  %v1198_v8 = vor.u32 %v1197_v56, %v1193_v20  ;;  %v1411_v31 = vshll.u32 %v11375_v30, 16  ;;  %v1415_v2 = vshrl.u32 %v11375_v30, 16  ;;  %v1183_v45 = vrot.slane %v1181_v4, 5 }
  0xe3   : > { %v1187_v47 = vrot.slane %v1185_v10, 4  ;;  %v1606_v43 = vsel %vm11068_vm12, %v1604_v36, %v1605_v41  ;;  %v1607_v17 = vrot.slane %v1605_v41, 4  ;;  %v1674_v7 = vrot.slane %v11375_v30, 5 }
  0xe4   : > { %v11385_v35 = vrot.slane %v1198_v8, 4  ;;  %1748 = vst [vmem:[#allocation4 + $0x24] sm:$0xf] %v1606_v43  ;;  %v11387_v42 = vrot.slane %v1411_v31, 5  ;;  %v1417_v33 = vrot.slane %v1415_v2, 4  ;;  %v1184_v40 = vsel %vm11076_vm13, %v1179_v13, %v1183_v45  ;;  %v704_v8 = vpop.permute.xlu1 %703 }
  0xe5   : > { %v1188_v19 = vor.u32 %v1187_v47, %v1183_v45  ;;  %v1609_v22 = vsel %vm11068_vm12, %v1607_v17, %v1608_v14  ;;  %1540 = vst [vmem:[#allocation3 + $0x24] sm:$0xf] %v1184_v40  ;;  %v866_v38 = vmul.f32 %v804_v9, %v11012_v29  ;;  %v865_v32 = vmul.f32 %v799_v55, %v11020_v54 }
  0xe6   : > { %1749 = vst [vmem:[#allocation4 + $0x28] sm:$0xf] %v1609_v22  ;;  %v1418_v50 = vor.u32 %v1417_v33, %v11387_v42  ;;  %v844_v46 = vmul.f32 %v694_v59, %v11023_v57  ;;  %v9376_v1 = vpack.c.bf16 %v863_v23, %v863_v23  ;;  %v9468_v58 = vpack.c.bf16 %v11363_v16, %v863_v23  ;;  %v699_v33 = vpop.permute.xlu0 %698  ;;  %v10287_v23 = vld [vmem:[#allocation3] sm:$0xff]  }
  0xe7   : > { %v1189_v52 = vrot.slane %v1188_v19, 4  ;;  %v843_v25 = vmul.f32 %v689_v51, %v11026_v60  ;;  %v9379_v37 = vpack.c.bf16 %v866_v38, %v866_v38  ;;  %v9378_v36 = vpack.c.bf16 %v865_v32, %v865_v32  ;;  %v10279_v61 = vld [vmem:[#allocation2 + $0x28] sm:$0xff]  }
  0xe8   : > { %v1419_v34 = vrot.slane %v1418_v50, 4  ;;  %v9473_v21 = vpack.c.bf16 %v866_v38, %v865_v32  ;;  %9500 = vst [vmem:[#allocation2 + $0x80] sm:$0xff] %v9468_v58   ;;  %v1401_v29 = vshll.u32 %v9376_v1, 16  ;;  %v1405_v9 = vshrl.u32 %v9376_v1, 16  ;;  %9763 = vmatmul.mubr.bf16.gmra.mxu0 %v10279_v61  ;;  %v814_v61 = vpop.permute.xlu1 %813 }
  0xe9   : > { %v1194_v3 = vsel %vm11076_vm13, %v1189_v52, %v1193_v20  ;;  %v1671_v54 = vrot.slane %v9376_v1, 5  ;;  %v1431_v57 = vshll.u32 %v9379_v37, 16  ;;  %v1435_v11 = vshrl.u32 %v9379_v37, 16 }
  0xea   : > { %1541 = vst [vmem:[#allocation3 + $0x28] sm:$0xf] %v1194_v3  ;;  %v1680_v14 = vrot.slane %v9379_v37, 5  ;;  %9501 = vst [vmem:[#allocation2 + $0x88] sm:$0xff] %v9473_v21   ;;  %v1421_v16 = vshll.u32 %v9378_v36, 16  ;;  %v1403_v60 = vrot.slane %v1401_v29, 5  ;;  %v9357_v41 = vpack.c.bf16 %v844_v46, %v844_v46 }
  0xeb   : > { %v1407_v55 = vrot.slane %v1405_v9, 4  ;;  %v1672_v5 = vsel %vm11068_vm12, %v11341_v18, %v1671_v54  ;;  %v1673_v44 = vrot.slane %v1671_v54, 4  ;;  %v1676_v24 = vrot.slane %v1674_v7, 4 }
  0xec   : > { %1770 = vst [vmem:[#allocation4 + $0x7c] sm:$0xf] %v1672_v5  ;;  %v11407_v26 = vrot.slane %v1431_v57, 5  ;;  %v11409_v63 = vrot.slane %v1435_v11, 4  ;;  %v1423_v13 = vrot.slane %v1421_v16, 5  ;;  %v1404_v20 = vsel %vm11076_vm13, %v11350_v39, %v1403_v60 }
  0xed   : > { %v1408_v56 = vor.u32 %v1407_v55, %v1403_v60  ;;  %v1675_v30 = vsel %vm11068_vm12, %v1673_v44, %v1674_v7  ;;  %v1425_v12 = vshrl.u32 %v9378_v36, 16  ;;  %1562 = vst [vmem:[#allocation3 + $0x7c] sm:$0xf] %v1404_v20  ;;  %v11416_v18 = vrot.slane %v1680_v14, 4 }
  0xee   : > { %1771 = vst [vmem:[#allocation4 + $0x80] sm:$0xf] %v1675_v30  ;;  %v1424_v4 = vsel %vm11076_vm13, %v1419_v34, %v1423_v13  ;;  %v1677_v10 = vrot.slane %v9378_v36, 5  ;;  %v9356_v45 = vpack.c.bf16 %v843_v25, %v843_v25  ;;  %v9418_v39 = vpack.c.bf16 %v844_v46, %v843_v25 }
  0xef   : > { %v1409_v31 = vrot.slane %v1408_v56, 4  ;;  %v1427_v2 = vrot.slane %v1425_v12, 4  ;;  %1564 = vst [vmem:[#allocation3 + $0x84] sm:$0xf] %v1424_v4  ;;  %v1438_v47 = vor.u32 %v11409_v63, %v11407_v26  ;;  %v1211_v59 = vshll.u32 %v9357_v41, 16  ;;  %v10282_v7 = vld [vmem:[#allocation2 + $0x80] sm:$0xff]  }
  0xf0   : > { %v1678_v43 = vsel %vm11068_vm12, %v1676_v24, %v1677_v10  ;;  %v1679_v17 = vrot.slane %v1677_v10, 4  ;;  %v1215_v19 = vshrl.u32 %v9357_v41, 16  ;;  %v1614_v22 = vrot.slane %v9357_v41, 5  ;;  %9490 = vst [vmem:[#allocation2 + $0x30] sm:$0xff] %v9418_v39   ;;  %9786 = vmatprep.mubr.bf16.mxu1 %v10282_v7 }
  0xf1   : > { %v1414_v51 = vsel %vm11076_vm13, %v1409_v31, %v11387_v42  ;;  %v1428_v40 = vor.u32 %v1427_v2, %v1423_v13  ;;  %1772 = vst [vmem:[#allocation4 + $0x84] sm:$0xf] %v1678_v43  ;;  %v1213_v38 = vrot.slane %v1211_v59, 5  ;;  %v1201_v32 = vshll.u32 %v9356_v45, 16  ;;  %v10285_v52 = vld [vmem:[#allocation2 + $0x88] sm:$0xff]  }
  0xf2   : > { %1563 = vst [vmem:[#allocation3 + $0x80] sm:$0xf] %v1414_v51  ;;  %v1681_v50 = vsel %vm11068_vm12, %v1679_v17, %v1680_v14  ;;  %v1205_v46 = vshrl.u32 %v9356_v45, 16  ;;  %v1217_v58 = vrot.slane %v1215_v19, 4  ;;  %v1616_v25 = vrot.slane %v1614_v22, 4  ;;  %9787 = vmatmul.mubr.bf16.gmra.mxu1 %v10285_v52  ;;  %v809_v14 = vpop.permute.xlu0 %808  ;;  %v10293_v31 = vld [vmem:[#allocation3 + $0x8] sm:$0xff]  }
  0xf3   : > { %v1429_v1 = vrot.slane %v1428_v40, 4  ;;  %1773 = vst [vmem:[#allocation4 + $0x88] sm:$0xf] %v1681_v50  ;;  %v1611_v42 = vrot.slane %v9356_v45, 5  ;;  %v1203_v34 = vrot.slane %v1201_v32, 5  ;;  %v846_v36 = vmul.f32 %v704_v8, %v11029_v0  ;;  %9806 = vmatprep.mubr.bf16.mxu1 %v10287_v23  ;;  %v10294_v17 = vld [vmem:[#allocation3 + $0x10] sm:$0xff]  }
  0xf4   : > { %v1207_v37 = vrot.slane %v1205_v46, 4  ;;  %v845_v21 = vmul.f32 %v699_v33, %v11036_v48  ;;  %v1218_v29 = vor.u32 %v1217_v58, %v1213_v38  ;;  %v13193_v33 = vld [vmem:[#allocation6_spill] sm:$0xff] }
  0xf5   : > { %v1434_v3 = vsel %vm11076_vm13, %v1429_v1, %v11407_v26  ;;  %v1612_v9 = vsel %vm11068_vm12, %v11379_v15, %v1611_v42  ;;  %v1613_v54 = vrot.slane %v1611_v42, 4  ;;  %v1204_v0 = vsel %vm11076_vm13, %v11385_v35, %v1203_v34  ;;  %v10303_v35 = vld [vmem:[%s13120_s4 + $0xf0] sm:$0xff]   ;;  %v10317_v26 = vld [vmem:[%s13120_s4 + $0xe0] sm:$0xff]  }
  0xf6   : > { %1565 = vst [vmem:[#allocation3 + $0x88] sm:$0xf] %v1434_v3  ;;  %v1208_v57 = vor.u32 %v1207_v37, %v1203_v34  ;;  %1750 = vst [vmem:[#allocation4 + $0x2c] sm:$0xf] %v1612_v9  ;;  %v9359_v48 = vpack.c.bf16 %v846_v36, %v846_v36  ;;  %v9358_v11 = vpack.c.bf16 %v845_v21, %v845_v21  ;;  %v1219_v16 = vrot.slane %v1218_v29, 4  ;;  %v819_v23 = vpop.permute.xlu0 %818  ;;  %v10309_v34 = vld [vmem:[%s13120_s4 + $0xe8] sm:$0xff]  }
  0xf7   : > { %1542 = vst [vmem:[#allocation3 + $0x2c] sm:$0xf] %v1204_v0  ;;  %v1615_v60 = vsel %vm11068_vm12, %v1613_v54, %v1614_v22  ;;  %v9423_v55 = vpack.c.bf16 %v846_v36, %v845_v21  ;;  %v11443_v15 = vmul.f32 %v814_v61, %v11039_v49  ;;  %v10289_v4 = vld [vmem:[#allocation2 + $0x30] sm:$0xff]   ;;  %v13194_v7 = vrot.slane %v13193_v33, 5  ;;  %v824_v22 = vpop.permute.xlu1 %823  ;;  %v13196_v21 = vld [vmem:[#allocation8_spill] sm:$0xff]  ;;  %v13197_v61 = vld [vmem:[#allocation9_spill] sm:$0xff] }
  0xf8   : > { %v1209_v5 = vrot.slane %v1208_v57, 4  ;;  %1751 = vst [vmem:[#allocation4 + $0x30] sm:$0xf] %v1615_v60  ;;  %v1231_v44 = vshll.u32 %v9359_v48, 16  ;;  %v1235_v24 = vshrl.u32 %v9359_v48, 16  ;;  %v1620_v13 = vrot.slane %v9359_v48, 5  ;;  %9766 = vmatprep.mubr.bf16.mxu0 %v10289_v4 }
  0xf9   : > { %9491 = vst [vmem:[#allocation2 + $0x38] sm:$0xff] %v9423_v55   ;;  %v1221_v20 = vshll.u32 %v9358_v11, 16  ;;  %v1225_v56 = vshrl.u32 %v9358_v11, 16  ;;  %v1617_v30 = vrot.slane %v9358_v11, 5  ;;  %v11450_v12 = vpack.c.bf16 %v11443_v15, %v11443_v15  ;;  %v10295_v29 = vld [vmem:[#allocation4] sm:$0xff]  }
  0xfa   : > { %v1214_v49 = vsel %vm11076_vm13, %v1209_v5, %v1213_v38  ;;  %v1233_v10 = vrot.slane %v1231_v44, 5  ;;  %v1237_v41 = vrot.slane %v1235_v24, 4  ;;  %v1622_v8 = vrot.slane %v1620_v13, 4  ;;  %9807 = vmatmul.mubr.bf16.vlgmr.msra.gmra.mxu1 %v10293_v31  ;;  %v13198_v9 = vld [vmem:[#allocation10_spill] sm:$0xff]  ;;  %v10301_v55 = vld [vmem:[#allocation3 + $0x20] sm:$0xff]  }
  0xfb   : > { %1543 = vst [vmem:[#allocation3 + $0x30] sm:$0xf] %v1214_v49  ;;  %v1223_v2 = vrot.slane %v1221_v20, 5  ;;  %v1227_v45 = vrot.slane %v1225_v56, 4  ;;  %v1618_v39 = vsel %vm11068_vm12, %v1616_v25, %v1617_v30  ;;  %v1619_v43 = vrot.slane %v1617_v30, 4  ;;  %9810 = vmatprep.mubr.bf16.mxu1 %v10294_v17  ;;  %9895 = vmatpush3.bf16.msra.mxu1 %v11219_v62  ;;  %v13195_v25 = vld [vmem:[#allocation7_spill] sm:$0xff] }
  0xfc   : > { %v1238_v59 = vor.u32 %v1237_v41, %v1233_v10  ;;  %v1624_v51 = vsel %vm11068_vm12, %v1622_v8, %v13194_v7  ;;  %1752 = vst [vmem:[#allocation4 + $0x34] sm:$0xf] %v1618_v39  ;;  %v1451_v40 = vshll.u32 %v11450_v12, 16  ;;  %v1455_v19 = vshrl.u32 %v11450_v12, 16  ;;  %9896 = vmatprep.subr.bf16.mxu1 %v10303_v35 }
  0xfd   : > { %1754 = vst [vmem:[#allocation4 + $0x3c] sm:$0xf] %v1624_v51  ;;  %v1224_v50 = vsel %vm11076_vm13, %v1219_v16, %v1223_v2  ;;  %v1228_v38 = vor.u32 %v1227_v45, %v1223_v2  ;;  %v1621_v32 = vsel %vm11068_vm12, %v1619_v43, %v1620_v13  ;;  %v1686_v46 = vrot.slane %v11450_v12, 5 }
  0xfe   : > { %v1239_v52 = vrot.slane %v1238_v59, 4  ;;  %1544 = vst [vmem:[#allocation3 + $0x34] sm:$0xf] %v1224_v50  ;;  %1753 = vst [vmem:[#allocation4 + $0x38] sm:$0xf] %v1621_v32  ;;  %v11468_v1 = vrot.slane %v1451_v40, 5  ;;  %v867_v42 = vmul.f32 %v809_v14, %v13195_v25  ;;  %v870_v62 = vmul.f32 %v824_v22, %v13196_v21 }
  0xff   : > { %v1457_v58 = vrot.slane %v1455_v19, 4  ;;  %v1439_v37 = vrot.slane %v1438_v47, 4  ;;  %v1229_v36 = vrot.slane %v1228_v38, 4  ;;  %v869_v3 = vmul.f32 %v819_v23, %v13197_v61  ;;  %v10299_v14 = vld [vmem:[#allocation3 + $0x18] sm:$0xff]   ;;  %9897 = vmatpush3.bf16.msra.mxu1 %v10303_v35  ;;  %v10306_v40 = vld [vmem:[%s13120_s4 + $0x130] sm:$0xff]  }
 0x100   : > { %v1244_v54 = vsel %vm11076_vm13, %v1239_v52, %v13198_v9  ;;  %v9380_v57 = vpack.c.bf16 %v867_v42, %v867_v42  ;;  %v9478_v48 = vpack.c.bf16 %v11443_v15, %v867_v42  ;;  %v10292_v11 = vld [vmem:[#allocation2 + $0x38] sm:$0xff]   ;;  %v11489_v47 = vpack.c.bf16 %v870_v62, %v870_v62  ;;  %9898 = vmatprep.subr.bf16.mxu1 %v10309_v34  ;;  %v10300_v23 = vld [vmem:[#allocation4 + $0x8] sm:$0xff]  }
 0x101   : > { %v1458_v0 = vor.u32 %v1457_v58, %v11468_v1  ;;  %1546 = vst [vmem:[#allocation3 + $0x3c] sm:$0xf] %v1244_v54  ;;  %v1234_v63 = vsel %vm11076_vm13, %v1229_v36, %v1233_v10  ;;  %v9382_v16 = vpack.c.bf16 %v869_v3, %v869_v3  ;;  %v9483_v60 = vpack.c.bf16 %v870_v62, %v869_v3  ;;  %v829_v10 = vpop.permute.xlu0 %828  ;;  %v10331_v50 = vld [vmem:[%s13120_s4 + $0xd0] sm:$0xff]   ;;  %v10302_v52 = vld [vmem:[#allocation4 + $0x10] sm:$0xff]  }
 0x102   : > { %1545 = vst [vmem:[#allocation3 + $0x38] sm:$0xf] %v1234_v63  ;;  %v1688_v5 = vrot.slane %v1686_v46, 4  ;;  %9502 = vst [vmem:[#allocation2 + $0x90] sm:$0xff] %v9478_v48   ;;  %v1441_v15 = vshll.u32 %v9380_v57, 16  ;;  %v1445_v44 = vshrl.u32 %v9380_v57, 16  ;;  %9767 = vmatmul.mubr.bf16.gmra.mxu0 %v10292_v11  ;;  %9811 = vmatmul.mubr.bf16.gmra.mxu1 %v10299_v14  ;;  %v871_v51 = vmul.f32 %v829_v10, %v11255_v6 }
 0x103   : > { %v1683_v24 = vrot.slane %v9380_v57, 5  ;;  %v1459_v13 = vrot.slane %v1458_v0, 4  ;;  %v1471_v20 = vshll.u32 %v11489_v47, 16  ;;  %v1475_v56 = vshrl.u32 %v11489_v47, 16  ;;  %9503 = vst [vmem:[#allocation2 + $0x98] sm:$0xff] %v9483_v60   ;;  %9858 = vmatprep.mubr.bf16.mxu0 %v10295_v29  ;;  %9814 = vmatprep.mubr.bf16.mxu1 %v10301_v55  ;;  %v10304_v58 = vld [vmem:[#allocation3 + $0x28] sm:$0xff]  }
 0x104   : > { %v1461_v30 = vshll.u32 %v9382_v16, 16  ;;  %v1443_v12 = vrot.slane %v1441_v15, 5  ;;  %v1447_v4 = vrot.slane %v1445_v44, 4  ;;  %v1692_v31 = vrot.slane %v11489_v47, 5  ;;  %9899 = vmatpush3.bf16.msra.mxu1 %v10309_v34  ;;  %v10337_v57 = vld [vmem:[%s13120_s4 + $0xc8] sm:$0xff]   ;;  %v10305_v14 = vld [vmem:[#allocation4 + $0x18] sm:$0xff]  }
 0x105   : > { %v1684_v35 = vsel %vm11068_vm12, %v11416_v18, %v1683_v24  ;;  %v1685_v49 = vrot.slane %v1683_v24, 4  ;;  %v1473_v41 = vrot.slane %v1471_v20, 5  ;;  %v1477_v8 = vrot.slane %v1475_v56, 4  ;;  %9900 = vmatprep.subr.bf16.mxu1 %v10317_v26  ;;  %v10325_v18 = vld [vmem:[%s13120_s4 + $0xd8] sm:$0xff]   ;;  %v10308_v47 = vld [vmem:[#allocation4 + $0x20] sm:$0xff]   ;;  %v10311_v15 = vld [vmem:[#allocation4 + $0x28] sm:$0xff]  }
 0x106   : > { %1774 = vst [vmem:[#allocation4 + $0x8c] sm:$0xf] %v1684_v35  ;;  %v1463_v2 = vrot.slane %v1461_v30, 5  ;;  %v1444_v45 = vsel %vm11076_vm13, %v1439_v37, %v1443_v12  ;;  %v1448_v39 = vor.u32 %v1447_v4, %v1443_v12  ;;  %v1465_v17 = vshrl.u32 %v9382_v16, 16  ;;  %v10307_v61 = vld [vmem:[#allocation3 + $0x30] sm:$0xff]   ;;  %v10315_v24 = vld [vmem:[#allocation3 + $0x48] sm:$0xff]  }
 0x107   : > { %v1687_v43 = vsel %vm11068_vm12, %v1685_v49, %v1686_v46  ;;  %1566 = vst [vmem:[#allocation3 + $0x8c] sm:$0xf] %v1444_v45  ;;  %v1478_v59 = vor.u32 %v1477_v8, %v1473_v41  ;;  %v1689_v7 = vrot.slane %v9382_v16, 5  ;;  %v9384_v46 = vpack.c.bf16 %v871_v51, %v871_v51  ;;  %v10312_v16 = vld [vmem:[#allocation3 + $0x40] sm:$0xff]   ;;  %v10326_v60 = vld [vmem:[%s13120_s4 + $0x118] sm:$0xff]   ;;  %v10322_v10 = vld [vmem:[#allocation4 + $0x48] sm:$0xff]  }
 0x108   : > { %1775 = vst [vmem:[#allocation4 + $0x90] sm:$0xf] %v1687_v43  ;;  %v1464_v33 = vsel %vm11076_vm13, %v1459_v13, %v1463_v2  ;;  %v1449_v19 = vrot.slane %v1448_v39, 4  ;;  %v1467_v22 = vrot.slane %v1465_v17, 4  ;;  %9901 = vmatpush3.bf16.msra.mxu1 %v10317_v26  ;;  %v1694_v42 = vrot.slane %v1692_v31, 4  ;;  %v10344_v26 = vld [vmem:[%s13120_s4 + $0xc0] sm:$0xff]  }
 0x109   : > { %1568 = vst [vmem:[#allocation3 + $0x94] sm:$0xf] %v1464_v33  ;;  %v1690_v38 = vsel %vm11068_vm12, %v1688_v5, %v1689_v7  ;;  %v1691_v32 = vrot.slane %v1689_v7, 4  ;;  %v1479_v25 = vrot.slane %v1478_v59, 4  ;;  %9902 = vmatprep.subr.bf16.mxu1 %v10325_v18  ;;  %1077 = vst [vmem:[#allocation2 + $0xa0] sm:$0x3] %v9384_v46 }
 0x10a   : > { %v1454_v6 = vsel %vm11076_vm13, %v1449_v19, %v11468_v1  ;;  %v1468_v34 = vor.u32 %v1467_v22, %v1463_v2  ;;  %1776 = vst [vmem:[#allocation4 + $0x94] sm:$0xf] %v1690_v38  ;;  %9859 = vmatmul.mubr.bf16.vlgmr.msra.gmra.mxu0 %v10300_v23  ;;  %v1481_v36 = vshll.u32 %v9384_v46, 16  ;;  %v1485_v21 = vshrl.u32 %v9384_v46, 16  ;;  %9815 = vmatmul.mubr.bf16.gmra.mxu1 %v10304_v58  ;;  %v10314_v1 = vld [vmem:[%s13120_s4 + $0x128] sm:$0xff]   ;;  %v10310_v27 = vld [vmem:[#allocation3 + $0x38] sm:$0xff]  }
 0x10b   : > { %1567 = vst [vmem:[#allocation3 + $0x90] sm:$0xf] %v1454_v6  ;;  %v1693_v37 = vsel %vm11068_vm12, %v1691_v32, %v1692_v31  ;;  %v1695_v62 = vrot.slane %v9384_v46, 5  ;;  %9947 = vmatpush3.bf16.msra.mxu0 %v11338_v28  ;;  %9862 = vmatprep.mubr.bf16.mxu0 %v10302_v52  ;;  %v11545_v55 = vld [vmem:[%s13120_s4 + $0x178] sm:$0xff]   ;;  %v10332_v5 = vld [vmem:[%s13120_s4 + $0x110] sm:$0xff]   ;;  %v10338_v20 = vld [vmem:[%s13120_s4 + $0x108] sm:$0xff]  }
 0x10c   : > { %v1469_v3 = vrot.slane %v1468_v34, 4  ;;  %1777 = vst [vmem:[#allocation4 + $0x98] sm:$0xf] %v1693_v37  ;;  %9948 = vmatprep.subr.bf16.mxu0 %v10306_v40  ;;  %v1483_v29 = vrot.slane %v1481_v36, 5  ;;  %v1487_v9 = vrot.slane %v1485_v21, 4  ;;  %9818 = vmatprep.mubr.bf16.mxu1 %v10307_v61  ;;  %v10313_v44 = vld [vmem:[#allocation4 + $0x30] sm:$0xff]  }
 0x10d   : > { %v1696_v54 = vsel %vm11068_vm12, %v1694_v42, %v1695_v62  ;;  %v1697_v0 = vrot.slane %v1695_v62, 4  ;;  %9903 = vmatpush3.bf16.msra.mxu1 %v10325_v18  ;;  %v10318_v13 = vld [vmem:[#allocation3 + $0x50] sm:$0xff]   ;;  %v10345_v56 = vld [vmem:[%s13120_s4 + $0x100] sm:$0xff]   ;;  %v10319_v12 = vld [vmem:[#allocation4 + $0x40] sm:$0xff]  }
 0x10e   : > { %v1474_v28 = vsel %vm11076_vm13, %v1469_v3, %v1473_v41  ;;  %1778 = vst [vmem:[#allocation4 + $0x9c] sm:$0xf] %v1696_v54  ;;  %9904 = vmatprep.subr.bf16.mxu1 %v10331_v50  ;;  %v1484_v48 = vsel %vm11076_vm13, %v1479_v25, %v1483_v29  ;;  %v1488_v11 = vor.u32 %v1487_v9, %v1483_v29  ;;  %v10316_v30 = vld [vmem:[#allocation4 + $0x38] sm:$0xff]   ;;  %v11560_v49 = vld [vmem:[%s13120_s4 + $0x1b8] sm:$0xff]   ;;  %v10327_v8 = vld [vmem:[#allocation3 + $0x68] sm:$0xff]  }
 0x10f   : > { %1569 = vst [vmem:[#allocation3 + $0x98] sm:$0xf] %v1474_v28  ;;  %1779 = vst [vmem:[#allocation4 + $0xa0] sm:$0x1] %v1697_v0  ;;  %9949 = vmatpush3.bf16.msra.mxu0 %v10306_v40  ;;  %v10321_v4 = vld [vmem:[#allocation3 + $0x58] sm:$0xff]   ;;  %v10323_v35 = vld [vmem:[#allocation3 + $0x60] sm:$0xff]  }
 0x110   : > { %1570 = vst [vmem:[#allocation3 + $0x9c] sm:$0xf] %v1484_v48  ;;  %9950 = vmatprep.subr.bf16.mxu0 %v10314_v1  ;;  %v1489_v63 = vrot.slane %v1488_v11, 4  ;;  %v10324_v41 = vld [vmem:[#allocation4 + $0x50] sm:$0xff]   ;;  %v10328_v2 = vld [vmem:[#allocation4 + $0x58] sm:$0xff]   ;;  %v10330_v45 = vld [vmem:[#allocation4 + $0x60] sm:$0xff]  }
 0x111   : > { %9905 = vmatpush3.bf16.msra.mxu1 %v10331_v50  ;;  %v10329_v31 = vld [vmem:[#allocation3 + $0x70] sm:$0xff]   ;;  %v10333_v39 = vld [vmem:[#allocation3 + $0x78] sm:$0xff]   ;;  %v10335_v43 = vld [vmem:[#allocation3 + $0x80] sm:$0xff]  }
 0x112   : > { %9863 = vmatmul.mubr.bf16.gmra.mxu0 %v10305_v14  ;;  %9906 = vmatprep.subr.bf16.mxu1 %v10337_v57  ;;  %1571 = vst [vmem:[#allocation3 + $0xa0] sm:$0x1] %v1489_v63  ;;  %v10343_v17 = vld [vmem:[#allocation2 + $0x10] sm:$0xff]   ;;  %v10342_v18 = vld [vmem:[#allocation2 + $0x8] sm:$0xfe]   ;;  %v10336_v7 = vld [vmem:[#allocation4 + $0x70] sm:$0xff]  }
 0x113   : > { %9866 = vmatprep.mubr.bf16.mxu0 %v10308_v47  ;;  %9951 = vmatpush3.bf16.msra.mxu0 %v10314_v1  ;;  %v10334_v59 = vld [vmem:[#allocation4 + $0x68] sm:$0xff]   ;;  %v3375_v33 = vrot.slane %v10343_v17, 1  ;;  %v3374_v40 = vrot.slane %v10342_v18, 1  ;;  %v10347_v19 = vld [vmem:[#allocation2 + $0x18] sm:$0xff]   ;;  %v10348_v23 = vld [vmem:[#allocation2 + $0x20] sm:$0xff]  }
 0x114   : > { %9819 = vmatmul.mubr.bf16.gmra.mxu1 %v10310_v27  ;;  %9952 = vmatprep.subr.bf16.mxu0 %v10320_v53  ;;  %v10339_v51 = vld [vmem:[#allocation3 + $0x88] sm:$0xff]   ;;  %v3377_v50 = vrot.slane %v10347_v19, 1  ;;  %v10340_v38 = vld [vmem:[#allocation4 + $0x78] sm:$0xff]   ;;  %v3379_v32 = vrot.slane %v10348_v23, 1  ;;  %v10350_v46 = vld [vmem:[#allocation3 + $0x10] sm:$0xff]  }
 0x115   : > { %9822 = vmatprep.mubr.bf16.mxu1 %v10312_v16  ;;  %9907 = vmatpush3.bf16.msra.mxu1 %v10337_v57  ;;  %v3376_v22 = vsel %vm3373_vm15, %v3374_v40, %v3375_v33  ;;  %v10341_v52 = vld [vmem:[#allocation4 + $0x80] sm:$0xff]   ;;  %v10357_v58 = vld [vmem:[%s13120_s4 + $0x170] sm:$0xff]   ;;  %v3910_v36 = vrot.slane %v10350_v46, 1  ;;  %v10354_v3 = vld [vmem:[#allocation3 + $0x18] sm:$0xff]  }
 0x116   : > { %9908 = vmatprep.subr.bf16.mxu1 %v10344_v26  ;;  %v3378_v6 = vsel %vm3373_vm15, %v3375_v33, %v3377_v50  ;;  %v10353_v25 = vld [vmem:[#allocation2 + $0x28] sm:$0xff]   ;;  %v3380_v42 = vsel %vm3373_vm15, %v3377_v50, %v3379_v32  ;;  %v10355_v37 = vld [vmem:[#allocation2 + $0x30] sm:$0xff]   ;;  %v10371_v0 = vld [vmem:[%s13120_s4 + $0x160] sm:$0xff]   ;;  %v3912_v11 = vrot.slane %v10354_v3, 1 }
 0x117   : > { %9953 = vmatpush3.bf16.msra.mxu0 %v10320_v53  ;;  %v10349_v34 = vld [vmem:[#allocation3 + $0x8] sm:$0xfe]   ;;  %v3381_v61 = vrot.slane %v10353_v25, 1  ;;  %v3383_v29 = vrot.slane %v10355_v37, 1  ;;  %v10356_v9 = vld [vmem:[#allocation3 + $0x20] sm:$0xff]   ;;  %v10358_v57 = vld [vmem:[#allocation2 + $0x38] sm:$0xff]  }
 0x118   : > { %9954 = vmatprep.subr.bf16.mxu0 %v10326_v60  ;;  %v10363_v21 = vld [vmem:[%s13120_s4 + $0x168] sm:$0xff]   ;;  %v10346_v62 = vld [vmem:[#allocation4 + $0x88] sm:$0xff]   ;;  %v3909_v1 = vrot.slane %v10349_v34, 1  ;;  %v10361_v53 = vld [vmem:[#allocation2 + $0x40] sm:$0xff]   ;;  %v3914_v14 = vrot.slane %v10356_v9, 1  ;;  %v3385_v63 = vrot.slane %v10358_v57, 1  ;;  %v3913_v16 = vsel %vm3373_vm15, %v3910_v36, %v3912_v11 }
 0x119   : > { %9909 = vmatpush3.bf16.msra.mxu1 %v10344_v26  ;;  %v3382_v28 = vsel %vm3373_vm15, %v3379_v32, %v3381_v61  ;;  %v3384_v48 = vsel %vm3373_vm15, %v3381_v61, %v3383_v29  ;;  %v10379_v26 = vld [vmem:[%s13120_s4 + $0x158] sm:$0xff]   ;;  %v10359_v47 = vld [vmem:[#allocation3 + $0x28] sm:$0xff]   ;;  %v10372_v17 = vld [vmem:[#allocation2 + $0x60] sm:$0xff]  }
 0x11a   : > { %9867 = vmatmul.mubr.bf16.gmra.mxu0 %v10311_v15  ;;  %9998 = vmatprep.subr.bf16.mxu1 %v11545_v55  ;;  %v3911_v54 = vsel %vm3373_vm15, %v3909_v1, %v3910_v36  ;;  %v10360_v27 = vld [vmem:[%s13120_s4 + $0x1b0] sm:$0xff]   ;;  %v10375_v46 = vld [vmem:[#allocation2 + $0x68] sm:$0xff]   ;;  %v10376_v36 = vld [vmem:[#allocation3 + $0x58] sm:$0xff]  }
 0x11b   : > { %9870 = vmatprep.mubr.bf16.mxu0 %v10313_v44  ;;  %9955 = vmatpush3.bf16.msra.mxu0 %v10326_v60  ;;  %v3387_v60 = vrot.slane %v10361_v53, 1  ;;  %v10385_v15 = vld [vmem:[%s13120_s4 + $0x150] sm:$0xff]   ;;  %v3915_v44 = vsel %vm3373_vm15, %v3912_v11, %v3914_v14  ;;  %v10392_v25 = vld [vmem:[%s13120_s4 + $0x188] sm:$0xff]   ;;  %v3397_v37 = vrot.slane %v10375_v46, 1  ;;  %v3928_v57 = vrot.slane %v10376_v36, 1 }
 0x11c   : > { %9823 = vmatmul.mubr.bf16.gmra.mxu1 %v10315_v24  ;;  %9956 = vmatprep.subr.bf16.mxu0 %v10332_v5  ;;  %v3386_v24 = vsel %vm3373_vm15, %v3383_v29, %v3385_v63  ;;  %v10370_v19 = vld [vmem:[#allocation3 + $0x48] sm:$0xff]   ;;  %v10378_v3 = vld [vmem:[#allocation3 + $0x60] sm:$0xff]   ;;  %v10381_v29 = vld [vmem:[#allocation2 + $0x78] sm:$0xff]  }
 0x11d   : > { %9826 = vmatprep.mubr.bf16.mxu1 %v10318_v13  ;;  %v10366_v13 = vld [vmem:[#allocation2 + $0x50] sm:$0xff]   ;;  %v3401_v11 = vrot.slane %v10381_v29, 1 }
 0x11e   : > { %v10386_v23 = vld [vmem:[%s13120_s4 + $0x190] sm:$0xff]  }
 0x11f   : > { %9957 = vmatpush3.bf16.msra.mxu0 %v10332_v5  ;;  %v10364_v5 = vld [vmem:[#allocation2 + $0x48] sm:$0xff]  }
 0x120   : > { %9958 = vmatprep.subr.bf16.mxu0 %v10338_v20 }
 0x122   : > { %9871 = vmatmul.mubr.bf16.gmra.mxu0 %v10316_v30  ;;  %v3916_v30 = vrot.slane %v10359_v47, 1  ;;  %v10384_v47 = vld [vmem:[#allocation3 + $0x70] sm:$0xff]  }
 0x123   : > { %9874 = vmatprep.mubr.bf16.mxu0 %v10319_v12  ;;  %9959 = vmatpush3.bf16.msra.mxu0 %v10338_v20  ;;  %v10368_v20 = vld [vmem:[%s13120_s4 + $0x1a8] sm:$0xff]  }
 0x124   : > { %9827 = vmatmul.mubr.bf16.gmra.mxu1 %v10321_v4  ;;  %9960 = vmatprep.subr.bf16.mxu0 %v10345_v56  ;;  %v10391_v4 = vld [vmem:[%s13120_s4 + $0x148] sm:$0xff]  }
 0x125   : > { %9830 = vmatprep.mubr.bf16.mxu1 %v10323_v35  ;;  %v3389_v35 = vrot.slane %v10364_v5, 1 }
 0x127   : > { %9961 = vmatpush3.bf16.msra.mxu0 %v10345_v56  ;;  %v3388_v56 = vsel %vm3373_vm15, %v3385_v63, %v3387_v60 }
 0x128   : > { %10050 = vmatprep.subr.bf16.mxu0 %v11560_v49 }
 0x12a   : > { %9875 = vmatmul.mubr.bf16.gmra.mxu0 %v10322_v10  ;;  %v10374_v10 = vld [vmem:[%s13120_s4 + $0x1a0] sm:$0xff]  }
 0x12b   : > { %9878 = vmatprep.mubr.bf16.mxu0 %v10324_v41  ;;  %v3917_v41 = vsel %vm3373_vm15, %v3914_v14, %v3916_v30 }
 0x12c   : > { %9831 = vmatmul.mubr.bf16.gmra.mxu1 %v10327_v8  ;;  %v10365_v8 = vld [vmem:[#allocation3 + $0x38] sm:$0xff]  }
 0x12d   : > { %9834 = vmatprep.mubr.bf16.mxu1 %v10329_v31  ;;  %v10367_v31 = vld [vmem:[#allocation3 + $0x40] sm:$0xff]   ;;  %v3920_v33 = vrot.slane %v10365_v8, 1 }
 0x132   : > { %9879 = vmatmul.mubr.bf16.gmra.mxu0 %v10328_v2  ;;  %v10369_v2 = vld [vmem:[#allocation2 + $0x58] sm:$0xff]  }
 0x133   : > { %9882 = vmatprep.mubr.bf16.mxu0 %v10330_v45  ;;  %v3393_v40 = vrot.slane %v10369_v2, 1  ;;  %v10396_v2 = vld [vmem:[#allocation4 + $0x8] sm:$0xfe]  }
 0x134   : > { %9835 = vmatmul.mubr.bf16.gmra.mxu1 %v10333_v39  ;;  %v10398_v39 = vld [vmem:[%s13120_s4 + $0x140] sm:$0xff]  }
 0x135   : > { %9838 = vmatprep.mubr.bf16.mxu1 %v10335_v43  ;;  %v3390_v43 = vsel %vm3373_vm15, %v3387_v60, %v3389_v35 }
 0x13a   : > { %9883 = vmatmul.mubr.bf16.gmra.mxu0 %v10334_v59  ;;  %v10380_v59 = vld [vmem:[%s13120_s4 + $0x198] sm:$0xff]  }
 0x13b   : > { %9886 = vmatprep.mubr.bf16.mxu0 %v10336_v7  ;;  %v11615_v7 = vld [vmem:[%s13120_s4 + $0x1f8] sm:$0xff]  }
 0x13c   : > { %9839 = vmatmul.mubr.bf16.gmra.mxu1 %v10339_v51  ;;  %v3922_v51 = vrot.slane %v10367_v31, 1 }
 0x13d   : > { %9910 = vmatprep.mubr.bf16.mxu1 %v3376_v22  ;;  %v3395_v22 = vrot.slane %v10372_v17, 1  ;;  %v10394_v17 = vld [vmem:[#allocation3 + $0x88] sm:$0xff]  }
 0x13e   : > { %v3923_v32 = vsel %vm3373_vm15, %v3920_v33, %v3922_v51 }
 0x13f   : > { %v3398_v9 = vsel %vm3373_vm15, %v3395_v22, %v3397_v37 }
 0x142   : > { %9887 = vmatmul.mubr.bf16.gmra.mxu0 %v10340_v38  ;;  %v10373_v38 = vld [vmem:[#allocation3 + $0x50] sm:$0xff]  }
 0x143   : > { %9890 = vmatprep.mubr.bf16.mxu0 %v10341_v52  ;;  %v3926_v34 = vrot.slane %v10373_v38, 1 }
 0x144   : > { %9911 = vmatmul.mubr.bf16.vlgmr.msra.gmra.mxu1 %v3378_v6  ;;  %v3396_v6 = vsel %vm3373_vm15, %v3393_v40, %v3395_v22 }
 0x145   : > { %9914 = vmatprep.mubr.bf16.mxu1 %v3380_v42  ;;  %9999 = vmatpush3.bf16.msra.mxu1 %v11545_v55  ;;  %v10362_v55 = vld [vmem:[#allocation3 + $0x30] sm:$0xff]   ;;  %v3924_v42 = vrot.slane %v10370_v19, 1  ;;  %v3929_v14 = vsel %vm3373_vm15, %v3926_v34, %v3928_v57  ;;  %v10401_v19 = vld [vmem:[#allocation4 + $0x18] sm:$0xff]  }
 0x146   : > { %10000 = vmatprep.subr.bf16.mxu1 %v10357_v58  ;;  %v3918_v12 = vrot.slane %v10362_v55, 1  ;;  %v10389_v55 = vld [vmem:[#allocation2 + $0x90] sm:$0xff]   ;;  %v4447_v46 = vrot.slane %v10401_v19, 1 }
 0x147   : > { %v3925_v61 = vsel %vm3373_vm15, %v3922_v51, %v3924_v42  ;;  %v3927_v1 = vsel %vm3373_vm15, %v3924_v42, %v3926_v34  ;;  %v4444_v51 = vrot.slane %v10396_v2, 1  ;;  %v10404_v34 = vld [vmem:[#allocation2 + $0x18] sm:$0xff]   ;;  %v10418_v2 = vld [vmem:[#allocation4 + $0x48] sm:$0xff]  }
 0x148   : > { %v3919_v45 = vsel %vm3373_vm15, %v3916_v30, %v3918_v12  ;;  %v3921_v50 = vsel %vm3373_vm15, %v3918_v12, %v3920_v33  ;;  %v10390_v12 = vld [vmem:[#allocation3 + $0x80] sm:$0xff]   ;;  %v10395_v33 = vld [vmem:[#allocation3 + $0x90] sm:$0xff]  }
 0x149   : > { %10001 = vmatpush3.bf16.msra.mxu1 %v10357_v58  ;;  %v10377_v58 = vld [vmem:[#allocation2 + $0x70] sm:$0xff]   ;;  %v3938_v8 = vrot.slane %v10390_v12, 1 }
 0x14a   : > { %9891 = vmatmul.mubr.bf16.gmra.mxu0 %v10346_v62  ;;  %10002 = vmatprep.subr.bf16.mxu1 %v10363_v21  ;;  %v10399_v62 = vld [vmem:[%s13120_s4 + $0x180] sm:$0xff]  }
 0x14b   : > { %9962 = vmatprep.mubr.bf16.mxu0 %v3911_v54  ;;  %v10383_v54 = vld [vmem:[#allocation2 + $0x80] sm:$0xff]  }
 0x14c   : > { %9915 = vmatmul.mubr.bf16.gmra.mxu1 %v3382_v28  ;;  %v11638_v28 = vld [vmem:[%s13120_s4 + $0x238] sm:$0xff]   ;;  %v3403_v53 = vrot.slane %v10383_v54, 1  ;;  %v10417_v54 = vld [vmem:[%s13120_s4 + $0x1e8] sm:$0xff]  }
 0x14d   : > { %9918 = vmatprep.mubr.bf16.mxu1 %v3384_v48  ;;  %10003 = vmatpush3.bf16.msra.mxu1 %v10363_v21  ;;  %v3399_v21 = vrot.slane %v10377_v58, 1  ;;  %v3930_v48 = vrot.slane %v10378_v3, 1  ;;  %v10409_v3 = vld [vmem:[#allocation4 + $0x30] sm:$0xff]  }
 0x14e   : > { %10004 = vmatprep.subr.bf16.mxu1 %v10371_v0  ;;  %v3404_v60 = vsel %vm3373_vm15, %v3401_v11, %v3403_v53 }
 0x14f   : > { %v3931_v63 = vsel %vm3373_vm15, %v3928_v57, %v3930_v48 }
 0x151   : > { %10005 = vmatpush3.bf16.msra.mxu1 %v10371_v0  ;;  %v3400_v0 = vsel %vm3373_vm15, %v3397_v37, %v3399_v21  ;;  %v10411_v37 = vld [vmem:[%s13120_s4 + $0x1f0] sm:$0xff]  }
 0x152   : > { %9963 = vmatmul.mubr.bf16.vlgmr.msra.gmra.mxu0 %v3913_v16  ;;  %10006 = vmatprep.subr.bf16.mxu1 %v10379_v26  ;;  %v10387_v16 = vld [vmem:[#allocation2 + $0x88] sm:$0xff]  }
 0x153   : > { %10051 = vmatpush3.bf16.msra.mxu0 %v11560_v49  ;;  %9966 = vmatprep.mubr.bf16.mxu0 %v3915_v44  ;;  %v3391_v49 = vrot.slane %v10366_v13, 1  ;;  %v3405_v44 = vrot.slane %v10387_v16, 1 }
 0x154   : > { %9919 = vmatmul.mubr.bf16.gmra.mxu1 %v3386_v24  ;;  %10052 = vmatprep.subr.bf16.mxu0 %v10360_v27  ;;  %v3407_v24 = vrot.slane %v10389_v55, 1 }
 0x155   : > { %9922 = vmatprep.mubr.bf16.mxu1 %v3388_v56  ;;  %10007 = vmatpush3.bf16.msra.mxu1 %v10379_v26  ;;  %v3392_v18 = vsel %vm3373_vm15, %v3389_v35, %v3391_v49  ;;  %v3394_v52 = vsel %vm3373_vm15, %v3391_v49, %v3393_v40  ;;  %v10382_v26 = vld [vmem:[#allocation3 + $0x68] sm:$0xff]   ;;  %v10393_v35 = vld [vmem:[#allocation2 + $0x98] ss:$0 sps:$4 sm:$0x11]  }
 0x156   : > { %10008 = vmatprep.subr.bf16.mxu1 %v10385_v15  ;;  %v3932_v5 = vrot.slane %v10382_v26, 1  ;;  %v3408_v49 = vsel %vm3373_vm15, %v3405_v44, %v3407_v24  ;;  %v10410_v26 = vld [vmem:[#allocation2 + $0x28] sm:$0xff]  }
 0x157   : > { %10053 = vmatpush3.bf16.msra.mxu0 %v10360_v27  ;;  %v3402_v27 = vsel %vm3373_vm15, %v3399_v21, %v3401_v11  ;;  %v10407_v21 = vld [vmem:[#allocation4 + $0x28] sm:$0xff]  }
 0x158   : > { %10054 = vmatprep.subr.bf16.mxu0 %v10368_v20  ;;  %v3933_v13 = vsel %vm3373_vm15, %v3930_v48, %v3932_v5  ;;  %v4453_v48 = vrot.slane %v10409_v3, 1 }
 0x159   : > { %10009 = vmatpush3.bf16.msra.mxu1 %v10385_v15  ;;  %v3934_v15 = vrot.slane %v10384_v47, 1 }
 0x15a   : > { %9967 = vmatmul.mubr.bf16.gmra.mxu0 %v3917_v41  ;;  %10010 = vmatprep.subr.bf16.mxu1 %v10391_v4 }
 0x15b   : > { %9970 = vmatprep.mubr.bf16.mxu0 %v3919_v45  ;;  %10055 = vmatpush3.bf16.msra.mxu0 %v10368_v20  ;;  %v10388_v20 = vld [vmem:[#allocation3 + $0x78] sm:$0xff]   ;;  %v3935_v56 = vsel %vm3373_vm15, %v3932_v5, %v3934_v15  ;;  %v3409_v45 = vrot.slane %v10393_v35, 1  ;;  %v4985_v5 = vrot.slane %v10410_v26, 2 }
 0x15c   : > { %9923 = vmatmul.mubr.bf16.gmra.mxu1 %v3390_v43  ;;  %10056 = vmatprep.subr.bf16.mxu0 %v10374_v10  ;;  %v3936_v41 = vrot.slane %v10388_v20, 1 }
 0x15d   : > { %9926 = vmatprep.mubr.bf16.mxu1 %v3392_v18  ;;  %10011 = vmatpush3.bf16.msra.mxu1 %v10391_v4  ;;  %v11647_v30 = vpop.f32.mrf.mxu1  ;;  %v3406_v4 = vsel %vm3373_vm15, %v3403_v53, %v3405_v44  ;;  %v3410_v40 = vsel %vm3373_vm15, %v3407_v24, %v3409_v45  ;;  %v10408_v53 = vld [vmem:[#allocation2 + $0x20] sm:$0xff]   ;;  %v10433_v44 = vld [vmem:[%s13120_s4 + $0x1d8] sm:$0xff]  }
 0x15e   : > { %10012 = vmatprep.subr.bf16.mxu1 %v10398_v39  ;;  %v3937_v43 = vsel %vm3373_vm15, %v3934_v15, %v3936_v41  ;;  %v3939_v18 = vsel %vm3373_vm15, %v3936_v41, %v3938_v8  ;;  %v10415_v15 = vld [vmem:[#allocation4 + $0x40] sm:$0xff]   ;;  %v10439_v41 = vld [vmem:[%s13120_s4 + $0x1d0] sm:$0xff]  }
 0x15f   : > { %10057 = vmatpush3.bf16.msra.mxu0 %v10374_v10  ;;  %v10397_v10 = vld [vmem:[#allocation4 + $0x10] sm:$0xff]   ;;  %v11651_v31 = vpop.f32.mrf.mxu1 }
 0x160   : > { %10058 = vmatprep.subr.bf16.mxu0 %v10380_v59 }
 0x161   : > { %10013 = vmatpush3.bf16.msra.mxu1 %v10398_v39  ;;  %v4445_v39 = vrot.slane %v10397_v10, 1  ;;  %v10416_v10 = vld [vmem:[#allocation2 + $0x38] sm:$0xff]  }
 0x162   : > { %9971 = vmatmul.mubr.bf16.gmra.mxu0 %v3921_v50  ;;  %10102 = vmatprep.subr.bf16.mxu1 %v11615_v7  ;;  %v3940_v50 = vrot.slane %v10394_v17, 1  ;;  %v10420_v17 = vld [vmem:[#allocation4 + $0x50] sm:$0xff]  }
 0x163   : > { %9974 = vmatprep.mubr.bf16.mxu0 %v3923_v32  ;;  %10059 = vmatpush3.bf16.msra.mxu0 %v10380_v59  ;;  %v11655_v59 = vpop.f32.mrf.mxu1  ;;  %v4446_v22 = vsel %vm3373_vm15, %v4444_v51, %v4445_v39  ;;  %v3942_v32 = vrot.slane %v10395_v33, 1  ;;  %v4448_v36 = vsel %vm3373_vm15, %v4445_v39, %v4447_v46  ;;  %v10445_v51 = vld [vmem:[%s13120_s4 + $0x1c8] sm:$0xff]  }
 0x164   : > { %9927 = vmatmul.mubr.bf16.gmra.mxu1 %v3394_v52  ;;  %10060 = vmatprep.subr.bf16.mxu0 %v10386_v23  ;;  %v3941_v58 = vsel %vm3373_vm15, %v3938_v8, %v3940_v50 }
 0x165   : > { %9930 = vmatprep.mubr.bf16.mxu1 %v3396_v6  ;;  %v11659_v38 = vpop.f32.mrf.mxu1  ;;  %v10400_v6 = vld [vmem:[#allocation3 + $0x98] ss:$0 sps:$4 sm:$0x11]   ;;  %v3943_v42 = vsel %vm3373_vm15, %v3940_v50, %v3942_v32  ;;  %v10428_v50 = vld [vmem:[%s13120_s4 + $0x220] sm:$0xff]  }
 0x167   : > { %10061 = vmatpush3.bf16.msra.mxu0 %v10386_v23  ;;  %v10402_v23 = vld [vmem:[#allocation4 + $0x20] sm:$0xff]  }
 0x168   : > { %10062 = vmatprep.subr.bf16.mxu0 %v10392_v25  ;;  %v4449_v52 = vrot.slane %v10402_v23, 1  ;;  %v4461_v23 = vrot.slane %v10420_v17, 1  ;;  %v10432_v17 = vld [vmem:[#allocation2 + $0x68] sm:$0xff]  }
 0x16a   : > { %9975 = vmatmul.mubr.bf16.gmra.mxu0 %v3925_v61  ;;  %v10403_v61 = vld [vmem:[#allocation2 + $0x10] sm:$0xfc]  }
 0x16b   : > { %9978 = vmatprep.mubr.bf16.mxu0 %v3927_v1  ;;  %10063 = vmatpush3.bf16.msra.mxu0 %v10392_v25  ;;  %v11662_v25 = vpop.f32.mrf.mxu1  ;;  %v3944_v1 = vrot.slane %v10400_v6, 1  ;;  %v4980_v57 = vrot.slane %v10403_v61, 2  ;;  %v10452_v6 = vld [vmem:[%s13120_s4 + $0x1c0] sm:$0xff]   ;;  %v10434_v61 = vld [vmem:[%s13120_s4 + $0x218] sm:$0xff]  }
 0x16c   : > { %9931 = vmatmul.mubr.bf16.gmra.mxu1 %v3398_v9  ;;  %10064 = vmatprep.subr.bf16.mxu0 %v10399_v62  ;;  %v4981_v9 = vrot.slane %v10404_v34, 2  ;;  %v10423_v34 = vld [vmem:[#allocation4 + $0x58] sm:$0xff]  }
 0x16d   : > { %9934 = vmatprep.mubr.bf16.mxu1 %v3400_v0  ;;  %v11671_v29 = vpop.f32.mrf.mxu1  ;;  %v4451_v0 = vrot.slane %v10407_v21, 1  ;;  %v3945_v11 = vsel %vm3373_vm15, %v3942_v32, %v3944_v1 }
 0x16f   : > { %10065 = vmatpush3.bf16.msra.mxu0 %v10399_v62  ;;  %v4450_v62 = vsel %vm3373_vm15, %v4447_v46, %v4449_v52  ;;  %v4452_v47 = vsel %vm3373_vm15, %v4449_v52, %v4451_v0  ;;  %v4454_v16 = vsel %vm3373_vm15, %v4451_v0, %v4453_v48  ;;  %v10419_v52 = vld [vmem:[#allocation2 + $0x40] sm:$0xff]   ;;  %v4463_v0 = vrot.slane %v10423_v34, 1 }
 0x170   : > { %10154 = vmatprep.subr.bf16.mxu0 %v11638_v28 }
 0x172   : > { %9979 = vmatmul.mubr.bf16.gmra.mxu0 %v3929_v14  ;;  %v11677_v14 = vpop.f32.mrf.mxu1 }
 0x173   : > { %9982 = vmatprep.mubr.bf16.mxu0 %v3931_v63  ;;  %v10425_v63 = vld [vmem:[%s13120_s4 + $0x1e0] sm:$0xff]  }
 0x174   : > { %9935 = vmatmul.mubr.bf16.gmra.mxu1 %v3402_v27  ;;  %v10412_v27 = vld [vmem:[#allocation4 + $0x38] sm:$0xff]   ;;  %v11685_v55 = vpop.f32.mrf.mxu1 }
 0x175   : > { %9938 = vmatprep.mubr.bf16.mxu1 %v3404_v60  ;;  %v4983_v60 = vrot.slane %v10408_v53, 2  ;;  %v4455_v24 = vrot.slane %v10412_v27, 1  ;;  %v10424_v53 = vld [vmem:[#allocation2 + $0x50] sm:$0xff]   ;;  %v4464_v27 = vsel %vm3373_vm15, %v4461_v23, %v4463_v0 }
 0x177   : > { %v4984_v12 = vsel %vm4979_vm0, %v4981_v9, %v4983_v60  ;;  %v4986_v35 = vsel %vm4979_vm0, %v4983_v60, %v4985_v5  ;;  %v4456_v8 = vsel %vm3373_vm15, %v4453_v48, %v4455_v24  ;;  %v10440_v48 = vld [vmem:[%s13120_s4 + $0x210] sm:$0xff]  }
 0x17a   : > { %9983 = vmatmul.mubr.bf16.gmra.mxu0 %v3933_v13  ;;  %v11690_v13 = vpop.f32.mrf.mxu0 }
 0x17b   : > { %9986 = vmatprep.mubr.bf16.mxu0 %v3935_v56  ;;  %v10414_v56 = vld [vmem:[%s13120_s4 + $0x230] sm:$0xff]  }
 0x17c   : > { %9939 = vmatmul.mubr.bf16.gmra.mxu1 %v3406_v4  ;;  %v10413_v4 = vld [vmem:[#allocation2 + $0x30] sm:$0xff]   ;;  %v11704_v45 = vpop.f32.mrf.mxu0 }
 0x17d   : > { %9942 = vmatprep.mubr.bf16.mxu1 %v3408_v49  ;;  %v4457_v49 = vrot.slane %v10415_v15, 1  ;;  %v4987_v33 = vrot.slane %v10413_v4, 2  ;;  %v10446_v15 = vld [vmem:[%s13120_s4 + $0x208] sm:$0xff]  }
 0x17e   : > { %v11715_v19 = vpop.f32.mrf.mxu0 }
 0x17f   : > { %v4988_v32 = vsel %vm4979_vm0, %v4985_v5, %v4987_v33  ;;  %v10431_v5 = vld [vmem:[#allocation4 + $0x70] sm:$0xff]  }
 0x182   : > { %9987 = vmatmul.mubr.bf16.gmra.mxu0 %v3937_v43  ;;  %v4458_v43 = vsel %vm3373_vm15, %v4455_v24, %v4457_v49 }
 0x183   : > { %9990 = vmatprep.mubr.bf16.mxu0 %v3939_v18  ;;  %v11692_v20 = vpop.f32.mrf.mxu1  ;;  %v10422_v18 = vld [vmem:[%s13120_s4 + $0x228] sm:$0xff]  }
 0x184   : > { %9943 = vmatmul.mubr.bf16.gmra.mxu1 %v3410_v40  ;;  %v4459_v40 = vrot.slane %v10418_v2, 1 }
 0x185   : > { %10014 = vmatprep.mubr.bf16.mxu1 %v4446_v22  ;;  %v11706_v39 = vpop.f32.mrf.mxu1 }
 0x186   : > { %v4462_v21 = vsel %vm3373_vm15, %v4459_v40, %v4461_v23  ;;  %v10437_v23 = vld [vmem:[#allocation4 + $0x80] sm:$0xff]  }
 0x187   : > { %v11717_v22 = vpop.f32.mrf.mxu1 }
 0x18a   : > { %9991 = vmatmul.mubr.bf16.gmra.mxu0 %v3941_v58  ;;  %v10421_v58 = vld [vmem:[#allocation2 + $0x48] sm:$0xff]  }
 0x18b   : > { %9994 = vmatprep.mubr.bf16.mxu0 %v3943_v42  ;;  %v4460_v42 = vsel %vm3373_vm15, %v4457_v49, %v4459_v40  ;;  %v10453_v49 = vld [vmem:[%s13120_s4 + $0x200] sm:$0xff]  }
 0x18c   : > { %10015 = vmatmul.mubr.bf16.vlgmr.msra.gmra.mxu1 %v4448_v36  ;;  %v11730_v36 = vpop.f32.mrf.mxu1 }
 0x18d   : > { %10018 = vmatprep.mubr.bf16.mxu1 %v4450_v62  ;;  %10103 = vmatpush3.bf16.msra.mxu1 %v11615_v7  ;;  %v4982_v7 = vsel %vm4979_vm0, %v4980_v57, %v4981_v9  ;;  %v10426_v62 = vld [vmem:[#allocation4 + $0x60] sm:$0xff]   ;;  %v4991_v9 = vrot.slane %v10419_v52, 2 }
 0x18e   : > { %10104 = vmatprep.subr.bf16.mxu1 %v10411_v37  ;;  %v4465_v57 = vrot.slane %v10426_v62, 1 }
 0x190   : > { %v4466_v60 = vsel %vm3373_vm15, %v4463_v0, %v4465_v57  ;;  %v10441_v0 = vld [vmem:[#allocation4 + $0x88] sm:$0xff]  }
 0x191   : > { %10105 = vmatpush3.bf16.msra.mxu1 %v10411_v37  ;;  %v11728_v37 = vpop.f32.mrf.mxu0 }
 0x192   : > { %9995 = vmatmul.mubr.bf16.gmra.mxu0 %v3945_v11  ;;  %10106 = vmatprep.subr.bf16.mxu1 %v10417_v54 }
 0x193   : > { %10066 = vmatprep.mubr.bf16.mxu0 %v4982_v7  ;;  %v11736_v3 = vpop.f32.mrf.mxu0 }
 0x194   : > { %10019 = vmatmul.mubr.bf16.gmra.mxu1 %v4452_v47  ;;  %v10427_v47 = vld [vmem:[#allocation2 + $0x58] sm:$0xff]  }
 0x195   : > { %10022 = vmatprep.mubr.bf16.mxu1 %v4454_v16  ;;  %10107 = vmatpush3.bf16.msra.mxu1 %v10417_v54  ;;  %v4993_v54 = vrot.slane %v10421_v58, 2  ;;  %v11744_v7 = vpop.f32.mrf.mxu0  ;;  %v10429_v16 = vld [vmem:[#allocation4 + $0x68] sm:$0xff]  }
 0x196   : > { %10108 = vmatprep.subr.bf16.mxu1 %v10425_v63  ;;  %v4467_v4 = vrot.slane %v10429_v16, 1  ;;  %v4475_v16 = vrot.slane %v10441_v0, 1 }
 0x197   : > { %v4994_v26 = vsel %vm4979_vm0, %v4991_v9, %v4993_v54  ;;  %v11754_v24 = vpop.f32.mrf.mxu0 }
 0x199   : > { %10109 = vmatpush3.bf16.msra.mxu1 %v10425_v63 }
 0x19a   : > { %10067 = vmatmul.mubr.bf16.vlgmr.msra.gmra.mxu0 %v4984_v12  ;;  %10110 = vmatprep.subr.bf16.mxu1 %v10433_v44  ;;  %v4997_v12 = vrot.slane %v10427_v47, 2 }
 0x19b   : > { %10155 = vmatpush3.bf16.msra.mxu0 %v11638_v28  ;;  %10070 = vmatprep.mubr.bf16.mxu0 %v4986_v35  ;;  %v4989_v28 = vrot.slane %v10416_v10, 2  ;;  %v4469_v35 = vrot.slane %v10431_v5, 1 }
 0x19c   : > { %10023 = vmatmul.mubr.bf16.gmra.mxu1 %v4456_v8  ;;  %10156 = vmatprep.subr.bf16.mxu0 %v10414_v56  ;;  %v11738_v1 = vpop.f32.mrf.mxu1  ;;  %v11762_v8 = vpop.f32.mrf.mxu0 }
 0x19d   : > { %10026 = vmatprep.mubr.bf16.mxu1 %v4458_v43  ;;  %10111 = vmatpush3.bf16.msra.mxu1 %v10433_v44  ;;  %v4990_v46 = vsel %vm4979_vm0, %v4987_v33, %v4989_v28  ;;  %v4992_v11 = vsel %vm4979_vm0, %v4989_v28, %v4991_v9  ;;  %v4995_v44 = vrot.slane %v10424_v53, 2  ;;  %v10435_v33 = vld [vmem:[#allocation4 + $0x78] sm:$0xff]   ;;  %v4470_v40 = vsel %vm3373_vm15, %v4467_v4, %v4469_v35  ;;  %v10438_v9 = vld [vmem:[#allocation2 + $0x78] sm:$0xff]  }
 0x19e   : > { %10112 = vmatprep.subr.bf16.mxu1 %v10439_v41  ;;  %v11747_v63 = vpop.f32.mrf.mxu1  ;;  %v4471_v52 = vrot.slane %v10435_v33, 1  ;;  %v10443_v53 = vld [vmem:[#allocation4 + $0x90] sm:$0xff]   ;;  %v5005_v47 = vrot.slane %v10438_v9, 2 }
 0x19f   : > { %10157 = vmatpush3.bf16.msra.mxu0 %v10414_v56  ;;  %v4996_v10 = vsel %vm4979_vm0, %v4993_v54, %v4995_v44  ;;  %v4998_v43 = vsel %vm4979_vm0, %v4995_v44, %v4997_v12 }
 0x1a0   : > { %10158 = vmatprep.subr.bf16.mxu0 %v10422_v18  ;;  %v11756_v56 = vpop.f32.mrf.mxu1  ;;  %v4472_v54 = vsel %vm3373_vm15, %v4469_v35, %v4471_v52 }
 0x1a1   : > { %10113 = vmatpush3.bf16.msra.mxu1 %v10439_v41  ;;  %v10430_v41 = vld [vmem:[#allocation2 + $0x60] sm:$0xff]  }
 0x1a2   : > { %10071 = vmatmul.mubr.bf16.gmra.mxu0 %v4988_v32  ;;  %10114 = vmatprep.subr.bf16.mxu1 %v10445_v51  ;;  %v11764_v2 = vpop.f32.mrf.mxu1  ;;  %v5001_v32 = vrot.slane %v10432_v17, 2  ;;  %v10447_v17 = vld [vmem:[#allocation4 + $0x98] ss:$0 sps:$4 sm:$0x11]  }
 0x1a3   : > { %10074 = vmatprep.mubr.bf16.mxu0 %v4990_v46  ;;  %10159 = vmatpush3.bf16.msra.mxu0 %v10422_v18  ;;  %v4468_v18 = vsel %vm3373_vm15, %v4465_v57, %v4467_v4 }
 0x1a4   : > { %10027 = vmatmul.mubr.bf16.gmra.mxu1 %v4460_v42  ;;  %10160 = vmatprep.subr.bf16.mxu0 %v10428_v50  ;;  %v4473_v42 = vrot.slane %v10437_v23, 1  ;;  %v10451_v23 = vld [vmem:[#allocation3 + $0x18] sm:$0xff]  }
 0x1a5   : > { %10030 = vmatprep.mubr.bf16.mxu1 %v4462_v21  ;;  %10115 = vmatpush3.bf16.msra.mxu1 %v10445_v51  ;;  %v10436_v21 = vld [vmem:[#allocation2 + $0x70] sm:$0xff]   ;;  %v5516_v0 = vrot.slane %v10451_v23, 2 }
 0x1a6   : > { %10116 = vmatprep.subr.bf16.mxu1 %v10452_v6 }
 0x1a7   : > { %10161 = vmatpush3.bf16.msra.mxu0 %v10428_v50  ;;  %v4999_v50 = vrot.slane %v10430_v41, 2 }
 0x1a8   : > { %10162 = vmatprep.subr.bf16.mxu0 %v10434_v61  ;;  %v11768_v28 = vpop.f32.mrf.mxu0 }
 0x1a9   : > { %10117 = vmatpush3.bf16.msra.mxu1 %v10452_v6  ;;  %v5000_v34 = vsel %vm4979_vm0, %v4997_v12, %v4999_v50  ;;  %v5002_v62 = vsel %vm4979_vm0, %v4999_v50, %v5001_v32  ;;  %v10442_v12 = vld [vmem:[#allocation2 + $0x80] sm:$0xff]  }
 0x1aa   : > { %10075 = vmatmul.mubr.bf16.gmra.mxu0 %v4992_v11  ;;  %v11775_v58 = vpop.f32.mrf.mxu0  ;;  %v4474_v11 = vsel %vm3373_vm15, %v4471_v52, %v4473_v42 }
 0x1ab   : > { %10078 = vmatprep.mubr.bf16.mxu0 %v4994_v26  ;;  %10163 = vmatpush3.bf16.msra.mxu0 %v10434_v61  ;;  %v5003_v26 = vrot.slane %v10436_v21, 2 }
 0x1ac   : > { %10031 = vmatmul.mubr.bf16.gmra.mxu1 %v4464_v27  ;;  %10164 = vmatprep.subr.bf16.mxu0 %v10440_v48  ;;  %v11784_v57 = vpop.f32.mrf.mxu0 }
 0x1ad   : > { %10034 = vmatprep.mubr.bf16.mxu1 %v4466_v60  ;;  %v5004_v44 = vsel %vm4979_vm0, %v5001_v32, %v5003_v26  ;;  %v5006_v35 = vsel %vm4979_vm0, %v5003_v26, %v5005_v47  ;;  %v5007_v32 = vrot.slane %v10442_v12, 2  ;;  %v10448_v26 = vld [vmem:[#allocation2 + $0x90] sm:$0xff]  }
 0x1ae   : > { %v11787_v60 = vpop.f32.mrf.mxu0 }
 0x1af   : > { %10165 = vmatpush3.bf16.msra.mxu0 %v10440_v48 }
 0x1b0   : > { %10166 = vmatprep.subr.bf16.mxu0 %v10446_v15 }
 0x1b2   : > { %10079 = vmatmul.mubr.bf16.gmra.mxu0 %v4996_v10  ;;  %v11770_v51 = vpop.f32.mrf.mxu1  ;;  %v10444_v10 = vld [vmem:[#allocation2 + $0x88] sm:$0xff]  }
 0x1b3   : > { %10082 = vmatprep.mubr.bf16.mxu0 %v4998_v43  ;;  %10167 = vmatpush3.bf16.msra.mxu0 %v10446_v15  ;;  %v4477_v15 = vrot.slane %v10443_v53, 1  ;;  %v4476_v43 = vsel %vm3373_vm15, %v4473_v42, %v4475_v16  ;;  %v4479_v42 = vrot.slane %v10447_v17, 1  ;;  %v5008_v53 = vsel %vm4979_vm0, %v5005_v47, %v5007_v32  ;;  %v10455_v47 = vld [vmem:[#allocation3 + $0x20] sm:$0xff]  }
 0x1b4   : > { %10035 = vmatmul.mubr.bf16.gmra.mxu1 %v4468_v18  ;;  %10168 = vmatprep.subr.bf16.mxu0 %v10453_v49  ;;  %v11773_v46 = vpop.f32.mrf.mxu1 }
 0x1b5   : > { %10038 = vmatprep.mubr.bf16.mxu1 %v4470_v40  ;;  %v4478_v40 = vsel %vm3373_vm15, %v4475_v16, %v4477_v15 }
 0x1b6   : > { %v11777_v6 = vpop.f32.mrf.mxu1 }
 0x1b7   : > { %10169 = vmatpush3.bf16.msra.mxu0 %v10453_v49 }
 0x1b8   : > { %v11781_v61 = vpop.f32.mrf.mxu1 }
 0x1ba   : > { %10083 = vmatmul.mubr.bf16.gmra.mxu0 %v5000_v34  ;;  %v9808_v48 = vpop.f32.mrf.mxu1  ;;  %v5009_v34 = vrot.slane %v10444_v10, 2 }
 0x1bb   : > { %10086 = vmatprep.mubr.bf16.mxu0 %v5002_v62  ;;  %v10450_v62 = vld [vmem:[#allocation3 + $0x10] sm:$0xfc]  }
 0x1bc   : > { %10039 = vmatmul.mubr.bf16.gmra.mxu1 %v4472_v54  ;;  %v2481_v27 = vpop.f32.mrf.mxu1 }
 0x1bd   : > { %10042 = vmatprep.mubr.bf16.mxu1 %v4474_v11  ;;  %v2626_v11 = vadd.f32 %v9808_v48, %v11690_v13  ;;  %v4480_v48 = vsel %vm3373_vm15, %v4477_v15, %v4479_v42  ;;  %v5518_v42 = vrot.slane %v10455_v47, 2 }
 0x1be   : > { %v9809_v5 = vpop.f32.mrf.mxu1 }
 0x1c0   : > { %v2484_v49 = vpop.f32.mrf.mxu1 }
 0x1c1   : > { %v2625_v41 = vadd.f32 %v2484_v49, %v11728_v37  ;;  %v2624_v49 = vadd.f32 %v2481_v27, %v11704_v45  ;;  %v5011_v27 = vrot.slane %v10448_v26, 2  ;;  %v10454_v26 = vld [vmem:[#allocation2 + $0xa0] ss:$0 sps:$4 sm:$0x33]  }
 0x1c2   : > { %v11790_v4 = vpop.f32.mrf.mxu0  ;;  %10087 = vmatmul.mubr.bf16.gmra.mxu0 %v5004_v44  ;;  %v9812_v33 = vpop.f32.mrf.mxu1  ;;  %v5010_v44 = vsel %vm4979_vm0, %v5007_v32, %v5009_v34 }
 0x1c3   : > { %10090 = vmatprep.mubr.bf16.mxu0 %v5006_v35  ;;  %v2630_v50 = vadd.f32 %v9812_v33, %v11736_v3  ;;  %v11808_v35 = vld [vmem:[#allocation2 + $0x98] sm:$0xff]   ;;  %v11816_v33 = vld [vmem:[#allocation3 + $0x28] sm:$0xff]  }
 0x1c4   : > { %v11795_v18 = vpop.f32.mrf.mxu0  ;;  %10043 = vmatmul.mubr.bf16.gmra.mxu1 %v4476_v43  ;;  %v2497_v21 = vpop.f32.mrf.mxu1 }
 0x1c5   : > { %10046 = vmatprep.mubr.bf16.mxu1 %v4478_v40  ;;  %v2628_v37 = vadd.f32 %v2497_v21, %v11744_v7  ;;  %v5515_v7 = vrot.slane %v10450_v62, 2  ;;  %v2627_v40 = vadd.f32 %v9809_v5, %v11715_v19  ;;  %v5012_v5 = vsel %vm4979_vm0, %v5009_v34, %v5011_v27  ;;  %v10457_v34 = vld [vmem:[#allocation4 + $0x10] sm:$0xfc]  }
 0x1c6   : > { %v11799_v52 = vpop.f32.mrf.mxu0  ;;  %v9813_v54 = vpop.f32.mrf.mxu1 }
 0x1c7   : > { %v2631_v3 = vadd.f32 %v9813_v54, %v11754_v24  ;;  %v5517_v17 = vsel %vm4979_vm0, %v5515_v7, %v5516_v0 }
 0x1c8   : > { %v11802_v9 = vpop.f32.mrf.mxu0  ;;  %v2500_v12 = vpop.f32.mrf.mxu1 }
 0x1c9   : > { %v2629_v13 = vadd.f32 %v2500_v12, %v11762_v8  ;;  %v5013_v8 = vrot.slane %v11808_v35, 2  ;;  %v10458_v35 = vld [vmem:[#allocation4 + $0x18] sm:$0xff]  }
 0x1ca   : > { %v9860_v16 = vpop.f32.mrf.mxu0  ;;  %10091 = vmatmul.mubr.bf16.gmra.mxu0 %v5008_v53  ;;  %v9816_v43 = vpop.f32.mrf.mxu1  ;;  %v5520_v53 = vrot.slane %v11816_v33, 2  ;;  %v5015_v33 = vrot.slane %v10454_v26, 2  ;;  %v10460_v26 = vld [vmem:[#allocation4 + $0x20] sm:$0xff]  }
 0x1cb   : > { %v11811_v10 = vadd.f32 %v9860_v16, %v2626_v11  ;;  %10094 = vmatprep.mubr.bf16.mxu0 %v5010_v44  ;;  %v2634_v45 = vadd.f32 %v9816_v43, %v11768_v28  ;;  %v5014_v44 = vsel %vm4979_vm0, %v5011_v27, %v5013_v8 }
 0x1cc   : > { %v2975_v24 = vpop.f32.mrf.mxu0  ;;  %10047 = vmatmul.mubr.bf16.gmra.mxu1 %v4480_v48  ;;  %v2513_v15 = vpop.f32.mrf.mxu1 }
 0x1cd   : > { %v11819_v23 = vadd.f32 %v2975_v24, %v2624_v49  ;;  %10118 = vmatprep.mubr.bf16.mxu1 %v5517_v17  ;;  %v2632_v62 = vadd.f32 %v2513_v15, %v11775_v58  ;;  %v5519_v49 = vsel %vm4979_vm0, %v5516_v0, %v5518_v42  ;;  %v10461_v24 = vld [vmem:[#allocation3 + $0x38] sm:$0xff]  }
 0x1ce   : > { %v9861_v32 = vpop.f32.mrf.mxu0  ;;  %v9817_v11 = vpop.f32.mrf.mxu1 }
 0x1cf   : > { %v11823_v21 = vadd.f32 %v9861_v32, %v2627_v40  ;;  %v2635_v28 = vadd.f32 %v9817_v11, %v11784_v57  ;;  %v5521_v57 = vsel %vm4979_vm0, %v5518_v42, %v5520_v53  ;;  %v6051_v40 = vrot.slane %v10458_v35, 2 }
 0x1d0   : > { %v2978_v54 = vpop.f32.mrf.mxu0  ;;  %v2516_v12 = vpop.f32.mrf.mxu1  ;;  %v5524_v42 = vrot.slane %v10461_v24, 2 }
 0x1d1   : > { %v11827_v19 = vadd.f32 %v2978_v54, %v2625_v41  ;;  %v2633_v58 = vadd.f32 %v2516_v12, %v11787_v60  ;;  %v10459_v41 = vld [vmem:[#allocation3 + $0x30] sm:$0xff]   ;;  %v6050_v54 = vrot.slane %v10457_v34, 2 }
 0x1d2   : > { %v9864_v16 = vpop.f32.mrf.mxu0  ;;  %10095 = vmatmul.mubr.bf16.gmra.mxu0 %v5012_v5  ;;  %v5522_v32 = vrot.slane %v10459_v41, 2  ;;  %v10462_v12 = vld [vmem:[#allocation4 + $0x28] sm:$0xff]  }
 0x1d3   : > { %v11832_v7 = vadd.f32 %v9864_v16, %v2630_v50  ;;  %10098 = vmatprep.mubr.bf16.mxu0 %v5014_v44  ;;  %v6052_v44 = vsel %vm4979_vm0, %v6050_v54, %v6051_v40  ;;  %v6055_v24 = vrot.slane %v10462_v12, 2 }
 0x1d4   : > { %v2991_v48 = vpop.f32.mrf.mxu0  ;;  %v9820_v47 = vpop.f32.mrf.mxu1  ;;  %10119 = vmatmul.mubr.bf16.vlgmr.msra.gmra.mxu1 %v5519_v49  ;;  %v5523_v49 = vsel %vm4979_vm0, %v5520_v53, %v5522_v32 }
 0x1d5   : > { %v11837_v43 = vadd.f32 %v2991_v48, %v2628_v37  ;;  %v2638_v17 = vadd.f32 %v9820_v47, %v11790_v4  ;;  %10122 = vmatprep.mubr.bf16.mxu1 %v5521_v57  ;;  %v5016_v37 = vsel %vm4979_vm0, %v5013_v8, %v5015_v33  ;;  %v5525_v8 = vsel %vm4979_vm0, %v5522_v32, %v5524_v42  ;;  %v10465_v48 = vld [vmem:[#allocation3 + $0x48] sm:$0xff]   ;;  %v10464_v32 = vld [vmem:[#allocation4 + $0x30] sm:$0xff]  }
 0x1d6   : > { %v9865_v50 = vpop.f32.mrf.mxu0  ;;  %v2529_v27 = vpop.f32.mrf.mxu1  ;;  %v6053_v57 = vrot.slane %v10460_v26, 2  ;;  %v5528_v53 = vrot.slane %v10465_v48, 2  ;;  %v10466_v26 = vld [vmem:[#allocation4 + $0x38] sm:$0xff]  }
 0x1d7   : > { %v11840_v60 = vadd.f32 %v9865_v50, %v2631_v3  ;;  %v2636_v0 = vadd.f32 %v2529_v27, %v11795_v18 }
 0x1d8   : > { %v2994_v15 = vpop.f32.mrf.mxu0  ;;  %v9821_v11 = vpop.f32.mrf.mxu1  ;;  %v6054_v54 = vsel %vm4979_vm0, %v6051_v40, %v6053_v57 }
 0x1d9   : > { %v11843_v5 = vadd.f32 %v2994_v15, %v2629_v13  ;;  %v2639_v4 = vadd.f32 %v9821_v11, %v11799_v52  ;;  %v10463_v52 = vld [vmem:[#allocation3 + $0x40] sm:$0xff]  }
 0x1da   : > { %v9868_v16 = vpop.f32.mrf.mxu0  ;;  %10099 = vmatmul.mubr.bf16.gmra.mxu0 %v5016_v37  ;;  %v2532_v3 = vpop.f32.mrf.mxu1  ;;  %v5526_v27 = vrot.slane %v10463_v52, 2  ;;  %v6059_v52 = vrot.slane %v10466_v26, 2 }
 0x1db   : > { %v11848_v35 = vadd.f32 %v9868_v16, %v2634_v45  ;;  %10170 = vmatprep.mubr.bf16.mxu0 %v6052_v44  ;;  %v2637_v18 = vadd.f32 %v2532_v3, %v11802_v9  ;;  %v10467_v44 = vld [vmem:[#allocation3 + $0x50] sm:$0xff]  }
 0x1dc   : > { %v3007_v13 = vpop.f32.mrf.mxu0  ;;  %v9824_v41 = vpop.f32.mrf.mxu1  ;;  %10123 = vmatmul.mubr.bf16.gmra.mxu1 %v5523_v49  ;;  %v10469_v49 = vld [vmem:[#allocation3 + $0x58] sm:$0xff]  }
 0x1dd   : > { %v11853_v47 = vadd.f32 %v3007_v13, %v2632_v62  ;;  %10126 = vmatprep.mubr.bf16.mxu1 %v5525_v8  ;;  %v6056_v62 = vsel %vm4979_vm0, %v6053_v57, %v6055_v24  ;;  %v6057_v13 = vrot.slane %v10464_v32, 2 }
 0x1de   : > { %v9869_v34 = vpop.f32.mrf.mxu0  ;;  %v2545_v45 = vpop.f32.mrf.mxu1 }
 0x1df   : > { %v11855_v33 = vadd.f32 %v9869_v34, %v2635_v28  ;;  %v5527_v28 = vsel %vm4979_vm0, %v5524_v42, %v5526_v27  ;;  %v5532_v42 = vrot.slane %v10469_v49, 2  ;;  %v2640_v26 = vadd.f32 %v2545_v45, %v11651_v31 }
 0x1e0   : > { %v3010_v50 = vpop.f32.mrf.mxu0  ;;  %v9825_v9 = vpop.f32.mrf.mxu1 }
 0x1e1   : > { %v11857_v15 = vadd.f32 %v3010_v50, %v2633_v58  ;;  %v5529_v58 = vsel %vm4979_vm0, %v5526_v27, %v5528_v53  ;;  %v6058_v27 = vsel %vm4979_vm0, %v6055_v24, %v6057_v13  ;;  %v10473_v24 = vld [vmem:[#allocation3 + $0x68] sm:$0xff]   ;;  %v2643_v49 = vadd.f32 %v9825_v9, %v11655_v59  ;;  %v10472_v9 = vld [vmem:[#allocation4 + $0x50] sm:$0xff]  }
 0x1e2   : > { %v9872_v11 = vpop.f32.mrf.mxu0  ;;  %10171 = vmatmul.mubr.bf16.vlgmr.msra.gmra.mxu0 %v6054_v54  ;;  %v2548_v37 = vpop.f32.mrf.mxu1  ;;  %v2642_v54 = vadd.f32 %v9824_v41, %v11647_v30 }
 0x1e3   : > { %v11861_v16 = vadd.f32 %v9872_v11, %v2638_v17  ;;  %10174 = vmatprep.mubr.bf16.mxu0 %v6056_v62  ;;  %v5530_v17 = vrot.slane %v10467_v44, 2 }
 0x1e4   : > { %v3023_v3 = vpop.f32.mrf.mxu0  ;;  %v9828_v12 = vpop.f32.mrf.mxu1  ;;  %10127 = vmatmul.mubr.bf16.gmra.mxu1 %v5527_v28  ;;  %v10470_v28 = vld [vmem:[#allocation4 + $0x48] sm:$0xff]  }
 0x1e5   : > { %v11865_v40 = vadd.f32 %v3023_v3, %v2636_v0  ;;  %10130 = vmatprep.mubr.bf16.mxu1 %v5529_v58  ;;  %v6060_v0 = vsel %vm4979_vm0, %v6057_v13, %v6059_v52  ;;  %v5531_v44 = vsel %vm4979_vm0, %v5528_v53, %v5530_v17  ;;  %v10468_v3 = vld [vmem:[#allocation4 + $0x40] sm:$0xff]   ;;  %v5533_v41 = vsel %vm4979_vm0, %v5530_v17, %v5532_v42 }
 0x1e6   : > { %v9873_v8 = vpop.f32.mrf.mxu0  ;;  %v2561_v48 = vpop.f32.mrf.mxu1  ;;  %v10471_v58 = vld [vmem:[#allocation3 + $0x60] sm:$0xff]   ;;  %v6063_v31 = vrot.slane %v10470_v28, 2  ;;  %v6061_v53 = vrot.slane %v10468_v3, 2  ;;  %v2646_v17 = vadd.f32 %v9828_v12, %v11662_v25 }
 0x1e7   : > { %v11867_v57 = vadd.f32 %v9873_v8, %v2639_v4 }
 0x1e8   : > { %v3026_v34 = vpop.f32.mrf.mxu0  ;;  %v9829_v50 = vpop.f32.mrf.mxu1  ;;  %v6062_v59 = vsel %vm4979_vm0, %v6059_v52, %v6061_v53  ;;  %v6064_v28 = vsel %vm4979_vm0, %v6061_v53, %v6063_v31 }
 0x1e9   : > { %v11870_v11 = vadd.f32 %v3026_v34, %v2637_v18  ;;  %v2641_v34 = vadd.f32 %v2548_v37, %v11659_v38  ;;  %v10474_v38 = vld [vmem:[#allocation4 + $0x58] sm:$0xff]   ;;  %v2644_v37 = vadd.f32 %v2561_v48, %v11671_v29 }
 0x1ea   : > { %v9876_v62 = vpop.f32.mrf.mxu0  ;;  %10175 = vmatmul.mubr.bf16.gmra.mxu0 %v6058_v27  ;;  %v2564_v32 = vpop.f32.mrf.mxu1  ;;  %v5534_v27 = vrot.slane %v10471_v58, 2  ;;  %v6067_v29 = vrot.slane %v10474_v38, 2 }
 0x1eb   : > { %v11875_v4 = vadd.f32 %v9876_v62, %v2642_v54  ;;  %10178 = vmatprep.mubr.bf16.mxu0 %v6060_v0 }
 0x1ec   : > { %v3039_v30 = vpop.f32.mrf.mxu0  ;;  %v9832_v18 = vpop.f32.mrf.mxu1  ;;  %10131 = vmatmul.mubr.bf16.gmra.mxu1 %v5531_v44  ;;  %v5536_v44 = vrot.slane %v10473_v24, 2  ;;  %v5535_v58 = vsel %vm4979_vm0, %v5532_v42, %v5534_v27  ;;  %v10477_v24 = vld [vmem:[#allocation3 + $0x78] sm:$0xff]  }
 0x1ed   : > { %13199 = vst [vmem:[#allocation6_spill] sm:$0xff] %v11875_v4  ;;  %v11880_v13 = vadd.f32 %v3039_v30, %v2640_v26  ;;  %10134 = vmatprep.mubr.bf16.mxu1 %v5533_v41  ;;  %v10475_v41 = vld [vmem:[#allocation3 + $0x70] sm:$0xff]  }
 0x1ee   : > { %v9877_v8 = vpop.f32.mrf.mxu0  ;;  %v2577_v45 = vpop.f32.mrf.mxu1  ;;  %v5537_v52 = vsel %vm4979_vm0, %v5534_v27, %v5536_v44  ;;  %v5538_v42 = vrot.slane %v10475_v41, 2  ;;  %v2650_v27 = vadd.f32 %v9832_v18, %v11692_v20 }
 0x1ef   : > { %v11883_v54 = vadd.f32 %v9877_v8, %v2643_v49  ;;  %v2647_v49 = vadd.f32 %v9829_v50, %v11677_v14  ;;  %v10476_v50 = vld [vmem:[#allocation4 + $0x60] sm:$0xff]  }
 0x1f0   : > { %v3042_v62 = vpop.f32.mrf.mxu0  ;;  %v9833_v0 = vpop.f32.mrf.mxu1  ;;  %v5539_v41 = vsel %vm4979_vm0, %v5536_v44, %v5538_v42 }
 0x1f1   : > { %v11886_v4 = vadd.f32 %v3042_v62, %v2641_v34  ;;  %v6065_v34 = vrot.slane %v10472_v9, 2  ;;  %v2645_v62 = vadd.f32 %v2564_v32, %v11685_v55  ;;  %v2648_v55 = vadd.f32 %v2577_v45, %v11706_v39 }
 0x1f2   : > { %v9880_v26 = vpop.f32.mrf.mxu0  ;;  %10179 = vmatmul.mubr.bf16.gmra.mxu0 %v6062_v59  ;;  %v2580_v30 = vpop.f32.mrf.mxu1 }
 0x1f3   : > { %v11891_v3 = vadd.f32 %v9880_v26, %v2646_v17  ;;  %10182 = vmatprep.mubr.bf16.mxu0 %v6064_v28  ;;  %v5540_v28 = vrot.slane %v10477_v24, 2  ;;  %v6066_v14 = vsel %vm4979_vm0, %v6063_v31, %v6065_v34  ;;  %v6068_v38 = vsel %vm4979_vm0, %v6065_v34, %v6067_v29  ;;  %v11911_v24 = vld [vmem:[#allocation3 + $0x88] sm:$0xff]  }
 0x1f4   : > { %v3055_v25 = vpop.f32.mrf.mxu0  ;;  %v9836_v12 = vpop.f32.mrf.mxu1  ;;  %10135 = vmatmul.mubr.bf16.gmra.mxu1 %v5535_v58 }
 0x1f5   : > { %v11896_v8 = vadd.f32 %v3055_v25, %v2644_v37  ;;  %10138 = vmatprep.mubr.bf16.mxu1 %v5537_v52  ;;  %v10478_v25 = vld [vmem:[#allocation4 + $0x68] sm:$0xff]   ;;  %v10479_v52 = vld [vmem:[#allocation3 + $0x80] sm:$0xff]   ;;  %v5541_v31 = vsel %vm4979_vm0, %v5538_v42, %v5540_v28  ;;  %v5544_v42 = vrot.slane %v11911_v24, 2  ;;  %v11932_v24 = vld [vmem:[#allocation3 + $0x98] sm:$0xff]  }
 0x1f6   : > { %v9881_v53 = vpop.f32.mrf.mxu0  ;;  %v2593_v48 = vpop.f32.mrf.mxu1  ;;  %v6071_v45 = vrot.slane %v10478_v25, 2 }
 0x1f7   : > { %v11899_v17 = vadd.f32 %v9881_v53, %v2647_v49  ;;  %v2651_v49 = vadd.f32 %v9833_v0, %v11717_v22  ;;  %v6069_v53 = vrot.slane %v10476_v50, 2  ;;  %v10480_v0 = vld [vmem:[#allocation4 + $0x70] sm:$0xff]  }
 0x1f8   : > { %v3058_v59 = vpop.f32.mrf.mxu0  ;;  %v9837_v26 = vpop.f32.mrf.mxu1 }
 0x1f9   : > { %v11902_v58 = vadd.f32 %v3058_v59, %v2645_v62  ;;  %v2649_v59 = vadd.f32 %v2580_v30, %v11730_v36  ;;  %v6070_v22 = vsel %vm4979_vm0, %v6067_v29, %v6069_v53  ;;  %v6072_v25 = vsel %vm4979_vm0, %v6069_v53, %v6071_v45  ;;  %v11925_v36 = vld [vmem:[#allocation4 + $0x78] sm:$0xff]  }
 0x1fa   : > { %v9884_v9 = vpop.f32.mrf.mxu0  ;;  %10183 = vmatmul.mubr.bf16.gmra.mxu0 %v6066_v14  ;;  %v2596_v37 = vpop.f32.mrf.mxu1  ;;  %v2652_v30 = vadd.f32 %v2593_v48, %v11747_v63  ;;  %v6073_v63 = vrot.slane %v10480_v0, 2 }
 0x1fb   : > { %v11907_v32 = vadd.f32 %v9884_v9, %v2650_v27  ;;  %10186 = vmatprep.mubr.bf16.mxu0 %v6068_v38  ;;  %v5542_v27 = vrot.slane %v10479_v52, 2  ;;  %v2654_v38 = vadd.f32 %v9836_v12, %v11738_v1  ;;  %v10483_v1 = vld [vmem:[#allocation3 + $0x90] sm:$0xff]  }
 0x1fc   : > { %v3071_v20 = vpop.f32.mrf.mxu0  ;;  %v9840_v18 = vpop.f32.mrf.mxu1  ;;  %10139 = vmatmul.mubr.bf16.gmra.mxu1 %v5539_v41  ;;  %v6074_v0 = vsel %vm4979_vm0, %v6071_v45, %v6073_v63 }
 0x1fd   : > { %v11914_v34 = vadd.f32 %v3071_v20, %v2648_v55  ;;  %10142 = vmatprep.mubr.bf16.mxu1 %v5541_v31  ;;  %v5543_v20 = vsel %vm4979_vm0, %v5540_v28, %v5542_v27  ;;  %v5545_v29 = vsel %vm4979_vm0, %v5542_v27, %v5544_v42 }
 0x1fe   : > { %v9885_v39 = vpop.f32.mrf.mxu0  ;;  %v2609_v62 = vpop.f32.mrf.mxu1 }
 0x1ff   : > { %v11917_v44 = vadd.f32 %v9885_v39, %v2651_v49  ;;  %v2655_v49 = vadd.f32 %v9837_v26, %v11756_v56  ;;  %v5548_v56 = vrot.slane %v11932_v24, 2  ;;  %v2658_v26 = vadd.f32 %v9840_v18, %v11770_v51 }
 0x200   : > { %v3074_v14 = vpop.f32.mrf.mxu0  ;;  %v9841_v9 = vpop.f32.mrf.mxu1 }
 0x201   : > { %v11921_v41 = vadd.f32 %v3074_v14, %v2649_v59  ;;  %v6075_v59 = vrot.slane %v11925_v36, 2  ;;  %v2653_v14 = vadd.f32 %v2596_v37, %v11764_v2  ;;  %v2659_v24 = vadd.f32 %v9841_v9, %v11777_v6  ;;  %v10488_v9 = vld [vmem:[#allocation4 + $0x90] sm:$0xff]  }
 0x202   : > { %v9888_v50 = vpop.f32.mrf.mxu0  ;;  %10187 = vmatmul.mubr.bf16.gmra.mxu0 %v6070_v22  ;;  %v2612_v55 = vpop.f32.mrf.mxu1  ;;  %v5546_v22 = vrot.slane %v10483_v1, 2  ;;  %v2656_v1 = vadd.f32 %v2609_v62, %v11773_v46 }
 0x203   : > { %v11928_v52 = vadd.f32 %v9888_v50, %v2654_v38  ;;  %10190 = vmatprep.mubr.bf16.mxu0 %v6072_v25  ;;  %v6076_v2 = vsel %vm4979_vm0, %v6073_v63, %v6075_v59 }
 0x204   : > { %v3087_v12 = vpop.f32.mrf.mxu0  ;;  %v9912_v31 = vpop.f32.mrf.mxu1  ;;  %10143 = vmatmul.mubr.bf16.gmra.mxu1 %v5543_v20  ;;  %v5547_v18 = vsel %vm4979_vm0, %v5544_v42, %v5546_v22 }
 0x205   : > { %v11935_v53 = vadd.f32 %v3087_v12, %v2652_v30  ;;  %v3656_v39 = vadd.f32 %v9912_v31, %v11811_v10  ;;  %10146 = vmatprep.mubr.bf16.mxu1 %v5545_v29  ;;  %v10484_v30 = vld [vmem:[#allocation4 + $0x80] sm:$0xff]   ;;  %v10487_v31 = vld [vmem:[#allocation3 + $0xa0] ss:$0 sps:$4 sm:$0x33]  }
 0x206   : > { %v9889_v48 = vpop.f32.mrf.mxu0  ;;  %v3511_v28 = vpop.f32.mrf.mxu1  ;;  %v6077_v46 = vrot.slane %v10484_v30, 2 }
 0x207   : > { %v11940_v38 = vadd.f32 %v9889_v48, %v2655_v49  ;;  %v3654_v27 = vadd.f32 %v3511_v28, %v11819_v23  ;;  %v10486_v23 = vld [vmem:[#allocation4 + $0x88] sm:$0xff]  }
 0x208   : > { %v3090_v50 = vpop.f32.mrf.mxu0  ;;  %v9913_v25 = vpop.f32.mrf.mxu1  ;;  %v6079_v48 = vrot.slane %v10486_v23, 2  ;;  %v6078_v6 = vsel %vm4979_vm0, %v6075_v59, %v6077_v46 }
 0x209   : > { %v11945_v10 = vadd.f32 %v3090_v50, %v2653_v14  ;;  %v3657_v36 = vadd.f32 %v9913_v25, %v11823_v21  ;;  %v5549_v21 = vsel %vm4979_vm0, %v5546_v22, %v5548_v56  ;;  %v5550_v50 = vrot.slane %v10487_v31, 2 }
 0x20a   : > { %v9892_v20 = vpop.f32.mrf.mxu0  ;;  %10191 = vmatmul.mubr.bf16.gmra.mxu0 %v6074_v0  ;;  %v3514_v37 = vpop.f32.mrf.mxu1  ;;  %v6080_v30 = vsel %vm4979_vm0, %v6077_v46, %v6079_v48 }
 0x20b   : > { %v11951_v12 = vadd.f32 %v9892_v20, %v2658_v26  ;;  %10194 = vmatprep.mubr.bf16.mxu0 %v6076_v2  ;;  %v3655_v51 = vadd.f32 %v3514_v37, %v11827_v19  ;;  %v2657_v19 = vadd.f32 %v2612_v55, %v11781_v61  ;;  %v10489_v61 = vld [vmem:[#allocation4 + $0x98] sm:$0xff]   ;;  %v5551_v2 = vsel %vm4979_vm0, %v5548_v56, %v5550_v50 }
 0x20c   : > { %v3103_v45 = vpop.f32.mrf.mxu0  ;;  %v9916_v29 = vpop.f32.mrf.mxu1  ;;  %10147 = vmatmul.mubr.bf16.gmra.mxu1 %v5547_v18  ;;  %v6083_v31 = vrot.slane %v10489_v61, 2 }
 0x20d   : > { %v11957_v49 = vadd.f32 %v3103_v45, %v2656_v1  ;;  %v3660_v63 = vadd.f32 %v9916_v29, %v11832_v7  ;;  %10150 = vmatprep.mubr.bf16.mxu1 %v5549_v21  ;;  %v6081_v1 = vrot.slane %v10488_v9, 2 }
 0x20e   : > { %v9893_v62 = vpop.f32.mrf.mxu0  ;;  %v3527_v28 = vpop.f32.mrf.mxu1 }
 0x20f   : > { %v11961_v42 = vadd.f32 %v9893_v62, %v2659_v24  ;;  %v3658_v14 = vadd.f32 %v3527_v28, %v11837_v43  ;;  %v6082_v56 = vsel %vm4979_vm0, %v6079_v48, %v6081_v1 }
 0x210   : > { %v3106_v25 = vpop.f32.mrf.mxu0  ;;  %v9917_v22 = vpop.f32.mrf.mxu1 }
 0x211   : > { %v11964_v26 = vadd.f32 %v3106_v25, %v2657_v19  ;;  %v3661_v7 = vadd.f32 %v9917_v22, %v11840_v60 }
 0x212   : > { %v9964_v0 = vpop.f32.mrf.mxu0  ;;  %10195 = vmatmul.mubr.bf16.gmra.mxu0 %v6078_v6  ;;  %v3530_v20 = vpop.f32.mrf.mxu1 }
 0x213   : > { %v11969_v55 = vadd.f32 %v9964_v0, %v3656_v39  ;;  %10198 = vmatprep.mubr.bf16.mxu0 %v6080_v30  ;;  %v3659_v43 = vadd.f32 %v3530_v20, %v11843_v5 }
 0x214   : > { %v4046_v37 = vpop.f32.mrf.mxu0  ;;  %v9920_v23 = vpop.f32.mrf.mxu1  ;;  %10151 = vmatmul.mubr.bf16.gmra.mxu1 %v5551_v2 }
 0x215   : > { %v11973_v59 = vadd.f32 %v4046_v37, %v3654_v27  ;;  %v3664_v60 = vadd.f32 %v9920_v23, %v11848_v35  ;;  %v10490_v27 = vld [vmem:[#allocation4 + $0xa0] ss:$0 sps:$4 sm:$0x33]   ;;  %v6084_v35 = vsel %vm4979_vm0, %v6081_v1, %v6083_v31 }
 0x216   : > { %v9965_v18 = vpop.f32.mrf.mxu0  ;;  %v3543_v45 = vpop.f32.mrf.mxu1  ;;  %v6085_v48 = vrot.slane %v10490_v27, 2 }
 0x217   : > { %v11976_v29 = vadd.f32 %v9965_v18, %v3657_v36  ;;  %v3662_v39 = vadd.f32 %v3543_v45, %v11853_v47 }
 0x218   : > { %v4049_v21 = vpop.f32.mrf.mxu0  ;;  %v9921_v24 = vpop.f32.mrf.mxu1  ;;  %v6086_v20 = vsel %vm4979_vm0, %v6083_v31, %v6085_v48 }
 0x219   : > { %v11979_v5 = vadd.f32 %v4049_v21, %v3655_v51  ;;  %v3665_v46 = vadd.f32 %v9921_v24, %v11855_v33 }
 0x21a   : > { %v9968_v62 = vpop.f32.mrf.mxu0  ;;  %10199 = vmatmul.mubr.bf16.gmra.mxu0 %v6082_v56  ;;  %v3546_v28 = vpop.f32.mrf.mxu1 }
 0x21b   : > { %v11984_v19 = vadd.f32 %v9968_v62, %v3660_v63  ;;  %10202 = vmatprep.mubr.bf16.mxu0 %v6084_v35  ;;  %v3663_v36 = vadd.f32 %v3546_v28, %v11857_v15 }
 0x21c   : > { %v4062_v47 = vpop.f32.mrf.mxu0  ;;  %v9924_v50 = vpop.f32.mrf.mxu1 }
 0x21d   : > { %v11987_v25 = vadd.f32 %v4062_v47, %v3658_v14  ;;  %v3668_v51 = vadd.f32 %v9924_v50, %v11861_v16 }
 0x21e   : > { %v9969_v22 = vpop.f32.mrf.mxu0  ;;  %v3559_v33 = vpop.f32.mrf.mxu1 }
 0x21f   : > { %v11990_v6 = vadd.f32 %v9969_v22, %v3661_v7  ;;  %v3666_v9 = vadd.f32 %v3559_v33, %v11865_v40  ;;  %v13200_v40 = vld [vmem:[#allocation6_spill] sm:$0xff] }
 0x220   : > { %v4065_v0 = vpop.f32.mrf.mxu0  ;;  %v9925_v30 = vpop.f32.mrf.mxu1 }
 0x221   : > { %v11993_v63 = vadd.f32 %v4065_v0, %v3659_v43  ;;  %v3669_v15 = vadd.f32 %v9925_v30, %v11867_v57 }
 0x222   : > { %v9972_v61 = vpop.f32.mrf.mxu0  ;;  %10203 = vmatmul.mubr.bf16.gmra.mxu0 %v6086_v20  ;;  %v3562_v14 = vpop.f32.mrf.mxu1 }
 0x223   : > { %v11997_v2 = vadd.f32 %v9972_v61, %v3664_v60  ;;  %v3667_v16 = vadd.f32 %v3562_v14, %v11870_v11 }
 0x224   : > { %v4078_v37 = vpop.f32.mrf.mxu0  ;;  %v9928_v7 = vpop.f32.mrf.mxu1 }
 0x225   : > { %v12000_v23 = vadd.f32 %v4078_v37, %v3662_v39  ;;  %v3672_v1 = vadd.f32 %v9928_v7, %v13200_v40 }
 0x226   : > { %v9973_v18 = vpop.f32.mrf.mxu0  ;;  %v3575_v43 = vpop.f32.mrf.mxu1 }
 0x227   : > { %v12003_v45 = vadd.f32 %v9973_v18, %v3665_v46  ;;  %v3670_v31 = vadd.f32 %v3575_v43, %v11880_v13 }
 0x228   : > { %v4081_v57 = vpop.f32.mrf.mxu0  ;;  %v9929_v21 = vpop.f32.mrf.mxu1 }
 0x229   : > { %v12006_v24 = vadd.f32 %v4081_v57, %v3663_v36  ;;  %v3673_v60 = vadd.f32 %v9929_v21, %v11883_v54 }
 0x22a   : > { %v9976_v56 = vpop.f32.mrf.mxu0  ;;  %v3578_v11 = vpop.f32.mrf.mxu1 }
 0x22b   : > { %v12009_v27 = vadd.f32 %v9976_v56, %v3668_v51  ;;  %v3671_v39 = vadd.f32 %v3578_v11, %v11886_v4 }
 0x22c   : > { %v4094_v62 = vpop.f32.mrf.mxu0  ;;  %v9932_v35 = vpop.f32.mrf.mxu1 }
 0x22d   : > { %v12012_v28 = vadd.f32 %v4094_v62, %v3666_v9  ;;  %v3676_v46 = vadd.f32 %v9932_v35, %v11891_v3 }
 0x22e   : > { %v9977_v47 = vpop.f32.mrf.mxu0  ;;  %v3591_v13 = vpop.f32.mrf.mxu1 }
 0x22f   : > { %v12015_v50 = vadd.f32 %v9977_v47, %v3669_v15  ;;  %v3674_v36 = vadd.f32 %v3591_v13, %v11896_v8 }
 0x230   : > { %v4097_v48 = vpop.f32.mrf.mxu0  ;;  %v9933_v54 = vpop.f32.mrf.mxu1 }
 0x231   : > { %v12018_v22 = vadd.f32 %v4097_v48, %v3667_v16  ;;  %v3677_v51 = vadd.f32 %v9933_v54, %v11899_v17 }
 0x232   : > { %v9980_v33 = vpop.f32.mrf.mxu0  ;;  %v3594_v4 = vpop.f32.mrf.mxu1 }
 0x233   : > { %v12021_v0 = vadd.f32 %v9980_v33, %v3672_v1  ;;  %v3675_v9 = vadd.f32 %v3594_v4, %v11902_v58 }
 0x234   : > { %v4110_v30 = vpop.f32.mrf.mxu0  ;;  %v9936_v3 = vpop.f32.mrf.mxu1 }
 0x235   : > { %v12024_v20 = vadd.f32 %v4110_v30, %v3670_v31  ;;  %v3680_v15 = vadd.f32 %v9936_v3, %v11907_v32 }
 0x236   : > { %v9981_v61 = vpop.f32.mrf.mxu0  ;;  %v3607_v8 = vpop.f32.mrf.mxu1 }
 0x237   : > { %v12027_v14 = vadd.f32 %v9981_v61, %v3673_v60  ;;  %v3678_v16 = vadd.f32 %v3607_v8, %v11914_v34 }
 0x238   : > { %v4113_v37 = vpop.f32.mrf.mxu0  ;;  %v9937_v17 = vpop.f32.mrf.mxu1 }
 0x239   : > { %v12030_v7 = vadd.f32 %v4113_v37, %v3671_v39  ;;  %v3681_v40 = vadd.f32 %v9937_v17, %v11917_v44 }
 0x23a   : > { %v9984_v1 = vpop.f32.mrf.mxu0  ;;  %v3610_v58 = vpop.f32.mrf.mxu1 }
 0x23b   : > { %v12033_v18 = vadd.f32 %v9984_v1, %v3676_v46  ;;  %v3679_v43 = vadd.f32 %v3610_v58, %v11921_v41 }
 0x23c   : > { %v4126_v31 = vpop.f32.mrf.mxu0  ;;  %v9940_v32 = vpop.f32.mrf.mxu1 }
 0x23d   : > { %v12036_v57 = vadd.f32 %v4126_v31, %v3674_v36  ;;  %v3684_v21 = vadd.f32 %v9940_v32, %v11928_v52 }
 0x23e   : > { %v9985_v60 = vpop.f32.mrf.mxu0  ;;  %v3623_v34 = vpop.f32.mrf.mxu1 }
 0x23f   : > { %v12039_v56 = vadd.f32 %v9985_v60, %v3677_v51  ;;  %v3682_v11 = vadd.f32 %v3623_v34, %v11935_v53 }
 0x240   : > { %v4129_v39 = vpop.f32.mrf.mxu0  ;;  %v9941_v44 = vpop.f32.mrf.mxu1 }
 0x241   : > { %v12042_v62 = vadd.f32 %v4129_v39, %v3675_v9  ;;  %v3685_v35 = vadd.f32 %v9941_v44, %v11940_v38 }
 0x242   : > { %v9988_v46 = vpop.f32.mrf.mxu0  ;;  %v3626_v41 = vpop.f32.mrf.mxu1 }
 0x243   : > { %v12045_v47 = vadd.f32 %v9988_v46, %v3680_v15  ;;  %v3683_v13 = vadd.f32 %v3626_v41, %v11945_v10 }
 0x244   : > { %v4142_v36 = vpop.f32.mrf.mxu0  ;;  %v9944_v52 = vpop.f32.mrf.mxu1 }
 0x245   : > { %v12048_v48 = vadd.f32 %v4142_v36, %v3678_v16  ;;  %v3688_v54 = vadd.f32 %v9944_v52, %v11951_v12 }
 0x246   : > { %v9989_v51 = vpop.f32.mrf.mxu0  ;;  %v3639_v53 = vpop.f32.mrf.mxu1 }
 0x247   : > { %v12051_v33 = vadd.f32 %v9989_v51, %v3681_v40  ;;  %v3686_v4 = vadd.f32 %v3639_v53, %v11957_v49 }
 0x248   : > { %v4145_v9 = vpop.f32.mrf.mxu0  ;;  %v9945_v38 = vpop.f32.mrf.mxu1 }
 0x249   : > { %v12054_v30 = vadd.f32 %v4145_v9, %v3679_v43  ;;  %v3689_v3 = vadd.f32 %v9945_v38, %v11961_v42 }
 0x24a   : > { %v9992_v15 = vpop.f32.mrf.mxu0  ;;  %v3642_v10 = vpop.f32.mrf.mxu1 }
 0x24b   : > { %v12057_v61 = vadd.f32 %v9992_v15, %v3684_v21  ;;  %v3687_v8 = vadd.f32 %v3642_v10, %v11964_v26 }
 0x24c   : > { %v4158_v16 = vpop.f32.mrf.mxu0  ;;  %v10016_v12 = vpop.f32.mrf.mxu1 }
 0x24d   : > { %v12060_v37 = vadd.f32 %v4158_v16, %v3682_v11  ;;  %v4726_v17 = vadd.f32 %v10016_v12, %v11969_v55 }
 0x24e   : > { %v9993_v40 = vpop.f32.mrf.mxu0  ;;  %v4581_v49 = vpop.f32.mrf.mxu1 }
 0x24f   : > { %v12063_v1 = vadd.f32 %v9993_v40, %v3685_v35  ;;  %v4724_v58 = vadd.f32 %v4581_v49, %v11973_v59 }
 0x250   : > { %v4161_v43 = vpop.f32.mrf.mxu0  ;;  %v10017_v42 = vpop.f32.mrf.mxu1 }
 0x251   : > { %v12066_v31 = vadd.f32 %v4161_v43, %v3683_v13  ;;  %v4727_v32 = vadd.f32 %v10017_v42, %v11976_v29 }
 0x252   : > { %v9996_v21 = vpop.f32.mrf.mxu0  ;;  %v4584_v26 = vpop.f32.mrf.mxu1 }
 0x253   : > { %v12069_v60 = vadd.f32 %v9996_v21, %v3688_v54  ;;  %v4725_v34 = vadd.f32 %v4584_v26, %v11979_v5 }
 0x254   : > { %v4174_v11 = vpop.f32.mrf.mxu0  ;;  %v10020_v55 = vpop.f32.mrf.mxu1 }
 0x255   : > { %v12072_v39 = vadd.f32 %v4174_v11, %v3686_v4  ;;  %v4730_v44 = vadd.f32 %v10020_v55, %v11984_v19 }
 0x256   : > { %v9997_v35 = vpop.f32.mrf.mxu0  ;;  %v4597_v59 = vpop.f32.mrf.mxu1 }
 0x257   : > { %v12075_v46 = vadd.f32 %v9997_v35, %v3689_v3  ;;  %v4728_v41 = vadd.f32 %v4597_v59, %v11987_v25  ;;  %v10549_v59 = vmov 1983009808  }
 0x258   : > { %v4177_v13 = vpop.f32.mrf.mxu0  ;;  %v10021_v29 = vpop.f32.mrf.mxu1 }
 0x259   : > { %v12078_v36 = vadd.f32 %v4177_v13, %v3687_v8  ;;  %v4731_v52 = vadd.f32 %v10021_v29, %v11990_v6  ;;  %v6478_v13 = vlaneseq }
 0x25a   : > { %v10068_v54 = vpop.f32.mrf.mxu0  ;;  %v4600_v5 = vpop.f32.mrf.mxu1 }
 0x25b   : > { %v12081_v51 = vadd.f32 %v10068_v54, %v4726_v17  ;;  %v4729_v53 = vadd.f32 %v4600_v5, %v11993_v63 }
 0x25c   : > { %v5117_v4 = vpop.f32.mrf.mxu0  ;;  %v10024_v19 = vpop.f32.mrf.mxu1 }
 0x25d   : > { %v12084_v9 = vadd.f32 %v5117_v4, %v4724_v58  ;;  %v4734_v38 = vadd.f32 %v10024_v19, %v11997_v2  ;;  %v6479_v19 = vshrl.u32 %v6478_v13, 7 }
 0x25e   : > { %v10069_v3 = vpop.f32.mrf.mxu0  ;;  %v4613_v25 = vpop.f32.mrf.mxu1 }
 0x25f   : > { %v12087_v15 = vadd.f32 %v10069_v3, %v4727_v32  ;;  %v4732_v10 = vadd.f32 %v4613_v25, %v12000_v23 }
 0x260   : > { %v5120_v8 = vpop.f32.mrf.mxu0  ;;  %v10025_v6 = vpop.f32.mrf.mxu1 }
 0x261   : > { %v12090_v16 = vadd.f32 %v5120_v8, %v4725_v34  ;;  %v4735_v12 = vadd.f32 %v10025_v6, %v12003_v45  ;;  %v7208_v6 = vld [vmem:[%s12120_s25 + $0x10] sm:$0xff] }
 0x262   : > { %v10072_v17 = vpop.f32.mrf.mxu0  ;;  %v4616_v63 = vpop.f32.mrf.mxu1 }
 0x263   : > { %v12093_v40 = vadd.f32 %v10072_v17, %v4730_v44  ;;  %v4733_v49 = vadd.f32 %v4616_v63, %v12006_v24 }
 0x264   : > { %v5133_v58 = vpop.f32.mrf.mxu0  ;;  %v10028_v2 = vpop.f32.mrf.mxu1 }
 0x265   : > { %v12096_v43 = vadd.f32 %v5133_v58, %v4728_v41  ;;  %v4738_v42 = vadd.f32 %v10028_v2, %v12009_v27  ;;  %v6476_v41 = vunpack.c.l.s4 %v10549_v59  ;;  %v7209_v59 = vld [vmem:[%s12120_s25 + $0x18] sm:$0xff] }
 0x266   : > { %v10073_v32 = vpop.f32.mrf.mxu0  ;;  %v4629_v23 = vpop.f32.mrf.mxu1 }
 0x267   : > { %v12099_v21 = vadd.f32 %v10073_v32, %v4731_v52  ;;  %v4736_v26 = vadd.f32 %v4629_v23, %v12012_v28  ;;  %v7304_v23 = vcombine.high %v7208_v6, %v7208_v6 }
 0x268   : > { %v5136_v45 = vpop.f32.mrf.mxu0  ;;  %v10029_v34 = vpop.f32.mrf.mxu1 }
 0x269   : > { %v12102_v11 = vadd.f32 %v5136_v45, %v4729_v53  ;;  %v4739_v55 = vadd.f32 %v10029_v34, %v12015_v50  ;;  %v7207_v45 = vld [vmem:[%s12120_s25 + $0x8] sm:$0xff] }
 0x26a   : > { %v10076_v24 = vpop.f32.mrf.mxu0  ;;  %v4632_v44 = vpop.f32.mrf.mxu1 }
 0x26b   : > { %v12105_v35 = vadd.f32 %v10076_v24, %v4734_v38  ;;  %v4737_v27 = vadd.f32 %v4632_v44, %v12018_v22  ;;  %v6477_v22 = vunpack.c.0.s8 %v6476_v41 }
 0x26c   : > { %v5149_v29 = vpop.f32.mrf.mxu0  ;;  %v10032_v52 = vpop.f32.mrf.mxu1 }
 0x26d   : > { %v12109_v28 = vadd.f32 %v5149_v29, %v4732_v10  ;;  %v4742_v54 = vadd.f32 %v10032_v52, %v12021_v0  ;;  %v7206_v10 = vld [vmem:[%s12120_s25] sm:$0xff]  ;;  %v12132_v63 = vsub.s32 %v6477_v22, %v6479_v19  ;;  %v7287_v52 = vcombine.high %v7207_v45, %v7207_v45 }
 0x26e   : > { %v10077_v5 = vpop.f32.mrf.mxu0  ;;  %v4645_v53 = vpop.f32.mrf.mxu1  ;;  %v7270_v32 = vcombine.high %v7206_v10, %v7206_v10 }
 0x26f   : > { %v12112_v50 = vadd.f32 %v10077_v5, %v4735_v12  ;;  %v4740_v4 = vadd.f32 %v4645_v53, %v12024_v20  ;;  %v12146_v44 = vrot.slane %v7208_v6, %v12132_v63  ;;  %v12162_v5 = vrot.slane %v7304_v23, %v12132_v63  ;;  %v7212_v53 = vld [vmem:[%s12120_s25 + $0x30] sm:$0xff] }
 0x270   : > { %v5152_v38 = vpop.f32.mrf.mxu0  ;;  %v10033_v3 = vpop.f32.mrf.mxu1  ;;  %v12154_v29 = vrot.slane %v7270_v32, %v12132_v63  ;;  %v12177_v6 = vrot.slane %v7207_v45, %v12132_v63  ;;  %v12214_v32 = vrot.slane %v7212_v53, %v12132_v63 }
 0x271   : > { %v12122_v0 = vadd.f32 %v5152_v38, %v4733_v49  ;;  %v4743_v25 = vadd.f32 %v10033_v3, %v12027_v14  ;;  %v12166_v38 = vrot.slane %v7209_v59, %v12132_v63 }
 0x272   : > { %v10080_v8 = vpop.f32.mrf.mxu0  ;;  %v4648_v20 = vpop.f32.mrf.mxu1 }
 0x273   : > { %v12127_v12 = vadd.f32 %v10080_v8, %v4738_v42  ;;  %v12130_v17 = vadd.f32 %v4648_v20, %v12030_v7  ;;  %v7321_v8 = vcombine.high %v7209_v59, %v7209_v59 }
 0x274   : > { %v5165_v58 = vpop.f32.mrf.mxu0  ;;  %v10036_v2 = vpop.f32.mrf.mxu1 }
 0x275   : > { %v12134_v49 = vadd.f32 %v5165_v58, %v4736_v26  ;;  %v12137_v14 = vadd.f32 %v10036_v2, %v12033_v18  ;;  %v7211_v26 = vld [vmem:[%s12120_s25 + $0x28] sm:$0xff]  ;;  %v12151_v18 = vrot.slane %v7206_v10, %v12132_v63  ;;  %v7210_v10 = vld [vmem:[%s12120_s25 + $0x20] sm:$0xff] }
 0x276   : > { %v10081_v34 = vpop.f32.mrf.mxu0  ;;  %v4661_v42 = vpop.f32.mrf.mxu1  ;;  %v7355_v3 = vcombine.high %v7211_v26, %v7211_v26  ;;  %v12194_v59 = vrot.slane %v7210_v10, %v12132_v63 }
 0x277   : > { %13201 = vst [vmem:[#allocation7_spill] sm:$0xff] %v12134_v49  ;;  %v12140_v24 = vadd.f32 %v10081_v34, %v4739_v55  ;;  %v12143_v7 = vadd.f32 %v4661_v42, %v12036_v57 }
 0x278   : > { %v5168_v41 = vpop.f32.mrf.mxu0  ;;  %v10037_v13 = vpop.f32.mrf.mxu1 }
 0x279   : > { %13202 = vst [vmem:[#allocation8_spill] sm:$0xff] %v12140_v24  ;;  %v12156_v55 = vadd.f32 %v5168_v41, %v4737_v27  ;;  %v12159_v57 = vadd.f32 %v10037_v13, %v12039_v56  ;;  %v7215_v41 = vld [vmem:[%s12120_s25 + $0x48] sm:$0xff] }
 0x27a   : > { %v10084_v22 = vpop.f32.mrf.mxu0  ;;  %v4664_v19 = vpop.f32.mrf.mxu1 }
 0x27b   : > { %13203 = vst [vmem:[#allocation9_spill] sm:$0xff] %v12156_v55  ;;  %v12169_v20 = vadd.f32 %v10084_v22, %v4742_v54  ;;  %v12172_v27 = vadd.f32 %v4664_v19, %v12042_v62  ;;  %v12184_v54 = vrot.slane %v7287_v52, %v12132_v63  ;;  %v7372_v62 = vcombine.high %v7212_v53, %v7212_v53 }
 0x27c   : > { %v5181_v58 = vpop.f32.mrf.mxu0  ;;  %v10040_v2 = vpop.f32.mrf.mxu1  ;;  %v12200_v19 = vrot.slane %v7355_v3, %v12132_v63 }
 0x27d   : > { %13204 = vst [vmem:[#allocation10_spill] sm:$0xff] %v12169_v20  ;;  %v12186_v34 = vadd.f32 %v5181_v58, %v4740_v4  ;;  %v12189_v42 = vadd.f32 %v10040_v2, %v12045_v47  ;;  %v12203_v4 = vrot.slane %v7321_v8, %v12132_v63  ;;  %v7338_v47 = vcombine.high %v7210_v10, %v7210_v10  ;;  %v7213_v58 = vld [vmem:[%s12120_s25 + $0x38] sm:$0xff]  ;;  %v7214_v10 = vld [vmem:[%s12120_s25 + $0x40] sm:$0xff]  ;;  %v7219_v20 = vld [vmem:[%s12120_s25 + $0x68] sm:$0xff] }
 0x27e   : > { %v10085_v13 = vpop.f32.mrf.mxu0  ;;  %v4677_v22 = vpop.f32.mrf.mxu1  ;;  %v12219_v8 = vrot.slane %v7372_v62, %v12132_v63  ;;  %v7389_v45 = vcombine.high %v7213_v58, %v7213_v58 }
 0x27f   : > { %13205 = vst [vmem:[#allocation6_spill] sm:$0xff] %v12186_v34  ;;  %v12206_v2 = vadd.f32 %v10085_v13, %v4743_v25  ;;  %v12209_v23 = vadd.f32 %v4677_v22, %v12048_v48  ;;  %v12222_v25 = vrot.slane %v7211_v26, %v12132_v63  ;;  %v7423_v48 = vcombine.high %v7215_v41, %v7215_v41  ;;  %v7216_v22 = vld [vmem:[%s12120_s25 + $0x50] sm:$0xff] }
 0x280   : > { %v5184_v52 = vpop.f32.mrf.mxu0  ;;  %v10041_v56 = vpop.f32.mrf.mxu1  ;;  %v12238_v34 = vrot.slane %v7338_v47, %v12132_v63  ;;  %v7406_v26 = vcombine.high %v7214_v10, %v7214_v10  ;;  %v12270_v47 = vrot.slane %v7389_v45, %v12132_v63 }
 0x281   : > { %13206 = vst [vmem:[#allocation11_spill] sm:$0xff] %v12206_v2  ;;  %v12226_v13 = vadd.f32 %v5184_v52, %v12130_v17  ;;  %v12229_v53 = vadd.f32 %v10041_v56, %v12051_v33  ;;  %v12241_v17 = vrot.slane %v7215_v41, %v12132_v63  ;;  %v12267_v52 = vrot.slane %v7213_v58, %v12132_v63 }
 0x282   : > { %v10088_v3 = vpop.f32.mrf.mxu0  ;;  %v4680_v2 = vpop.f32.mrf.mxu1  ;;  %13210 = vst [vmem:[#allocation15_spill] sm:$0xff] %v12270_v47  ;;  %v12350_v47 = vld [vmem:[%s12120_s25 + $0x98] sm:$0xff] }
 0x283   : > { %13207 = vst [vmem:[#allocation12_spill] sm:$0xff] %v12226_v13  ;;  %v12244_v33 = vadd.f32 %v10088_v3, %v12137_v14  ;;  %v12247_v56 = vadd.f32 %v4680_v2, %v12054_v30  ;;  %v12257_v14 = vrot.slane %v7423_v48, %v12132_v63  ;;  %v7440_v3 = vcombine.high %v7216_v22, %v7216_v22  ;;  %v7217_v48 = vld [vmem:[%s12120_s25 + $0x58] sm:$0xff] }
 0x284   : > { %v5197_v13 = vpop.f32.mrf.mxu0  ;;  %v10044_v62 = vpop.f32.mrf.mxu1 }
 0x285   : > { %13208 = vst [vmem:[#allocation13_spill] sm:$0xff] %v12244_v33  ;;  %v7218_v33 = vld [vmem:[%s12120_s25 + $0x60] sm:$0xff]  ;;  %v12261_v30 = vadd.f32 %v5197_v13, %v12143_v7  ;;  %v12264_v2 = vadd.f32 %v10044_v62, %v12057_v61  ;;  %v12278_v7 = vrot.slane %v7216_v22, %v12132_v63  ;;  %v12281_v61 = vrot.slane %v7214_v10, %v12132_v63 }
 0x286   : > { %v10089_v41 = vpop.f32.mrf.mxu0  ;;  %v4693_v55 = vpop.f32.mrf.mxu1  ;;  %v12290_v13 = vrot.slane %v7406_v26, %v12132_v63  ;;  %v7474_v62 = vcombine.high %v7218_v33, %v7218_v33  ;;  %v12296_v10 = vrot.slane %v7219_v20, %v12132_v63 }
 0x287   : > { %13209 = vst [vmem:[#allocation14_spill] sm:$0xff] %v12261_v30  ;;  %13211 = vst [vmem:[#allocation16_spill] sm:$0xff] %v12278_v7  ;;  %v12284_v58 = vadd.f32 %v10089_v41, %v12159_v57  ;;  %v12287_v45 = vadd.f32 %v4693_v55, %v12060_v37  ;;  %v12299_v57 = vrot.slane %v7440_v3, %v12132_v63 }
 0x288   : > { %13212 = vst [vmem:[#allocation17_spill] sm:$0xff] %v12281_v61  ;;  %13214 = vst [vmem:[#allocation19_spill] sm:$0xff] %v12290_v13  ;;  %v5200_v30 = vpop.f32.mrf.mxu0  ;;  %v10045_v24 = vpop.f32.mrf.mxu1  ;;  %v7491_v37 = vcombine.high %v7219_v20, %v7219_v20  ;;  %v7223_v20 = vld [vmem:[%s12120_s25 + $0x88] sm:$0xff]  ;;  %v7221_v13 = vld [vmem:[%s12120_s25 + $0x78] sm:$0xff] }
 0x289   : > { %13213 = vst [vmem:[#allocation18_spill] sm:$0xff] %v12284_v58  ;;  %13215 = vst [vmem:[#allocation20_spill] sm:$0xff] %v12296_v10  ;;  %v12302_v55 = vadd.f32 %v5200_v30, %v12172_v27  ;;  %v12305_v26 = vadd.f32 %v10045_v24, %v12063_v1  ;;  %v12316_v27 = vrot.slane %v7217_v48, %v12132_v63  ;;  %v7220_v30 = vld [vmem:[%s12120_s25 + $0x70] sm:$0xff]  ;;  %v7222_v24 = vld [vmem:[%s12120_s25 + $0x80] sm:$0xff] }
 0x28a   : > { %13216 = vst [vmem:[#allocation21_spill] sm:$0xff] %v12299_v57  ;;  %v10092_v58 = vpop.f32.mrf.mxu0  ;;  %v4696_v49 = vpop.f32.mrf.mxu1  ;;  %v7457_v1 = vcombine.high %v7217_v48, %v7217_v48  ;;  %v7542_v3 = vcombine.high %v7222_v24, %v7222_v24  ;;  %v12369_v57 = vrot.slane %v7220_v30, %v12132_v63 }
 0x28b   : > { %13217 = vst [vmem:[#allocation22_spill] sm:$0xff] %v12302_v55  ;;  %13218 = vst [vmem:[#allocation23_spill] sm:$0xff] %v12316_v27  ;;  %v12321_v41 = vadd.f32 %v10092_v58, %v12189_v42  ;;  %v12324_v22 = vadd.f32 %v4696_v49, %v12066_v31  ;;  %v12329_v55 = vrot.slane %v7474_v62, %v12132_v63 }
 0x28c   : > { %v5213_v61 = vpop.f32.mrf.mxu0  ;;  %v10048_v7 = vpop.f32.mrf.mxu1  ;;  %v12337_v58 = vrot.slane %v7491_v37, %v12132_v63  ;;  %v12340_v31 = vrot.slane %v7218_v33, %v12132_v63  ;;  %v12355_v33 = vrot.slane %v7457_v1, %v12132_v63  ;;  %13226 = vst [vmem:[#allocation31_spill] sm:$0xff] %v12369_v57 }
 0x28d   : > { %13219 = vst [vmem:[#allocation24_spill] sm:$0xff] %v12321_v41  ;;  %v12343_v49 = vadd.f32 %v5213_v61, %v12209_v23  ;;  %v12346_v62 = vadd.f32 %v10048_v7, %v12069_v60  ;;  %v7508_v41 = vcombine.high %v7220_v30, %v7220_v30  ;;  %v12358_v23 = vrot.slane %v7222_v24, %v12132_v63 }
 0x28e   : > { %13220 = vst [vmem:[#allocation25_spill] sm:$0xff] %v12337_v58  ;;  %13221 = vst [vmem:[#allocation26_spill] sm:$0xff] %v12340_v31  ;;  %v10093_v48 = vpop.f32.mrf.mxu0  ;;  %v4709_v42 = vpop.f32.mrf.mxu1  ;;  %v7559_v61 = vcombine.high %v7223_v20, %v7223_v20  ;;  %v7227_v31 = vld [vmem:[%s12120_s25 + $0xa8] sm:$0xff] }
 0x28f   : > { %13222 = vst [vmem:[#allocation27_spill] sm:$0xff] %v12343_v49  ;;  %13223 = vst [vmem:[#allocation28_spill] sm:$0xff] %v12355_v33  ;;  %v12361_v60 = vadd.f32 %v10093_v48, %v12229_v53  ;;  %v12364_v7 = vadd.f32 %v4709_v42, %v12072_v39  ;;  %v7525_v53 = vcombine.high %v7221_v13, %v7221_v13  ;;  %v7226_v48 = vld [vmem:[%s12120_s25 + $0xa0] sm:$0xff]  ;;  %v7231_v33 = vld [vmem:[%s12120_s25 + $0xc8] sm:$0xff] }
 0x290   : > { %13224 = vst [vmem:[#allocation29_spill] sm:$0xff] %v12358_v23  ;;  %v5216_v37 = vpop.f32.mrf.mxu0  ;;  %v10049_v27 = vpop.f32.mrf.mxu1  ;;  %v7593_v39 = vcombine.high %v12350_v47, %v12350_v47  ;;  %v12385_v49 = vrot.slane %v7542_v3, %v12132_v63  ;;  %v12388_v1 = vrot.slane %v7508_v41, %v12132_v63 }
 0x291   : > { %13225 = vst [vmem:[#allocation30_spill] sm:$0xff] %v12361_v60  ;;  %v12379_v42 = vadd.f32 %v5216_v37, %v12247_v56  ;;  %v12382_v30 = vadd.f32 %v10049_v27, %v12075_v46  ;;  %v12395_v56 = vrot.slane %v7223_v20, %v12132_v63  ;;  %v12398_v46 = vrot.slane %v7559_v61, %v12132_v63  ;;  %v7224_v27 = vld [vmem:[%s12120_s25 + $0x90] sm:$0xff] }
 0x292   : > { %13228 = vst [vmem:[#allocation33_spill] sm:$0xff] %v12385_v49  ;;  %13229 = vst [vmem:[#allocation34_spill] sm:$0xff] %v12388_v1  ;;  %v10096_v60 = vpop.f32.mrf.mxu0  ;;  %v4712_v24 = vpop.f32.mrf.mxu1  ;;  %v12408_v37 = vrot.slane %v7221_v13, %v12132_v63  ;;  %v12416_v61 = vrot.slane %v7525_v53, %v12132_v63  ;;  %v7576_v20 = vcombine.high %v7224_v27, %v7224_v27  ;;  %v7233_v49 = vld [vmem:[%s12120_s25 + $0xd8] sm:$0xff] }
 0x293   : > { %13227 = vst [vmem:[#allocation32_spill] sm:$0xff] %v12379_v42  ;;  %13230 = vst [vmem:[#allocation35_spill] sm:$0xff] %v12395_v56  ;;  %v12402_v3 = vadd.f32 %v10096_v60, %v12264_v2  ;;  %v12405_v41 = vadd.f32 %v4712_v24, %v12078_v36  ;;  %v7610_v42 = vcombine.high %v7226_v48, %v7226_v48  ;;  %v7228_v60 = vld [vmem:[%s12120_s25 + $0xb0] sm:$0xff]  ;;  %v7230_v24 = vld [vmem:[%s12120_s25 + $0xc0] sm:$0xff] }
 0x294   : > { %13231 = vst [vmem:[#allocation36_spill] sm:$0xff] %v12398_v46  ;;  %13233 = vst [vmem:[#allocation38_spill] sm:$0xff] %v12408_v37  ;;  %v5229_v58 = vpop.f32.mrf.mxu0  ;;  %v12411_v23 = vpop.f32.mrf.mxu1  ;;  %v12419_v2 = vrot.slane %v7593_v39, %v12132_v63  ;;  %v12422_v36 = vrot.slane %v7226_v48, %v12132_v63  ;;  %v7627_v56 = vcombine.high %v7227_v31, %v7227_v31 }
 0x295   : > { %13232 = vst [vmem:[#allocation37_spill] sm:$0xff] %v12402_v3  ;;  %v12425_v13 = vadd.f32 %v5229_v58, %v12287_v45  ;;  %v7229_v3 = vld [vmem:[%s12120_s25 + $0xb8] sm:$0xff]  ;;  %v12439_v45 = vrot.slane %v7224_v27, %v12132_v63  ;;  %v12442_v58 = vrot.slane %v7227_v31, %v12132_v63  ;;  %v12452_v39 = vrot.slane %v7610_v42, %v12132_v63 }
 0x296   : > { %13234 = vst [vmem:[#allocation39_spill] sm:$0xff] %v12419_v2  ;;  %13235 = vst [vmem:[#allocation40_spill] sm:$0xff] %v12422_v36  ;;  %v10097_v57 = vpop.f32.mrf.mxu0  ;;  %v12432_v53 = vpop.f32.mrf.mxu1  ;;  %v12467_v31 = vrot.slane %v7576_v20, %v12132_v63  ;;  %v7678_v42 = vcombine.high %v7230_v24, %v7230_v24  ;;  %v7644_v37 = vcombine.high %v7228_v60, %v7228_v60 }
 0x297   : > { %13236 = vst [vmem:[#allocation41_spill] sm:$0xff] %v12425_v13  ;;  %13237 = vst [vmem:[#allocation42_spill] sm:$0xff] %v12439_v45  ;;  %v12447_v13 = vadd.f32 %v10097_v57, %v12305_v26  ;;  %v7661_v26 = vcombine.high %v7229_v3, %v7229_v3  ;;  %v12476_v2 = vrot.slane %v12350_v47, %v12132_v63 }
 0x298   : > { %13238 = vst [vmem:[#allocation43_spill] sm:$0xff] %v12442_v58  ;;  %13240 = vst [vmem:[#allocation45_spill] sm:$0xff] %v12452_v39  ;;  %v5232_v48 = vpop.f32.mrf.mxu0  ;;  %v12454_v46 = vpop.f32.mrf.mxu1  ;;  %v12494_v47 = vrot.slane %v7228_v60, %v12132_v63 }
 0x299   : > { %13239 = vst [vmem:[#allocation44_spill] sm:$0xff] %v12447_v13  ;;  %v7232_v13 = vld [vmem:[%s12120_s25 + $0xd0] sm:$0xff]  ;;  %v12464_v1 = vadd.f32 %v5232_v48, %v12324_v22  ;;  %13242 = vst [vmem:[#allocation47_spill] sm:$0xff] %v12476_v2  ;;  %v12479_v22 = vrot.slane %v7229_v3, %v12132_v63  ;;  %v12491_v58 = vrot.slane %v7661_v26, %v12132_v63 }
 0x29a   : > { %v10100_v10 = vpop.f32.mrf.mxu0  ;;  %v5655_v27 = vpop.f32.mrf.mxu1  ;;  %v7712_v45 = vcombine.high %v7232_v13, %v7232_v13  ;;  %v12497_v3 = vrot.slane %v7230_v24, %v12132_v63  ;;  %v12505_v48 = vrot.slane %v7678_v42, %v12132_v63  ;;  %v12508_v26 = vrot.slane %v7644_v37, %v12132_v63  ;;  %v12529_v24 = vld [vmem:[%s12120_s25 + $0xe0] sm:$0xff] }
 0x29b   : > { %13241 = vst [vmem:[#allocation46_spill] sm:$0xff] %v12464_v1  ;;  %13243 = vst [vmem:[#allocation48_spill] sm:$0xff] %v12479_v22  ;;  %v12482_v20 = vadd.f32 %v10100_v10, %v12346_v62  ;;  %v12487_v1 = vrot.slane %v7627_v56, %v12132_v63  ;;  %v7695_v10 = vcombine.high %v7231_v33, %v7231_v33 }
 0x29c   : > { %v5245_v36 = vpop.f32.mrf.mxu0  ;;  %v10124_v57 = vpop.f32.mrf.mxu1  ;;  %v12523_v37 = vrot.slane %v7712_v45, %v12132_v63  ;;  %v5796_v22 = vadd.f32 %v5655_v27, %v12090_v16 }
 0x29d   : > { %13244 = vst [vmem:[#allocation49_spill] sm:$0xff] %v12482_v20  ;;  %v12500_v62 = vadd.f32 %v5245_v36, %v12364_v7  ;;  %v12515_v7 = vrot.slane %v7233_v49, %v12132_v63  ;;  %v7729_v36 = vcombine.high %v7233_v49, %v7233_v49 }
 0x29e   : > { %v10101_v20 = vpop.f32.mrf.mxu0  ;;  %v5668_v60 = vpop.f32.mrf.mxu1  ;;  %13248 = vst [vmem:[#allocation53_spill] sm:$0xff] %v12523_v37 }
 0x29f   : > { %13245 = vst [vmem:[#allocation50_spill] sm:$0xff] %v12500_v62  ;;  %13246 = vst [vmem:[#allocation51_spill] sm:$0xff] %v12515_v7  ;;  %v12518_v56 = vadd.f32 %v10101_v20, %v12382_v30  ;;  %v12526_v62 = vrot.slane %v7231_v33, %v12132_v63  ;;  %v12538_v20 = vrot.slane %v7695_v10, %v12132_v63 }
 0x2a0   : > { %v5248_v2 = vpop.f32.mrf.mxu0  ;;  %v10125_v39 = vpop.f32.mrf.mxu1  ;;  %v5797_v33 = vadd.f32 %v12411_v23, %v12081_v51  ;;  %v12552_v10 = vrot.slane %v7729_v36, %v12132_v63  ;;  %v12556_v51 = vrot.slane %v12529_v24, %v12132_v63  ;;  %v12559_v23 = vrot.slane %v7232_v13, %v12132_v63 }
 0x2a1   : > { %13247 = vst [vmem:[#allocation52_spill] sm:$0xff] %v12518_v56  ;;  %13249 = vst [vmem:[#allocation54_spill] sm:$0xff] %v12538_v20  ;;  %v12543_v45 = vadd.f32 %v5248_v2, %v12405_v41  ;;  %v5795_v41 = vadd.f32 %v12432_v53, %v12084_v9  ;;  %v5798_v36 = vadd.f32 %v12454_v46, %v12087_v15 }
 0x2a2   : > { %v10172_v56 = vpop.f32.mrf.mxu0  ;;  %v5671_v49 = vpop.f32.mrf.mxu1  ;;  %13251 = vst [vmem:[#allocation56_spill] sm:$0xff] %v12556_v51  ;;  %13252 = vst [vmem:[#allocation57_spill] sm:$0xff] %v12559_v23  ;;  %v12578_v30 = vadd.f32 %v10125_v39, %v12099_v21 }
 0x2a3   : > { %13250 = vst [vmem:[#allocation55_spill] sm:$0xff] %v12543_v45  ;;  %v6332_v2 = vadd.f32 %v10172_v56, %v5797_v33  ;;  %v5801_v45 = vadd.f32 %v10124_v57, %v12093_v40  ;;  %v12575_v56 = vadd.f32 %v5668_v60, %v12096_v43  ;;  %v12592_v39 = vadd.f32 %v5671_v49, %v12102_v11 }
 0x2a4   : > { %v6187_v7 = vpop.f32.mrf.mxu0  ;;  %v10128_v42 = vpop.f32.mrf.mxu1 }
 0x2a5   : > { %v6508_v9 = vcombine.high %v6332_v2, %v6332_v2  ;;  %v6515_v53 = vrot.slane %v6332_v2, %v12132_v63  ;;  %v6330_v33 = vadd.f32 %v6187_v7, %v5795_v41  ;;  %v12589_v7 = vld [vmem:[%s12120_s25 + $0xf0] sm:$0xff]  ;;  %v12595_v2 = vadd.f32 %v10128_v42, %v12105_v35 }
 0x2a6   : > { %v10173_v15 = vpop.f32.mrf.mxu0 }
 0x2a7   : > { %v6522_v27 = vrot.slane %v6508_v9, %v12132_v63  ;;  %v6523_v57 = vcombine.high %v6515_v53, %v6515_v53  ;;  %v6474_v43 = vcombine.high %v6330_v33, %v6330_v33  ;;  %v6481_v60 = vrot.slane %v6330_v33, %v12132_v63 }
 0x2a8   : > { %v6333_v21 = vadd.f32 %v10173_v15, %v5798_v36  ;;  %v6190_v41 = vpop.f32.mrf.mxu0  ;;  %v13253_v53 = vcombine.high %v12146_v44, %v12146_v44 }
 0x2a9   : > { %v6524_v46 = vcombine.high %v6522_v27, %v6522_v27  ;;  %v7950_v9 = vadd.f32 %v12146_v44, %v6523_v57  ;;  %v6488_v13 = vrot.slane %v6474_v43, %v12132_v63  ;;  %v6489_v36 = vcombine.high %v6481_v60, %v6481_v60 }
 0x2aa   : > { %v7951_v33 = vadd.f32 %v13253_v53, %v6522_v27  ;;  %v6525_v15 = vcombine.high %v6333_v21, %v6333_v21  ;;  %v6532_v11 = vrot.slane %v6333_v21, %v12132_v63  ;;  %v10176_v49 = vpop.f32.mrf.mxu0  ;;  %v7942_v40 = vadd.f32 %v12151_v18, %v6481_v60 }
 0x2ab   : > { %v6490_v16 = vcombine.high %v6488_v13, %v6488_v13  ;;  %v7952_v57 = vadd.f32 %v12162_v5, %v6524_v46  ;;  %v13254_v44 = vcombine.high %v12151_v18, %v12151_v18  ;;  %v13255_v21 = vcombine.high %v12162_v5, %v12162_v5  ;;  %v5684_v5 = vpop.f32.mrf.mxu1 }
 0x2ac   : > { %v8232_v42 = vcombine.low %v7950_v9, %v7951_v33  ;;  %v6539_v43 = vrot.slane %v6525_v15, %v12132_v63  ;;  %v6540_v53 = vcombine.high %v6532_v11, %v6532_v11  ;;  %v6203_v23 = vpop.f32.mrf.mxu0  ;;  %v7944_v35 = vadd.f32 %v12154_v29, %v6488_v13 }
 0x2ad   : > { %v7943_v27 = vadd.f32 %v13254_v44, %v6489_v36  ;;  %v7953_v37 = vadd.f32 %v13255_v21, %v6532_v11  ;;  %v13256_v9 = vcombine.high %v12154_v29, %v12154_v29  ;;  %v6331_v33 = vadd.f32 %v6190_v41, %v5796_v22 }
 0x2ae   : > { %v6336_v46 = vadd.f32 %v10176_v49, %v5801_v45  ;;  %v8240_v51 = vrot.slane %v8232_v42, %v12132_v63  ;;  %v7954_v36 = vadd.f32 %v12166_v38, %v6540_v53  ;;  %v13257_v15 = vcombine.high %v12166_v38, %v12166_v38  ;;  %v10177_v11 = vpop.f32.mrf.mxu0  ;;  %v10129_v53 = vpop.f32.mrf.mxu1 }
 0x2af   : > { %v7945_v60 = vadd.f32 %v13256_v9, %v6490_v16  ;;  %v8198_v18 = vcombine.low %v7942_v40, %v7943_v27  ;;  %v8233_v13 = vcombine.low %v7952_v57, %v7953_v37  ;;  %v6491_v20 = vcombine.high %v6331_v33, %v6331_v33 }
 0x2b0   : > { %v7955_v44 = vadd.f32 %v13257_v15, %v6539_v43  ;;  %v6498_v29 = vrot.slane %v6331_v33, %v12132_v63  ;;  %v6541_v45 = vcombine.high %v6539_v43, %v6539_v43  ;;  %v6575_v16 = vcombine.high %v6336_v46, %v6336_v46  ;;  %v6206_v41 = vpop.f32.mrf.mxu0 }
 0x2b1   : > { %v8199_v21 = vcombine.low %v7944_v35, %v7945_v60  ;;  %v8206_v22 = vrot.slane %v8198_v18, %v12132_v63  ;;  %v6582_v40 = vrot.slane %v6336_v46, %v12132_v63  ;;  %v8247_v38 = vrot.slane %v8233_v13, %v12132_v63 }
 0x2b2   : > { %v6505_v42 = vrot.slane %v6491_v20, %v12132_v63  ;;  %v6506_v27 = vcombine.high %v6498_v29, %v6498_v29  ;;  %v8249_v37 = vcombine.low %v7954_v36, %v7955_v44  ;;  %v7946_v35 = vadd.f32 %v12177_v6, %v6498_v29  ;;  %v10180_v9 = vpop.f32.mrf.mxu0 }
 0x2b3   : > { %v8213_v49 = vrot.slane %v8199_v21, %v12132_v63  ;;  %v6589_v57 = vrot.slane %v6575_v16, %v12132_v63  ;;  %v6590_v43 = vcombine.high %v6582_v40, %v6582_v40  ;;  %v8248_v33 = vcombine.low %v8240_v51, %v8247_v38 }
 0x2b4   : > { %v6507_v20 = vcombine.high %v6505_v42, %v6505_v42  ;;  %v13258_v46 = vcombine.high %v12177_v6, %v12177_v6  ;;  %v7948_v15 = vadd.f32 %v12184_v54, %v6505_v42  ;;  %v13259_v36 = vcombine.high %v12200_v19, %v12200_v19 }
 0x2b5   : > { %v8214_v60 = vcombine.low %v8206_v22, %v8213_v49  ;;  %v6591_v21 = vcombine.high %v6589_v57, %v6589_v57  ;;  %v12649_v13 = vrot.slane %v12589_v7, %v12132_v63  ;;  %8776 = vst [vmem:[%s12636_s28 + $0x10] sm:$0xff] %v8248_v33  ;;  %v13260_v51 = vcombine.high %v12184_v54, %v12184_v54  ;;  %v12658_v49 = vpop.f32.mrf.mxu0 }
 0x2b6   : > { %v7947_v18 = vadd.f32 %v13258_v46, %v6506_v27  ;;  %v7965_v44 = vadd.f32 %v13259_v36, %v6590_v43  ;;  %v7964_v6 = vadd.f32 %v12200_v19, %v6582_v40  ;;  %v6334_v16 = vadd.f32 %v6203_v23, %v12575_v56  ;;  %v5687_v43 = vpop.f32.mrf.mxu1 }
 0x2b7   : > { %8774 = vst [vmem:[%s12636_s28] sm:$0xff] %v8214_v60  ;;  %v7949_v29 = vadd.f32 %v13260_v51, %v6507_v20  ;;  %v8257_v38 = vrot.slane %v8249_v37, %v12132_v63  ;;  %v12662_v42 = vadd.f32 %v5684_v5, %v12109_v28  ;;  %v7956_v27 = vadd.f32 %v12203_v4, %v6541_v45  ;;  %v10181_v37 = vpop.f32.mrf.mxu0 }
 0x2b8   : > { %v8215_v22 = vcombine.low %v7946_v35, %v7947_v18  ;;  %v6337_v57 = vadd.f32 %v10177_v11, %v12578_v30  ;;  %v8284_v54 = vcombine.low %v7964_v6, %v7965_v44  ;;  %v6542_v33 = vcombine.high %v6334_v16, %v6334_v16  ;;  %v10132_v36 = vpop.f32.mrf.mxu1 }
 0x2b9   : > { %v8216_v60 = vcombine.low %v7948_v15, %v7949_v29  ;;  %v6549_v35 = vrot.slane %v6334_v16, %v12132_v63  ;;  %v7966_v23 = vadd.f32 %v12214_v32, %v6591_v21  ;;  %v13261_v30 = vcombine.high %v12203_v4, %v12203_v4 }
 0x2ba   : > { %v8223_v19 = vrot.slane %v8215_v22, %v12132_v63  ;;  %v6592_v56 = vcombine.high %v6337_v57, %v6337_v57  ;;  %v6599_v40 = vrot.slane %v6337_v57, %v12132_v63  ;;  %v6556_v5 = vrot.slane %v6542_v33, %v12132_v63 }
 0x2bb   : > { %v8230_v28 = vrot.slane %v8216_v60, %v12132_v63  ;;  %v7957_v11 = vadd.f32 %v13261_v30, %v6549_v35  ;;  %v6335_v45 = vadd.f32 %v6206_v41, %v12592_v39  ;;  %v5806_v20 = vadd.f32 %v10129_v53, %v12112_v50  ;;  %v6222_v60 = vpop.f32.mrf.mxu0 }
 0x2bc   : > { %v6606_v46 = vrot.slane %v6592_v56, %v12132_v63  ;;  %v6607_v18 = vcombine.high %v6599_v40, %v6599_v40  ;;  %v13262_v15 = vcombine.high %v12214_v32, %v12214_v32  ;;  %v12682_v51 = vrot.slane %v8284_v54, %v12132_v63 }
 0x2bd   : > { %v8231_v44 = vcombine.low %v8223_v19, %v8230_v28  ;;  %v6557_v4 = vcombine.high %v6556_v5, %v6556_v5  ;;  %v8250_v29 = vcombine.low %v7956_v27, %v7957_v11  ;;  %v7958_v22 = vadd.f32 %v12194_v59, %v6556_v5  ;;  %v12697_v19 = vpop.f32.mrf.mxu1 }
 0x2be   : > { %v7967_v21 = vadd.f32 %v13262_v15, %v6599_v40  ;;  %v7968_v39 = vadd.f32 %v12219_v8, %v6607_v18  ;;  %v13263_v50 = vcombine.high %v12219_v8, %v12219_v8  ;;  %v13264_v32 = vcombine.high %v12194_v59, %v12194_v59 }
 0x2bf   : > { %8775 = vst [vmem:[%s12636_s28 + $0x8] sm:$0xff] %v8231_v44  ;;  %v8264_v16 = vrot.slane %v8250_v29, %v12132_v63  ;;  %v6558_v57 = vcombine.high %v6335_v45, %v6335_v45  ;;  %v6565_v27 = vrot.slane %v6335_v45, %v12132_v63  ;;  %v6608_v54 = vcombine.high %v6606_v46, %v6606_v46  ;;  %v10133_v44 = vpop.f32.mrf.mxu1 }
 0x2c0   : > { %v7969_v41 = vadd.f32 %v13263_v50, %v6606_v46  ;;  %v8300_v53 = vcombine.low %v7966_v23, %v7967_v21  ;;  %v7959_v6 = vadd.f32 %v13264_v32, %v6557_v4  ;;  %v5804_v35 = vadd.f32 %v5687_v43, %v12122_v0  ;;  %v10184_v43 = vpop.f32.mrf.mxu0 }
 0x2c1   : > { %v6340_v8 = vadd.f32 %v10180_v9, %v12595_v2  ;;  %v8265_v23 = vcombine.low %v8257_v38, %v8264_v16  ;;  %v6572_v59 = vrot.slane %v6558_v57, %v12132_v63  ;;  %v6573_v40 = vcombine.high %v6565_v27, %v6565_v27 }
 0x2c2   : > { %v8301_v33 = vcombine.low %v7968_v39, %v7969_v41  ;;  %v8266_v56 = vcombine.low %v7958_v22, %v7959_v6  ;;  %v8308_v28 = vrot.slane %v8300_v53, %v12132_v63  ;;  %v7960_v0 = vadd.f32 %v12238_v34, %v6565_v27  ;;  %v6235_v57 = vpop.f32.mrf.mxu0 }
 0x2c3   : > { %v6642_v30 = vcombine.high %v6340_v8, %v6340_v8  ;;  %v6649_v11 = vrot.slane %v6340_v8, %v12132_v63  ;;  %8777 = vst [vmem:[%s12636_s28 + $0x18] sm:$0xff] %v8265_v23  ;;  %v6574_v45 = vcombine.high %v6572_v59, %v6572_v59  ;;  %v13265_v2 = vcombine.high %v12238_v34, %v12238_v34 }
 0x2c4   : > { %v8315_v5 = vrot.slane %v8301_v33, %v12132_v63  ;;  %v5809_v38 = vadd.f32 %v10132_v36, %v12127_v12  ;;  %v8274_v46 = vrot.slane %v8266_v56, %v12132_v63  ;;  %v7962_v4 = vadd.f32 %v12222_v25, %v6572_v59 }
 0x2c5   : > { %v7961_v9 = vadd.f32 %v13265_v2, %v6573_v40  ;;  %v6656_v15 = vrot.slane %v6642_v30, %v12132_v63  ;;  %v6657_v21 = vcombine.high %v6649_v11, %v6649_v11  ;;  %v13266_v29 = vcombine.high %v12222_v25, %v12222_v25 }
 0x2c6   : > { %v8316_v18 = vcombine.low %v8308_v28, %v8315_v5  ;;  %v6338_v34 = vadd.f32 %v12658_v49, %v12662_v42  ;;  %v7978_v36 = vadd.f32 %v12241_v17, %v6649_v11  ;;  %v13267_v50 = vcombine.high %v12241_v17, %v12241_v17  ;;  %v5703_v17 = vpop.f32.mrf.mxu1 }
 0x2c7   : > { %v7963_v22 = vadd.f32 %v13266_v29, %v6574_v45  ;;  %v8267_v39 = vcombine.low %v7960_v0, %v7961_v9  ;;  %v6658_v12 = vcombine.high %v6656_v15, %v6656_v15  ;;  %v7970_v53 = vadd.f32 %v12267_v52, %v6608_v54  ;;  %v12742_v9 = vpop.f32.mrf.mxu0 }
 0x2c8   : > { %8780 = vst [vmem:[%s12636_s28 + $0x30] sm:$0xff] %v8316_v18  ;;  %v7979_v41 = vadd.f32 %v13267_v50, %v6657_v21  ;;  %v6609_v16 = vcombine.high %v6338_v34, %v6338_v34  ;;  %v6616_v25 = vrot.slane %v6338_v34, %v12132_v63  ;;  %v7980_v49 = vadd.f32 %v12257_v14, %v6656_v15  ;;  %v10136_v21 = vpop.f32.mrf.mxu1 }
 0x2c9   : > { %v8281_v32 = vrot.slane %v8267_v39, %v12132_v63  ;;  %v8283_v6 = vcombine.low %v7962_v4, %v7963_v22  ;;  %v13268_v42 = vcombine.high %v12257_v14, %v12257_v14  ;;  %v6341_v8 = vadd.f32 %v10181_v37, %v5806_v20  ;;  %v13270_v37 = vld [vmem:[#allocation15_spill] sm:$0xff] }
 0x2ca   : > { %v8351_v33 = vcombine.low %v7978_v36, %v7979_v41  ;;  %v6623_v56 = vrot.slane %v6609_v16, %v12132_v63  ;;  %v6624_v59 = vcombine.high %v6616_v25, %v6616_v25  ;;  %v13269_v5 = vcombine.high %v12267_v52, %v12267_v52  ;;  %v13274_v41 = vld [vmem:[#allocation8_spill] sm:$0xff] }
 0x2cb   : > { %v7981_v27 = vadd.f32 %v13268_v42, %v6658_v12  ;;  %v8282_v23 = vcombine.low %v8274_v46, %v8281_v32  ;;  %v8291_v54 = vrot.slane %v8283_v6, %v12132_v63  ;;  %v6659_v11 = vcombine.high %v6341_v8, %v6341_v8  ;;  %v13273_v12 = vld [vmem:[#allocation7_spill] sm:$0xff] }
 0x2cc   : > { %v8359_v28 = vrot.slane %v8351_v33, %v12132_v63  ;;  %v7971_v30 = vadd.f32 %v13269_v5, %v6616_v25  ;;  %v7972_v20 = vadd.f32 %v13270_v37, %v6624_v59  ;;  %v13271_v45 = vcombine.high %v13270_v37, %v13270_v37  ;;  %v13281_v37 = vld [vmem:[#allocation6_spill] sm:$0xff] }
 0x2cd   : > { %v8352_v40 = vcombine.low %v7980_v49, %v7981_v27  ;;  %v8299_v14 = vcombine.low %v8291_v54, %v12682_v51  ;;  %8778 = vst [vmem:[%s12636_s28 + $0x20] sm:$0xff] %v8282_v23  ;;  %v6666_v2 = vrot.slane %v6341_v8, %v12132_v63  ;;  %v6673_v52 = vrot.slane %v6659_v11, %v12132_v63  ;;  %v5716_v49 = vpop.f32.mrf.mxu1  ;;  %v13277_v27 = vld [vmem:[#allocation9_spill] sm:$0xff] }
 0x2ce   : > { %v7973_v0 = vadd.f32 %v13271_v45, %v6623_v56  ;;  %v8317_v18 = vcombine.low %v7970_v53, %v7971_v30  ;;  %v6339_v15 = vadd.f32 %v6222_v60, %v5804_v35  ;;  %v6344_v29 = vadd.f32 %v10184_v43, %v5809_v38  ;;  %v13275_v53 = vld [vmem:[#allocation16_spill] sm:$0xff]  ;;  %v13278_v56 = vld [vmem:[#allocation10_spill] sm:$0xff]  ;;  %v13279_v30 = vld [vmem:[#allocation17_spill] sm:$0xff] }
 0x2cf   : > { %v8366_v46 = vrot.slane %v8352_v40, %v12132_v63  ;;  %8779 = vst [vmem:[%s12636_s28 + $0x28] sm:$0xff] %v8299_v14  ;;  %v6674_v4 = vcombine.high %v6666_v2, %v6666_v2  ;;  %v13272_v22 = vcombine.high %v12529_v24, %v12529_v24  ;;  %v5807_v36 = vadd.f32 %v12697_v19, %v13273_v12  ;;  %v6238_v24 = vpop.f32.mrf.mxu0  ;;  %v13285_v12 = vld [vmem:[#allocation20_spill] sm:$0xff] }
 0x2d0   : > { %v8318_v51 = vcombine.low %v7972_v20, %v7973_v0  ;;  %v8325_v50 = vrot.slane %v8317_v18, %v12132_v63  ;;  %v5810_v60 = vadd.f32 %v10133_v44, %v13274_v41  ;;  %v13276_v32 = vcombine.high %v13275_v53, %v13275_v53 }
 0x2d1   : > { %v12751_v39 = vrot.slane %v13272_v22, %v12132_v63  ;;  %v8367_v34 = vcombine.low %v8359_v28, %v8366_v46  ;;  %v6625_v43 = vcombine.high %v6339_v15, %v6339_v15  ;;  %v6632_v6 = vrot.slane %v6339_v15, %v12132_v63  ;;  %v13283_v15 = vld [vmem:[#allocation19_spill] sm:$0xff] }
 0x2d2   : > { %v8332_v35 = vrot.slane %v8318_v51, %v12132_v63  ;;  %v7983_v38 = vadd.f32 %v13276_v32, %v6673_v52  ;;  %v7982_v16 = vadd.f32 %v13275_v53, %v6674_v4  ;;  %v6709_v25 = vcombine.high %v6344_v29, %v6344_v29 }
 0x2d3   : > { %8783 = vst [vmem:[%s12636_s28 + $0x48] sm:$0xff] %v8367_v34  ;;  %v6716_v19 = vrot.slane %v6344_v29, %v12132_v63  ;;  %v6342_v42 = vadd.f32 %v6235_v57, %v5807_v36  ;;  %v5808_v33 = vadd.f32 %v5703_v17, %v13277_v27  ;;  %v6639_v8 = vrot.slane %v6625_v43, %v12132_v63  ;;  %v10188_v17 = vpop.f32.mrf.mxu0 }
 0x2d4   : > { %v8333_v44 = vcombine.low %v8325_v50, %v8332_v35  ;;  %v6640_v23 = vcombine.high %v6632_v6, %v6632_v6  ;;  %v6675_v54 = vcombine.high %v6673_v52, %v6673_v52  ;;  %v5813_v59 = vadd.f32 %v10136_v21, %v13278_v56  ;;  %v10137_v52 = vpop.f32.mrf.mxu1 }
 0x2d5   : > { %v6723_v40 = vrot.slane %v6709_v25, %v12132_v63  ;;  %v6724_v28 = vcombine.high %v6716_v19, %v6716_v19  ;;  %v6641_v5 = vcombine.high %v6639_v8, %v6639_v8  ;;  %v7974_v11 = vadd.f32 %v13279_v30, %v6632_v6  ;;  %v6251_v25 = vpop.f32.mrf.mxu0 }
 0x2d6   : > { %8781 = vst [vmem:[%s12636_s28 + $0x38] sm:$0xff] %v8333_v44  ;;  %v13280_v14 = vcombine.high %v13279_v30, %v13279_v30  ;;  %v12775_v20 = vadd.f32 %v5716_v49, %v13281_v37  ;;  %v8368_v45 = vcombine.low %v7982_v16, %v7983_v38  ;;  %v13282_v2 = vcombine.high %v12329_v55, %v12329_v55  ;;  %v13287_v38 = vld [vmem:[#allocation21_spill] sm:$0xff]  ;;  %v13291_v30 = vld [vmem:[#allocation11_spill] sm:$0xff] }
 0x2d7   : > { %v6725_v0 = vcombine.high %v6723_v40, %v6723_v40  ;;  %v6676_v18 = vcombine.high %v6342_v42, %v6342_v42  ;;  %v7976_v21 = vadd.f32 %v13283_v15, %v6639_v8  ;;  %v13284_v51 = vcombine.high %v13283_v15, %v13283_v15  ;;  %v5719_v8 = vpop.f32.mrf.mxu1 }
 0x2d8   : > { %v7975_v57 = vadd.f32 %v13280_v14, %v6640_v23  ;;  %v7993_v46 = vadd.f32 %v13282_v2, %v6724_v28  ;;  %v6683_v22 = vrot.slane %v6342_v42, %v12132_v63  ;;  %v7992_v34 = vadd.f32 %v12329_v55, %v6716_v19  ;;  %v13289_v42 = vld [vmem:[#allocation23_spill] sm:$0xff] }
 0x2d9   : > { %v7977_v4 = vadd.f32 %v13284_v51, %v6641_v5  ;;  %v7994_v36 = vadd.f32 %v13285_v12, %v6723_v40  ;;  %v13286_v50 = vcombine.high %v13285_v12, %v13285_v12  ;;  %v6690_v35 = vrot.slane %v6676_v18, %v12132_v63  ;;  %v13292_v51 = vld [vmem:[#allocation28_spill] sm:$0xff] }
 0x2da   : > { %v8334_v29 = vcombine.low %v7974_v11, %v7975_v57  ;;  %v6691_v32 = vcombine.high %v6683_v22, %v6683_v22  ;;  %v7984_v43 = vadd.f32 %v13287_v38, %v6675_v54  ;;  %v13288_v6 = vcombine.high %v13287_v38, %v13287_v38  ;;  %v13295_v38 = vld [vmem:[#allocation25_spill] sm:$0xff] }
 0x2db   : > { %v7995_v41 = vadd.f32 %v13286_v50, %v6725_v0  ;;  %v8335_v53 = vcombine.low %v7976_v21, %v7977_v4  ;;  %v8403_v55 = vcombine.low %v7992_v34, %v7993_v46  ;;  %v6692_v19 = vcombine.high %v6690_v35, %v6690_v35  ;;  %v10189_v46 = vpop.f32.mrf.mxu0  ;;  %v13294_v50 = vld [vmem:[#allocation12_spill] sm:$0xff] }
 0x2dc   : > { %v7985_v16 = vadd.f32 %v13288_v6, %v6683_v22  ;;  %v8342_v49 = vrot.slane %v8334_v29, %v12132_v63  ;;  %v13290_v44 = vcombine.high %v13289_v42, %v13289_v42  ;;  %v7986_v56 = vadd.f32 %v13289_v42, %v6691_v32 }
 0x2dd   : > { %v8349_v23 = vrot.slane %v8335_v53, %v12132_v63  ;;  %v6345_v54 = vadd.f32 %v12742_v9, %v5810_v60  ;;  %v8376_v28 = vrot.slane %v8368_v45, %v12132_v63  ;;  %v8419_v5 = vcombine.low %v7994_v36, %v7995_v41  ;;  %v12808_v60 = vpop.f32.mrf.mxu1  ;;  %v6254_v32 = vpop.f32.mrf.mxu0 }
 0x2de   : > { %v7987_v27 = vadd.f32 %v13290_v44, %v6690_v35  ;;  %v8369_v40 = vcombine.low %v7984_v43, %v7985_v16  ;;  %v5814_v11 = vadd.f32 %v10137_v52, %v13291_v30  ;;  %v6343_v14 = vadd.f32 %v6238_v24, %v5808_v33 }
 0x2df   : > { %v8350_v57 = vcombine.low %v8342_v49, %v8349_v23  ;;  %v6726_v2 = vcombine.high %v6345_v54, %v6345_v54  ;;  %v6733_v18 = vrot.slane %v6345_v54, %v12132_v63  ;;  %v7988_v9 = vadd.f32 %v13292_v51, %v6692_v19  ;;  %v5732_v49 = vpop.f32.mrf.mxu1  ;;  %v13297_v19 = vld [vmem:[#allocation26_spill] sm:$0xff] }
 0x2e0   : > { %v8383_v37 = vrot.slane %v8369_v40, %v12132_v63  ;;  %v8385_v0 = vcombine.low %v7986_v56, %v7987_v27  ;;  %v6693_v15 = vcombine.high %v6343_v14, %v6343_v14  ;;  %v6700_v21 = vrot.slane %v6343_v14, %v12132_v63 }
 0x2e1   : > { %8782 = vst [vmem:[%s12636_s28 + $0x40] sm:$0xff] %v8350_v57  ;;  %v8417_v45 = vrot.slane %v8403_v55, %v12132_v63  ;;  %v6740_v33 = vrot.slane %v6726_v2, %v12132_v63  ;;  %v6348_v52 = vadd.f32 %v10188_v17, %v5813_v59  ;;  %v8427_v4 = vrot.slane %v8419_v5, %v12132_v63  ;;  %v13299_v5 = vld [vmem:[#allocation29_spill] sm:$0xff]  ;;  %v10192_v2 = vpop.f32.mrf.mxu0 }
 0x2e2   : > { %v8384_v24 = vcombine.low %v8376_v28, %v8383_v37  ;;  %v6741_v29 = vcombine.high %v6733_v18, %v6733_v18  ;;  %v6707_v22 = vrot.slane %v6693_v15, %v12132_v63  ;;  %v13293_v34 = vcombine.high %v13292_v51, %v13292_v51  ;;  %v13301_v37 = vld [vmem:[#allocation33_spill] sm:$0xff] }
 0x2e3   : > { %v8393_v36 = vrot.slane %v8385_v0, %v12132_v63  ;;  %v5812_v41 = vadd.f32 %v5719_v8, %v13294_v50  ;;  %v6776_v35 = vcombine.high %v6348_v52, %v6348_v52  ;;  %v6783_v53 = vrot.slane %v6348_v52, %v12132_v63 }
 0x2e4   : > { %v7989_v12 = vadd.f32 %v13293_v34, %v6700_v21  ;;  %8784 = vst [vmem:[%s12636_s28 + $0x50] sm:$0xff] %v8384_v24  ;;  %v7996_v59 = vadd.f32 %v13295_v38, %v6733_v18  ;;  %v13296_v17 = vcombine.high %v13295_v38, %v13295_v38  ;;  %v6708_v6 = vcombine.high %v6707_v22, %v6707_v22 }
 0x2e5   : > { %v6742_v55 = vcombine.high %v6740_v33, %v6740_v33  ;;  %v7990_v42 = vadd.f32 %v13297_v19, %v6707_v22  ;;  %v6790_v44 = vrot.slane %v6776_v35, %v12132_v63  ;;  %v6791_v27 = vcombine.high %v6783_v53, %v6783_v53 }
 0x2e6   : > { %v7997_v43 = vadd.f32 %v13296_v17, %v6741_v29  ;;  %v8386_v16 = vcombine.low %v7988_v9, %v7989_v12  ;;  %v13298_v23 = vcombine.high %v13297_v19, %v13297_v19  ;;  %v6346_v54 = vadd.f32 %v6251_v25, %v12775_v20  ;;  %v10141_v9 = vpop.f32.mrf.mxu1  ;;  %v13303_v29 = vld [vmem:[#allocation31_spill] sm:$0xff]  ;;  %v6267_v17 = vpop.f32.mrf.mxu0 }
 0x2e7   : > { %v6792_v28 = vcombine.high %v6790_v44, %v6790_v44  ;;  %v8006_v30 = vadd.f32 %v13299_v5, %v6783_v53  ;;  %v13300_v14 = vcombine.high %v13299_v5, %v13299_v5  ;;  %v8008_v0 = vadd.f32 %v13301_v37, %v6790_v44 }
 0x2e8   : > { %v8420_v8 = vcombine.low %v7996_v59, %v7997_v43  ;;  %v7991_v56 = vadd.f32 %v13298_v23, %v6708_v6  ;;  %v8400_v40 = vrot.slane %v8386_v16, %v12132_v63  ;;  %v6743_v51 = vcombine.high %v6346_v54, %v6346_v54  ;;  %v13305_v43 = vld [vmem:[#allocation34_spill] sm:$0xff] }
 0x2e9   : > { %v8007_v57 = vadd.f32 %v13300_v14, %v6791_v27  ;;  %v13302_v20 = vcombine.high %v13301_v37, %v13301_v37  ;;  %v6750_v33 = vrot.slane %v6346_v54, %v12132_v63  ;;  %v6349_v52 = vadd.f32 %v10189_v46, %v5814_v11  ;;  %v13309_v14 = vld [vmem:[#allocation38_spill] sm:$0xff]  ;;  %v10193_v37 = vpop.f32.mrf.mxu0 }
 0x2ea   : > { %v8434_v18 = vrot.slane %v8420_v8, %v12132_v63  ;;  %v8401_v15 = vcombine.low %v8393_v36, %v8400_v40  ;;  %v8402_v21 = vcombine.low %v7990_v42, %v7991_v56  ;;  %v7998_v22 = vadd.f32 %v13303_v29, %v6742_v55  ;;  %v5735_v55 = vpop.f32.mrf.mxu1  ;;  %v13307_v8 = vld [vmem:[#allocation13_spill] sm:$0xff] }
 0x2eb   : > { %v8009_v25 = vadd.f32 %v13302_v20, %v6792_v28  ;;  %v8470_v24 = vcombine.low %v8006_v30, %v8007_v57  ;;  %v6757_v36 = vrot.slane %v6743_v51, %v12132_v63  ;;  %v6758_v53 = vcombine.high %v6750_v33, %v6750_v33 }
 0x2ec   : > { %v8435_v34 = vcombine.low %v8427_v4, %v8434_v18  ;;  %v8410_v12 = vrot.slane %v8402_v21, %v12132_v63  ;;  %8785 = vst [vmem:[%s12636_s28 + $0x58] sm:$0xff] %v8401_v15  ;;  %v13304_v38 = vcombine.high %v13303_v29, %v13303_v29  ;;  %v13306_v4 = vcombine.high %v13305_v43, %v13305_v43  ;;  %v13310_v15 = vld [vmem:[#allocation35_spill] sm:$0xff]  ;;  %v10144_v20 = vpop.f32.mrf.mxu1 }
 0x2ed   : > { %v8471_v50 = vcombine.low %v8008_v0, %v8009_v25  ;;  %v8478_v35 = vrot.slane %v8470_v24, %v12132_v63  ;;  %v6759_v46 = vcombine.high %v6757_v36, %v6757_v36  ;;  %v6793_v16 = vcombine.high %v6349_v52, %v6349_v52  ;;  %v13312_v24 = vld [vmem:[#allocation36_spill] sm:$0xff] }
 0x2ee   : > { %v7999_v59 = vadd.f32 %v13304_v38, %v6750_v33  ;;  %8787 = vst [vmem:[%s12636_s28 + $0x68] sm:$0xff] %v8435_v34  ;;  %v8418_v11 = vcombine.low %v8410_v12, %v8417_v45  ;;  %v8001_v6 = vadd.f32 %v13306_v4, %v6757_v36  ;;  %v8000_v42 = vadd.f32 %v13305_v43, %v6758_v53  ;;  %v13308_v45 = vld [vmem:[#allocation14_spill] sm:$0xff]  ;;  %v6270_v38 = vpop.f32.mrf.mxu0 }
 0x2ef   : > { %v8485_v19 = vrot.slane %v8471_v50, %v12132_v63  ;;  %v6800_v27 = vrot.slane %v6349_v52, %v12132_v63  ;;  %v5817_v23 = vadd.f32 %v12808_v60, %v13307_v8  ;;  %v5815_v56 = vadd.f32 %v5732_v49, %v13308_v45 }
 0x2f0   : > { %v8436_v44 = vcombine.low %v7998_v22, %v7999_v59  ;;  %8786 = vst [vmem:[%s12636_s28 + $0x60] sm:$0xff] %v8418_v11  ;;  %v6807_v40 = vrot.slane %v6793_v16, %v12132_v63  ;;  %v6347_v54 = vadd.f32 %v6254_v32, %v5812_v41  ;;  %v8437_v5 = vcombine.low %v8000_v42, %v8001_v6  ;;  %v13315_v59 = vld [vmem:[#allocation18_spill] sm:$0xff]  ;;  %v5748_v6 = vpop.f32.mrf.mxu1 }
 0x2f1   : > { %v8486_v28 = vcombine.low %v8478_v35, %v8485_v19  ;;  %v6808_v30 = vcombine.high %v6800_v27, %v6800_v27  ;;  %v8002_v57 = vadd.f32 %v13309_v14, %v6759_v46  ;;  %v8010_v21 = vadd.f32 %v13310_v15, %v6800_v27  ;;  %v13317_v16 = vld [vmem:[#allocation22_spill] sm:$0xff] }
 0x2f2   : > { %v8444_v0 = vrot.slane %v8436_v44, %v12132_v63  ;;  %v6809_v18 = vcombine.high %v6807_v40, %v6807_v40  ;;  %v6760_v51 = vcombine.high %v6347_v54, %v6347_v54  ;;  %v8451_v60 = vrot.slane %v8437_v5, %v12132_v63 }
 0x2f3   : > { %8790 = vst [vmem:[%s12636_s28 + $0x80] sm:$0xff] %v8486_v28  ;;  %v13311_v49 = vcombine.high %v13310_v15, %v13310_v15  ;;  %v6767_v32 = vrot.slane %v6347_v54, %v12132_v63  ;;  %v6352_v25 = vadd.f32 %v10192_v2, %v5817_v23  ;;  %v8012_v33 = vadd.f32 %v13312_v24, %v6807_v40  ;;  %v10196_v28 = vpop.f32.mrf.mxu0 }
 0x2f4   : > { %v13313_v52 = vcombine.high %v13312_v24, %v13312_v24  ;;  %v6774_v22 = vrot.slane %v6760_v51, %v12132_v63  ;;  %v6350_v34 = vadd.f32 %v6267_v17, %v5815_v56  ;;  %v8452_v12 = vcombine.low %v8444_v0, %v8451_v60  ;;  %v13318_v56 = vld [vmem:[#allocation24_spill] sm:$0xff] }
 0x2f5   : > { %v8011_v41 = vadd.f32 %v13311_v49, %v6808_v30  ;;  %v6775_v50 = vcombine.high %v6767_v32, %v6767_v32  ;;  %v13314_v35 = vcombine.high %v13309_v14, %v13309_v14  ;;  %v5818_v11 = vadd.f32 %v10141_v9, %v13315_v59  ;;  %v13321_v49 = vld [vmem:[#allocation42_spill] sm:$0xff] }
 0x2f6   : > { %v8013_v29 = vadd.f32 %v13313_v52, %v6809_v18  ;;  %v13316_v46 = vcombine.high %v12416_v61, %v12416_v61  ;;  %v6844_v4 = vcombine.high %v6352_v25, %v6352_v25  ;;  %8788 = vst [vmem:[%s12636_s28 + $0x70] sm:$0xff] %v8452_v12  ;;  %v5816_v17 = vadd.f32 %v5735_v55, %v13317_v16  ;;  %v13319_v18 = vld [vmem:[#allocation40_spill] sm:$0xff]  ;;  %v13323_v52 = vld [vmem:[#allocation27_spill] sm:$0xff]  ;;  %v13327_v16 = vld [vmem:[#allocation45_spill] sm:$0xff] }
 0x2f7   : > { %v8487_v36 = vcombine.low %v8010_v21, %v8011_v41  ;;  %v8003_v53 = vadd.f32 %v13314_v35, %v6767_v32  ;;  %v8004_v19 = vadd.f32 %v12416_v61, %v6775_v50  ;;  %v6810_v44 = vcombine.high %v6350_v34, %v6350_v34  ;;  %v13324_v12 = vld [vmem:[#allocation39_spill] sm:$0xff] }
 0x2f8   : > { %v8488_v2 = vcombine.low %v8012_v33, %v8013_v29  ;;  %v8005_v43 = vadd.f32 %v13316_v46, %v6774_v22  ;;  %v6858_v9 = vrot.slane %v6844_v4, %v12132_v63  ;;  %v6817_v23 = vrot.slane %v6350_v34, %v12132_v63 }
 0x2f9   : > { %v8453_v42 = vcombine.low %v8002_v57, %v8003_v53  ;;  %v8495_v27 = vrot.slane %v8487_v36, %v12132_v63  ;;  %v5821_v40 = vadd.f32 %v10144_v20, %v13318_v56  ;;  %v6851_v54 = vrot.slane %v6352_v25, %v12132_v63  ;;  %v10145_v57 = vpop.f32.mrf.mxu1 }
 0x2fa   : > { %v8502_v8 = vrot.slane %v8488_v2, %v12132_v63  ;;  %v8454_v45 = vcombine.low %v8004_v19, %v8005_v43  ;;  %v6824_v55 = vrot.slane %v6810_v44, %v12132_v63  ;;  %v6859_v30 = vcombine.high %v6858_v9, %v6858_v9  ;;  %v13326_v2 = vld [vmem:[#allocation30_spill] sm:$0xff] }
 0x2fb   : > { %v8461_v5 = vrot.slane %v8453_v42, %v12132_v63  ;;  %v6825_v14 = vcombine.high %v6817_v23, %v6817_v23  ;;  %v8022_v15 = vadd.f32 %v13319_v18, %v6858_v9  ;;  %v6353_v51 = vadd.f32 %v10193_v37, %v5818_v11  ;;  %v6283_v37 = vpop.f32.mrf.mxu0  ;;  %v5751_v53 = vpop.f32.mrf.mxu1 }
 0x2fc   : > { %v8503_v61 = vcombine.low %v8495_v27, %v8502_v8  ;;  %v8468_v0 = vrot.slane %v8454_v45, %v12132_v63  ;;  %v6826_v21 = vcombine.high %v6824_v55, %v6824_v55  ;;  %v13320_v20 = vcombine.high %v13319_v18, %v13319_v18 }
 0x2fd   : > { %v8014_v41 = vadd.f32 %v13321_v49, %v6825_v14  ;;  %v13322_v32 = vcombine.high %v13321_v49, %v13321_v49  ;;  %v6351_v24 = vadd.f32 %v6270_v38, %v5816_v17  ;;  %v5819_v29 = vadd.f32 %v5748_v6, %v13323_v52  ;;  %v10197_v56 = vpop.f32.mrf.mxu0  ;;  %v10148_v14 = vpop.f32.mrf.mxu1 }
 0x2fe   : > { %8791 = vst [vmem:[%s12636_s28 + $0x88] sm:$0xff] %v8503_v61  ;;  %v8023_v60 = vadd.f32 %v13320_v20, %v6859_v30  ;;  %v8469_v33 = vcombine.low %v8461_v5, %v8468_v0  ;;  %v6860_v22 = vcombine.high %v6353_v51, %v6353_v51  ;;  %v6867_v34 = vrot.slane %v6353_v51, %v12132_v63  ;;  %v13332_v0 = vld [vmem:[#allocation43_spill] sm:$0xff] }
 0x2ff   : > { %v8015_v25 = vadd.f32 %v13322_v32, %v6824_v55  ;;  %v13325_v36 = vcombine.high %v13324_v12, %v13324_v12  ;;  %v6827_v59 = vcombine.high %v6351_v24, %v6351_v24  ;;  %v6834_v11 = vrot.slane %v6351_v24, %v12132_v63  ;;  %v13330_v55 = vld [vmem:[#allocation47_spill] sm:$0xff]  ;;  %v6286_v24 = vpop.f32.mrf.mxu0 }
 0x300   : > { %v8538_v35 = vcombine.low %v8022_v15, %v8023_v60  ;;  %8789 = vst [vmem:[%s12636_s28 + $0x78] sm:$0xff] %v8469_v33  ;;  %v5822_v46 = vadd.f32 %v10145_v57, %v13326_v2  ;;  %v6874_v38 = vrot.slane %v6860_v22, %v12132_v63  ;;  %v6875_v43 = vcombine.high %v6867_v34, %v6867_v34 }
 0x301   : > { %v8021_v50 = vadd.f32 %v13325_v36, %v6851_v54  ;;  %v8016_v4 = vadd.f32 %v12467_v31, %v6826_v21  ;;  %v8504_v6 = vcombine.low %v8014_v41, %v8015_v25  ;;  %v8024_v17 = vadd.f32 %v13327_v16, %v6867_v34 }
 0x302   : > { %v6841_v19 = vrot.slane %v6827_v59, %v12132_v63  ;;  %v6842_v42 = vcombine.high %v6834_v11, %v6834_v11  ;;  %v8546_v44 = vrot.slane %v8538_v35, %v12132_v63  ;;  %v6876_v27 = vcombine.high %v6874_v38, %v6874_v38  ;;  %v13334_v35 = vld [vmem:[#allocation32_spill] sm:$0xff] }
 0x303   : > { %v13328_v8 = vcombine.high %v13327_v16, %v13327_v16  ;;  %v13329_v23 = vcombine.high %v12467_v31, %v12467_v31  ;;  %v13331_v5 = vcombine.high %v13330_v55, %v13330_v55  ;;  %v6356_v57 = vadd.f32 %v10196_v28, %v5821_v40  ;;  %v13337_v16 = vld [vmem:[#allocation41_spill] sm:$0xff] }
 0x304   : > { %v6843_v54 = vcombine.high %v6841_v19, %v6841_v19  ;;  %v8018_v61 = vadd.f32 %v13330_v55, %v6842_v42  ;;  %v8026_v18 = vadd.f32 %v13332_v0, %v6874_v38  ;;  %v13333_v15 = vcombine.high %v13332_v0, %v13332_v0  ;;  %v10200_v42 = vpop.f32.mrf.mxu0 }
 0x305   : > { %v8025_v9 = vadd.f32 %v13328_v8, %v6875_v43  ;;  %v8017_v45 = vadd.f32 %v13329_v23, %v6834_v11  ;;  %v8019_v30 = vadd.f32 %v13331_v5, %v6841_v19  ;;  %v6911_v49 = vcombine.high %v6356_v57, %v6356_v57 }
 0x306   : > { %v8027_v21 = vadd.f32 %v13333_v15, %v6876_v27  ;;  %v8020_v31 = vadd.f32 %v13324_v12, %v6843_v54  ;;  %v6918_v41 = vrot.slane %v6356_v57, %v12132_v63  ;;  %v8512_v32 = vrot.slane %v8504_v6, %v12132_v63  ;;  %v5764_v12 = vpop.f32.mrf.mxu1 }
 0x307   : > { %v8539_v51 = vcombine.low %v8024_v17, %v8025_v9  ;;  %v8505_v20 = vcombine.low %v8016_v4, %v8017_v45  ;;  %v8521_v60 = vcombine.low %v8018_v61, %v8019_v30  ;;  %v6354_v28 = vadd.f32 %v6283_v37, %v5819_v29 }
 0x308   : > { %v8555_v33 = vcombine.low %v8026_v18, %v8027_v21  ;;  %v8522_v52 = vcombine.low %v8020_v31, %v8021_v50  ;;  %v6925_v22 = vrot.slane %v6911_v49, %v12132_v63  ;;  %v6926_v34 = vcombine.high %v6918_v41, %v6918_v41  ;;  %v13336_v50 = vld [vmem:[#allocation37_spill] sm:$0xff]  ;;  %v10149_v18 = vpop.f32.mrf.mxu1 }
 0x309   : > { %v8553_v25 = vrot.slane %v8539_v51, %v12132_v63  ;;  %v8519_v40 = vrot.slane %v8505_v20, %v12132_v63  ;;  %v5820_v59 = vadd.f32 %v5751_v53, %v13334_v35  ;;  %v8529_v2 = vrot.slane %v8521_v60, %v12132_v63  ;;  %v6299_v51 = vpop.f32.mrf.mxu0 }
 0x30a   : > { %v8536_v38 = vrot.slane %v8522_v52, %v12132_v63  ;;  %v8036_v43 = vadd.f32 %v12491_v58, %v6926_v34  ;;  %v13335_v29 = vcombine.high %v12491_v58, %v12491_v58  ;;  %v6877_v4 = vcombine.high %v6354_v28, %v6354_v28  ;;  %v13338_v58 = vld [vmem:[#allocation48_spill] sm:$0xff] }
 0x30b   : > { %v8554_v36 = vcombine.low %v8546_v44, %v8553_v25  ;;  %v8520_v11 = vcombine.low %v8512_v32, %v8519_v40  ;;  %v5825_v6 = vadd.f32 %v10148_v14, %v13336_v50  ;;  %v5823_v17 = vadd.f32 %v5764_v12, %v13337_v16 }
 0x30c   : > { %v8037_v37 = vadd.f32 %v13335_v29, %v6925_v22  ;;  %v6884_v53 = vrot.slane %v6354_v28, %v12132_v63  ;;  %v6357_v19 = vadd.f32 %v10197_v56, %v5822_v46  ;;  %v8563_v44 = vrot.slane %v8555_v33, %v12132_v63 }
 0x30d   : > { %8794 = vst [vmem:[%s12636_s28 + $0xa0] sm:$0xff] %v8554_v36  ;;  %8792 = vst [vmem:[%s12636_s28 + $0x90] sm:$0xff] %v8520_v11  ;;  %v8537_v27 = vcombine.low %v8529_v2, %v8536_v38  ;;  %v6891_v8 = vrot.slane %v6877_v4, %v12132_v63  ;;  %v6355_v9 = vadd.f32 %v6286_v24, %v5820_v59  ;;  %v10201_v11 = vpop.f32.mrf.mxu0  ;;  %v13345_v2 = vld [vmem:[#allocation44_spill] sm:$0xff] }
 0x30e   : > { %v13339_v23 = vcombine.high %v13338_v58, %v13338_v58  ;;  %v6892_v54 = vcombine.high %v6884_v53, %v6884_v53  ;;  %v6927_v55 = vcombine.high %v6357_v19, %v6357_v19  ;;  %v6934_v61 = vrot.slane %v6357_v19, %v12132_v63 }
 0x30f   : > { %8793 = vst [vmem:[%s12636_s28 + $0x98] sm:$0xff] %v8537_v27  ;;  %v8590_v5 = vcombine.low %v8036_v43, %v8037_v37  ;;  %v6893_v30 = vcombine.high %v6891_v8, %v6891_v8  ;;  %v6894_v14 = vcombine.high %v6355_v9, %v6355_v9  ;;  %v6901_v46 = vrot.slane %v6355_v9, %v12132_v63  ;;  %v12990_v8 = vld [vmem:[%s12120_s25 + $0xe8] sm:$0xff] }
 0x310   : > { %v8035_v45 = vadd.f32 %v13339_v23, %v6918_v41  ;;  %v8028_v56 = vadd.f32 %v12487_v1, %v6884_v53  ;;  %v13340_v57 = vcombine.high %v12487_v1, %v12487_v1  ;;  %v6941_v15 = vrot.slane %v6927_v55, %v12132_v63  ;;  %v6302_v23 = vpop.f32.mrf.mxu0 }
 0x311   : > { %v6942_v21 = vcombine.high %v6934_v61, %v6934_v61  ;;  %v8030_v20 = vadd.f32 %v12494_v47, %v6893_v30  ;;  %v6908_v31 = vrot.slane %v6894_v14, %v12132_v63  ;;  %v6909_v60 = vcombine.high %v6901_v46, %v6901_v46 }
 0x312   : > { %v8029_v0 = vadd.f32 %v13340_v57, %v6892_v54  ;;  %v13341_v49 = vcombine.high %v12494_v47, %v12494_v47  ;;  %v6943_v25 = vcombine.high %v6941_v15, %v6941_v15  ;;  %v8038_v40 = vadd.f32 %v12497_v3, %v6934_v61  ;;  %v13346_v57 = vld [vmem:[#allocation51_spill] sm:$0xff] }
 0x313   : > { %v13342_v1 = vcombine.high %v12497_v3, %v12497_v3  ;;  %v6910_v24 = vcombine.high %v6908_v31, %v6908_v31  ;;  %v8032_v33 = vadd.f32 %v12508_v26, %v6909_v60  ;;  %v13343_v52 = vcombine.high %v12508_v26, %v12508_v26  ;;  %v5767_v3 = vpop.f32.mrf.mxu1 }
 0x314   : > { %v8031_v41 = vadd.f32 %v13341_v49, %v6901_v46  ;;  %v8556_v32 = vcombine.low %v8028_v56, %v8029_v0  ;;  %v8040_v47 = vadd.f32 %v12505_v48, %v6941_v15  ;;  %v13344_v36 = vcombine.high %v12505_v48, %v12505_v48 }
 0x315   : > { %v8039_v28 = vadd.f32 %v13342_v1, %v6942_v21  ;;  %v8033_v22 = vadd.f32 %v13343_v52, %v6908_v31  ;;  %v5826_v38 = vadd.f32 %v10149_v18, %v13345_v2  ;;  %v8034_v43 = vadd.f32 %v13338_v58, %v6910_v24  ;;  %v13348_v21 = vld [vmem:[#allocation46_spill] sm:$0xff] }
 0x316   : > { %v8572_v34 = vcombine.low %v8030_v20, %v8031_v41  ;;  %v8570_v12 = vrot.slane %v8556_v32, %v12132_v63  ;;  %v8041_v35 = vadd.f32 %v13344_v36, %v6943_v25  ;;  %v6360_v29 = vadd.f32 %v10200_v42, %v5825_v6  ;;  %v10152_v42 = vpop.f32.mrf.mxu1  ;;  %v10204_v41 = vpop.f32.mrf.mxu0  ;;  %v13349_v32 = vld [vmem:[#allocation49_spill] sm:$0xff] }
 0x317   : > { %v8606_v59 = vcombine.low %v8038_v40, %v8039_v28  ;;  %v8573_v26 = vcombine.low %v8032_v33, %v8033_v22  ;;  %v8604_v37 = vrot.slane %v8590_v5, %v12132_v63  ;;  %v8589_v53 = vcombine.low %v8034_v43, %v8035_v45 }
 0x318   : > { %v8571_v4 = vcombine.low %v8563_v44, %v8570_v12  ;;  %v8607_v50 = vcombine.low %v8040_v47, %v8041_v35  ;;  %v8580_v16 = vrot.slane %v8572_v34, %v12132_v63  ;;  %v6978_v19 = vcombine.high %v6360_v29, %v6360_v29  ;;  %v5780_v20 = vpop.f32.mrf.mxu1 }
 0x319   : > { %v8587_v48 = vrot.slane %v8573_v26, %v12132_v63  ;;  %v12987_v27 = vrot.slane %v6360_v29, %v12132_v63  ;;  %v8614_v9 = vrot.slane %v8606_v59, %v12132_v63  ;;  %v6358_v44 = vadd.f32 %v6299_v51, %v5823_v17 }
 0x31a   : > { %8795 = vst [vmem:[%s12636_s28 + $0xa8] sm:$0xff] %v8571_v4  ;;  %v8621_v6 = vrot.slane %v8607_v50, %v12132_v63  ;;  %v6361_v58 = vadd.f32 %v10201_v11, %v5826_v38  ;;  %v8597_v45 = vrot.slane %v8589_v53, %v12132_v63  ;;  %v6992_v55 = vrot.slane %v6978_v19, %v12132_v63  ;;  %v13353_v11 = vld [vmem:[#allocation54_spill] sm:$0xff]  ;;  %v10153_v26 = vpop.f32.mrf.mxu1  ;;  %v13355_v53 = vld [vmem:[#allocation56_spill] sm:$0xff] }
 0x31b   : > { %v8588_v54 = vcombine.low %v8580_v16, %v8587_v48  ;;  %v6993_v61 = vcombine.high %v12987_v27, %v12987_v27  ;;  %v6944_v30 = vcombine.high %v6358_v44, %v6358_v44  ;;  %v6951_v14 = vrot.slane %v6358_v44, %v12132_v63  ;;  %v6315_v16 = vpop.f32.mrf.mxu0 }
 0x31c   : > { %v8622_v5 = vcombine.low %v8614_v9, %v8621_v6  ;;  %v13002_v46 = vrot.slane %v12990_v8, %v12132_v63  ;;  %v8605_v17 = vcombine.low %v8597_v45, %v8604_v37  ;;  %v6994_v56 = vcombine.high %v6992_v55, %v6992_v55 }
 0x31d   : > { %8796 = vst [vmem:[%s12636_s28 + $0xb0] sm:$0xff] %v8588_v54  ;;  %v8050_v0 = vadd.f32 %v13346_v57, %v6993_v61  ;;  %v13347_v18 = vcombine.high %v13346_v57, %v13346_v57  ;;  %v5824_v51 = vadd.f32 %v5767_v3, %v13348_v21  ;;  %v6958_v31 = vrot.slane %v6944_v30, %v12132_v63 }
 0x31e   : > { %8798 = vst [vmem:[%s12636_s28 + $0xc0] sm:$0xff] %v8622_v5  ;;  %v6959_v60 = vcombine.high %v6951_v14, %v6951_v14  ;;  %v6995_v49 = vcombine.high %v6361_v58, %v6361_v58  ;;  %8797 = vst [vmem:[%s12636_s28 + $0xb8] sm:$0xff] %v8605_v17  ;;  %v5829_v25 = vadd.f32 %v10152_v42, %v13349_v32  ;;  %v13357_v17 = vld [vmem:[#allocation57_spill] sm:$0xff] }
 0x31f   : > { %v8051_v15 = vadd.f32 %v13347_v18, %v6992_v55  ;;  %v8042_v40 = vadd.f32 %v12526_v62, %v6951_v14  ;;  %v7002_v1 = vrot.slane %v6361_v58, %v12132_v63  ;;  %v8052_v28 = vadd.f32 %v12552_v10, %v6994_v56  ;;  %v5783_v55 = vpop.f32.mrf.mxu1  ;;  %v10205_v18 = vpop.f32.mrf.mxu0 }
 0x320   : > { %v6960_v33 = vcombine.high %v6958_v31, %v6958_v31  ;;  %v13350_v52 = vcombine.high %v12526_v62, %v12526_v62  ;;  %v7009_v34 = vrot.slane %v6995_v49, %v12132_v63  ;;  %v13351_v12 = vcombine.high %v12552_v10, %v12552_v10 }
 0x321   : > { %v8657_v24 = vcombine.low %v8050_v0, %v8051_v15  ;;  %v6359_v36 = vadd.f32 %v6302_v23, %v5824_v51  ;;  %v6364_v35 = vadd.f32 %v10204_v41, %v5829_v25  ;;  %v13352_v59 = vcombine.high %v12589_v7, %v12589_v7  ;;  %v13359_v15 = vld [vmem:[#allocation53_spill] sm:$0xff]  ;;  %v13362_v41 = vld [vmem:[#allocation52_spill] sm:$0xff] }
 0x322   : > { %v8043_v22 = vadd.f32 %v13350_v52, %v6959_v60  ;;  %v8053_v47 = vadd.f32 %v13351_v12, %v7002_v1  ;;  %v8044_v2 = vadd.f32 %v13353_v11, %v6958_v31  ;;  %v13354_v62 = vcombine.high %v13353_v11, %v13353_v11  ;;  %v13361_v31 = vld [vmem:[#allocation50_spill] sm:$0xff]  ;;  %v7237_v25 = vld [vmem:[%s12120_s25 + $0xf8] sm:$0xff] }
 0x323   : > { %v13028_v3 = vrot.slane %v13352_v59, %v12132_v63  ;;  %v7010_v29 = vcombine.high %v7009_v34, %v7009_v34  ;;  %v6961_v10 = vcombine.high %v6359_v36, %v6359_v36  ;;  %v6968_v4 = vrot.slane %v6359_v36, %v12132_v63  ;;  %v13363_v1 = vld [vmem:[#allocation55_spill] sm:$0xff] }
 0x324   : > { %v8045_v38 = vadd.f32 %v13354_v62, %v6960_v33  ;;  %v8623_v43 = vcombine.low %v8042_v40, %v8043_v22  ;;  %v8658_v37 = vcombine.low %v8052_v28, %v8053_v47  ;;  %v7045_v50 = vcombine.high %v6364_v35, %v6364_v35 }
 0x325   : > { %v8665_v48 = vrot.slane %v8657_v24, %v12132_v63  ;;  %v8054_v19 = vadd.f32 %v13355_v53, %v7009_v34  ;;  %v7795_v9 = vcombine.high %v12649_v13, %v12649_v13  ;;  %v13356_v6 = vcombine.high %v13355_v53, %v13355_v53 }
 0x326   : > { %v8624_v7 = vcombine.low %v8044_v2, %v8045_v38  ;;  %v8672_v44 = vrot.slane %v8658_v37, %v12132_v63  ;;  %v6975_v58 = vrot.slane %v6961_v10, %v12132_v63  ;;  %v6976_v23 = vcombine.high %v6968_v4, %v6968_v4 }
 0x327   : > { %v8055_v42 = vadd.f32 %v13356_v6, %v7010_v29  ;;  %v8631_v54 = vrot.slane %v8623_v43, %v12132_v63  ;;  %v13047_v61 = vrot.slane %v6364_v35, %v12132_v63  ;;  %v7059_v5 = vrot.slane %v7045_v50, %v12132_v63  ;;  %v6318_v50 = vpop.f32.mrf.mxu0 }
 0x328   : > { %v8638_v45 = vrot.slane %v8624_v7, %v12132_v63  ;;  %v8673_v30 = vcombine.low %v8665_v48, %v8672_v44  ;;  %v6977_v14 = vcombine.high %v6975_v58, %v6975_v58  ;;  %v8046_v56 = vadd.f32 %v13357_v17, %v6976_v23 }
 0x329   : > { %v13358_v57 = vcombine.high %v13357_v17, %v13357_v17  ;;  %v13360_v21 = vcombine.high %v13359_v15, %v13359_v15  ;;  %v5827_v60 = vadd.f32 %v5780_v20, %v13361_v31  ;;  %v5830_v32 = vadd.f32 %v10153_v26, %v13362_v41 }
 0x32a   : > { %v8639_v49 = vcombine.low %v8631_v54, %v8638_v45  ;;  %v8674_v40 = vcombine.low %v8054_v19, %v8055_v42  ;;  %8801 = vst [vmem:[%s12636_s28 + $0xd8] sm:$0xff] %v8673_v30  ;;  %v5828_v28 = vadd.f32 %v5783_v55, %v13363_v1  ;;  %v8048_v24 = vadd.f32 %v13359_v15, %v6977_v14 }
 0x32b   : > { %v8047_v0 = vadd.f32 %v13358_v57, %v6975_v58  ;;  %v8049_v51 = vadd.f32 %v13360_v21, %v12987_v27  ;;  %v7060_v52 = vcombine.high %v13047_v61, %v13047_v61  ;;  %v7796_v27 = vcombine.high %v13028_v3, %v13028_v3 }
 0x32c   : > { %8799 = vst [vmem:[%s12636_s28 + $0xc8] sm:$0xff] %v8639_v49  ;;  %v6362_v22 = vadd.f32 %v6315_v16, %v5827_v60  ;;  %v6365_v20 = vadd.f32 %v10205_v18, %v5830_v32  ;;  %v7061_v12 = vcombine.high %v7059_v5, %v7059_v5  ;;  %v7762_v47 = vcombine.high %v12751_v39, %v12751_v39 }
 0x32d   : > { %v8640_v33 = vcombine.low %v8046_v56, %v8047_v0  ;;  %v8641_v34 = vcombine.low %v8048_v24, %v8049_v51  ;;  %v7797_v36 = vcombine.high %v7237_v25, %v7237_v25  ;;  %v7804_v43 = vrot.slane %v7237_v25, %v12132_v63 }
 0x32e   : > { %v7011_v35 = vcombine.high %v6362_v22, %v6362_v22  ;;  %v7018_v59 = vrot.slane %v6362_v22, %v12132_v63  ;;  %v7062_v11 = vcombine.high %v6365_v20, %v6365_v20  ;;  %v7069_v2 = vrot.slane %v6365_v20, %v12132_v63 }
 0x32f   : > { %v8648_v62 = vrot.slane %v8640_v33, %v12132_v63  ;;  %v8655_v38 = vrot.slane %v8641_v34, %v12132_v63  ;;  %v7811_v26 = vrot.slane %v7797_v36, %v12132_v63  ;;  %v7778_v10 = vcombine.high %v13002_v46, %v13002_v46 }
 0x330   : > { %v7025_v29 = vrot.slane %v7011_v35, %v12132_v63  ;;  %v7026_v37 = vcombine.high %v7018_v59, %v7018_v59  ;;  %v7076_v4 = vrot.slane %v7062_v11, %v12132_v63  ;;  %v7077_v48 = vcombine.high %v7069_v2, %v7069_v2 }
 0x331   : > { %v8656_v16 = vcombine.low %v8648_v62, %v8655_v38  ;;  %v7812_v7 = vcombine.high %v7804_v43, %v7804_v43  ;;  %v7813_v53 = vcombine.high %v7811_v26, %v7811_v26  ;;  %v8056_v6 = vadd.f32 %v12751_v39, %v7018_v59 }
 0x332   : > { %v7027_v19 = vcombine.high %v7025_v29, %v7025_v29  ;;  %v8057_v42 = vadd.f32 %v7762_v47, %v7026_v37  ;;  %v8066_v44 = vadd.f32 %v7804_v43, %v7061_v12  ;;  %v8068_v23 = vadd.f32 %v7811_v26, %v7077_v48 }
 0x333   : > { %8800 = vst [vmem:[%s12636_s28 + $0xd0] sm:$0xff] %v8656_v16  ;;  %v8067_v58 = vadd.f32 %v7812_v7, %v7069_v2  ;;  %v8069_v54 = vadd.f32 %v7813_v53, %v7076_v4  ;;  %v6363_v45 = vadd.f32 %v6318_v50, %v5828_v28  ;;  %v8682_v55 = vrot.slane %v8674_v40, %v12132_v63 }
 0x334   : > { %v8064_v30 = vadd.f32 %v13028_v3, %v7060_v52  ;;  %v8675_v14 = vcombine.low %v8056_v6, %v8057_v42  ;;  %v7763_v17 = vcombine.high %v12990_v8, %v12990_v8  ;;  %v8065_v18 = vadd.f32 %v7796_v27, %v7059_v5 }
 0x335   : > { %v8725_v56 = vcombine.low %v8066_v44, %v8067_v58  ;;  %v8726_v57 = vcombine.low %v8068_v23, %v8069_v54  ;;  %v7028_v0 = vcombine.high %v6363_v45, %v6363_v45  ;;  %v7035_v39 = vrot.slane %v6363_v45, %v12132_v63 }
 0x336   : > { %v8059_v15 = vadd.f32 %v7778_v10, %v7027_v19  ;;  %v8689_v21 = vrot.slane %v8675_v14, %v12132_v63  ;;  %v7777_v51 = vrot.slane %v7763_v17, %v12132_v63  ;;  %v8058_v49 = vadd.f32 %v13002_v46, %v7025_v29 }
 0x337   : > { %v8733_v31 = vrot.slane %v8725_v56, %v12132_v63  ;;  %v8740_v3 = vrot.slane %v8726_v57, %v12132_v63  ;;  %v7042_v60 = vrot.slane %v7028_v0, %v12132_v63  ;;  %v7043_v8 = vcombine.high %v7035_v39, %v7035_v39 }
 0x338   : > { %v8690_v41 = vcombine.low %v8682_v55, %v8689_v21  ;;  %v7779_v32 = vcombine.high %v7777_v51, %v7777_v51  ;;  %v8691_v5 = vcombine.low %v8058_v49, %v8059_v15  ;;  %v8060_v1 = vadd.f32 %v7777_v51, %v7035_v39 }
 0x339   : > { %v8741_v25 = vcombine.low %v8733_v31, %v8740_v3  ;;  %v7044_v40 = vcombine.high %v7042_v60, %v7042_v60  ;;  %v8063_v24 = vadd.f32 %v7795_v9, %v13047_v61  ;;  %v8709_v33 = vcombine.low %v8064_v30, %v8065_v18 }
 0x33a   : > { %8802 = vst [vmem:[%s12636_s28 + $0xe0] sm:$0xff] %v8690_v41  ;;  %v8061_v28 = vadd.f32 %v7779_v32, %v7043_v8  ;;  %v8699_v22 = vrot.slane %v8691_v5, %v12132_v63 }
 0x33b   : > { %8805 = vst [vmem:[%s12636_s28 + $0xf8] sm:$0xff] %v8741_v25  ;;  %v8062_v52 = vadd.f32 %v12649_v13, %v7044_v40  ;;  %v8723_v34 = vrot.slane %v8709_v33, %v12132_v63 }
 0x33c   : > { %v8692_v46 = vcombine.low %v8060_v1, %v8061_v28 }
 0x33d   : > { %v8708_v27 = vcombine.low %v8062_v52, %v8063_v24 }
 0x33e   : > { %v8706_v20 = vrot.slane %v8692_v46, %v12132_v63 }
 0x33f   : > { %v8716_v12 = vrot.slane %v8708_v27, %v12132_v63 }
 0x340   : > { %v8707_v47 = vcombine.low %v8699_v22, %v8706_v20 }
 0x341   : > { %v8724_v36 = vcombine.low %v8716_v12, %v8723_v34 }
 0x342   : > { %8803 = vst [vmem:[%s12636_s28 + $0xe8] sm:$0xff] %v8707_v47 }
 0x343   : > { %8804 = vst [vmem:[%s12636_s28 + $0xf0] sm:$0xff] %v8724_v36 }
 0x344 PF: > { %s16_s23 = sadd.s32 1, %s10546_s23   ;;  %s13364_s21 = smov %s10542_s22 }
 0x345   : > { %p13_p5 = scmp.ge.s32.totalorder %s16_s23, 4   ;;  %s13365_s22 = smov %s13367_s24 }
 0x347   :  { %15 = sbr.rel (!%p13_p5) target bundleno = 2 (0x2), region = 92 }

// kernel: wide_basic_block_forward.2
= control target key start
LH: loop header
LB: loop body
LE: loop exit
PB: predicated region body
PF: predicated region fallthrough
CT: control target
= control target key end

     0   :  { %s10666_s24 = smov 0   ;;  %s10668_s25 = smov 0   ;;  %s12841_s0 = inlined_call_operand.vmem [shape: f32[2,324,128], index: 0, kind: input, shape index: {}]   ;;  %s12842_s1 = inlined_call_operand.vmem [shape: f32[324,1], index: 1, kind: input, shape index: {}]   ;;  %s12843_s2 = inlined_call_operand.vmem [shape: f32[1,128], index: 2, kind: input, shape index: {}]   ;;  %s12844_s3 = inlined_call_operand.vmem [shape: f32[1,128], index: 3, kind: input, shape index: {}]   ;;  %s12845_s4 = inlined_call_operand.vmem [shape: bf16[9,128,128], index: 4, kind: input, shape index: {}]   ;;  %s12846_s5 = inlined_call_operand.vmem [shape: f32[2,18,18,128], index: 5, kind: output, shape index: {0}]   ;;  %s12847_s6 = inlined_call_operand.vmem [shape: f32[2,8,128], index: 6, kind: output, shape index: {1}]   ;;  %s12848_s7 = inlined_call_operand.vmem [shape: f32[2,8,128], index: 7, kind: output, shape index: {2}]  }
   0x1   :  { %s10670_s26 = smov 0  }
   0x2 LB: > { %s30_s27 = sadd.s32 1, %s10617_s25  ;;  %p8963_p0 = scmp.ge.s32.totalorder %s10621_s26, 1  ;;  %s10621_s26 = sphi %s10670_s26, %s18_s26   ;;  %s10617_s25 = sphi %s10668_s25, %s12875_s25   ;;  %s10613_s24 = sphi %s10666_s24, %s12874_s24  }
   0x3   : > { %p32_p1 = scmp.ge.s32.totalorder %s30_s27, 2  ;;  %p269_p2 = scmp.lt.s32.totalorder %s10621_s26, 3 }
   0x5   : > { %s12877_s27 = smov (%p32_p1, %s30_s27), 0  ;;  %p270_p3 = pnand %p8963_p0, %p269_p2 }
   0x7   : > { %273 = sbr.rel (%p270_p3) target bundleno = 877 (0x36d), region = 40 }
   0xc   : > { %v636_v0 = vld [vmem:[%s12842_s1 + $0x90] sm:$0xff]  ;;  %v634_v1 = vld [vmem:[%s12842_s1 + $0x80] sm:$0xff]  ;;  %v10623_v2 = vmov 0   ;;  %v637_v3 = vld [vmem:[%s12842_s1 + $0x98] sm:$0xff]  ;;  %p322_p4 = scmp.lt.s32.totalorder %s10613_s24, 1 }
   0xd   : > { %10357 = vset.pattern.permute.xlu1 %v10623_v2  ;;  %10356 = vset.pattern.permute.xlu0 %v10623_v2  ;;  %v635_v4 = vld [vmem:[%s12842_s1 + $0x88] sm:$0xff]  ;;  %v638_v6 = vld [vmem:[%s12842_s1 + $0xa0] sm:$0xff]  ;;  %v641_v7 = vld [vmem:[%s12842_s1 + $0xb8] sm:$0xff] }
   0xe   : > { %751 = vperm.xlu1 %10357, %v636_v0   ;;  %741 = vperm.xlu0 %10356, %v634_v1   ;;  %v639_v5 = vld [vmem:[%s12842_s1 + $0xa8] sm:$0xff]  ;;  %v640_v8 = vld [vmem:[%s12842_s1 + $0xb0] sm:$0xff]  ;;  %v618_v10 = vld [vmem:[%s12842_s1] sm:$0xff]  ;;  %s12879_s24 = smov (!%p322_p4, %s10613_s24), 1 }
   0xf   : > { %v619_v9 = vld [vmem:[%s12842_s1 + $0x8] sm:$0xff]  ;;  %v10358_v11 = vld [vmem:[%s12845_s4 + $0x38] sm:$0xff]   ;;  %v10359_v12 = vld [vmem:[%s12845_s4 + $0x30] sm:$0xff]   ;;  %s10327_s20 = smul.u32 328, %s12879_s24  ;;  %s8966_s18 = sshll.u32 %s12879_s24, 3 }
  0x10   : > { %10311 = vmatprep.subr.bf16.mxu1 %v10358_v11  ;;  %9843 = vmatprep.subr.bf16.mxu0 %v10358_v11  ;;  %v621_v13 = vld [vmem:[%s12842_s1 + $0x18] sm:$0xff]  ;;  %v620_v14 = vld [vmem:[%s12842_s1 + $0x10] sm:$0xff]  ;;  %v10360_v15 = vld [vmem:[%s12845_s4 + $0x28] sm:$0xff]   ;;  %s10328_s14 = smul.u32 432, %s12879_s24  ;;  %s352_s22 = scalar_lea.vmem %s12848_s7, %s8966_s18 }
  0x11   : > { %10319 = vmatpush3.bf16.msra.mxu1 %v10358_v11  ;;  %9844 = vmatpush3.bf16.msra.mxu0 %v10358_v11  ;;  %v643_v16 = vld [vmem:[%s12842_s1 + $0xc8] sm:$0xff]  ;;  %v642_v17 = vld [vmem:[%s12842_s1 + $0xc0] sm:$0xff]  ;;  %v645_v19 = vld [vmem:[%s12842_s1 + $0xd8] sm:$0xff]  ;;  %s10808_s8 = scalar_lea.vmem %s12841_s0, %s10327_s20 }
  0x12   : > { %756 = vperm.xlu1 %10357, %v637_v3   ;;  %746 = vperm.xlu0 %10356, %v635_v4   ;;  %v10361_v18 = vld [vmem:[%s12845_s4 + $0x20] sm:$0xff]   ;;  %v644_v20 = vld [vmem:[%s12842_s1 + $0xd0] sm:$0xff]  ;;  %v10362_v21 = vld [vmem:[%s12845_s4 + $0x18] sm:$0xff]   ;;  %s12309_s17 = scalar_lea.vmem %s12846_s5, %s10328_s14 }
  0x13   : > { %10312 = vmatprep.subr.bf16.mxu1 %v10359_v12  ;;  %9845 = vmatprep.subr.bf16.mxu0 %v10359_v12  ;;  %v623_v22 = vld [vmem:[%s12842_s1 + $0x28] sm:$0xff]  ;;  %v622_v23 = vld [vmem:[%s12842_s1 + $0x20] sm:$0xff]  ;;  %v10363_v24 = vld [vmem:[%s12845_s4 + $0x10] sm:$0xff]  }
  0x14   : > { %v625_v25 = vld [vmem:[%s12842_s1 + $0x38] sm:$0xff]  ;;  %v624_v26 = vld [vmem:[%s12842_s1 + $0x30] sm:$0xff]  ;;  %v10364_v27 = vld [vmem:[%s12845_s4 + $0x8] sm:$0xff]  }
  0x15   : > { %10320 = vmatpush3.bf16.msra.mxu1 %v10359_v12  ;;  %9846 = vmatpush3.bf16.msra.mxu0 %v10359_v12  ;;  %v647_v28 = vld [vmem:[%s12842_s1 + $0xe8] sm:$0xff]  ;;  %v646_v29 = vld [vmem:[%s12842_s1 + $0xe0] sm:$0xff]  ;;  %v649_v31 = vld [vmem:[%s12842_s1 + $0xf8] sm:$0xff] }
  0x16   : > { %766 = vperm.xlu1 %10357, %v639_v5   ;;  %761 = vperm.xlu0 %10356, %v638_v6   ;;  %v10365_v30 = vld [vmem:[%s12845_s4] sm:$0xff]   ;;  %v648_v32 = vld [vmem:[%s12842_s1 + $0xf0] sm:$0xff]  ;;  %v627_v33 = vld [vmem:[%s12842_s1 + $0x48] sm:$0xff] }
  0x17   : > { %10313 = vmatprep.subr.bf16.mxu1 %v10360_v15  ;;  %9847 = vmatprep.subr.bf16.mxu0 %v10360_v15  ;;  %v626_v34 = vld [vmem:[%s12842_s1 + $0x40] sm:$0xff]  ;;  %v629_v35 = vld [vmem:[%s12842_s1 + $0x58] sm:$0xff]  ;;  %v628_v36 = vld [vmem:[%s12842_s1 + $0x50] sm:$0xff] }
  0x18   : > { %v651_v37 = vld [vmem:[%s12842_s1 + $0x108] sm:$0xff]  ;;  %v650_v38 = vld [vmem:[%s12842_s1 + $0x100] sm:$0xff]  ;;  %v653_v39 = vld [vmem:[%s12842_s1 + $0x118] sm:$0xff] }
  0x19   : > { %10321 = vmatpush3.bf16.msra.mxu1 %v10360_v15  ;;  %9848 = vmatpush3.bf16.msra.mxu0 %v10360_v15  ;;  %v652_v40 = vld [vmem:[%s12842_s1 + $0x110] sm:$0xff]  ;;  %v10820_v42 = vld [vmem:[%s12843_s2] ss:$0 sm:$0xff]  ;;  %v631_v43 = vld [vmem:[%s12842_s1 + $0x68] sm:$0xff] }
  0x1a   : > { %776 = vperm.xlu1 %10357, %v641_v7   ;;  %771 = vperm.xlu0 %10356, %v640_v8   ;;  %v376_v41 = vld [vmem:[%s10808_s8 + $0x90] sm:$0xff]  ;;  %v630_v44 = vld [vmem:[%s12842_s1 + $0x60] sm:$0xff]  ;;  %v377_v48 = vld [vmem:[%s10808_s8 + $0x98] sm:$0xff] }
  0x1b   : > { %10314 = vmatprep.subr.bf16.mxu1 %v10361_v18  ;;  %9849 = vmatprep.subr.bf16.mxu0 %v10361_v18  ;;  %v424_v45 = vmul.f32 %v10820_v42, %v376_v41  ;;  %v10832_v46 = vld [vmem:[%s12844_s3] ss:$0 sm:$0xff]  ;;  %v375_v49 = vld [vmem:[%s10808_s8 + $0x88] sm:$0xff]  ;;  %v633_v50 = vld [vmem:[%s12842_s1 + $0x78] sm:$0xff]  ;;  %v425_v54 = vmul.f32 %v10820_v42, %v377_v48 }
  0x1c   : > { %v374_v47 = vld [vmem:[%s10808_s8 + $0x80] sm:$0xff]  ;;  %v632_v51 = vld [vmem:[%s12842_s1 + $0x70] sm:$0xff]  ;;  %v423_v55 = vmul.f32 %v10820_v42, %v375_v49  ;;  %v655_v56 = vld [vmem:[%s12842_s1 + $0x128] sm:$0xff] }
  0x1d   : > { %10322 = vmatpush3.bf16.msra.mxu1 %v10361_v18  ;;  %9850 = vmatpush3.bf16.msra.mxu0 %v10361_v18  ;;  %v10844_v52 = vadd.f32 %v10832_v46, %v424_v45  ;;  %v422_v53 = vmul.f32 %v10820_v42, %v374_v47  ;;  %v654_v57 = vld [vmem:[%s12842_s1 + $0x120] sm:$0xff]  ;;  %v379_v58 = vld [vmem:[%s10808_s8 + $0xa8] sm:$0xff]  ;;  %v381_v61 = vld [vmem:[%s10808_s8 + $0xb8] sm:$0xff]  ;;  %v10865_v63 = vadd.f32 %v10832_v46, %v425_v54 }
  0x1e   : > { %666 = vperm.xlu1 %10357, %v619_v9   ;;  %661 = vperm.xlu0 %10356, %v618_v10   ;;  %v378_v60 = vld [vmem:[%s10808_s8 + $0xa0] sm:$0xff]  ;;  %v380_v0 = vld [vmem:[%s10808_s8 + $0xb0] sm:$0xff]  ;;  %v359_v1 = vld [vmem:[%s10808_s8 + $0x8] sm:$0xff]  ;;  %v10875_v3 = vadd.f32 %v10832_v46, %v423_v55  ;;  %v427_v6 = vmul.f32 %v10820_v42, %v379_v58  ;;  %v429_v8 = vmul.f32 %v10820_v42, %v381_v61 }
  0x1f   : > { %10315 = vmatprep.subr.bf16.mxu1 %v10362_v21  ;;  %9851 = vmatprep.subr.bf16.mxu0 %v10362_v21  ;;  %v10857_v59 = vmul.f32 0.1, %v10844_v52  ;;  %v10862_v62 = vadd.f32 %v10832_v46, %v422_v53  ;;  %v10872_v2 = vld [vmem:[%s12845_s4 + $0x78] sm:$0xff]   ;;  %v656_v5 = vld [vmem:[%s12842_s1 + $0x130] sm:$0xff]  ;;  %v426_v7 = vmul.f32 %v10820_v42, %v378_v60  ;;  %v555_v10 = vmul.f32 0.1, %v10865_v63 }
  0x20   : > { %v657_v4 = vld [vmem:[%s12842_s1 + $0x138] sm:$0xff]  ;;  %v553_v11 = vmul.f32 0.1, %v10875_v3  ;;  %v428_v12 = vmul.f32 %v10820_v42, %v380_v0  ;;  %vm513_vm0 = vcmp.ge.f32.partialorder %v10844_v52, 0.0  ;;  %vm514_vm2 = vcmp.ge.f32.partialorder %v10865_v63, 0.0  ;;  %v362_v47 = vld [vmem:[%s10808_s8 + $0x20] sm:$0xff] }
  0x21   : > { %10323 = vmatpush3.bf16.msra.mxu1 %v10362_v21  ;;  %9852 = vmatpush3.bf16.msra.mxu0 %v10362_v21  ;;  %v552_v9 = vmul.f32 0.1, %v10862_v62  ;;  %v361_v15 = vld [vmem:[%s10808_s8 + $0x18] sm:$0xff]  ;;  %v474_v18 = vadd.f32 %v10832_v46, %v426_v7  ;;  %vm511_vm1 = vcmp.ge.f32.partialorder %v10862_v62, 0.0  ;;  %vm512_vm3 = vcmp.ge.f32.partialorder %v10875_v3, 0.0 }
  0x22   : > { %676 = vperm.xlu1 %10357, %v621_v13   ;;  %671 = vperm.xlu0 %10356, %v620_v14   ;;  %v407_v13 = vmul.f32 %v10820_v42, %v359_v1  ;;  %v358_v14 = vld [vmem:[%s10808_s8] sm:$0xff]  ;;  %v476_v21 = vadd.f32 %v10832_v46, %v428_v12  ;;  %v10929_v48 = vsel %vm513_vm0, %v10844_v52, %v10857_v59 }
  0x23   : > { %10316 = vmatprep.subr.bf16.mxu1 %v10363_v24  ;;  %9853 = vmatprep.subr.bf16.mxu0 %v10363_v24  ;;  %vm515_vm5 = vcmp.ge.f32.partialorder %v474_v18, 0.0  ;;  %v10934_v49 = vsel %vm511_vm1, %v10862_v62, %v552_v9  ;;  %v10941_v53 = vsel %vm514_vm2, %v10865_v63, %v555_v10  ;;  %v10946_v52 = vsel %vm512_vm3, %v10875_v3, %v553_v11  ;;  %v364_v3 = vld [vmem:[%s10808_s8 + $0x30] sm:$0xff]  ;;  %v386_v12 = vld [vmem:[%s10808_s8 + $0xe0] sm:$0xff] }
  0x24   : > { %vm517_vm7 = vcmp.ge.f32.partialorder %v476_v21, 0.0 }
  0x25   : > { %10324 = vmatpush3.bf16.msra.mxu1 %v10363_v24  ;;  %9854 = vmatpush3.bf16.msra.mxu0 %v10363_v24  ;;  %v556_v24 = vmul.f32 0.1, %v474_v18 }
  0x26   : > { %786 = vperm.xlu1 %10357, %v643_v16   ;;  %781 = vperm.xlu0 %10356, %v642_v17   ;;  %v658_v16 = vld [vmem:[%s12842_s1 + $0x140] sm:$0xf]  ;;  %v475_v17 = vadd.f32 %v10832_v46, %v427_v6 }
  0x27   : > { %10317 = vmatprep.subr.bf16.mxu1 %v10364_v27  ;;  %9855 = vmatprep.subr.bf16.mxu0 %v10364_v27  ;;  %v10955_v59 = vsel %vm515_vm5, %v474_v18, %v556_v24 }
  0x28   : > { %vm516_vm4 = vcmp.ge.f32.partialorder %v475_v17, 0.0 }
  0x29   : > { %10325 = vmatpush3.bf16.msra.mxu1 %v10364_v27  ;;  %9856 = vmatpush3.bf16.msra.mxu0 %v10364_v27 }
  0x2a   : > { %796 = vperm.xlu1 %10357, %v645_v19   ;;  %791 = vperm.xlu0 %10356, %v644_v20   ;;  %v477_v19 = vadd.f32 %v10832_v46, %v429_v8  ;;  %v360_v20 = vld [vmem:[%s10808_s8 + $0x10] sm:$0xff]  ;;  %v387_v8 = vld [vmem:[%s10808_s8 + $0xe8] sm:$0xff] }
  0x2b   : > { %10318 = vmatprep.subr.bf16.mxu1 %v10365_v30  ;;  %9857 = vmatprep.subr.bf16.mxu0 %v10365_v30 }
  0x2c   : > { %v559_v27 = vmul.f32 0.1, %v477_v19  ;;  %vm518_vm6 = vcmp.ge.f32.partialorder %v477_v19, 0.0 }
  0x2d   : > { %10326 = vmatpush3.bf16.msra.mxu1 %v10365_v30  ;;  %9858 = vmatpush3.bf16.msra.mxu0 %v10365_v30  ;;  %v408_v30 = vmul.f32 %v10820_v42, %v360_v20  ;;  %v367_v20 = vld [vmem:[%s10808_s8 + $0x48] sm:$0xff] }
  0x2e   : > { %686 = vperm.xlu1 %10357, %v623_v22   ;;  %681 = vperm.xlu0 %10356, %v622_v23   ;;  %v455_v22 = vadd.f32 %v10832_v46, %v407_v13  ;;  %v557_v23 = vmul.f32 0.1, %v475_v17  ;;  %v10960_v62 = vsel %vm518_vm6, %v477_v19, %v559_v27  ;;  %v435_v19 = vmul.f32 %v10820_v42, %v387_v8 }
  0x2f   : > { %9895 = vmatprep.subr.bf16.mxu1 %v10872_v2 }
  0x30   : > { %vm496_vm8 = vcmp.ge.f32.partialorder %v455_v22, 0.0  ;;  %v10952_v58 = vsel %vm516_vm4, %v475_v17, %v557_v23 }
  0x32   : > { %696 = vperm.xlu1 %10357, %v625_v25   ;;  %691 = vperm.xlu0 %10356, %v624_v26   ;;  %v406_v25 = vmul.f32 %v10820_v42, %v358_v14  ;;  %v409_v26 = vmul.f32 %v10820_v42, %v361_v15  ;;  %v412_v14 = vmul.f32 %v10820_v42, %v364_v3  ;;  %v389_v15 = vld [vmem:[%s10808_s8 + $0xf8] sm:$0xff] }
  0x33   : > { %v437_v27 = vmul.f32 %v10820_v42, %v389_v15  ;;  %v393_v3 = vld [vmem:[%s10808_s8 + $0x118] sm:$0xff] }
  0x36   : > { %806 = vperm.xlu1 %10357, %v647_v28   ;;  %801 = vperm.xlu0 %10356, %v646_v29   ;;  %v383_v28 = vld [vmem:[%s10808_s8 + $0xc8] sm:$0xff]  ;;  %v558_v29 = vmul.f32 0.1, %v476_v21 }
  0x38   : > { %v10963_v63 = vsel %vm517_vm7, %v476_v21, %v558_v29  ;;  %v366_v21 = vld [vmem:[%s10808_s8 + $0x40] sm:$0xff]  ;;  %v460_v29 = vadd.f32 %v10832_v46, %v412_v14  ;;  %v392_v14 = vld [vmem:[%s10808_s8 + $0x110] sm:$0xff] }
  0x3a   : > { %816 = vperm.xlu1 %10357, %v649_v31   ;;  %811 = vperm.xlu0 %10356, %v648_v32   ;;  %v382_v31 = vld [vmem:[%s10808_s8 + $0xc0] sm:$0xff]  ;;  %v385_v32 = vld [vmem:[%s10808_s8 + $0xd8] sm:$0xff]  ;;  %vm501_vm3 = vcmp.ge.f32.partialorder %v460_v29, 0.0 }
  0x3b   : > { %v433_v45 = vmul.f32 %v10820_v42, %v385_v32  ;;  %v369_v32 = vld [vmem:[%s10808_s8 + $0x58] sm:$0xff] }
  0x3d   : > { %v481_v61 = vadd.f32 %v10832_v46, %v433_v45  ;;  %v417_v45 = vmul.f32 %v10820_v42, %v369_v32 }
  0x3e   : > { %706 = vperm.xlu1 %10357, %v627_v33   ;;  %701 = vperm.xlu0 %10356, %v626_v34   ;;  %v454_v33 = vadd.f32 %v10832_v46, %v406_v25  ;;  %v457_v34 = vadd.f32 %v10832_v46, %v409_v26  ;;  %v434_v25 = vmul.f32 %v10820_v42, %v386_v12 }
  0x3f   : > { %vm522_vm14 = vcmp.ge.f32.partialorder %v481_v61, 0.0  ;;  %v563_v17 = vmul.f32 0.1, %v481_v61  ;;  %v465_v8 = vadd.f32 %v10832_v46, %v417_v45  ;;  %v396_v45 = vld [vmem:[%s10808_s8 + $0x130] sm:$0xff] }
  0x40   : > { %v536_v41 = vmul.f32 0.1, %v454_v33  ;;  %vm495_vm9 = vcmp.ge.f32.partialorder %v454_v33, 0.0  ;;  %vm498_vm10 = vcmp.ge.f32.partialorder %v457_v34, 0.0 }
  0x42   : > { %716 = vperm.xlu1 %10357, %v629_v35   ;;  %711 = vperm.xlu0 %10356, %v628_v36   ;;  %v384_v35 = vld [vmem:[%s10808_s8 + $0xd0] sm:$0xff]  ;;  %v537_v36 = vmul.f32 0.1, %v455_v22 }
  0x46   : > { %826 = vperm.xlu1 %10357, %v651_v37   ;;  %821 = vperm.xlu0 %10356, %v650_v38   ;;  %v431_v37 = vmul.f32 %v10820_v42, %v383_v28  ;;  %v363_v38 = vld [vmem:[%s10808_s8 + $0x28] sm:$0xff] }
  0x47   : > { %v411_v55 = vmul.f32 %v10820_v42, %v363_v38 }
  0x48   : > { %v479_v54 = vadd.f32 %v10832_v46, %v431_v37  ;;  %v368_v37 = vld [vmem:[%s10808_s8 + $0x50] sm:$0xff] }
  0x49   : > { %v459_v7 = vadd.f32 %v10832_v46, %v411_v55  ;;  %v416_v55 = vmul.f32 %v10820_v42, %v368_v37 }
  0x4a   : > { %836 = vperm.xlu1 %10357, %v653_v39   ;;  %831 = vperm.xlu0 %10356, %v652_v40   ;;  %v10380_v39 = vld [vmem:[%s12845_s4 + $0xb8] sm:$0xff]   ;;  %v456_v40 = vadd.f32 %v10832_v46, %v408_v30  ;;  %v561_v6 = vmul.f32 0.1, %v479_v54  ;;  %vm520_vm12 = vcmp.ge.f32.partialorder %v479_v54, 0.0  ;;  %v415_v30 = vmul.f32 %v10820_v42, %v367_v20 }
  0x4b   : > { %9947 = vmatprep.subr.bf16.mxu0 %v10380_v39  ;;  %v541_v24 = vmul.f32 0.1, %v459_v7  ;;  %vm500_vm0 = vcmp.ge.f32.partialorder %v459_v7, 0.0 }
  0x4c   : > { %vm497_vm11 = vcmp.ge.f32.partialorder %v456_v40, 0.0 }
  0x4d   : > { %v11011_v39 = vsel %vm500_vm0, %v459_v7, %v541_v24 }
  0x4e   : > { %726 = vperm.xlu1 %10357, %v631_v43   ;;  %721 = vperm.xlu0 %10356, %v630_v44   ;;  %v539_v43 = vmul.f32 0.1, %v457_v34  ;;  %v430_v44 = vmul.f32 %v10820_v42, %v382_v31  ;;  %v414_v31 = vmul.f32 %v10820_v42, %v366_v21  ;;  %v371_v21 = vld [vmem:[%s10808_s8 + $0x68] sm:$0xff] }
  0x50   : > { %v478_v60 = vadd.f32 %v10832_v46, %v430_v44  ;;  %v10977_v9 = vsel %vm498_vm10, %v457_v34, %v539_v43  ;;  %v11004_v34 = vsel %vm522_vm14, %v481_v61, %v563_v17  ;;  %v485_v43 = vadd.f32 %v10832_v46, %v437_v27 }
  0x51   : > { %v440_v27 = vmul.f32 %v10820_v42, %v392_v14  ;;  %vm506_vm10 = vcmp.ge.f32.partialorder %v465_v8, 0.0 }
  0x52   : > { %736 = vperm.xlu1 %10357, %v633_v50   ;;  %731 = vperm.xlu0 %10356, %v632_v51   ;;  %v432_v50 = vmul.f32 %v10820_v42, %v384_v35  ;;  %v365_v51 = vld [vmem:[%s10808_s8 + $0x38] sm:$0xff]  ;;  %vm519_vm13 = vcmp.ge.f32.partialorder %v478_v60, 0.0  ;;  %v560_v13 = vmul.f32 0.1, %v478_v60  ;;  %vm526_vm6 = vcmp.ge.f32.partialorder %v485_v43, 0.0 }
  0x53   : > { %v413_v1 = vmul.f32 %v10820_v42, %v365_v51  ;;  %v463_v51 = vadd.f32 %v10832_v46, %v415_v30 }
  0x54   : > { %v480_v0 = vadd.f32 %v10832_v46, %v432_v50  ;;  %v390_v50 = vld [vmem:[%s10808_s8 + $0x100] sm:$0xff] }
  0x55   : > { %v461_v18 = vadd.f32 %v10832_v46, %v413_v1  ;;  %v438_v1 = vmul.f32 %v10820_v42, %v390_v50 }
  0x56   : > { %846 = vperm.xlu1 %10357, %v655_v56   ;;  %841 = vperm.xlu0 %10356, %v654_v57   ;;  %v538_v56 = vmul.f32 0.1, %v456_v40  ;;  %v410_v57 = vmul.f32 %v10820_v42, %v362_v47  ;;  %vm521_vm15 = vcmp.ge.f32.partialorder %v480_v0, 0.0  ;;  %v562_v23 = vmul.f32 0.1, %v480_v0  ;;  %v391_v47 = vld [vmem:[%s10808_s8 + $0x108] sm:$0xff] }
  0x57   : > { %v543_v35 = vmul.f32 0.1, %v461_v18  ;;  %vm502_vm2 = vcmp.ge.f32.partialorder %v461_v18, 0.0  ;;  %v486_v20 = vadd.f32 %v10832_v46, %v438_v1  ;;  %v444_v1 = vmul.f32 %v10820_v42, %v396_v45 }
  0x58   : > { %v10980_v10 = vsel %vm497_vm11, %v456_v40, %v538_v56  ;;  %v458_v11 = vadd.f32 %v10832_v46, %v410_v57  ;;  %v11009_v38 = vsel %vm521_vm15, %v480_v0, %v562_v23  ;;  %v482_v40 = vadd.f32 %v10832_v46, %v434_v25  ;;  %v370_v23 = vld [vmem:[%s10808_s8 + $0x60] sm:$0xff] }
  0x59   : > { %v11024_v56 = vsel %vm502_vm2, %v461_v18, %v543_v35  ;;  %v542_v57 = vmul.f32 0.1, %v460_v29  ;;  %v439_v0 = vmul.f32 %v10820_v42, %v391_v47  ;;  %v395_v35 = vld [vmem:[%s10808_s8 + $0x128] sm:$0xff]  ;;  %v568_v50 = vmul.f32 0.1, %v486_v20 }
  0x5a   : > { %856 = vperm.xlu1 %10357, %v657_v4   ;;  %851 = vperm.xlu0 %10356, %v656_v5   ;;  %v10969_v4 = vsel %vm496_vm8, %v455_v22, %v537_v36  ;;  %v10972_v5 = vsel %vm495_vm9, %v454_v33, %v536_v41  ;;  %v10991_v22 = vsel %vm520_vm12, %v479_v54, %v561_v6  ;;  %v540_v26 = vmul.f32 0.1, %v458_v11 }
  0x5b   : > { %vm499_vm1 = vcmp.ge.f32.partialorder %v458_v11, 0.0  ;;  %v11001_v33 = vsel %vm519_vm13, %v478_v60, %v560_v13  ;;  %v483_v36 = vadd.f32 %v10832_v46, %v435_v19  ;;  %v462_v54 = vadd.f32 %v10832_v46, %v414_v31 }
  0x5c   : > { %v11014_v41 = vsel %vm499_vm1, %v458_v11, %v540_v26  ;;  %vm523_vm5 = vcmp.ge.f32.partialorder %v482_v40, 0.0  ;;  %v564_v61 = vmul.f32 0.1, %v482_v40  ;;  %v567_v6 = vmul.f32 0.1, %v485_v43 }
  0x5d   : > { %vm524_vm4 = vcmp.ge.f32.partialorder %v483_v36, 0.0  ;;  %v565_v60 = vmul.f32 0.1, %v483_v36  ;;  %v545_v11 = vmul.f32 0.1, %v463_v51  ;;  %v464_v13 = vadd.f32 %v10832_v46, %v416_v55 }
  0x5e   : > { %861 = vperm.xlu0 %10356, %v658_v16   ;;  %v388_v16 = vld [vmem:[%s10808_s8 + $0xf0] sm:$0xff]  ;;  %v544_v12 = vmul.f32 0.1, %v462_v54  ;;  %v11033_v15 = vsel %vm501_vm3, %v460_v29, %v542_v57  ;;  %vm504_vm8 = vcmp.ge.f32.partialorder %v463_v51, 0.0  ;;  %vm503_vm9 = vcmp.ge.f32.partialorder %v462_v54, 0.0 }
  0x5f   : > { %v436_v28 = vmul.f32 %v10820_v42, %v388_v16  ;;  %v441_v16 = vmul.f32 %v10820_v42, %v393_v3  ;;  %v11037_v17 = vsel %vm524_vm4, %v483_v36, %v565_v60  ;;  %v11040_v18 = vsel %vm523_vm5, %v482_v40, %v564_v61  ;;  %v372_v29 = vld [vmem:[%s10808_s8 + $0x70] sm:$0xff]  ;;  %v394_v36 = vld [vmem:[%s10808_s8 + $0x120] sm:$0xff] }
  0x60   : > { %v487_v19 = vadd.f32 %v10832_v46, %v439_v0  ;;  %v11047_v24 = vsel %vm526_vm6, %v485_v43, %v567_v6  ;;  %v547_v26 = vmul.f32 0.1, %v465_v8  ;;  %v11055_v30 = vsel %vm504_vm8, %v463_v51, %v545_v11 }
  0x61   : > { %v484_v44 = vadd.f32 %v10832_v46, %v436_v28  ;;  %v373_v28 = vld [vmem:[%s10808_s8 + $0x78] sm:$0xff]  ;;  %v11057_v31 = vsel %vm503_vm9, %v462_v54, %v544_v12  ;;  %v546_v32 = vmul.f32 0.1, %v464_v13  ;;  %vm505_vm11 = vcmp.ge.f32.partialorder %v464_v13, 0.0  ;;  %v398_v12 = vld [vmem:[%s10808_s8 + $0x140] sm:$0xf] }
  0x62   : > { %v489_v37 = vadd.f32 %v10832_v46, %v441_v16  ;;  %v419_v40 = vmul.f32 %v10820_v42, %v371_v21  ;;  %v418_v43 = vmul.f32 %v10820_v42, %v370_v23  ;;  %v569_v47 = vmul.f32 0.1, %v487_v19 }
  0x63   : > { %v566_v7 = vmul.f32 0.1, %v484_v44  ;;  %vm525_vm7 = vcmp.ge.f32.partialorder %v484_v44, 0.0  ;;  %v421_v51 = vmul.f32 %v10820_v42, %v373_v28  ;;  %v420_v54 = vmul.f32 %v10820_v42, %v372_v29 }
  0x64   : > { %vm528_vm12 = vcmp.ge.f32.partialorder %v487_v19, 0.0  ;;  %v488_v55 = vadd.f32 %v10832_v46, %v440_v27  ;;  %v443_v57 = vmul.f32 %v10820_v42, %v395_v35  ;;  %v442_v60 = vmul.f32 %v10820_v42, %v394_v36 }
  0x65   : > { %v11050_v25 = vsel %vm525_vm7, %v484_v44, %v566_v7  ;;  %v397_v44 = vld [vmem:[%s10808_s8 + $0x138] sm:$0xff]  ;;  %v11072_v61 = vsel %vm506_vm10, %v465_v8, %v547_v26  ;;  %vm527_vm13 = vcmp.ge.f32.partialorder %v486_v20, 0.0  ;;  %v11077_v3 = vsel %vm505_vm11, %v464_v13, %v546_v32  ;;  %s345_s8 = scalar_lea.vmem %s12847_s6, %s8966_s18 }
  0x66   : > { %v445_v0 = vmul.f32 %v10820_v42, %v397_v44  ;;  %v571_v6 = vmul.f32 0.1, %v489_v37  ;;  %v467_v7 = vadd.f32 %v10832_v46, %v419_v40  ;;  %v466_v11 = vadd.f32 %v10832_v46, %v418_v43 }
  0x67   : > { %v11082_v14 = vsel %vm528_vm12, %v487_v19, %v569_v47  ;;  %vm530_vm14 = vcmp.ge.f32.partialorder %v489_v37, 0.0  ;;  %v469_v8 = vadd.f32 %v10832_v46, %v421_v51  ;;  %v468_v16 = vadd.f32 %v10832_v46, %v420_v54 }
  0x68   : > { %v11086_v21 = vsel %vm527_vm13, %v486_v20, %v568_v50  ;;  %v570_v23 = vmul.f32 0.1, %v488_v55  ;;  %v491_v26 = vadd.f32 %v10832_v46, %v443_v57  ;;  %v490_v13 = vadd.f32 %v10832_v46, %v442_v60 }
  0x69   : > { %vm529_vm15 = vcmp.ge.f32.partialorder %v488_v55, 0.0  ;;  %v493_v27 = vadd.f32 %v10832_v46, %v445_v0  ;;  %v492_v28 = vadd.f32 %v10832_v46, %v444_v1  ;;  %v446_v19 = vmul.f32 %v10820_v42, %v398_v12 }
  0x6a   : > { %v11093_v29 = vsel %vm530_vm14, %v489_v37, %v571_v6  ;;  %vm508_vm0 = vcmp.ge.f32.partialorder %v467_v7, 0.0  ;;  %v549_v32 = vmul.f32 0.1, %v467_v7  ;;  %v548_v35 = vmul.f32 0.1, %v466_v11 }
  0x6b   : > { %vm1606_vm1 = vcmask 1042432   ;;  %vm1607_vm2 = vcmask 1046532   ;;  %vm507_vm3 = vcmp.ge.f32.partialorder %v466_v11, 0.0  ;;  %vm510_vm4 = vcmp.ge.f32.partialorder %v469_v8, 0.0 }
  0x6c   : > { %v551_v20 = vmul.f32 0.1, %v469_v8  ;;  %v550_v36 = vmul.f32 0.1, %v468_v16  ;;  %vm509_vm5 = vcmp.ge.f32.partialorder %v468_v16, 0.0  ;;  %vm532_vm6 = vcmp.ge.f32.partialorder %v491_v26, 0.0  ;;  %vm11149_vm12 = vmor %vm1606_vm1, %vm1607_vm2 }
  0x6d   : > { %v573_v40 = vmul.f32 0.1, %v491_v26  ;;  %v572_v43 = vmul.f32 0.1, %v490_v13  ;;  %vm1111_vm7 = vsmask.f32 3328  ;;  %v11096_v47 = vadd.f32 %v10832_v46, %v446_v19 }
  0x6e   : > { %vm1112_vm8 = vsmask.f32 7440  ;;  %vm531_vm9 = vcmp.ge.f32.partialorder %v490_v13, 0.0  ;;  %v575_v42 = vmul.f32 0.1, %v493_v27  ;;  %vm534_vm10 = vcmp.ge.f32.partialorder %v493_v27, 0.0 }
  0x6f   : > { %v574_v37 = vmul.f32 0.1, %v492_v28  ;;  %vm533_vm11 = vcmp.ge.f32.partialorder %v492_v28, 0.0  ;;  %v11101_v54 = vsel %vm529_vm15, %v488_v55, %v570_v23  ;;  %v11104_v57 = vsel %vm508_vm0, %v467_v7, %v549_v32  ;;  %vm11157_vm13 = vmor %vm1111_vm7, %vm1112_vm8 }
  0x70   : > { %v11107_v60 = vsel %vm507_vm3, %v466_v11, %v548_v35  ;;  %v11110_v0 = vsel %vm510_vm4, %v469_v8, %v551_v20  ;;  %v11123_v7 = vsel %vm531_vm9, %v490_v13, %v572_v43  ;;  %v11125_v11 = vsel %vm534_vm10, %v493_v27, %v575_v42 }
  0x71   : > { %12853 = vst [vmem:[#allocation7_spill] sm:$0xff] %v11123_v7  ;;  %12854 = vst [vmem:[#allocation8_spill] sm:$0xff] %v11125_v11  ;;  %v11127_v12 = vsel %vm533_vm11, %v492_v28, %v574_v37  ;;  %v11130_v8 = vmul.f32 0.1, %v11096_v47  ;;  %vm535_vm14 = vcmp.ge.f32.partialorder %v11096_v47, 0.0  ;;  %vm3406_vm15 = vcmask 1046528  }
  0x72   : > { %12855 = vst [vmem:[#allocation9_spill] sm:$0xff] %v11127_v12  ;;  %vm5012_vm0 = vcmask 1045504  }
  0x89   : > { %v752_v44 = vpop.permute.xlu1 %751  ;;  %v742_v45 = vpop.permute.xlu0 %741 }
  0x8a   : > { %v882_v50 = vmul.f32 %v752_v44, %v10929_v48  ;;  %v880_v51 = vmul.f32 %v742_v45, %v10934_v49  ;;  %v11117_v48 = vsel %vm509_vm5, %v468_v16, %v550_v36  ;;  %v11120_v49 = vsel %vm532_vm6, %v491_v26, %v573_v40 }
  0x8c   : > { %v11112_v46 = vpack.c.bf16 %v882_v50, %v882_v50  ;;  %v11114_v1 = vpack.c.bf16 %v880_v51, %v880_v51 }
  0x8d   : > { %v757_v55 = vpop.permute.xlu1 %756  ;;  %v747_v6 = vpop.permute.xlu0 %746 }
  0x8e   : > { %12852 = vst [vmem:[#allocation6_spill] sm:$0xff] %v11114_v1  ;;  %v1294_v23 = vshll.u32 %v11112_v46, 16  ;;  %v1298_v16 = vshrl.u32 %v11112_v46, 16  ;;  %v1662_v19 = vrot.slane %v11112_v46, 5  ;;  %v1274_v26 = vshll.u32 %v11114_v1, 16 }
  0x8f   : > { %v1278_v32 = vshrl.u32 %v11114_v1, 16  ;;  %v12849_v13 = vrot.slane %v11114_v1, 5  ;;  %v883_v27 = vmul.f32 %v757_v55, %v10941_v53  ;;  %v881_v28 = vmul.f32 %v747_v6, %v10946_v52  ;;  %v10427_v53 = vld [vmem:[%s12845_s4 + $0x120] sm:$0xff]  }
  0x90   : > { %v11140_v35 = vrot.slane %v1294_v23, 5  ;;  %v1300_v20 = vrot.slane %v1298_v16, 4  ;;  %v1664_v36 = vrot.slane %v1662_v19, 4  ;;  %v11142_v40 = vrot.slane %v1274_v26, 5 }
  0x91   : > { %v1280_v43 = vrot.slane %v1278_v32, 4  ;;  %v1658_v44 = vrot.slane %v12849_v13, 4  ;;  %v9468_v45 = vpack.c.bf16 %v883_v27, %v883_v27  ;;  %v9538_v42 = vpack.c.bf16 %v883_v27, %v882_v50  ;;  %v767_v37 = vpop.permute.xlu1 %766  ;;  %v762_v46 = vpop.permute.xlu0 %761 }
  0x92   : > { %12856 = vst [vmem:[#allocation10_spill] sm:$0xff] %v11142_v40  ;;  %v1301_v12 = vor.u32 %v1300_v20, %v11140_v35  ;;  %v9466_v52 = vpack.c.bf16 %v881_v28, %v881_v28  ;;  %v9533_v55 = vpack.c.bf16 %v881_v28, %v880_v51  ;;  %v885_v6 = vmul.f32 %v767_v37, %v10952_v58 }
  0x93   : > { %v1281_v23 = vor.u32 %v1280_v43, %v11142_v40  ;;  %9598 = vst [vmem:[#allocation2 + $0x48] sm:$0xff] %v9538_v42   ;;  %v1304_v16 = vshll.u32 %v9468_v45, 16  ;;  %v1308_v26 = vshrl.u32 %v9468_v45, 16  ;;  %v1665_v50 = vrot.slane %v9468_v45, 5 }
  0x94   : > { %v1302_v32 = vrot.slane %v1301_v12, 4  ;;  %9597 = vst [vmem:[#allocation2 + $0x40] sm:$0xff] %v9533_v55   ;;  %v1284_v20 = vshll.u32 %v9466_v52, 16  ;;  %v1288_v13 = vshrl.u32 %v9466_v52, 16  ;;  %v1659_v11 = vrot.slane %v9466_v52, 5 }
  0x95   : > { %v1282_v51 = vrot.slane %v1281_v23, 4  ;;  %v1306_v28 = vrot.slane %v1304_v16, 5  ;;  %v1310_v58 = vrot.slane %v1308_v26, 4  ;;  %v1666_v43 = vsel %vm11149_vm12, %v1664_v36, %v1665_v50  ;;  %v777_v42 = vpop.permute.xlu1 %776  ;;  %v772_v37 = vpop.permute.xlu0 %771 }
  0x96   : > { %v1667_v45 = vrot.slane %v1665_v50, 4  ;;  %1790 = vst [vmem:[#allocation4 + $0x48] sm:$0xf] %v1666_v43  ;;  %v1286_v12 = vrot.slane %v1284_v20, 5  ;;  %v1290_v40 = vrot.slane %v1288_v13, 4  ;;  %v1660_v7 = vsel %vm11149_vm12, %v1658_v44, %v1659_v11 }
  0x97   : > { %v1307_v55 = vsel %vm11157_vm13, %v1302_v32, %v1306_v28  ;;  %v1311_v1 = vor.u32 %v1310_v58, %v1306_v28  ;;  %v1661_v52 = vrot.slane %v1659_v11, 4  ;;  %1788 = vst [vmem:[#allocation4 + $0x40] sm:$0xf] %v1660_v7  ;;  %v9470_v23 = vpack.c.bf16 %v885_v6, %v885_v6 }
  0x98   : > { %1582 = vst [vmem:[#allocation3 + $0x48] sm:$0xf] %v1307_v55  ;;  %v1287_v36 = vsel %vm11157_vm13, %v1282_v51, %v1286_v12  ;;  %v1291_v16 = vor.u32 %v1290_v40, %v1286_v12  ;;  %v884_v26 = vmul.f32 %v762_v46, %v10955_v59  ;;  %v887_v50 = vmul.f32 %v777_v42, %v10960_v62 }
  0x99   : > { %v1312_v13 = vrot.slane %v1311_v1, 4  ;;  %1580 = vst [vmem:[#allocation3 + $0x40] sm:$0xf] %v1287_v36  ;;  %v1663_v44 = vsel %vm11149_vm12, %v1661_v52, %v1662_v19  ;;  %v1324_v20 = vshll.u32 %v9470_v23, 16  ;;  %v1328_v32 = vshrl.u32 %v9470_v23, 16  ;;  %v667_v43 = vpop.permute.xlu1 %666  ;;  %v662_v62 = vpop.permute.xlu0 %661 }
  0x9a   : > { %v1292_v28 = vrot.slane %v1291_v16, 4  ;;  %1789 = vst [vmem:[#allocation4 + $0x44] sm:$0xf] %v1663_v44  ;;  %v1671_v7 = vrot.slane %v9470_v23, 5  ;;  %v9469_v11 = vpack.c.bf16 %v884_v26, %v884_v26  ;;  %v9543_v58 = vpack.c.bf16 %v885_v6, %v884_v26  ;;  %v10367_v52 = vld [vmem:[#allocation2 + $0x48] sm:$0xff]  }
  0x9b   : > { %v1326_v55 = vrot.slane %v1324_v20, 5  ;;  %v1330_v51 = vrot.slane %v1328_v32, 4  ;;  %v11173_v40 = vpack.c.bf16 %v887_v50, %v887_v50  ;;  %v886_v59 = vmul.f32 %v772_v37, %v10963_v63  ;;  %v10366_v12 = vld [vmem:[#allocation2 + $0x40] sm:$0xff]   ;;  %v10377_v63 = vld [vmem:[%s12845_s4 + $0x70] sm:$0xff]  }
  0x9c   : > { %v1297_v1 = vsel %vm11157_vm13, %v1292_v28, %v11140_v35  ;;  %v1673_v19 = vrot.slane %v1671_v7, 4  ;;  %9599 = vst [vmem:[#allocation2 + $0x50] sm:$0xff] %v9543_v58   ;;  %v1314_v46 = vshll.u32 %v9469_v11, 16  ;;  %v1318_v42 = vshrl.u32 %v9469_v11, 16  ;;  %9875 = vmatprep.mubr.bf16.mxu1 %v10366_v12 }
  0x9d   : > { %1581 = vst [vmem:[#allocation3 + $0x44] sm:$0xf] %v1297_v1  ;;  %v1331_v6 = vor.u32 %v1330_v51, %v1326_v55  ;;  %v1668_v23 = vrot.slane %v9469_v11, 5  ;;  %v1344_v36 = vshll.u32 %v11173_v40, 16  ;;  %v1348_v16 = vshrl.u32 %v11173_v40, 16  ;;  %9876 = vmatmul.mubr.bf16.vlgmr.msra.gmra.mxu1 %v10367_v52 }
  0x9e   : > { %v1316_v37 = vrot.slane %v1314_v46, 5  ;;  %v1320_v26 = vrot.slane %v1318_v42, 4  ;;  %v1677_v35 = vrot.slane %v11173_v40, 5  ;;  %v9471_v44 = vpack.c.bf16 %v886_v59, %v886_v59  ;;  %v677_v42 = vpop.permute.xlu1 %676  ;;  %9896 = vmatpush3.bf16.msra.mxu1 %v10872_v2 }
  0x9f   : > { %v1332_v20 = vrot.slane %v1331_v6, 4  ;;  %v1669_v32 = vsel %vm11149_vm12, %v1667_v45, %v1668_v23  ;;  %v1670_v28 = vrot.slane %v1668_v23, 4  ;;  %v11187_v11 = vrot.slane %v1344_v36, 5  ;;  %v672_v23 = vpop.permute.xlu0 %671  ;;  %9897 = vmatprep.subr.bf16.mxu1 %v10377_v63 }
  0xa0   : > { %v1317_v58 = vsel %vm11157_vm13, %v1312_v13, %v1316_v37  ;;  %v1321_v51 = vor.u32 %v1320_v26, %v1316_v37  ;;  %1791 = vst [vmem:[#allocation4 + $0x4c] sm:$0xf] %v1669_v32  ;;  %v1350_v1 = vrot.slane %v1348_v16, 4  ;;  %v11191_v46 = vrot.slane %v1677_v35, 4  ;;  %v10379_v13 = vld [vmem:[%s12845_s4 + $0x68] sm:$0xff]  }
  0xa1   : > { %1583 = vst [vmem:[#allocation3 + $0x4c] sm:$0xf] %v1317_v58  ;;  %v1672_v40 = vsel %vm11149_vm12, %v1670_v28, %v1671_v7  ;;  %v9548_v45 = vpack.c.bf16 %v887_v50, %v886_v59  ;;  %v1334_v12 = vshll.u32 %v9471_v44, 16  ;;  %v1338_v6 = vshrl.u32 %v9471_v44, 16 }
  0xa2   : > { %v1322_v52 = vrot.slane %v1321_v51, 4  ;;  %1792 = vst [vmem:[#allocation4 + $0x50] sm:$0xf] %v1672_v40  ;;  %v1351_v36 = vor.u32 %v1350_v1, %v11187_v11  ;;  %v1674_v16 = vrot.slane %v9471_v44, 5  ;;  %v865_v2 = vmul.f32 %v667_v43, %v10969_v4  ;;  %9898 = vmatpush3.bf16.msra.mxu1 %v10377_v63  ;;  %v10384_v4 = vld [vmem:[%s12845_s4 + $0x60] sm:$0xff]   ;;  %v787_v1 = vpop.permute.xlu1 %786 }
  0xa3   : > { %9600 = vst [vmem:[#allocation2 + $0x58] sm:$0xff] %v9548_v45   ;;  %v1336_v37 = vrot.slane %v1334_v12, 5  ;;  %v1340_v26 = vrot.slane %v1338_v6, 4  ;;  %v864_v50 = vmul.f32 %v662_v62, %v10972_v5  ;;  %v11203_v7 = vmul.f32 %v677_v42, %v10977_v9  ;;  %v10368_v44 = vld [vmem:[#allocation2 + $0x50] sm:$0xff]   ;;  %9899 = vmatprep.subr.bf16.mxu1 %v10379_v13  ;;  %v782_v12 = vpop.permute.xlu0 %781 }
  0xa4   : > { %v1327_v59 = vsel %vm11157_vm13, %v1322_v52, %v1326_v55  ;;  %v11207_v32 = vrot.slane %v1351_v36, 4  ;;  %v1675_v28 = vsel %vm11149_vm12, %v1673_v19, %v1674_v16  ;;  %v1676_v58 = vrot.slane %v1674_v16, 4  ;;  %9879 = vmatprep.mubr.bf16.mxu1 %v10368_v44 }
  0xa5   : > { %1584 = vst [vmem:[#allocation3 + $0x50] sm:$0xf] %v1327_v59  ;;  %v1337_v5 = vsel %vm11157_vm13, %v1332_v20, %v1336_v37  ;;  %v1341_v9 = vor.u32 %v1340_v26, %v1336_v37  ;;  %1793 = vst [vmem:[#allocation4 + $0x54] sm:$0xf] %v1675_v28  ;;  %v9450_v43 = vpack.c.bf16 %v865_v2, %v865_v2  ;;  %v10387_v37 = vld [vmem:[%s12845_s4 + $0x58] sm:$0xff]  }
  0xa6   : > { %v9449_v55 = vpack.c.bf16 %v864_v50, %v864_v50  ;;  %1585 = vst [vmem:[#allocation3 + $0x54] sm:$0xf] %v1337_v5  ;;  %v1678_v62 = vsel %vm11149_vm12, %v1676_v58, %v1677_v35  ;;  %v9493_v19 = vpack.c.bf16 %v865_v2, %v864_v50  ;;  %v11220_v63 = vpack.c.bf16 %v11203_v7, %v11203_v7 }
  0xa7   : > { %v866_v51 = vmul.f32 %v672_v23, %v10980_v10  ;;  %v1342_v42 = vrot.slane %v1341_v9, 4  ;;  %1794 = vst [vmem:[#allocation4 + $0x58] sm:$0xf] %v1678_v62  ;;  %v1124_v20 = vshll.u32 %v9450_v43, 16  ;;  %v1128_v40 = vshrl.u32 %v9450_v43, 16  ;;  %9900 = vmatpush3.bf16.msra.mxu1 %v10379_v13 }
  0xa8   : > { %v1611_v45 = vrot.slane %v9450_v43, 5  ;;  %9494 = vst [vmem:[#allocation2] sm:$0xff] %v9493_v19   ;;  %v1115_v6 = vshrl.u32 %v9449_v55, 16  ;;  %v1118_v52 = vshll.u32 %v9449_v55, 16  ;;  %v9011_v36 = vrot.slane %v9449_v55, 9  ;;  %9901 = vmatprep.subr.bf16.mxu1 %v10384_v4  ;;  %v797_v19 = vpop.permute.xlu1 %796 }
  0xa9   : > { %v1144_v35 = vshll.u32 %v11220_v63, 16  ;;  %v1347_v16 = vsel %vm11157_vm13, %v1342_v42, %v11187_v11  ;;  %v1126_v10 = vrot.slane %v1124_v20, 5  ;;  %v1130_v23 = vrot.slane %v1128_v40, 4 }
  0xaa   : > { %v1613_v2 = vrot.slane %v1611_v45, 4  ;;  %1586 = vst [vmem:[#allocation3 + $0x58] sm:$0xf] %v1347_v16  ;;  %v1117_v26 = vrot.slane %v1115_v6, 4  ;;  %v1120_v50 = vrot.slane %v1118_v52, 5  ;;  %v1612_v59 = vsel %vm11149_vm12, %v9011_v36, %v1611_v45  ;;  %v10369_v13 = vld [vmem:[#allocation2 + $0x58] sm:$0xff]   ;;  %v792_v6 = vpop.permute.xlu0 %791 }
  0xab   : > { %v11232_v28 = vrot.slane %v1144_v35, 5  ;;  %v1131_v58 = vor.u32 %v1130_v23, %v1126_v10  ;;  %1772 = vst [vmem:[#allocation4] sm:$0xf] %v1612_v59  ;;  %v1148_v11 = vshrl.u32 %v11220_v63, 16  ;;  %v1617_v44 = vrot.slane %v11220_v63, 5  ;;  %9880 = vmatmul.mubr.bf16.gmra.mxu1 %v10369_v13 }
  0xac   : > { %v9451_v5 = vpack.c.bf16 %v866_v51, %v866_v51  ;;  %v1121_v9 = vor.u32 %v1120_v50, %v1117_v26  ;;  %v9498_v43 = vpack.c.bf16 %v11203_v7, %v866_v51  ;;  %v889_v55 = vmul.f32 %v787_v1, %v10991_v22  ;;  %9902 = vmatpush3.bf16.msra.mxu1 %v10384_v4  ;;  %v10390_v22 = vld [vmem:[%s12845_s4 + $0x50] sm:$0xff]  }
  0xad   : > { %v888_v62 = vmul.f32 %v782_v12, %v11001_v33  ;;  %v1132_v42 = vrot.slane %v1131_v58, 4  ;;  %v1150_v20 = vrot.slane %v1148_v11, 4  ;;  %v11239_v40 = vrot.slane %v1617_v44, 4  ;;  %9903 = vmatprep.subr.bf16.mxu1 %v10387_v37 }
  0xae   : > { %v1134_v45 = vshll.u32 %v9451_v5, 16  ;;  %v1122_v52 = vrot.slane %v1121_v9, 4  ;;  %9590 = vst [vmem:[#allocation2 + $0x8] sm:$0xff] %v9498_v43   ;;  %v1138_v63 = vshrl.u32 %v9451_v5, 16  ;;  %v1614_v36 = vrot.slane %v9451_v5, 5  ;;  %v687_v9 = vpop.permute.xlu1 %686  ;;  %v10393_v43 = vld [vmem:[%s12845_s4 + $0x48] sm:$0xff]  }
  0xaf   : > { %v9474_v35 = vpack.c.bf16 %v889_v55, %v889_v55  ;;  %v1151_v33 = vor.u32 %v1150_v20, %v11232_v28  ;;  %v9473_v51 = vpack.c.bf16 %v888_v62, %v888_v62  ;;  %v9553_v1 = vpack.c.bf16 %v889_v55, %v888_v62  ;;  %v10370_v12 = vld [vmem:[#allocation2] sm:$0xff]  }
  0xb0   : > { %v1136_v7 = vrot.slane %v1134_v45, 5  ;;  %v1127_v16 = vsel %vm11157_vm13, %v1122_v52, %v1126_v10  ;;  %v1140_v4 = vrot.slane %v1138_v63, 4  ;;  %v1615_v23 = vsel %vm11149_vm12, %v1613_v2, %v1614_v36  ;;  %9859 = vmatprep.mubr.bf16.mxu0 %v10370_v12  ;;  %9904 = vmatpush3.bf16.msra.mxu1 %v10387_v37  ;;  %v682_v45 = vpop.permute.xlu0 %681 }
  0xb1   : > { %v1616_v26 = vrot.slane %v1614_v36, 4  ;;  %1564 = vst [vmem:[#allocation3] sm:$0xf] %v1127_v16  ;;  %v11249_v50 = vrot.slane %v1151_v33, 4  ;;  %1773 = vst [vmem:[#allocation4 + $0x4] sm:$0xf] %v1615_v23  ;;  %9905 = vmatprep.subr.bf16.mxu1 %v10390_v22  ;;  %v891_v36 = vmul.f32 %v797_v19, %v11004_v34  ;;  %v890_v12 = vmul.f32 %v792_v6, %v11009_v38 }
  0xb2   : > { %v1137_v59 = vsel %vm11157_vm13, %v1132_v42, %v1136_v7  ;;  %v1364_v13 = vshll.u32 %v9474_v35, 16  ;;  %v1368_v58 = vshrl.u32 %v9474_v35, 16  ;;  %9601 = vst [vmem:[#allocation2 + $0x60] sm:$0xff] %v9553_v1   ;;  %v1141_v11 = vor.u32 %v1140_v4, %v1136_v7 }
  0xb3   : > { %1565 = vst [vmem:[#allocation3 + $0x4] sm:$0xf] %v1137_v59  ;;  %v1618_v10 = vsel %vm11149_vm12, %v1616_v26, %v1617_v44  ;;  %v1683_v5 = vrot.slane %v9474_v35, 5  ;;  %v1354_v2 = vshll.u32 %v9473_v51, 16  ;;  %v1358_v42 = vshrl.u32 %v9473_v51, 16  ;;  %v10382_v44 = vld [vmem:[%s12845_s4 + $0xb0] sm:$0xff]   ;;  %v697_v59 = vpop.permute.xlu1 %696 }
  0xb4   : > { %1774 = vst [vmem:[#allocation4 + $0x8] sm:$0xf] %v1618_v10  ;;  %v1366_v55 = vrot.slane %v1364_v13, 5  ;;  %v1370_v62 = vrot.slane %v1368_v58, 4  ;;  %v1680_v20 = vrot.slane %v9473_v51, 5  ;;  %v1142_v37 = vrot.slane %v1141_v11, 4  ;;  %9906 = vmatpush3.bf16.msra.mxu1 %v10390_v22 }
  0xb5   : > { %v1685_v52 = vrot.slane %v1683_v5, 4  ;;  %v1356_v63 = vrot.slane %v1354_v2, 5  ;;  %v1360_v33 = vrot.slane %v1358_v42, 4  ;;  %v11272_v19 = vpack.c.bf16 %v891_v36, %v891_v36  ;;  %v10371_v16 = vld [vmem:[#allocation2 + $0x8] sm:$0xff]   ;;  %9907 = vmatprep.subr.bf16.mxu1 %v10393_v43  ;;  %v692_v2 = vpop.permute.xlu0 %691 }
  0xb6   : > { %v1371_v35 = vor.u32 %v1370_v62, %v1366_v55  ;;  %v1681_v7 = vsel %vm11149_vm12, %v11191_v46, %v1680_v20  ;;  %v1682_v1 = vrot.slane %v1680_v20, 4  ;;  %v1147_v51 = vsel %vm11157_vm13, %v1142_v37, %v11232_v28  ;;  %9860 = vmatmul.mubr.bf16.vlgmr.msra.gmra.mxu0 %v10371_v16  ;;  %v11300_v62 = vld [vmem:[%s12845_s4 + $0xf8] sm:$0xff]  }
  0xb7   : > { %v1357_v34 = vsel %vm11157_vm13, %v11207_v32, %v1356_v63  ;;  %1795 = vst [vmem:[#allocation4 + $0x5c] sm:$0xf] %v1681_v7  ;;  %1566 = vst [vmem:[#allocation3 + $0x8] sm:$0xf] %v1147_v51  ;;  %v1361_v22 = vor.u32 %v1360_v33, %v1356_v63  ;;  %v11278_v28 = vmul.f32 %v687_v9, %v11011_v39  ;;  %v10397_v32 = vld [vmem:[%s12845_s4 + $0x40] sm:$0xff]   ;;  %v1384_v23 = vshll.u32 %v11272_v19, 16 }
  0xb8   : > { %v1372_v46 = vrot.slane %v1371_v35, 4  ;;  %1587 = vst [vmem:[#allocation3 + $0x5c] sm:$0xf] %v1357_v34  ;;  %v1684_v4 = vsel %vm11149_vm12, %v1682_v1, %v1683_v5  ;;  %v1388_v38 = vshrl.u32 %v11272_v19, 16  ;;  %v1689_v6 = vrot.slane %v11272_v19, 5  ;;  %v10385_v39 = vld [vmem:[%s12845_s4 + $0xa8] sm:$0xff]   ;;  %9908 = vmatpush3.bf16.msra.mxu1 %v10393_v43 }
  0xb9   : > { %1796 = vst [vmem:[#allocation4 + $0x60] sm:$0xf] %v1684_v4  ;;  %v9475_v26 = vpack.c.bf16 %v890_v12, %v890_v12  ;;  %v10372_v13 = vld [vmem:[#allocation2 + $0x60] sm:$0xff]   ;;  %v1362_v58 = vrot.slane %v1361_v22, 4  ;;  %v9558_v11 = vpack.c.bf16 %v891_v36, %v890_v12  ;;  %v11291_v10 = vpack.c.bf16 %v11278_v28, %v11278_v28  ;;  %v10598_v9 = vld [vmem:[%s12845_s4 + $0xb8] sm:$0xff]   ;;  %9909 = vmatprep.subr.bf16.mxu1 %v10397_v32 }
  0xba   : > { %v868_v5 = vmul.f32 %v682_v45, %v11014_v41  ;;  %9948 = vmatpush3.bf16.msra.mxu0 %v10598_v9  ;;  %v1386_v42 = vrot.slane %v1384_v23, 5  ;;  %v1390_v20 = vrot.slane %v1388_v38, 4  ;;  %v11302_v37 = vrot.slane %v1689_v6, 4  ;;  %9883 = vmatprep.mubr.bf16.mxu1 %v10372_v13  ;;  %v807_v23 = vpop.permute.xlu1 %806 }
  0xbb   : > { %v1374_v63 = vshll.u32 %v9475_v26, 16  ;;  %9949 = vmatprep.subr.bf16.mxu0 %v10382_v44  ;;  %v1367_v41 = vsel %vm11157_vm13, %v1362_v58, %v1366_v55  ;;  %9602 = vst [vmem:[#allocation2 + $0x68] sm:$0xff] %v9558_v11   ;;  %v1378_v45 = vshrl.u32 %v9475_v26, 16  ;;  %v1686_v36 = vrot.slane %v9475_v26, 5  ;;  %v802_v26 = vpop.permute.xlu0 %801 }
  0xbc   : > { %v1164_v43 = vshll.u32 %v11291_v10, 16  ;;  %1588 = vst [vmem:[#allocation3 + $0x60] sm:$0xf] %v1367_v41  ;;  %v1391_v35 = vor.u32 %v1390_v20, %v1386_v42  ;;  %v1168_v7 = vshrl.u32 %v11291_v10, 16  ;;  %v1623_v1 = vrot.slane %v11291_v10, 5  ;;  %9910 = vmatpush3.bf16.msra.mxu1 %v10397_v32  ;;  %v10391_v10 = vld [vmem:[%s12845_s4 + $0x98] sm:$0xff]  }
  0xbd   : > { %v1376_v33 = vrot.slane %v1374_v63, 5  ;;  %v1380_v51 = vrot.slane %v1378_v45, 4  ;;  %v1687_v34 = vsel %vm11149_vm12, %v1685_v52, %v1686_v36  ;;  %v1688_v19 = vrot.slane %v1686_v36, 4  ;;  %v10388_v52 = vld [vmem:[%s12845_s4 + $0xa0] sm:$0xff]   ;;  %9999 = vmatprep.subr.bf16.mxu1 %v11300_v62 }
  0xbe   : > { %v11311_v12 = vrot.slane %v1164_v43, 5  ;;  %9950 = vmatpush3.bf16.msra.mxu0 %v10382_v44  ;;  %v11313_v55 = vrot.slane %v1391_v35, 4  ;;  %1797 = vst [vmem:[#allocation4 + $0x64] sm:$0xf] %v1687_v34  ;;  %v1170_v22 = vrot.slane %v1168_v7, 4  ;;  %v11317_v4 = vrot.slane %v1623_v1, 4  ;;  %v817_v35 = vpop.permute.xlu1 %816 }
  0xbf   : > { %v1377_v16 = vsel %vm11157_vm13, %v1372_v46, %v1376_v33  ;;  %9951 = vmatprep.subr.bf16.mxu0 %v10385_v39  ;;  %v1381_v38 = vor.u32 %v1380_v51, %v1376_v33  ;;  %v1690_v44 = vsel %vm11149_vm12, %v1688_v19, %v1689_v6  ;;  %v9453_v32 = vpack.c.bf16 %v868_v5, %v868_v5  ;;  %v11353_v34 = vpop.permute.xlu0 %811 }
  0xc0   : > { %1589 = vst [vmem:[#allocation3 + $0x64] sm:$0xf] %v1377_v16  ;;  %v9503_v46 = vpack.c.bf16 %v11278_v28, %v868_v5  ;;  %1798 = vst [vmem:[#allocation4 + $0x68] sm:$0xf] %v1690_v44  ;;  %v1171_v13 = vor.u32 %v1170_v22, %v11311_v12  ;;  %v871_v58 = vmul.f32 %v697_v59, %v11024_v56 }
  0xc1   : > { %v870_v11 = vmul.f32 %v692_v2, %v11033_v15  ;;  %v11336_v6 = vsel %vm535_vm14, %v11096_v47, %v11130_v8  ;;  %v1382_v9 = vrot.slane %v1381_v38, 4  ;;  %v1154_v28 = vshll.u32 %v9453_v32, 16 }
  0xc2   : > { %9591 = vst [vmem:[#allocation2 + $0x10] sm:$0xff] %v9503_v46   ;;  %v1158_v5 = vshrl.u32 %v9453_v32, 16  ;;  %v1620_v20 = vrot.slane %v9453_v32, 5  ;;  %9952 = vmatpush3.bf16.msra.mxu0 %v10385_v39  ;;  %v11338_v63 = vpack.c.bf16 %v871_v58, %v871_v58  ;;  %v11341_v59 = vmul.f32 %v807_v23, %v11037_v17  ;;  %v10373_v2 = vld [vmem:[#allocation2 + $0x68] sm:$0xff]   ;;  %v10395_v23 = vld [vmem:[%s12845_s4 + $0x90] sm:$0xff]  }
  0xc3   : > { %v9455_v56 = vpack.c.bf16 %v870_v11, %v870_v11  ;;  %v9508_v15 = vpack.c.bf16 %v871_v58, %v870_v11  ;;  %9953 = vmatprep.subr.bf16.mxu0 %v10388_v52  ;;  %v1387_v41 = vsel %vm11157_vm13, %v1382_v9, %v1386_v42  ;;  %v1156_v47 = vrot.slane %v1154_v28, 5  ;;  %9884 = vmatmul.mubr.bf16.gmra.mxu1 %v10373_v2  ;;  %v702_v2 = vpop.permute.xlu0 %701 }
  0xc4   : > { %v1160_v8 = vrot.slane %v1158_v5, 4  ;;  %v1621_v45 = vsel %vm11149_vm12, %v11239_v40, %v1620_v20  ;;  %1590 = vst [vmem:[#allocation3 + $0x68] sm:$0xf] %v1387_v41  ;;  %v1172_v39 = vrot.slane %v1171_v13, 4  ;;  %v1622_v36 = vrot.slane %v1620_v20, 4 }
  0xc5   : > { %1775 = vst [vmem:[#allocation4 + $0xc] sm:$0xf] %v1621_v45  ;;  %v1184_v43 = vshll.u32 %v11338_v63, 16  ;;  %v1188_v17 = vshrl.u32 %v11338_v63, 16  ;;  %9592 = vst [vmem:[#allocation2 + $0x18] sm:$0xff] %v9508_v15   ;;  %v1157_v42 = vsel %vm11157_vm13, %v11249_v50, %v1156_v47  ;;  %v1174_v7 = vshll.u32 %v9455_v56, 16 }
  0xc6   : > { %v1161_v33 = vor.u32 %v1160_v8, %v1156_v47  ;;  %v1178_v51 = vshrl.u32 %v9455_v56, 16  ;;  %9954 = vmatpush3.bf16.msra.mxu0 %v10388_v52  ;;  %1567 = vst [vmem:[#allocation3 + $0xc] sm:$0xf] %v1157_v42  ;;  %v1624_v40 = vsel %vm11149_vm12, %v1622_v36, %v1623_v1  ;;  %v1629_v22 = vrot.slane %v11338_v63, 5  ;;  %v10398_v63 = vld [vmem:[%s12845_s4 + $0x88] sm:$0xff]  }
  0xc7   : > { %v1186_v19 = vrot.slane %v1184_v43, 5  ;;  %v1190_v16 = vrot.slane %v1188_v17, 4  ;;  %9955 = vmatprep.subr.bf16.mxu0 %v10391_v10  ;;  %1776 = vst [vmem:[#allocation4 + $0x10] sm:$0xf] %v1624_v40  ;;  %v1176_v38 = vrot.slane %v1174_v7, 5  ;;  %v1626_v32 = vrot.slane %v9455_v56, 5 }
  0xc8   : > { %v1162_v50 = vrot.slane %v1161_v33, 4  ;;  %v1180_v44 = vrot.slane %v1178_v51, 4  ;;  %v11363_v52 = vpack.c.bf16 %v11341_v59, %v11341_v59  ;;  %v892_v1 = vmul.f32 %v802_v26, %v11040_v18  ;;  %v10403_v51 = vld [vmem:[%s12845_s4 + $0x80] sm:$0xff]  }
  0xc9   : > { %v1191_v46 = vor.u32 %v1190_v16, %v1186_v19  ;;  %v11367_v13 = vmul.f32 %v817_v35, %v11047_v24  ;;  %v10374_v58 = vld [vmem:[#allocation2 + $0x10] sm:$0xff]   ;;  %v1177_v9 = vsel %vm11157_vm13, %v1172_v39, %v1176_v38  ;;  %v1627_v5 = vsel %vm11149_vm12, %v11317_v4, %v1626_v32 }
  0xca   : > { %v1167_v11 = vsel %vm11157_vm13, %v1162_v50, %v11311_v12  ;;  %v1181_v28 = vor.u32 %v1180_v44, %v1176_v38  ;;  %9956 = vmatpush3.bf16.msra.mxu0 %v10391_v10  ;;  %v11377_v20 = vrot.slane %v1629_v22, 4  ;;  %1569 = vst [vmem:[#allocation3 + $0x14] sm:$0xf] %v1177_v9  ;;  %v1628_v18 = vrot.slane %v1626_v32, 4  ;;  %1777 = vst [vmem:[#allocation4 + $0x14] sm:$0xf] %v1627_v5  ;;  %v707_v12 = vpop.permute.xlu1 %706 }
  0xcb   : > { %1568 = vst [vmem:[#allocation3 + $0x10] sm:$0xf] %v1167_v11  ;;  %v1404_v24 = vshll.u32 %v11363_v52, 16  ;;  %v1408_v26 = vshrl.u32 %v11363_v52, 16  ;;  %9863 = vmatprep.mubr.bf16.mxu0 %v10374_v58  ;;  %9957 = vmatprep.subr.bf16.mxu0 %v10395_v23  ;;  %v1695_v4 = vrot.slane %v11363_v52, 5  ;;  %v9477_v10 = vpack.c.bf16 %v892_v1, %v892_v1  ;;  %v712_v11 = vpop.permute.xlu0 %711 }
  0xcc   : > { %v1182_v56 = vrot.slane %v1181_v28, 4  ;;  %v9563_v15 = vpack.c.bf16 %v11341_v59, %v892_v1  ;;  %v1630_v41 = vsel %vm11149_vm12, %v1628_v18, %v1629_v22  ;;  %v11390_v45 = vpack.c.bf16 %v11367_v13, %v11367_v13  ;;  %v10376_v39 = vld [vmem:[#allocation2 + $0x18] sm:$0xff]  }
  0xcd   : > { %v1406_v47 = vrot.slane %v1404_v24, 5  ;;  %v1410_v8 = vrot.slane %v1408_v26, 4  ;;  %v11392_v36 = vrot.slane %v1191_v46, 4  ;;  %1778 = vst [vmem:[#allocation4 + $0x18] sm:$0xf] %v1630_v41  ;;  %v1394_v17 = vshll.u32 %v9477_v10, 16  ;;  %9864 = vmatmul.mubr.bf16.gmra.mxu0 %v10376_v39 }
  0xce   : > { %v1187_v43 = vsel %vm11157_vm13, %v1182_v56, %v1186_v19  ;;  %9603 = vst [vmem:[#allocation2 + $0x70] sm:$0xff] %v9563_v15   ;;  %v1398_v59 = vshrl.u32 %v9477_v10, 16  ;;  %9958 = vmatpush3.bf16.msra.mxu0 %v10395_v23  ;;  %v1692_v42 = vrot.slane %v9477_v10, 5  ;;  %v1424_v33 = vshll.u32 %v11390_v45, 16  ;;  %v717_v32 = vpop.permute.xlu1 %716  ;;  %v11419_v28 = vld [vmem:[%s12845_s4 + $0x138] sm:$0xff]  }
  0xcf   : > { %1570 = vst [vmem:[#allocation3 + $0x18] sm:$0xf] %v1187_v43  ;;  %v1411_v35 = vor.u32 %v1410_v8, %v1406_v47  ;;  %v1428_v7 = vshrl.u32 %v11390_v45, 16  ;;  %9959 = vmatprep.subr.bf16.mxu0 %v10398_v63  ;;  %v1396_v40 = vrot.slane %v1394_v17, 5  ;;  %v1701_v16 = vrot.slane %v11390_v45, 5 }
  0xd0   : > { %v1400_v19 = vrot.slane %v1398_v59, 4  ;;  %v894_v22 = vmul.f32 %v11353_v34, %v11050_v25  ;;  %v1697_v23 = vrot.slane %v1695_v4, 4  ;;  %v1693_v50 = vsel %vm11149_vm12, %v11302_v37, %v1692_v42 }
  0xd1   : > { %v1694_v38 = vrot.slane %v1692_v42, 4  ;;  %v11407_v44 = vrot.slane %v1424_v33, 5  ;;  %v1412_v46 = vrot.slane %v1411_v35, 4  ;;  %v1397_v52 = vsel %vm11157_vm13, %v11313_v55, %v1396_v40  ;;  %1799 = vst [vmem:[#allocation4 + $0x6c] sm:$0xf] %v1693_v50 }
  0xd2   : > { %v1401_v1 = vor.u32 %v1400_v19, %v1396_v40  ;;  %v1430_v58 = vrot.slane %v1428_v7, 4  ;;  %9960 = vmatpush3.bf16.msra.mxu0 %v10398_v63  ;;  %1591 = vst [vmem:[#allocation3 + $0x6c] sm:$0xf] %v1397_v52  ;;  %v9479_v34 = vpack.c.bf16 %v894_v22, %v894_v22  ;;  %v9568_v37 = vpack.c.bf16 %v11367_v13, %v894_v22  ;;  %v827_v45 = vpop.permute.xlu1 %826 }
  0xd3   : > { %v1696_v25 = vsel %vm11149_vm12, %v1694_v38, %v1695_v4  ;;  %v873_v9 = vmul.f32 %v707_v12, %v11055_v30  ;;  %9961 = vmatprep.subr.bf16.mxu0 %v10403_v51  ;;  %v11422_v18 = vrot.slane %v1701_v16, 4  ;;  %v872_v24 = vmul.f32 %v702_v2, %v11057_v31 }
  0xd4   : > { %v1402_v55 = vrot.slane %v1401_v1, 4  ;;  %1800 = vst [vmem:[#allocation4 + $0x70] sm:$0xf] %v1696_v25  ;;  %v1431_v5 = vor.u32 %v1430_v58, %v11407_v44  ;;  %9604 = vst [vmem:[#allocation2 + $0x78] sm:$0xff] %v9568_v37   ;;  %v1414_v26 = vshll.u32 %v9479_v34, 16  ;;  %v1418_v63 = vshrl.u32 %v9479_v34, 16 }
  0xd5   : > { %v1698_v13 = vrot.slane %v9479_v34, 5  ;;  %v9458_v56 = vpack.c.bf16 %v873_v9, %v873_v9  ;;  %v10378_v30 = vld [vmem:[#allocation2 + $0x70] sm:$0xff]   ;;  %v9457_v4 = vpack.c.bf16 %v872_v24, %v872_v24  ;;  %v9513_v10 = vpack.c.bf16 %v873_v9, %v872_v24 }
  0xd6   : > { %v1407_v12 = vsel %vm11157_vm13, %v1402_v55, %v1406_v47  ;;  %v875_v15 = vmul.f32 %v717_v32, %v11072_v61  ;;  %9962 = vmatpush3.bf16.msra.mxu0 %v10403_v51  ;;  %v1416_v41 = vrot.slane %v1414_v26, 5  ;;  %v1420_v8 = vrot.slane %v1418_v63, 4  ;;  %9887 = vmatprep.mubr.bf16.mxu1 %v10378_v30  ;;  %v11433_v61 = vpop.permute.xlu0 %821  ;;  %v837_v9 = vpop.permute.xlu1 %836 }
  0xd7   : > { %1592 = vst [vmem:[#allocation3 + $0x70] sm:$0xf] %v1407_v12  ;;  %v1699_v31 = vsel %vm11149_vm12, %v1697_v23, %v1698_v13  ;;  %v1700_v2 = vrot.slane %v1698_v13, 4  ;;  %10051 = vmatprep.subr.bf16.mxu0 %v11419_v28  ;;  %v11431_v39 = vrot.slane %v1431_v5, 4  ;;  %v1204_v47 = vshll.u32 %v9458_v56, 16  ;;  %9593 = vst [vmem:[#allocation2 + $0x20] sm:$0xff] %v9513_v10  }
  0xd8   : > { %1801 = vst [vmem:[#allocation4 + $0x74] sm:$0xf] %v1699_v31  ;;  %v1208_v43 = vshrl.u32 %v9458_v56, 16  ;;  %v1194_v17 = vshll.u32 %v9457_v4, 16  ;;  %v1417_v59 = vsel %vm11157_vm13, %v1412_v46, %v1416_v41  ;;  %v1421_v35 = vor.u32 %v1420_v8, %v1416_v41 }
  0xd9   : > { %v1702_v42 = vsel %vm11149_vm12, %v1700_v2, %v1701_v16  ;;  %v1198_v33 = vshrl.u32 %v9457_v4, 16  ;;  %1593 = vst [vmem:[#allocation3 + $0x74] sm:$0xf] %v1417_v59  ;;  %v1206_v7 = vrot.slane %v1204_v47, 5  ;;  %v1635_v40 = vrot.slane %v9458_v56, 5 }
  0xda   : > { %1802 = vst [vmem:[#allocation4 + $0x78] sm:$0xf] %v1702_v42  ;;  %v1210_v51 = vrot.slane %v1208_v43, 4  ;;  %v1196_v19 = vrot.slane %v1194_v17, 5  ;;  %v1422_v22 = vrot.slane %v1421_v35, 4  ;;  %v1632_v50 = vrot.slane %v9457_v4, 5  ;;  %v832_v55 = vpop.permute.xlu0 %831  ;;  %v727_v59 = vpop.permute.xlu1 %726 }
  0xdb   : > { %v1200_v23 = vrot.slane %v1198_v33, 4  ;;  %v9460_v38 = vpack.c.bf16 %v875_v15, %v875_v15  ;;  %v874_v52 = vmul.f32 %v712_v11, %v11077_v3  ;;  %v11444_v16 = vmul.f32 %v827_v45, %v11082_v14  ;;  %v10381_v1 = vld [vmem:[#allocation2 + $0x78] sm:$0xff]  }
  0xdc   : > { %v1211_v32 = vor.u32 %v1210_v51, %v1206_v7  ;;  %v1197_v46 = vsel %vm11157_vm13, %v11392_v36, %v1196_v19  ;;  %v1427_v58 = vsel %vm11157_vm13, %v1422_v22, %v11407_v44  ;;  %v1633_v34 = vsel %vm11149_vm12, %v11377_v20, %v1632_v50  ;;  %9888 = vmatmul.mubr.bf16.gmra.mxu1 %v10381_v1 }
  0xdd   : > { %v1201_v25 = vor.u32 %v1200_v23, %v1196_v19  ;;  %1571 = vst [vmem:[#allocation3 + $0x1c] sm:$0xf] %v1197_v46  ;;  %v1634_v37 = vrot.slane %v1632_v50, 4  ;;  %1594 = vst [vmem:[#allocation3 + $0x78] sm:$0xf] %v1427_v58  ;;  %v1637_v36 = vrot.slane %v1635_v40, 4  ;;  %v9459_v24 = vpack.c.bf16 %v874_v52, %v874_v52 }
  0xde   : > { %1779 = vst [vmem:[#allocation4 + $0x1c] sm:$0xf] %v1633_v34  ;;  %v1224_v3 = vshll.u32 %v9460_v38, 16  ;;  %v1228_v11 = vshrl.u32 %v9460_v38, 16  ;;  %v1641_v14 = vrot.slane %v9460_v38, 5  ;;  %v9518_v26 = vpack.c.bf16 %v875_v15, %v874_v52  ;;  %v10383_v63 = vld [vmem:[#allocation2 + $0x20] sm:$0xff]   ;;  %v722_v51 = vpop.permute.xlu0 %721 }
  0xdf   : > { %v1202_v5 = vrot.slane %v1201_v25, 4  ;;  %v1636_v44 = vsel %vm11149_vm12, %v1634_v37, %v1635_v40  ;;  %v1212_v13 = vrot.slane %v1211_v32, 4  ;;  %v11456_v30 = vpack.c.bf16 %v11444_v16, %v11444_v16  ;;  %9867 = vmatprep.mubr.bf16.mxu0 %v10383_v63 }
  0xe0   : > { %1780 = vst [vmem:[#allocation4 + $0x20] sm:$0xf] %v1636_v44  ;;  %v1226_v20 = vrot.slane %v1224_v3, 5  ;;  %v1230_v56 = vrot.slane %v1228_v11, 4  ;;  %9594 = vst [vmem:[#allocation2 + $0x28] sm:$0xff] %v9518_v26   ;;  %v1214_v4 = vshll.u32 %v9459_v24, 16  ;;  %v896_v23 = vmul.f32 %v11433_v61, %v11086_v21 }
  0xe1   : > { %v1207_v12 = vsel %vm11157_vm13, %v1202_v5, %v1206_v7  ;;  %v1218_v10 = vshrl.u32 %v9459_v24, 16  ;;  %v1638_v41 = vrot.slane %v9459_v24, 5  ;;  %v11460_v15 = vrot.slane %v1641_v14, 4 }
  0xe2   : > { %1572 = vst [vmem:[#allocation3 + $0x20] sm:$0xf] %v1207_v12  ;;  %v1231_v8 = vor.u32 %v1230_v56, %v1226_v20  ;;  %v1444_v31 = vshll.u32 %v11456_v30, 16  ;;  %v1448_v2 = vshrl.u32 %v11456_v30, 16  ;;  %v1216_v45 = vrot.slane %v1214_v4, 5 }
  0xe3   : > { %v1220_v47 = vrot.slane %v1218_v10, 4  ;;  %v1639_v43 = vsel %vm11149_vm12, %v1637_v36, %v1638_v41  ;;  %v1640_v17 = vrot.slane %v1638_v41, 4  ;;  %v1707_v7 = vrot.slane %v11456_v30, 5 }
  0xe4   : > { %v11466_v35 = vrot.slane %v1231_v8, 4  ;;  %1781 = vst [vmem:[#allocation4 + $0x24] sm:$0xf] %v1639_v43  ;;  %v11468_v42 = vrot.slane %v1444_v31, 5  ;;  %v1450_v33 = vrot.slane %v1448_v2, 4  ;;  %v1217_v40 = vsel %vm11157_vm13, %v1212_v13, %v1216_v45  ;;  %v737_v8 = vpop.permute.xlu1 %736 }
  0xe5   : > { %v1221_v19 = vor.u32 %v1220_v47, %v1216_v45  ;;  %v1642_v22 = vsel %vm11149_vm12, %v1640_v17, %v1641_v14  ;;  %1573 = vst [vmem:[#allocation3 + $0x24] sm:$0xf] %v1217_v40  ;;  %v899_v38 = vmul.f32 %v837_v9, %v11093_v29  ;;  %v898_v32 = vmul.f32 %v832_v55, %v11101_v54 }
  0xe6   : > { %1782 = vst [vmem:[#allocation4 + $0x28] sm:$0xf] %v1642_v22  ;;  %v1451_v50 = vor.u32 %v1450_v33, %v11468_v42  ;;  %v877_v46 = vmul.f32 %v727_v59, %v11104_v57  ;;  %v9481_v1 = vpack.c.bf16 %v896_v23, %v896_v23  ;;  %v9573_v58 = vpack.c.bf16 %v11444_v16, %v896_v23  ;;  %v732_v33 = vpop.permute.xlu0 %731  ;;  %v10394_v23 = vld [vmem:[#allocation3] sm:$0xff]  }
  0xe7   : > { %v1222_v52 = vrot.slane %v1221_v19, 4  ;;  %v876_v25 = vmul.f32 %v722_v51, %v11107_v60  ;;  %v9484_v37 = vpack.c.bf16 %v899_v38, %v899_v38  ;;  %v9483_v36 = vpack.c.bf16 %v898_v32, %v898_v32  ;;  %v10386_v61 = vld [vmem:[#allocation2 + $0x28] sm:$0xff]  }
  0xe8   : > { %v1452_v34 = vrot.slane %v1451_v50, 4  ;;  %v9578_v21 = vpack.c.bf16 %v899_v38, %v898_v32  ;;  %9605 = vst [vmem:[#allocation2 + $0x80] sm:$0xff] %v9573_v58   ;;  %v1434_v29 = vshll.u32 %v9481_v1, 16  ;;  %v1438_v9 = vshrl.u32 %v9481_v1, 16  ;;  %9868 = vmatmul.mubr.bf16.gmra.mxu0 %v10386_v61  ;;  %v847_v61 = vpop.permute.xlu1 %846 }
  0xe9   : > { %v1227_v3 = vsel %vm11157_vm13, %v1222_v52, %v1226_v20  ;;  %v1704_v54 = vrot.slane %v9481_v1, 5  ;;  %v1464_v57 = vshll.u32 %v9484_v37, 16  ;;  %v1468_v11 = vshrl.u32 %v9484_v37, 16 }
  0xea   : > { %1574 = vst [vmem:[#allocation3 + $0x28] sm:$0xf] %v1227_v3  ;;  %v1713_v14 = vrot.slane %v9484_v37, 5  ;;  %9606 = vst [vmem:[#allocation2 + $0x88] sm:$0xff] %v9578_v21   ;;  %v1454_v16 = vshll.u32 %v9483_v36, 16  ;;  %v1436_v60 = vrot.slane %v1434_v29, 5  ;;  %v9462_v41 = vpack.c.bf16 %v877_v46, %v877_v46 }
  0xeb   : > { %v1440_v55 = vrot.slane %v1438_v9, 4  ;;  %v1705_v5 = vsel %vm11149_vm12, %v11422_v18, %v1704_v54  ;;  %v1706_v44 = vrot.slane %v1704_v54, 4  ;;  %v1709_v24 = vrot.slane %v1707_v7, 4 }
  0xec   : > { %1803 = vst [vmem:[#allocation4 + $0x7c] sm:$0xf] %v1705_v5  ;;  %v11488_v26 = vrot.slane %v1464_v57, 5  ;;  %v11490_v63 = vrot.slane %v1468_v11, 4  ;;  %v1456_v13 = vrot.slane %v1454_v16, 5  ;;  %v1437_v20 = vsel %vm11157_vm13, %v11431_v39, %v1436_v60 }
  0xed   : > { %v1441_v56 = vor.u32 %v1440_v55, %v1436_v60  ;;  %v1708_v30 = vsel %vm11149_vm12, %v1706_v44, %v1707_v7  ;;  %v1458_v12 = vshrl.u32 %v9483_v36, 16  ;;  %1595 = vst [vmem:[#allocation3 + $0x7c] sm:$0xf] %v1437_v20  ;;  %v11497_v18 = vrot.slane %v1713_v14, 4 }
  0xee   : > { %1804 = vst [vmem:[#allocation4 + $0x80] sm:$0xf] %v1708_v30  ;;  %v1457_v4 = vsel %vm11157_vm13, %v1452_v34, %v1456_v13  ;;  %v1710_v10 = vrot.slane %v9483_v36, 5  ;;  %v9461_v45 = vpack.c.bf16 %v876_v25, %v876_v25  ;;  %v9523_v39 = vpack.c.bf16 %v877_v46, %v876_v25 }
  0xef   : > { %v1442_v31 = vrot.slane %v1441_v56, 4  ;;  %v1460_v2 = vrot.slane %v1458_v12, 4  ;;  %1597 = vst [vmem:[#allocation3 + $0x84] sm:$0xf] %v1457_v4  ;;  %v1471_v47 = vor.u32 %v11490_v63, %v11488_v26  ;;  %v1244_v59 = vshll.u32 %v9462_v41, 16  ;;  %v10389_v7 = vld [vmem:[#allocation2 + $0x80] sm:$0xff]  }
  0xf0   : > { %v1711_v43 = vsel %vm11149_vm12, %v1709_v24, %v1710_v10  ;;  %v1712_v17 = vrot.slane %v1710_v10, 4  ;;  %v1248_v19 = vshrl.u32 %v9462_v41, 16  ;;  %v1647_v22 = vrot.slane %v9462_v41, 5  ;;  %9595 = vst [vmem:[#allocation2 + $0x30] sm:$0xff] %v9523_v39   ;;  %9891 = vmatprep.mubr.bf16.mxu1 %v10389_v7 }
  0xf1   : > { %v1447_v51 = vsel %vm11157_vm13, %v1442_v31, %v11468_v42  ;;  %v1461_v40 = vor.u32 %v1460_v2, %v1456_v13  ;;  %1805 = vst [vmem:[#allocation4 + $0x84] sm:$0xf] %v1711_v43  ;;  %v1246_v38 = vrot.slane %v1244_v59, 5  ;;  %v1234_v32 = vshll.u32 %v9461_v45, 16  ;;  %v10392_v52 = vld [vmem:[#allocation2 + $0x88] sm:$0xff]  }
  0xf2   : > { %1596 = vst [vmem:[#allocation3 + $0x80] sm:$0xf] %v1447_v51  ;;  %v1714_v50 = vsel %vm11149_vm12, %v1712_v17, %v1713_v14  ;;  %v1238_v46 = vshrl.u32 %v9461_v45, 16  ;;  %v1250_v58 = vrot.slane %v1248_v19, 4  ;;  %v1649_v25 = vrot.slane %v1647_v22, 4  ;;  %9892 = vmatmul.mubr.bf16.gmra.mxu1 %v10392_v52  ;;  %v842_v14 = vpop.permute.xlu0 %841  ;;  %v10400_v31 = vld [vmem:[#allocation3 + $0x8] sm:$0xff]  }
  0xf3   : > { %v1462_v1 = vrot.slane %v1461_v40, 4  ;;  %1806 = vst [vmem:[#allocation4 + $0x88] sm:$0xf] %v1714_v50  ;;  %v1644_v42 = vrot.slane %v9461_v45, 5  ;;  %v1236_v34 = vrot.slane %v1234_v32, 5  ;;  %v879_v36 = vmul.f32 %v737_v8, %v11110_v0  ;;  %9911 = vmatprep.mubr.bf16.mxu1 %v10394_v23  ;;  %v10401_v17 = vld [vmem:[#allocation3 + $0x10] sm:$0xff]  }
  0xf4   : > { %v1240_v37 = vrot.slane %v1238_v46, 4  ;;  %v878_v21 = vmul.f32 %v732_v33, %v11117_v48  ;;  %v1251_v29 = vor.u32 %v1250_v58, %v1246_v38  ;;  %v12861_v33 = vld [vmem:[#allocation6_spill] sm:$0xff] }
  0xf5   : > { %v1467_v3 = vsel %vm11157_vm13, %v1462_v1, %v11488_v26  ;;  %v1645_v9 = vsel %vm11149_vm12, %v11460_v15, %v1644_v42  ;;  %v1646_v54 = vrot.slane %v1644_v42, 4  ;;  %v1237_v0 = vsel %vm11157_vm13, %v11466_v35, %v1236_v34  ;;  %v10410_v35 = vld [vmem:[%s12845_s4 + $0xf0] sm:$0xff]   ;;  %v10424_v26 = vld [vmem:[%s12845_s4 + $0xe0] sm:$0xff]  }
  0xf6   : > { %1598 = vst [vmem:[#allocation3 + $0x88] sm:$0xf] %v1467_v3  ;;  %v1241_v57 = vor.u32 %v1240_v37, %v1236_v34  ;;  %1783 = vst [vmem:[#allocation4 + $0x2c] sm:$0xf] %v1645_v9  ;;  %v9464_v48 = vpack.c.bf16 %v879_v36, %v879_v36  ;;  %v9463_v11 = vpack.c.bf16 %v878_v21, %v878_v21  ;;  %v1252_v16 = vrot.slane %v1251_v29, 4  ;;  %v852_v23 = vpop.permute.xlu0 %851  ;;  %v10416_v34 = vld [vmem:[%s12845_s4 + $0xe8] sm:$0xff]  }
  0xf7   : > { %1575 = vst [vmem:[#allocation3 + $0x2c] sm:$0xf] %v1237_v0  ;;  %v1648_v60 = vsel %vm11149_vm12, %v1646_v54, %v1647_v22  ;;  %v9528_v55 = vpack.c.bf16 %v879_v36, %v878_v21  ;;  %v11524_v15 = vmul.f32 %v847_v61, %v11120_v49  ;;  %v10396_v4 = vld [vmem:[#allocation2 + $0x30] sm:$0xff]   ;;  %v12862_v7 = vrot.slane %v12861_v33, 5  ;;  %v857_v22 = vpop.permute.xlu1 %856  ;;  %v12864_v21 = vld [vmem:[#allocation8_spill] sm:$0xff]  ;;  %v12865_v61 = vld [vmem:[#allocation9_spill] sm:$0xff] }
  0xf8   : > { %v1242_v5 = vrot.slane %v1241_v57, 4  ;;  %1784 = vst [vmem:[#allocation4 + $0x30] sm:$0xf] %v1648_v60  ;;  %v1264_v44 = vshll.u32 %v9464_v48, 16  ;;  %v1268_v24 = vshrl.u32 %v9464_v48, 16  ;;  %v1653_v13 = vrot.slane %v9464_v48, 5  ;;  %9871 = vmatprep.mubr.bf16.mxu0 %v10396_v4 }
  0xf9   : > { %9596 = vst [vmem:[#allocation2 + $0x38] sm:$0xff] %v9528_v55   ;;  %v1254_v20 = vshll.u32 %v9463_v11, 16  ;;  %v1258_v56 = vshrl.u32 %v9463_v11, 16  ;;  %v1650_v30 = vrot.slane %v9463_v11, 5  ;;  %v11531_v12 = vpack.c.bf16 %v11524_v15, %v11524_v15  ;;  %v10402_v29 = vld [vmem:[#allocation4] sm:$0xff]  }
  0xfa   : > { %v1247_v49 = vsel %vm11157_vm13, %v1242_v5, %v1246_v38  ;;  %v1266_v10 = vrot.slane %v1264_v44, 5  ;;  %v1270_v41 = vrot.slane %v1268_v24, 4  ;;  %v1655_v8 = vrot.slane %v1653_v13, 4  ;;  %9912 = vmatmul.mubr.bf16.vlgmr.msra.gmra.mxu1 %v10400_v31  ;;  %v12866_v9 = vld [vmem:[#allocation10_spill] sm:$0xff]  ;;  %v10408_v55 = vld [vmem:[#allocation3 + $0x20] sm:$0xff]  }
  0xfb   : > { %1576 = vst [vmem:[#allocation3 + $0x30] sm:$0xf] %v1247_v49  ;;  %v1256_v2 = vrot.slane %v1254_v20, 5  ;;  %v1260_v45 = vrot.slane %v1258_v56, 4  ;;  %v1651_v39 = vsel %vm11149_vm12, %v1649_v25, %v1650_v30  ;;  %v1652_v43 = vrot.slane %v1650_v30, 4  ;;  %9915 = vmatprep.mubr.bf16.mxu1 %v10401_v17  ;;  %10000 = vmatpush3.bf16.msra.mxu1 %v11300_v62  ;;  %v12863_v25 = vld [vmem:[#allocation7_spill] sm:$0xff] }
  0xfc   : > { %v1271_v59 = vor.u32 %v1270_v41, %v1266_v10  ;;  %v1657_v51 = vsel %vm11149_vm12, %v1655_v8, %v12862_v7  ;;  %1785 = vst [vmem:[#allocation4 + $0x34] sm:$0xf] %v1651_v39  ;;  %v1484_v40 = vshll.u32 %v11531_v12, 16  ;;  %v1488_v19 = vshrl.u32 %v11531_v12, 16  ;;  %10001 = vmatprep.subr.bf16.mxu1 %v10410_v35 }
  0xfd   : > { %1787 = vst [vmem:[#allocation4 + $0x3c] sm:$0xf] %v1657_v51  ;;  %v1257_v50 = vsel %vm11157_vm13, %v1252_v16, %v1256_v2  ;;  %v1261_v38 = vor.u32 %v1260_v45, %v1256_v2  ;;  %v1654_v32 = vsel %vm11149_vm12, %v1652_v43, %v1653_v13  ;;  %v1719_v46 = vrot.slane %v11531_v12, 5 }
  0xfe   : > { %v1272_v52 = vrot.slane %v1271_v59, 4  ;;  %1577 = vst [vmem:[#allocation3 + $0x34] sm:$0xf] %v1257_v50  ;;  %1786 = vst [vmem:[#allocation4 + $0x38] sm:$0xf] %v1654_v32  ;;  %v11549_v1 = vrot.slane %v1484_v40, 5  ;;  %v900_v42 = vmul.f32 %v842_v14, %v12863_v25  ;;  %v903_v62 = vmul.f32 %v857_v22, %v12864_v21 }
  0xff   : > { %v1490_v58 = vrot.slane %v1488_v19, 4  ;;  %v1472_v37 = vrot.slane %v1471_v47, 4  ;;  %v1262_v36 = vrot.slane %v1261_v38, 4  ;;  %v902_v3 = vmul.f32 %v852_v23, %v12865_v61  ;;  %v10406_v14 = vld [vmem:[#allocation3 + $0x18] sm:$0xff]   ;;  %10002 = vmatpush3.bf16.msra.mxu1 %v10410_v35  ;;  %v10413_v40 = vld [vmem:[%s12845_s4 + $0x130] sm:$0xff]  }
 0x100   : > { %v1277_v54 = vsel %vm11157_vm13, %v1272_v52, %v12866_v9  ;;  %v9485_v57 = vpack.c.bf16 %v900_v42, %v900_v42  ;;  %v9583_v48 = vpack.c.bf16 %v11524_v15, %v900_v42  ;;  %v10399_v11 = vld [vmem:[#allocation2 + $0x38] sm:$0xff]   ;;  %v11570_v47 = vpack.c.bf16 %v903_v62, %v903_v62  ;;  %10003 = vmatprep.subr.bf16.mxu1 %v10416_v34  ;;  %v10407_v23 = vld [vmem:[#allocation4 + $0x8] sm:$0xff]  }
 0x101   : > { %v1491_v0 = vor.u32 %v1490_v58, %v11549_v1  ;;  %1579 = vst [vmem:[#allocation3 + $0x3c] sm:$0xf] %v1277_v54  ;;  %v1267_v63 = vsel %vm11157_vm13, %v1262_v36, %v1266_v10  ;;  %v9487_v16 = vpack.c.bf16 %v902_v3, %v902_v3  ;;  %v9588_v60 = vpack.c.bf16 %v903_v62, %v902_v3  ;;  %v862_v10 = vpop.permute.xlu0 %861  ;;  %v10438_v50 = vld [vmem:[%s12845_s4 + $0xd0] sm:$0xff]   ;;  %v10409_v52 = vld [vmem:[#allocation4 + $0x10] sm:$0xff]  }
 0x102   : > { %1578 = vst [vmem:[#allocation3 + $0x38] sm:$0xf] %v1267_v63  ;;  %v1721_v5 = vrot.slane %v1719_v46, 4  ;;  %9607 = vst [vmem:[#allocation2 + $0x90] sm:$0xff] %v9583_v48   ;;  %v1474_v15 = vshll.u32 %v9485_v57, 16  ;;  %v1478_v44 = vshrl.u32 %v9485_v57, 16  ;;  %9872 = vmatmul.mubr.bf16.gmra.mxu0 %v10399_v11  ;;  %9916 = vmatmul.mubr.bf16.gmra.mxu1 %v10406_v14  ;;  %v904_v51 = vmul.f32 %v862_v10, %v11336_v6 }
 0x103   : > { %v1716_v24 = vrot.slane %v9485_v57, 5  ;;  %v1492_v13 = vrot.slane %v1491_v0, 4  ;;  %v1504_v20 = vshll.u32 %v11570_v47, 16  ;;  %v1508_v56 = vshrl.u32 %v11570_v47, 16  ;;  %9608 = vst [vmem:[#allocation2 + $0x98] sm:$0xff] %v9588_v60   ;;  %9963 = vmatprep.mubr.bf16.mxu0 %v10402_v29  ;;  %9919 = vmatprep.mubr.bf16.mxu1 %v10408_v55  ;;  %v10411_v58 = vld [vmem:[#allocation3 + $0x28] sm:$0xff]  }
 0x104   : > { %v1494_v30 = vshll.u32 %v9487_v16, 16  ;;  %v1476_v12 = vrot.slane %v1474_v15, 5  ;;  %v1480_v4 = vrot.slane %v1478_v44, 4  ;;  %v1725_v31 = vrot.slane %v11570_v47, 5  ;;  %10004 = vmatpush3.bf16.msra.mxu1 %v10416_v34  ;;  %v10444_v57 = vld [vmem:[%s12845_s4 + $0xc8] sm:$0xff]   ;;  %v10412_v14 = vld [vmem:[#allocation4 + $0x18] sm:$0xff]  }
 0x105   : > { %v1717_v35 = vsel %vm11149_vm12, %v11497_v18, %v1716_v24  ;;  %v1718_v49 = vrot.slane %v1716_v24, 4  ;;  %v1506_v41 = vrot.slane %v1504_v20, 5  ;;  %v1510_v8 = vrot.slane %v1508_v56, 4  ;;  %10005 = vmatprep.subr.bf16.mxu1 %v10424_v26  ;;  %v10432_v18 = vld [vmem:[%s12845_s4 + $0xd8] sm:$0xff]   ;;  %v10415_v47 = vld [vmem:[#allocation4 + $0x20] sm:$0xff]   ;;  %v10418_v15 = vld [vmem:[#allocation4 + $0x28] sm:$0xff]  }
 0x106   : > { %1807 = vst [vmem:[#allocation4 + $0x8c] sm:$0xf] %v1717_v35  ;;  %v1496_v2 = vrot.slane %v1494_v30, 5  ;;  %v1477_v45 = vsel %vm11157_vm13, %v1472_v37, %v1476_v12  ;;  %v1481_v39 = vor.u32 %v1480_v4, %v1476_v12  ;;  %v1498_v17 = vshrl.u32 %v9487_v16, 16  ;;  %v10414_v61 = vld [vmem:[#allocation3 + $0x30] sm:$0xff]   ;;  %v10422_v24 = vld [vmem:[#allocation3 + $0x48] sm:$0xff]  }
 0x107   : > { %v1720_v43 = vsel %vm11149_vm12, %v1718_v49, %v1719_v46  ;;  %1599 = vst [vmem:[#allocation3 + $0x8c] sm:$0xf] %v1477_v45  ;;  %v1511_v59 = vor.u32 %v1510_v8, %v1506_v41  ;;  %v1722_v7 = vrot.slane %v9487_v16, 5  ;;  %v9489_v46 = vpack.c.bf16 %v904_v51, %v904_v51  ;;  %v10419_v16 = vld [vmem:[#allocation3 + $0x40] sm:$0xff]   ;;  %v10433_v60 = vld [vmem:[%s12845_s4 + $0x118] sm:$0xff]   ;;  %v10429_v10 = vld [vmem:[#allocation4 + $0x48] sm:$0xff]  }
 0x108   : > { %1808 = vst [vmem:[#allocation4 + $0x90] sm:$0xf] %v1720_v43  ;;  %v1497_v33 = vsel %vm11157_vm13, %v1492_v13, %v1496_v2  ;;  %v1482_v19 = vrot.slane %v1481_v39, 4  ;;  %v1500_v22 = vrot.slane %v1498_v17, 4  ;;  %10006 = vmatpush3.bf16.msra.mxu1 %v10424_v26  ;;  %v1727_v42 = vrot.slane %v1725_v31, 4  ;;  %v10451_v26 = vld [vmem:[%s12845_s4 + $0xc0] sm:$0xff]  }
 0x109   : > { %1601 = vst [vmem:[#allocation3 + $0x94] sm:$0xf] %v1497_v33  ;;  %v1723_v38 = vsel %vm11149_vm12, %v1721_v5, %v1722_v7  ;;  %v1724_v32 = vrot.slane %v1722_v7, 4  ;;  %v1512_v25 = vrot.slane %v1511_v59, 4  ;;  %10007 = vmatprep.subr.bf16.mxu1 %v10432_v18  ;;  %1110 = vst [vmem:[#allocation2 + $0xa0] sm:$0x3] %v9489_v46 }
 0x10a   : > { %v1487_v6 = vsel %vm11157_vm13, %v1482_v19, %v11549_v1  ;;  %v1501_v34 = vor.u32 %v1500_v22, %v1496_v2  ;;  %1809 = vst [vmem:[#allocation4 + $0x94] sm:$0xf] %v1723_v38  ;;  %9964 = vmatmul.mubr.bf16.vlgmr.msra.gmra.mxu0 %v10407_v23  ;;  %v1514_v36 = vshll.u32 %v9489_v46, 16  ;;  %v1518_v21 = vshrl.u32 %v9489_v46, 16  ;;  %9920 = vmatmul.mubr.bf16.gmra.mxu1 %v10411_v58  ;;  %v10421_v1 = vld [vmem:[%s12845_s4 + $0x128] sm:$0xff]   ;;  %v10417_v27 = vld [vmem:[#allocation3 + $0x38] sm:$0xff]  }
 0x10b   : > { %1600 = vst [vmem:[#allocation3 + $0x90] sm:$0xf] %v1487_v6  ;;  %v1726_v37 = vsel %vm11149_vm12, %v1724_v32, %v1725_v31  ;;  %v1728_v62 = vrot.slane %v9489_v46, 5  ;;  %10052 = vmatpush3.bf16.msra.mxu0 %v11419_v28  ;;  %9967 = vmatprep.mubr.bf16.mxu0 %v10409_v52  ;;  %v11626_v55 = vld [vmem:[%s12845_s4 + $0x178] sm:$0xff]   ;;  %v10439_v5 = vld [vmem:[%s12845_s4 + $0x110] sm:$0xff]   ;;  %v10445_v20 = vld [vmem:[%s12845_s4 + $0x108] sm:$0xff]  }
 0x10c   : > { %v1502_v3 = vrot.slane %v1501_v34, 4  ;;  %1810 = vst [vmem:[#allocation4 + $0x98] sm:$0xf] %v1726_v37  ;;  %10053 = vmatprep.subr.bf16.mxu0 %v10413_v40  ;;  %v1516_v29 = vrot.slane %v1514_v36, 5  ;;  %v1520_v9 = vrot.slane %v1518_v21, 4  ;;  %9923 = vmatprep.mubr.bf16.mxu1 %v10414_v61  ;;  %v10420_v44 = vld [vmem:[#allocation4 + $0x30] sm:$0xff]  }
 0x10d   : > { %v1729_v54 = vsel %vm11149_vm12, %v1727_v42, %v1728_v62  ;;  %v1730_v0 = vrot.slane %v1728_v62, 4  ;;  %10008 = vmatpush3.bf16.msra.mxu1 %v10432_v18  ;;  %v10425_v13 = vld [vmem:[#allocation3 + $0x50] sm:$0xff]   ;;  %v10452_v56 = vld [vmem:[%s12845_s4 + $0x100] sm:$0xff]   ;;  %v10426_v12 = vld [vmem:[#allocation4 + $0x40] sm:$0xff]  }
 0x10e   : > { %v1507_v28 = vsel %vm11157_vm13, %v1502_v3, %v1506_v41  ;;  %1811 = vst [vmem:[#allocation4 + $0x9c] sm:$0xf] %v1729_v54  ;;  %10009 = vmatprep.subr.bf16.mxu1 %v10438_v50  ;;  %v1517_v48 = vsel %vm11157_vm13, %v1512_v25, %v1516_v29  ;;  %v1521_v11 = vor.u32 %v1520_v9, %v1516_v29  ;;  %v10423_v30 = vld [vmem:[#allocation4 + $0x38] sm:$0xff]   ;;  %v11641_v49 = vld [vmem:[%s12845_s4 + $0x1b8] sm:$0xff]   ;;  %v10434_v8 = vld [vmem:[#allocation3 + $0x68] sm:$0xff]  }
 0x10f   : > { %1602 = vst [vmem:[#allocation3 + $0x98] sm:$0xf] %v1507_v28  ;;  %1812 = vst [vmem:[#allocation4 + $0xa0] sm:$0x1] %v1730_v0  ;;  %10054 = vmatpush3.bf16.msra.mxu0 %v10413_v40  ;;  %v10428_v4 = vld [vmem:[#allocation3 + $0x58] sm:$0xff]   ;;  %v10430_v35 = vld [vmem:[#allocation3 + $0x60] sm:$0xff]  }
 0x110   : > { %1603 = vst [vmem:[#allocation3 + $0x9c] sm:$0xf] %v1517_v48  ;;  %10055 = vmatprep.subr.bf16.mxu0 %v10421_v1  ;;  %v1522_v63 = vrot.slane %v1521_v11, 4  ;;  %v10431_v41 = vld [vmem:[#allocation4 + $0x50] sm:$0xff]   ;;  %v10435_v2 = vld [vmem:[#allocation4 + $0x58] sm:$0xff]   ;;  %v10437_v45 = vld [vmem:[#allocation4 + $0x60] sm:$0xff]  }
 0x111   : > { %10010 = vmatpush3.bf16.msra.mxu1 %v10438_v50  ;;  %v10436_v31 = vld [vmem:[#allocation3 + $0x70] sm:$0xff]   ;;  %v10440_v39 = vld [vmem:[#allocation3 + $0x78] sm:$0xff]   ;;  %v10442_v43 = vld [vmem:[#allocation3 + $0x80] sm:$0xff]  }
 0x112   : > { %9968 = vmatmul.mubr.bf16.gmra.mxu0 %v10412_v14  ;;  %10011 = vmatprep.subr.bf16.mxu1 %v10444_v57  ;;  %1604 = vst [vmem:[#allocation3 + $0xa0] sm:$0x1] %v1522_v63  ;;  %v10450_v17 = vld [vmem:[#allocation2 + $0x10] sm:$0xff]   ;;  %v10449_v18 = vld [vmem:[#allocation2 + $0x8] sm:$0xfe]   ;;  %v10443_v7 = vld [vmem:[#allocation4 + $0x70] sm:$0xff]  }
 0x113   : > { %9971 = vmatprep.mubr.bf16.mxu0 %v10415_v47  ;;  %10056 = vmatpush3.bf16.msra.mxu0 %v10421_v1  ;;  %v10441_v59 = vld [vmem:[#allocation4 + $0x68] sm:$0xff]   ;;  %v3408_v33 = vrot.slane %v10450_v17, 1  ;;  %v3407_v40 = vrot.slane %v10449_v18, 1  ;;  %v10454_v19 = vld [vmem:[#allocation2 + $0x18] sm:$0xff]   ;;  %v10455_v23 = vld [vmem:[#allocation2 + $0x20] sm:$0xff]  }
 0x114   : > { %9924 = vmatmul.mubr.bf16.gmra.mxu1 %v10417_v27  ;;  %10057 = vmatprep.subr.bf16.mxu0 %v10427_v53  ;;  %v10446_v51 = vld [vmem:[#allocation3 + $0x88] sm:$0xff]   ;;  %v3410_v50 = vrot.slane %v10454_v19, 1  ;;  %v10447_v38 = vld [vmem:[#allocation4 + $0x78] sm:$0xff]   ;;  %v3412_v32 = vrot.slane %v10455_v23, 1  ;;  %v10457_v46 = vld [vmem:[#allocation3 + $0x10] sm:$0xff]  }
 0x115   : > { %9927 = vmatprep.mubr.bf16.mxu1 %v10419_v16  ;;  %10012 = vmatpush3.bf16.msra.mxu1 %v10444_v57  ;;  %v3409_v22 = vsel %vm3406_vm15, %v3407_v40, %v3408_v33  ;;  %v10448_v52 = vld [vmem:[#allocation4 + $0x80] sm:$0xff]   ;;  %v10464_v58 = vld [vmem:[%s12845_s4 + $0x170] sm:$0xff]   ;;  %v3943_v36 = vrot.slane %v10457_v46, 1  ;;  %v10461_v3 = vld [vmem:[#allocation3 + $0x18] sm:$0xff]  }
 0x116   : > { %10013 = vmatprep.subr.bf16.mxu1 %v10451_v26  ;;  %v3411_v6 = vsel %vm3406_vm15, %v3408_v33, %v3410_v50  ;;  %v10460_v25 = vld [vmem:[#allocation2 + $0x28] sm:$0xff]   ;;  %v3413_v42 = vsel %vm3406_vm15, %v3410_v50, %v3412_v32  ;;  %v10462_v37 = vld [vmem:[#allocation2 + $0x30] sm:$0xff]   ;;  %v10478_v0 = vld [vmem:[%s12845_s4 + $0x160] sm:$0xff]   ;;  %v3945_v11 = vrot.slane %v10461_v3, 1 }
 0x117   : > { %10058 = vmatpush3.bf16.msra.mxu0 %v10427_v53  ;;  %v10456_v34 = vld [vmem:[#allocation3 + $0x8] sm:$0xfe]   ;;  %v3414_v61 = vrot.slane %v10460_v25, 1  ;;  %v3416_v29 = vrot.slane %v10462_v37, 1  ;;  %v10463_v9 = vld [vmem:[#allocation3 + $0x20] sm:$0xff]   ;;  %v10465_v57 = vld [vmem:[#allocation2 + $0x38] sm:$0xff]  }
 0x118   : > { %10059 = vmatprep.subr.bf16.mxu0 %v10433_v60  ;;  %v10470_v21 = vld [vmem:[%s12845_s4 + $0x168] sm:$0xff]   ;;  %v10453_v62 = vld [vmem:[#allocation4 + $0x88] sm:$0xff]   ;;  %v3942_v1 = vrot.slane %v10456_v34, 1  ;;  %v10468_v53 = vld [vmem:[#allocation2 + $0x40] sm:$0xff]   ;;  %v3947_v14 = vrot.slane %v10463_v9, 1  ;;  %v3418_v63 = vrot.slane %v10465_v57, 1  ;;  %v3946_v16 = vsel %vm3406_vm15, %v3943_v36, %v3945_v11 }
 0x119   : > { %10014 = vmatpush3.bf16.msra.mxu1 %v10451_v26  ;;  %v3415_v28 = vsel %vm3406_vm15, %v3412_v32, %v3414_v61  ;;  %v3417_v48 = vsel %vm3406_vm15, %v3414_v61, %v3416_v29  ;;  %v10486_v26 = vld [vmem:[%s12845_s4 + $0x158] sm:$0xff]   ;;  %v10466_v47 = vld [vmem:[#allocation3 + $0x28] sm:$0xff]   ;;  %v10479_v17 = vld [vmem:[#allocation2 + $0x60] sm:$0xff]  }
 0x11a   : > { %9972 = vmatmul.mubr.bf16.gmra.mxu0 %v10418_v15  ;;  %10103 = vmatprep.subr.bf16.mxu1 %v11626_v55  ;;  %v3944_v54 = vsel %vm3406_vm15, %v3942_v1, %v3943_v36  ;;  %v10467_v27 = vld [vmem:[%s12845_s4 + $0x1b0] sm:$0xff]   ;;  %v10482_v46 = vld [vmem:[#allocation2 + $0x68] sm:$0xff]   ;;  %v10483_v36 = vld [vmem:[#allocation3 + $0x58] sm:$0xff]  }
 0x11b   : > { %9975 = vmatprep.mubr.bf16.mxu0 %v10420_v44  ;;  %10060 = vmatpush3.bf16.msra.mxu0 %v10433_v60  ;;  %v3420_v60 = vrot.slane %v10468_v53, 1  ;;  %v10492_v15 = vld [vmem:[%s12845_s4 + $0x150] sm:$0xff]   ;;  %v3948_v44 = vsel %vm3406_vm15, %v3945_v11, %v3947_v14  ;;  %v10499_v25 = vld [vmem:[%s12845_s4 + $0x188] sm:$0xff]   ;;  %v3430_v37 = vrot.slane %v10482_v46, 1  ;;  %v3961_v57 = vrot.slane %v10483_v36, 1 }
 0x11c   : > { %9928 = vmatmul.mubr.bf16.gmra.mxu1 %v10422_v24  ;;  %10061 = vmatprep.subr.bf16.mxu0 %v10439_v5  ;;  %v3419_v24 = vsel %vm3406_vm15, %v3416_v29, %v3418_v63  ;;  %v10477_v19 = vld [vmem:[#allocation3 + $0x48] sm:$0xff]   ;;  %v10485_v3 = vld [vmem:[#allocation3 + $0x60] sm:$0xff]   ;;  %v10488_v29 = vld [vmem:[#allocation2 + $0x78] sm:$0xff]  }
 0x11d   : > { %9931 = vmatprep.mubr.bf16.mxu1 %v10425_v13  ;;  %v10473_v13 = vld [vmem:[#allocation2 + $0x50] sm:$0xff]   ;;  %v3434_v11 = vrot.slane %v10488_v29, 1 }
 0x11e   : > { %v10493_v23 = vld [vmem:[%s12845_s4 + $0x190] sm:$0xff]  }
 0x11f   : > { %10062 = vmatpush3.bf16.msra.mxu0 %v10439_v5  ;;  %v10471_v5 = vld [vmem:[#allocation2 + $0x48] sm:$0xff]  }
 0x120   : > { %10063 = vmatprep.subr.bf16.mxu0 %v10445_v20 }
 0x122   : > { %9976 = vmatmul.mubr.bf16.gmra.mxu0 %v10423_v30  ;;  %v3949_v30 = vrot.slane %v10466_v47, 1  ;;  %v10491_v47 = vld [vmem:[#allocation3 + $0x70] sm:$0xff]  }
 0x123   : > { %9979 = vmatprep.mubr.bf16.mxu0 %v10426_v12  ;;  %10064 = vmatpush3.bf16.msra.mxu0 %v10445_v20  ;;  %v10475_v20 = vld [vmem:[%s12845_s4 + $0x1a8] sm:$0xff]  }
 0x124   : > { %9932 = vmatmul.mubr.bf16.gmra.mxu1 %v10428_v4  ;;  %10065 = vmatprep.subr.bf16.mxu0 %v10452_v56  ;;  %v10498_v4 = vld [vmem:[%s12845_s4 + $0x148] sm:$0xff]  }
 0x125   : > { %9935 = vmatprep.mubr.bf16.mxu1 %v10430_v35  ;;  %v3422_v35 = vrot.slane %v10471_v5, 1 }
 0x127   : > { %10066 = vmatpush3.bf16.msra.mxu0 %v10452_v56  ;;  %v3421_v56 = vsel %vm3406_vm15, %v3418_v63, %v3420_v60 }
 0x128   : > { %10155 = vmatprep.subr.bf16.mxu0 %v11641_v49 }
 0x12a   : > { %9980 = vmatmul.mubr.bf16.gmra.mxu0 %v10429_v10  ;;  %v10481_v10 = vld [vmem:[%s12845_s4 + $0x1a0] sm:$0xff]  }
 0x12b   : > { %9983 = vmatprep.mubr.bf16.mxu0 %v10431_v41  ;;  %v3950_v41 = vsel %vm3406_vm15, %v3947_v14, %v3949_v30 }
 0x12c   : > { %9936 = vmatmul.mubr.bf16.gmra.mxu1 %v10434_v8  ;;  %v10472_v8 = vld [vmem:[#allocation3 + $0x38] sm:$0xff]  }
 0x12d   : > { %9939 = vmatprep.mubr.bf16.mxu1 %v10436_v31  ;;  %v10474_v31 = vld [vmem:[#allocation3 + $0x40] sm:$0xff]   ;;  %v3953_v33 = vrot.slane %v10472_v8, 1 }
 0x132   : > { %9984 = vmatmul.mubr.bf16.gmra.mxu0 %v10435_v2  ;;  %v10476_v2 = vld [vmem:[#allocation2 + $0x58] sm:$0xff]  }
 0x133   : > { %9987 = vmatprep.mubr.bf16.mxu0 %v10437_v45  ;;  %v3426_v40 = vrot.slane %v10476_v2, 1  ;;  %v10503_v2 = vld [vmem:[#allocation4 + $0x8] sm:$0xfe]  }
 0x134   : > { %9940 = vmatmul.mubr.bf16.gmra.mxu1 %v10440_v39  ;;  %v10505_v39 = vld [vmem:[%s12845_s4 + $0x140] sm:$0xff]  }
 0x135   : > { %9943 = vmatprep.mubr.bf16.mxu1 %v10442_v43  ;;  %v3423_v43 = vsel %vm3406_vm15, %v3420_v60, %v3422_v35 }
 0x13a   : > { %9988 = vmatmul.mubr.bf16.gmra.mxu0 %v10441_v59  ;;  %v10487_v59 = vld [vmem:[%s12845_s4 + $0x198] sm:$0xff]  }
 0x13b   : > { %9991 = vmatprep.mubr.bf16.mxu0 %v10443_v7  ;;  %v11696_v7 = vld [vmem:[%s12845_s4 + $0x1f8] sm:$0xff]  }
 0x13c   : > { %9944 = vmatmul.mubr.bf16.gmra.mxu1 %v10446_v51  ;;  %v3955_v51 = vrot.slane %v10474_v31, 1 }
 0x13d   : > { %10015 = vmatprep.mubr.bf16.mxu1 %v3409_v22  ;;  %v3428_v22 = vrot.slane %v10479_v17, 1  ;;  %v10501_v17 = vld [vmem:[#allocation3 + $0x88] sm:$0xff]  }
 0x13e   : > { %v3956_v32 = vsel %vm3406_vm15, %v3953_v33, %v3955_v51 }
 0x13f   : > { %v3431_v9 = vsel %vm3406_vm15, %v3428_v22, %v3430_v37 }
 0x142   : > { %9992 = vmatmul.mubr.bf16.gmra.mxu0 %v10447_v38  ;;  %v10480_v38 = vld [vmem:[#allocation3 + $0x50] sm:$0xff]  }
 0x143   : > { %9995 = vmatprep.mubr.bf16.mxu0 %v10448_v52  ;;  %v3959_v34 = vrot.slane %v10480_v38, 1 }
 0x144   : > { %10016 = vmatmul.mubr.bf16.vlgmr.msra.gmra.mxu1 %v3411_v6  ;;  %v3429_v6 = vsel %vm3406_vm15, %v3426_v40, %v3428_v22 }
 0x145   : > { %10019 = vmatprep.mubr.bf16.mxu1 %v3413_v42  ;;  %10104 = vmatpush3.bf16.msra.mxu1 %v11626_v55  ;;  %v10469_v55 = vld [vmem:[#allocation3 + $0x30] sm:$0xff]   ;;  %v3957_v42 = vrot.slane %v10477_v19, 1  ;;  %v3962_v14 = vsel %vm3406_vm15, %v3959_v34, %v3961_v57  ;;  %v10508_v19 = vld [vmem:[#allocation4 + $0x18] sm:$0xff]  }
 0x146   : > { %10105 = vmatprep.subr.bf16.mxu1 %v10464_v58  ;;  %v3951_v12 = vrot.slane %v10469_v55, 1  ;;  %v10496_v55 = vld [vmem:[#allocation2 + $0x90] sm:$0xff]   ;;  %v4480_v46 = vrot.slane %v10508_v19, 1 }
 0x147   : > { %v3958_v61 = vsel %vm3406_vm15, %v3955_v51, %v3957_v42  ;;  %v3960_v1 = vsel %vm3406_vm15, %v3957_v42, %v3959_v34  ;;  %v4477_v51 = vrot.slane %v10503_v2, 1  ;;  %v10511_v34 = vld [vmem:[#allocation2 + $0x18] sm:$0xff]   ;;  %v10525_v2 = vld [vmem:[#allocation4 + $0x48] sm:$0xff]  }
 0x148   : > { %v3952_v45 = vsel %vm3406_vm15, %v3949_v30, %v3951_v12  ;;  %v3954_v50 = vsel %vm3406_vm15, %v3951_v12, %v3953_v33  ;;  %v10497_v12 = vld [vmem:[#allocation3 + $0x80] sm:$0xff]   ;;  %v10502_v33 = vld [vmem:[#allocation3 + $0x90] sm:$0xff]  }
 0x149   : > { %10106 = vmatpush3.bf16.msra.mxu1 %v10464_v58  ;;  %v10484_v58 = vld [vmem:[#allocation2 + $0x70] sm:$0xff]   ;;  %v3971_v8 = vrot.slane %v10497_v12, 1 }
 0x14a   : > { %9996 = vmatmul.mubr.bf16.gmra.mxu0 %v10453_v62  ;;  %10107 = vmatprep.subr.bf16.mxu1 %v10470_v21  ;;  %v10506_v62 = vld [vmem:[%s12845_s4 + $0x180] sm:$0xff]  }
 0x14b   : > { %10067 = vmatprep.mubr.bf16.mxu0 %v3944_v54  ;;  %v10490_v54 = vld [vmem:[#allocation2 + $0x80] sm:$0xff]  }
 0x14c   : > { %10020 = vmatmul.mubr.bf16.gmra.mxu1 %v3415_v28  ;;  %v11719_v28 = vld [vmem:[%s12845_s4 + $0x238] sm:$0xff]   ;;  %v3436_v53 = vrot.slane %v10490_v54, 1  ;;  %v10524_v54 = vld [vmem:[%s12845_s4 + $0x1e8] sm:$0xff]  }
 0x14d   : > { %10023 = vmatprep.mubr.bf16.mxu1 %v3417_v48  ;;  %10108 = vmatpush3.bf16.msra.mxu1 %v10470_v21  ;;  %v3432_v21 = vrot.slane %v10484_v58, 1  ;;  %v3963_v48 = vrot.slane %v10485_v3, 1  ;;  %v10516_v3 = vld [vmem:[#allocation4 + $0x30] sm:$0xff]  }
 0x14e   : > { %10109 = vmatprep.subr.bf16.mxu1 %v10478_v0  ;;  %v3437_v60 = vsel %vm3406_vm15, %v3434_v11, %v3436_v53 }
 0x14f   : > { %v3964_v63 = vsel %vm3406_vm15, %v3961_v57, %v3963_v48 }
 0x151   : > { %10110 = vmatpush3.bf16.msra.mxu1 %v10478_v0  ;;  %v3433_v0 = vsel %vm3406_vm15, %v3430_v37, %v3432_v21  ;;  %v10518_v37 = vld [vmem:[%s12845_s4 + $0x1f0] sm:$0xff]  }
 0x152   : > { %10068 = vmatmul.mubr.bf16.vlgmr.msra.gmra.mxu0 %v3946_v16  ;;  %10111 = vmatprep.subr.bf16.mxu1 %v10486_v26  ;;  %v10494_v16 = vld [vmem:[#allocation2 + $0x88] sm:$0xff]  }
 0x153   : > { %10156 = vmatpush3.bf16.msra.mxu0 %v11641_v49  ;;  %10071 = vmatprep.mubr.bf16.mxu0 %v3948_v44  ;;  %v3424_v49 = vrot.slane %v10473_v13, 1  ;;  %v3438_v44 = vrot.slane %v10494_v16, 1 }
 0x154   : > { %10024 = vmatmul.mubr.bf16.gmra.mxu1 %v3419_v24  ;;  %10157 = vmatprep.subr.bf16.mxu0 %v10467_v27  ;;  %v3440_v24 = vrot.slane %v10496_v55, 1 }
 0x155   : > { %10027 = vmatprep.mubr.bf16.mxu1 %v3421_v56  ;;  %10112 = vmatpush3.bf16.msra.mxu1 %v10486_v26  ;;  %v3425_v18 = vsel %vm3406_vm15, %v3422_v35, %v3424_v49  ;;  %v3427_v52 = vsel %vm3406_vm15, %v3424_v49, %v3426_v40  ;;  %v10489_v26 = vld [vmem:[#allocation3 + $0x68] sm:$0xff]   ;;  %v10500_v35 = vld [vmem:[#allocation2 + $0x98] ss:$0 sps:$4 sm:$0x11]  }
 0x156   : > { %10113 = vmatprep.subr.bf16.mxu1 %v10492_v15  ;;  %v3965_v5 = vrot.slane %v10489_v26, 1  ;;  %v3441_v49 = vsel %vm3406_vm15, %v3438_v44, %v3440_v24  ;;  %v10517_v26 = vld [vmem:[#allocation2 + $0x28] sm:$0xff]  }
 0x157   : > { %10158 = vmatpush3.bf16.msra.mxu0 %v10467_v27  ;;  %v3435_v27 = vsel %vm3406_vm15, %v3432_v21, %v3434_v11  ;;  %v10514_v21 = vld [vmem:[#allocation4 + $0x28] sm:$0xff]  }
 0x158   : > { %10159 = vmatprep.subr.bf16.mxu0 %v10475_v20  ;;  %v3966_v13 = vsel %vm3406_vm15, %v3963_v48, %v3965_v5  ;;  %v4486_v48 = vrot.slane %v10516_v3, 1 }
 0x159   : > { %10114 = vmatpush3.bf16.msra.mxu1 %v10492_v15  ;;  %v3967_v15 = vrot.slane %v10491_v47, 1 }
 0x15a   : > { %10072 = vmatmul.mubr.bf16.gmra.mxu0 %v3950_v41  ;;  %10115 = vmatprep.subr.bf16.mxu1 %v10498_v4 }
 0x15b   : > { %10075 = vmatprep.mubr.bf16.mxu0 %v3952_v45  ;;  %10160 = vmatpush3.bf16.msra.mxu0 %v10475_v20  ;;  %v10495_v20 = vld [vmem:[#allocation3 + $0x78] sm:$0xff]   ;;  %v3968_v56 = vsel %vm3406_vm15, %v3965_v5, %v3967_v15  ;;  %v3442_v45 = vrot.slane %v10500_v35, 1  ;;  %v5018_v5 = vrot.slane %v10517_v26, 2 }
 0x15c   : > { %10028 = vmatmul.mubr.bf16.gmra.mxu1 %v3423_v43  ;;  %10161 = vmatprep.subr.bf16.mxu0 %v10481_v10  ;;  %v3969_v41 = vrot.slane %v10495_v20, 1 }
 0x15d   : > { %10031 = vmatprep.mubr.bf16.mxu1 %v3425_v18  ;;  %10116 = vmatpush3.bf16.msra.mxu1 %v10498_v4  ;;  %v11728_v30 = vpop.f32.mrf.mxu1  ;;  %v3439_v4 = vsel %vm3406_vm15, %v3436_v53, %v3438_v44  ;;  %v3443_v40 = vsel %vm3406_vm15, %v3440_v24, %v3442_v45  ;;  %v10515_v53 = vld [vmem:[#allocation2 + $0x20] sm:$0xff]   ;;  %v10540_v44 = vld [vmem:[%s12845_s4 + $0x1d8] sm:$0xff]  }
 0x15e   : > { %10117 = vmatprep.subr.bf16.mxu1 %v10505_v39  ;;  %v3970_v43 = vsel %vm3406_vm15, %v3967_v15, %v3969_v41  ;;  %v3972_v18 = vsel %vm3406_vm15, %v3969_v41, %v3971_v8  ;;  %v10522_v15 = vld [vmem:[#allocation4 + $0x40] sm:$0xff]   ;;  %v10546_v41 = vld [vmem:[%s12845_s4 + $0x1d0] sm:$0xff]  }
 0x15f   : > { %10162 = vmatpush3.bf16.msra.mxu0 %v10481_v10  ;;  %v10504_v10 = vld [vmem:[#allocation4 + $0x10] sm:$0xff]   ;;  %v11732_v31 = vpop.f32.mrf.mxu1 }
 0x160   : > { %10163 = vmatprep.subr.bf16.mxu0 %v10487_v59 }
 0x161   : > { %10118 = vmatpush3.bf16.msra.mxu1 %v10505_v39  ;;  %v4478_v39 = vrot.slane %v10504_v10, 1  ;;  %v10523_v10 = vld [vmem:[#allocation2 + $0x38] sm:$0xff]  }
 0x162   : > { %10076 = vmatmul.mubr.bf16.gmra.mxu0 %v3954_v50  ;;  %10207 = vmatprep.subr.bf16.mxu1 %v11696_v7  ;;  %v3973_v50 = vrot.slane %v10501_v17, 1  ;;  %v10527_v17 = vld [vmem:[#allocation4 + $0x50] sm:$0xff]  }
 0x163   : > { %10079 = vmatprep.mubr.bf16.mxu0 %v3956_v32  ;;  %10164 = vmatpush3.bf16.msra.mxu0 %v10487_v59  ;;  %v11736_v59 = vpop.f32.mrf.mxu1  ;;  %v4479_v22 = vsel %vm3406_vm15, %v4477_v51, %v4478_v39  ;;  %v3975_v32 = vrot.slane %v10502_v33, 1  ;;  %v4481_v36 = vsel %vm3406_vm15, %v4478_v39, %v4480_v46  ;;  %v10552_v51 = vld [vmem:[%s12845_s4 + $0x1c8] sm:$0xff]  }
 0x164   : > { %10032 = vmatmul.mubr.bf16.gmra.mxu1 %v3427_v52  ;;  %10165 = vmatprep.subr.bf16.mxu0 %v10493_v23  ;;  %v3974_v58 = vsel %vm3406_vm15, %v3971_v8, %v3973_v50 }
 0x165   : > { %10035 = vmatprep.mubr.bf16.mxu1 %v3429_v6  ;;  %v11740_v38 = vpop.f32.mrf.mxu1  ;;  %v10507_v6 = vld [vmem:[#allocation3 + $0x98] ss:$0 sps:$4 sm:$0x11]   ;;  %v3976_v42 = vsel %vm3406_vm15, %v3973_v50, %v3975_v32  ;;  %v10535_v50 = vld [vmem:[%s12845_s4 + $0x220] sm:$0xff]  }
 0x167   : > { %10166 = vmatpush3.bf16.msra.mxu0 %v10493_v23  ;;  %v10509_v23 = vld [vmem:[#allocation4 + $0x20] sm:$0xff]  }
 0x168   : > { %10167 = vmatprep.subr.bf16.mxu0 %v10499_v25  ;;  %v4482_v52 = vrot.slane %v10509_v23, 1  ;;  %v4494_v23 = vrot.slane %v10527_v17, 1  ;;  %v10539_v17 = vld [vmem:[#allocation2 + $0x68] sm:$0xff]  }
 0x16a   : > { %10080 = vmatmul.mubr.bf16.gmra.mxu0 %v3958_v61  ;;  %v10510_v61 = vld [vmem:[#allocation2 + $0x10] sm:$0xfc]  }
 0x16b   : > { %10083 = vmatprep.mubr.bf16.mxu0 %v3960_v1  ;;  %10168 = vmatpush3.bf16.msra.mxu0 %v10499_v25  ;;  %v11743_v25 = vpop.f32.mrf.mxu1  ;;  %v3977_v1 = vrot.slane %v10507_v6, 1  ;;  %v5013_v57 = vrot.slane %v10510_v61, 2  ;;  %v10559_v6 = vld [vmem:[%s12845_s4 + $0x1c0] sm:$0xff]   ;;  %v10541_v61 = vld [vmem:[%s12845_s4 + $0x218] sm:$0xff]  }
 0x16c   : > { %10036 = vmatmul.mubr.bf16.gmra.mxu1 %v3431_v9  ;;  %10169 = vmatprep.subr.bf16.mxu0 %v10506_v62  ;;  %v5014_v9 = vrot.slane %v10511_v34, 2  ;;  %v10530_v34 = vld [vmem:[#allocation4 + $0x58] sm:$0xff]  }
 0x16d   : > { %10039 = vmatprep.mubr.bf16.mxu1 %v3433_v0  ;;  %v11752_v29 = vpop.f32.mrf.mxu1  ;;  %v4484_v0 = vrot.slane %v10514_v21, 1  ;;  %v3978_v11 = vsel %vm3406_vm15, %v3975_v32, %v3977_v1 }
 0x16f   : > { %10170 = vmatpush3.bf16.msra.mxu0 %v10506_v62  ;;  %v4483_v62 = vsel %vm3406_vm15, %v4480_v46, %v4482_v52  ;;  %v4485_v47 = vsel %vm3406_vm15, %v4482_v52, %v4484_v0  ;;  %v4487_v16 = vsel %vm3406_vm15, %v4484_v0, %v4486_v48  ;;  %v10526_v52 = vld [vmem:[#allocation2 + $0x40] sm:$0xff]   ;;  %v4496_v0 = vrot.slane %v10530_v34, 1 }
 0x170   : > { %10259 = vmatprep.subr.bf16.mxu0 %v11719_v28 }
 0x172   : > { %10084 = vmatmul.mubr.bf16.gmra.mxu0 %v3962_v14  ;;  %v11758_v14 = vpop.f32.mrf.mxu1 }
 0x173   : > { %10087 = vmatprep.mubr.bf16.mxu0 %v3964_v63  ;;  %v10532_v63 = vld [vmem:[%s12845_s4 + $0x1e0] sm:$0xff]  }
 0x174   : > { %10040 = vmatmul.mubr.bf16.gmra.mxu1 %v3435_v27  ;;  %v10519_v27 = vld [vmem:[#allocation4 + $0x38] sm:$0xff]   ;;  %v11766_v55 = vpop.f32.mrf.mxu1 }
 0x175   : > { %10043 = vmatprep.mubr.bf16.mxu1 %v3437_v60  ;;  %v5016_v60 = vrot.slane %v10515_v53, 2  ;;  %v4488_v24 = vrot.slane %v10519_v27, 1  ;;  %v10531_v53 = vld [vmem:[#allocation2 + $0x50] sm:$0xff]   ;;  %v4497_v27 = vsel %vm3406_vm15, %v4494_v23, %v4496_v0 }
 0x177   : > { %v5017_v12 = vsel %vm5012_vm0, %v5014_v9, %v5016_v60  ;;  %v5019_v35 = vsel %vm5012_vm0, %v5016_v60, %v5018_v5  ;;  %v4489_v8 = vsel %vm3406_vm15, %v4486_v48, %v4488_v24  ;;  %v10547_v48 = vld [vmem:[%s12845_s4 + $0x210] sm:$0xff]  }
 0x17a   : > { %10088 = vmatmul.mubr.bf16.gmra.mxu0 %v3966_v13  ;;  %v11771_v13 = vpop.f32.mrf.mxu0 }
 0x17b   : > { %10091 = vmatprep.mubr.bf16.mxu0 %v3968_v56  ;;  %v10521_v56 = vld [vmem:[%s12845_s4 + $0x230] sm:$0xff]  }
 0x17c   : > { %10044 = vmatmul.mubr.bf16.gmra.mxu1 %v3439_v4  ;;  %v10520_v4 = vld [vmem:[#allocation2 + $0x30] sm:$0xff]   ;;  %v11785_v45 = vpop.f32.mrf.mxu0 }
 0x17d   : > { %10047 = vmatprep.mubr.bf16.mxu1 %v3441_v49  ;;  %v4490_v49 = vrot.slane %v10522_v15, 1  ;;  %v5020_v33 = vrot.slane %v10520_v4, 2  ;;  %v10553_v15 = vld [vmem:[%s12845_s4 + $0x208] sm:$0xff]  }
 0x17e   : > { %v11796_v19 = vpop.f32.mrf.mxu0 }
 0x17f   : > { %v5021_v32 = vsel %vm5012_vm0, %v5018_v5, %v5020_v33  ;;  %v10538_v5 = vld [vmem:[#allocation4 + $0x70] sm:$0xff]  }
 0x182   : > { %10092 = vmatmul.mubr.bf16.gmra.mxu0 %v3970_v43  ;;  %v4491_v43 = vsel %vm3406_vm15, %v4488_v24, %v4490_v49 }
 0x183   : > { %10095 = vmatprep.mubr.bf16.mxu0 %v3972_v18  ;;  %v11773_v20 = vpop.f32.mrf.mxu1  ;;  %v10529_v18 = vld [vmem:[%s12845_s4 + $0x228] sm:$0xff]  }
 0x184   : > { %10048 = vmatmul.mubr.bf16.gmra.mxu1 %v3443_v40  ;;  %v4492_v40 = vrot.slane %v10525_v2, 1 }
 0x185   : > { %10119 = vmatprep.mubr.bf16.mxu1 %v4479_v22  ;;  %v11787_v39 = vpop.f32.mrf.mxu1 }
 0x186   : > { %v4495_v21 = vsel %vm3406_vm15, %v4492_v40, %v4494_v23  ;;  %v10544_v23 = vld [vmem:[#allocation4 + $0x80] sm:$0xff]  }
 0x187   : > { %v11798_v22 = vpop.f32.mrf.mxu1 }
 0x18a   : > { %10096 = vmatmul.mubr.bf16.gmra.mxu0 %v3974_v58  ;;  %v10528_v58 = vld [vmem:[#allocation2 + $0x48] sm:$0xff]  }
 0x18b   : > { %10099 = vmatprep.mubr.bf16.mxu0 %v3976_v42  ;;  %v4493_v42 = vsel %vm3406_vm15, %v4490_v49, %v4492_v40  ;;  %v10560_v49 = vld [vmem:[%s12845_s4 + $0x200] sm:$0xff]  }
 0x18c   : > { %10120 = vmatmul.mubr.bf16.vlgmr.msra.gmra.mxu1 %v4481_v36  ;;  %v11811_v36 = vpop.f32.mrf.mxu1 }
 0x18d   : > { %10123 = vmatprep.mubr.bf16.mxu1 %v4483_v62  ;;  %10208 = vmatpush3.bf16.msra.mxu1 %v11696_v7  ;;  %v5015_v7 = vsel %vm5012_vm0, %v5013_v57, %v5014_v9  ;;  %v10533_v62 = vld [vmem:[#allocation4 + $0x60] sm:$0xff]   ;;  %v5024_v9 = vrot.slane %v10526_v52, 2 }
 0x18e   : > { %10209 = vmatprep.subr.bf16.mxu1 %v10518_v37  ;;  %v4498_v57 = vrot.slane %v10533_v62, 1 }
 0x190   : > { %v4499_v60 = vsel %vm3406_vm15, %v4496_v0, %v4498_v57  ;;  %v10548_v0 = vld [vmem:[#allocation4 + $0x88] sm:$0xff]  }
 0x191   : > { %10210 = vmatpush3.bf16.msra.mxu1 %v10518_v37  ;;  %v11809_v37 = vpop.f32.mrf.mxu0 }
 0x192   : > { %10100 = vmatmul.mubr.bf16.gmra.mxu0 %v3978_v11  ;;  %10211 = vmatprep.subr.bf16.mxu1 %v10524_v54 }
 0x193   : > { %10171 = vmatprep.mubr.bf16.mxu0 %v5015_v7  ;;  %v11817_v3 = vpop.f32.mrf.mxu0 }
 0x194   : > { %10124 = vmatmul.mubr.bf16.gmra.mxu1 %v4485_v47  ;;  %v10534_v47 = vld [vmem:[#allocation2 + $0x58] sm:$0xff]  }
 0x195   : > { %10127 = vmatprep.mubr.bf16.mxu1 %v4487_v16  ;;  %10212 = vmatpush3.bf16.msra.mxu1 %v10524_v54  ;;  %v5026_v54 = vrot.slane %v10528_v58, 2  ;;  %v11825_v7 = vpop.f32.mrf.mxu0  ;;  %v10536_v16 = vld [vmem:[#allocation4 + $0x68] sm:$0xff]  }
 0x196   : > { %10213 = vmatprep.subr.bf16.mxu1 %v10532_v63  ;;  %v4500_v4 = vrot.slane %v10536_v16, 1  ;;  %v4508_v16 = vrot.slane %v10548_v0, 1 }
 0x197   : > { %v5027_v26 = vsel %vm5012_vm0, %v5024_v9, %v5026_v54  ;;  %v11835_v24 = vpop.f32.mrf.mxu0 }
 0x199   : > { %10214 = vmatpush3.bf16.msra.mxu1 %v10532_v63 }
 0x19a   : > { %10172 = vmatmul.mubr.bf16.vlgmr.msra.gmra.mxu0 %v5017_v12  ;;  %10215 = vmatprep.subr.bf16.mxu1 %v10540_v44  ;;  %v5030_v12 = vrot.slane %v10534_v47, 2 }
 0x19b   : > { %10260 = vmatpush3.bf16.msra.mxu0 %v11719_v28  ;;  %10175 = vmatprep.mubr.bf16.mxu0 %v5019_v35  ;;  %v5022_v28 = vrot.slane %v10523_v10, 2  ;;  %v4502_v35 = vrot.slane %v10538_v5, 1 }
 0x19c   : > { %10128 = vmatmul.mubr.bf16.gmra.mxu1 %v4489_v8  ;;  %10261 = vmatprep.subr.bf16.mxu0 %v10521_v56  ;;  %v11819_v1 = vpop.f32.mrf.mxu1  ;;  %v11843_v8 = vpop.f32.mrf.mxu0 }
 0x19d   : > { %10131 = vmatprep.mubr.bf16.mxu1 %v4491_v43  ;;  %10216 = vmatpush3.bf16.msra.mxu1 %v10540_v44  ;;  %v5023_v46 = vsel %vm5012_vm0, %v5020_v33, %v5022_v28  ;;  %v5025_v11 = vsel %vm5012_vm0, %v5022_v28, %v5024_v9  ;;  %v5028_v44 = vrot.slane %v10531_v53, 2  ;;  %v10542_v33 = vld [vmem:[#allocation4 + $0x78] sm:$0xff]   ;;  %v4503_v40 = vsel %vm3406_vm15, %v4500_v4, %v4502_v35  ;;  %v10545_v9 = vld [vmem:[#allocation2 + $0x78] sm:$0xff]  }
 0x19e   : > { %10217 = vmatprep.subr.bf16.mxu1 %v10546_v41  ;;  %v11828_v63 = vpop.f32.mrf.mxu1  ;;  %v4504_v52 = vrot.slane %v10542_v33, 1  ;;  %v10550_v53 = vld [vmem:[#allocation4 + $0x90] sm:$0xff]   ;;  %v5038_v47 = vrot.slane %v10545_v9, 2 }
 0x19f   : > { %10262 = vmatpush3.bf16.msra.mxu0 %v10521_v56  ;;  %v5029_v10 = vsel %vm5012_vm0, %v5026_v54, %v5028_v44  ;;  %v5031_v43 = vsel %vm5012_vm0, %v5028_v44, %v5030_v12 }
 0x1a0   : > { %10263 = vmatprep.subr.bf16.mxu0 %v10529_v18  ;;  %v11837_v56 = vpop.f32.mrf.mxu1  ;;  %v4505_v54 = vsel %vm3406_vm15, %v4502_v35, %v4504_v52 }
 0x1a1   : > { %10218 = vmatpush3.bf16.msra.mxu1 %v10546_v41  ;;  %v10537_v41 = vld [vmem:[#allocation2 + $0x60] sm:$0xff]  }
 0x1a2   : > { %10176 = vmatmul.mubr.bf16.gmra.mxu0 %v5021_v32  ;;  %10219 = vmatprep.subr.bf16.mxu1 %v10552_v51  ;;  %v11845_v2 = vpop.f32.mrf.mxu1  ;;  %v5034_v32 = vrot.slane %v10539_v17, 2  ;;  %v10554_v17 = vld [vmem:[#allocation4 + $0x98] ss:$0 sps:$4 sm:$0x11]  }
 0x1a3   : > { %10179 = vmatprep.mubr.bf16.mxu0 %v5023_v46  ;;  %10264 = vmatpush3.bf16.msra.mxu0 %v10529_v18  ;;  %v4501_v18 = vsel %vm3406_vm15, %v4498_v57, %v4500_v4 }
 0x1a4   : > { %10132 = vmatmul.mubr.bf16.gmra.mxu1 %v4493_v42  ;;  %10265 = vmatprep.subr.bf16.mxu0 %v10535_v50  ;;  %v4506_v42 = vrot.slane %v10544_v23, 1  ;;  %v10558_v23 = vld [vmem:[#allocation3 + $0x18] sm:$0xff]  }
 0x1a5   : > { %10135 = vmatprep.mubr.bf16.mxu1 %v4495_v21  ;;  %10220 = vmatpush3.bf16.msra.mxu1 %v10552_v51  ;;  %v10543_v21 = vld [vmem:[#allocation2 + $0x70] sm:$0xff]   ;;  %v5549_v0 = vrot.slane %v10558_v23, 2 }
 0x1a6   : > { %10221 = vmatprep.subr.bf16.mxu1 %v10559_v6 }
 0x1a7   : > { %10266 = vmatpush3.bf16.msra.mxu0 %v10535_v50  ;;  %v5032_v50 = vrot.slane %v10537_v41, 2 }
 0x1a8   : > { %10267 = vmatprep.subr.bf16.mxu0 %v10541_v61  ;;  %v11849_v28 = vpop.f32.mrf.mxu0 }
 0x1a9   : > { %10222 = vmatpush3.bf16.msra.mxu1 %v10559_v6  ;;  %v5033_v34 = vsel %vm5012_vm0, %v5030_v12, %v5032_v50  ;;  %v5035_v62 = vsel %vm5012_vm0, %v5032_v50, %v5034_v32  ;;  %v10549_v12 = vld [vmem:[#allocation2 + $0x80] sm:$0xff]  }
 0x1aa   : > { %10180 = vmatmul.mubr.bf16.gmra.mxu0 %v5025_v11  ;;  %v11856_v58 = vpop.f32.mrf.mxu0  ;;  %v4507_v11 = vsel %vm3406_vm15, %v4504_v52, %v4506_v42 }
 0x1ab   : > { %10183 = vmatprep.mubr.bf16.mxu0 %v5027_v26  ;;  %10268 = vmatpush3.bf16.msra.mxu0 %v10541_v61  ;;  %v5036_v26 = vrot.slane %v10543_v21, 2 }
 0x1ac   : > { %10136 = vmatmul.mubr.bf16.gmra.mxu1 %v4497_v27  ;;  %10269 = vmatprep.subr.bf16.mxu0 %v10547_v48  ;;  %v11865_v57 = vpop.f32.mrf.mxu0 }
 0x1ad   : > { %10139 = vmatprep.mubr.bf16.mxu1 %v4499_v60  ;;  %v5037_v44 = vsel %vm5012_vm0, %v5034_v32, %v5036_v26  ;;  %v5039_v35 = vsel %vm5012_vm0, %v5036_v26, %v5038_v47  ;;  %v5040_v32 = vrot.slane %v10549_v12, 2  ;;  %v10555_v26 = vld [vmem:[#allocation2 + $0x90] sm:$0xff]  }
 0x1ae   : > { %v11868_v60 = vpop.f32.mrf.mxu0 }
 0x1af   : > { %10270 = vmatpush3.bf16.msra.mxu0 %v10547_v48 }
 0x1b0   : > { %10271 = vmatprep.subr.bf16.mxu0 %v10553_v15 }
 0x1b2   : > { %10184 = vmatmul.mubr.bf16.gmra.mxu0 %v5029_v10  ;;  %v11851_v51 = vpop.f32.mrf.mxu1  ;;  %v10551_v10 = vld [vmem:[#allocation2 + $0x88] sm:$0xff]  }
 0x1b3   : > { %10187 = vmatprep.mubr.bf16.mxu0 %v5031_v43  ;;  %10272 = vmatpush3.bf16.msra.mxu0 %v10553_v15  ;;  %v4510_v15 = vrot.slane %v10550_v53, 1  ;;  %v4509_v43 = vsel %vm3406_vm15, %v4506_v42, %v4508_v16  ;;  %v4512_v42 = vrot.slane %v10554_v17, 1  ;;  %v5041_v53 = vsel %vm5012_vm0, %v5038_v47, %v5040_v32  ;;  %v10562_v47 = vld [vmem:[#allocation3 + $0x20] sm:$0xff]  }
 0x1b4   : > { %10140 = vmatmul.mubr.bf16.gmra.mxu1 %v4501_v18  ;;  %10273 = vmatprep.subr.bf16.mxu0 %v10560_v49  ;;  %v11854_v46 = vpop.f32.mrf.mxu1 }
 0x1b5   : > { %10143 = vmatprep.mubr.bf16.mxu1 %v4503_v40  ;;  %v4511_v40 = vsel %vm3406_vm15, %v4508_v16, %v4510_v15 }
 0x1b6   : > { %v11858_v6 = vpop.f32.mrf.mxu1 }
 0x1b7   : > { %10274 = vmatpush3.bf16.msra.mxu0 %v10560_v49 }
 0x1b8   : > { %v11862_v61 = vpop.f32.mrf.mxu1 }
 0x1ba   : > { %10188 = vmatmul.mubr.bf16.gmra.mxu0 %v5033_v34  ;;  %v9913_v48 = vpop.f32.mrf.mxu1  ;;  %v5042_v34 = vrot.slane %v10551_v10, 2 }
 0x1bb   : > { %10191 = vmatprep.mubr.bf16.mxu0 %v5035_v62  ;;  %v10557_v62 = vld [vmem:[#allocation3 + $0x10] sm:$0xfc]  }
 0x1bc   : > { %10144 = vmatmul.mubr.bf16.gmra.mxu1 %v4505_v54  ;;  %v2514_v27 = vpop.f32.mrf.mxu1 }
 0x1bd   : > { %10147 = vmatprep.mubr.bf16.mxu1 %v4507_v11  ;;  %v2659_v11 = vadd.f32 %v9913_v48, %v11771_v13  ;;  %v4513_v48 = vsel %vm3406_vm15, %v4510_v15, %v4512_v42  ;;  %v5551_v42 = vrot.slane %v10562_v47, 2 }
 0x1be   : > { %v9914_v5 = vpop.f32.mrf.mxu1 }
 0x1c0   : > { %v2517_v49 = vpop.f32.mrf.mxu1 }
 0x1c1   : > { %v2658_v41 = vadd.f32 %v2517_v49, %v11809_v37  ;;  %v2657_v49 = vadd.f32 %v2514_v27, %v11785_v45  ;;  %v5044_v27 = vrot.slane %v10555_v26, 2  ;;  %v10561_v26 = vld [vmem:[#allocation2 + $0xa0] ss:$0 sps:$4 sm:$0x33]  }
 0x1c2   : > { %v11871_v4 = vpop.f32.mrf.mxu0  ;;  %10192 = vmatmul.mubr.bf16.gmra.mxu0 %v5037_v44  ;;  %v9917_v33 = vpop.f32.mrf.mxu1  ;;  %v5043_v44 = vsel %vm5012_vm0, %v5040_v32, %v5042_v34 }
 0x1c3   : > { %10195 = vmatprep.mubr.bf16.mxu0 %v5039_v35  ;;  %v2663_v50 = vadd.f32 %v9917_v33, %v11817_v3  ;;  %v11889_v35 = vld [vmem:[#allocation2 + $0x98] sm:$0xff]   ;;  %v11897_v33 = vld [vmem:[#allocation3 + $0x28] sm:$0xff]  }
 0x1c4   : > { %v11876_v18 = vpop.f32.mrf.mxu0  ;;  %10148 = vmatmul.mubr.bf16.gmra.mxu1 %v4509_v43  ;;  %v2530_v21 = vpop.f32.mrf.mxu1 }
 0x1c5   : > { %10151 = vmatprep.mubr.bf16.mxu1 %v4511_v40  ;;  %v2661_v37 = vadd.f32 %v2530_v21, %v11825_v7  ;;  %v5548_v7 = vrot.slane %v10557_v62, 2  ;;  %v2660_v40 = vadd.f32 %v9914_v5, %v11796_v19  ;;  %v5045_v5 = vsel %vm5012_vm0, %v5042_v34, %v5044_v27  ;;  %v10564_v34 = vld [vmem:[#allocation4 + $0x10] sm:$0xfc]  }
 0x1c6   : > { %v11880_v52 = vpop.f32.mrf.mxu0  ;;  %v9918_v54 = vpop.f32.mrf.mxu1 }
 0x1c7   : > { %v2664_v3 = vadd.f32 %v9918_v54, %v11835_v24  ;;  %v5550_v17 = vsel %vm5012_vm0, %v5548_v7, %v5549_v0 }
 0x1c8   : > { %v11883_v9 = vpop.f32.mrf.mxu0  ;;  %v2533_v12 = vpop.f32.mrf.mxu1 }
 0x1c9   : > { %v2662_v13 = vadd.f32 %v2533_v12, %v11843_v8  ;;  %v5046_v8 = vrot.slane %v11889_v35, 2  ;;  %v10565_v35 = vld [vmem:[#allocation4 + $0x18] sm:$0xff]  }
 0x1ca   : > { %v9965_v16 = vpop.f32.mrf.mxu0  ;;  %10196 = vmatmul.mubr.bf16.gmra.mxu0 %v5041_v53  ;;  %v9921_v43 = vpop.f32.mrf.mxu1  ;;  %v5553_v53 = vrot.slane %v11897_v33, 2  ;;  %v5048_v33 = vrot.slane %v10561_v26, 2  ;;  %v10567_v26 = vld [vmem:[#allocation4 + $0x20] sm:$0xff]  }
 0x1cb   : > { %v11892_v10 = vadd.f32 %v9965_v16, %v2659_v11  ;;  %10199 = vmatprep.mubr.bf16.mxu0 %v5043_v44  ;;  %v2667_v45 = vadd.f32 %v9921_v43, %v11849_v28  ;;  %v5047_v44 = vsel %vm5012_vm0, %v5044_v27, %v5046_v8 }
 0x1cc   : > { %v3008_v24 = vpop.f32.mrf.mxu0  ;;  %10152 = vmatmul.mubr.bf16.gmra.mxu1 %v4513_v48  ;;  %v2546_v15 = vpop.f32.mrf.mxu1 }
 0x1cd   : > { %v11900_v23 = vadd.f32 %v3008_v24, %v2657_v49  ;;  %10223 = vmatprep.mubr.bf16.mxu1 %v5550_v17  ;;  %v2665_v62 = vadd.f32 %v2546_v15, %v11856_v58  ;;  %v5552_v49 = vsel %vm5012_vm0, %v5549_v0, %v5551_v42  ;;  %v10568_v24 = vld [vmem:[#allocation3 + $0x38] sm:$0xff]  }
 0x1ce   : > { %v9966_v32 = vpop.f32.mrf.mxu0  ;;  %v9922_v11 = vpop.f32.mrf.mxu1 }
 0x1cf   : > { %v11904_v21 = vadd.f32 %v9966_v32, %v2660_v40  ;;  %v2668_v28 = vadd.f32 %v9922_v11, %v11865_v57  ;;  %v5554_v57 = vsel %vm5012_vm0, %v5551_v42, %v5553_v53  ;;  %v6084_v40 = vrot.slane %v10565_v35, 2 }
 0x1d0   : > { %v3011_v54 = vpop.f32.mrf.mxu0  ;;  %v2549_v12 = vpop.f32.mrf.mxu1  ;;  %v5557_v42 = vrot.slane %v10568_v24, 2 }
 0x1d1   : > { %v11908_v19 = vadd.f32 %v3011_v54, %v2658_v41  ;;  %v2666_v58 = vadd.f32 %v2549_v12, %v11868_v60  ;;  %v10566_v41 = vld [vmem:[#allocation3 + $0x30] sm:$0xff]   ;;  %v6083_v54 = vrot.slane %v10564_v34, 2 }
 0x1d2   : > { %v9969_v16 = vpop.f32.mrf.mxu0  ;;  %10200 = vmatmul.mubr.bf16.gmra.mxu0 %v5045_v5  ;;  %v5555_v32 = vrot.slane %v10566_v41, 2  ;;  %v10569_v12 = vld [vmem:[#allocation4 + $0x28] sm:$0xff]  }
 0x1d3   : > { %v11913_v7 = vadd.f32 %v9969_v16, %v2663_v50  ;;  %10203 = vmatprep.mubr.bf16.mxu0 %v5047_v44  ;;  %v6085_v44 = vsel %vm5012_vm0, %v6083_v54, %v6084_v40  ;;  %v6088_v24 = vrot.slane %v10569_v12, 2 }
 0x1d4   : > { %v3024_v48 = vpop.f32.mrf.mxu0  ;;  %v9925_v47 = vpop.f32.mrf.mxu1  ;;  %10224 = vmatmul.mubr.bf16.vlgmr.msra.gmra.mxu1 %v5552_v49  ;;  %v5556_v49 = vsel %vm5012_vm0, %v5553_v53, %v5555_v32 }
 0x1d5   : > { %v11918_v43 = vadd.f32 %v3024_v48, %v2661_v37  ;;  %v2671_v17 = vadd.f32 %v9925_v47, %v11871_v4  ;;  %10227 = vmatprep.mubr.bf16.mxu1 %v5554_v57  ;;  %v5049_v37 = vsel %vm5012_vm0, %v5046_v8, %v5048_v33  ;;  %v5558_v8 = vsel %vm5012_vm0, %v5555_v32, %v5557_v42  ;;  %v10572_v48 = vld [vmem:[#allocation3 + $0x48] sm:$0xff]   ;;  %v10571_v32 = vld [vmem:[#allocation4 + $0x30] sm:$0xff]  }
 0x1d6   : > { %v9970_v50 = vpop.f32.mrf.mxu0  ;;  %v2562_v27 = vpop.f32.mrf.mxu1  ;;  %v6086_v57 = vrot.slane %v10567_v26, 2  ;;  %v5561_v53 = vrot.slane %v10572_v48, 2  ;;  %v10573_v26 = vld [vmem:[#allocation4 + $0x38] sm:$0xff]  }
 0x1d7   : > { %v11921_v60 = vadd.f32 %v9970_v50, %v2664_v3  ;;  %v2669_v0 = vadd.f32 %v2562_v27, %v11876_v18 }
 0x1d8   : > { %v3027_v15 = vpop.f32.mrf.mxu0  ;;  %v9926_v11 = vpop.f32.mrf.mxu1  ;;  %v6087_v54 = vsel %vm5012_vm0, %v6084_v40, %v6086_v57 }
 0x1d9   : > { %v11924_v5 = vadd.f32 %v3027_v15, %v2662_v13  ;;  %v2672_v4 = vadd.f32 %v9926_v11, %v11880_v52  ;;  %v10570_v52 = vld [vmem:[#allocation3 + $0x40] sm:$0xff]  }
 0x1da   : > { %v9973_v16 = vpop.f32.mrf.mxu0  ;;  %10204 = vmatmul.mubr.bf16.gmra.mxu0 %v5049_v37  ;;  %v2565_v3 = vpop.f32.mrf.mxu1  ;;  %v5559_v27 = vrot.slane %v10570_v52, 2  ;;  %v6092_v52 = vrot.slane %v10573_v26, 2 }
 0x1db   : > { %v11929_v35 = vadd.f32 %v9973_v16, %v2667_v45  ;;  %10275 = vmatprep.mubr.bf16.mxu0 %v6085_v44  ;;  %v2670_v18 = vadd.f32 %v2565_v3, %v11883_v9  ;;  %v10574_v44 = vld [vmem:[#allocation3 + $0x50] sm:$0xff]  }
 0x1dc   : > { %v3040_v13 = vpop.f32.mrf.mxu0  ;;  %v9929_v41 = vpop.f32.mrf.mxu1  ;;  %10228 = vmatmul.mubr.bf16.gmra.mxu1 %v5556_v49  ;;  %v10576_v49 = vld [vmem:[#allocation3 + $0x58] sm:$0xff]  }
 0x1dd   : > { %v11934_v47 = vadd.f32 %v3040_v13, %v2665_v62  ;;  %10231 = vmatprep.mubr.bf16.mxu1 %v5558_v8  ;;  %v6089_v62 = vsel %vm5012_vm0, %v6086_v57, %v6088_v24  ;;  %v6090_v13 = vrot.slane %v10571_v32, 2 }
 0x1de   : > { %v9974_v34 = vpop.f32.mrf.mxu0  ;;  %v2578_v45 = vpop.f32.mrf.mxu1 }
 0x1df   : > { %v11936_v33 = vadd.f32 %v9974_v34, %v2668_v28  ;;  %v5560_v28 = vsel %vm5012_vm0, %v5557_v42, %v5559_v27  ;;  %v5565_v42 = vrot.slane %v10576_v49, 2  ;;  %v2673_v26 = vadd.f32 %v2578_v45, %v11732_v31 }
 0x1e0   : > { %v3043_v50 = vpop.f32.mrf.mxu0  ;;  %v9930_v9 = vpop.f32.mrf.mxu1 }
 0x1e1   : > { %v11938_v15 = vadd.f32 %v3043_v50, %v2666_v58  ;;  %v5562_v58 = vsel %vm5012_vm0, %v5559_v27, %v5561_v53  ;;  %v6091_v27 = vsel %vm5012_vm0, %v6088_v24, %v6090_v13  ;;  %v10580_v24 = vld [vmem:[#allocation3 + $0x68] sm:$0xff]   ;;  %v2676_v49 = vadd.f32 %v9930_v9, %v11736_v59  ;;  %v10579_v9 = vld [vmem:[#allocation4 + $0x50] sm:$0xff]  }
 0x1e2   : > { %v9977_v11 = vpop.f32.mrf.mxu0  ;;  %10276 = vmatmul.mubr.bf16.vlgmr.msra.gmra.mxu0 %v6087_v54  ;;  %v2581_v37 = vpop.f32.mrf.mxu1  ;;  %v2675_v54 = vadd.f32 %v9929_v41, %v11728_v30 }
 0x1e3   : > { %v11942_v16 = vadd.f32 %v9977_v11, %v2671_v17  ;;  %10279 = vmatprep.mubr.bf16.mxu0 %v6089_v62  ;;  %v5563_v17 = vrot.slane %v10574_v44, 2 }
 0x1e4   : > { %v3056_v3 = vpop.f32.mrf.mxu0  ;;  %v9933_v12 = vpop.f32.mrf.mxu1  ;;  %10232 = vmatmul.mubr.bf16.gmra.mxu1 %v5560_v28  ;;  %v10577_v28 = vld [vmem:[#allocation4 + $0x48] sm:$0xff]  }
 0x1e5   : > { %v11946_v40 = vadd.f32 %v3056_v3, %v2669_v0  ;;  %10235 = vmatprep.mubr.bf16.mxu1 %v5562_v58  ;;  %v6093_v0 = vsel %vm5012_vm0, %v6090_v13, %v6092_v52  ;;  %v5564_v44 = vsel %vm5012_vm0, %v5561_v53, %v5563_v17  ;;  %v10575_v3 = vld [vmem:[#allocation4 + $0x40] sm:$0xff]   ;;  %v5566_v41 = vsel %vm5012_vm0, %v5563_v17, %v5565_v42 }
 0x1e6   : > { %v9978_v8 = vpop.f32.mrf.mxu0  ;;  %v2594_v48 = vpop.f32.mrf.mxu1  ;;  %v10578_v58 = vld [vmem:[#allocation3 + $0x60] sm:$0xff]   ;;  %v6096_v31 = vrot.slane %v10577_v28, 2  ;;  %v6094_v53 = vrot.slane %v10575_v3, 2  ;;  %v2679_v17 = vadd.f32 %v9933_v12, %v11743_v25 }
 0x1e7   : > { %v11948_v57 = vadd.f32 %v9978_v8, %v2672_v4 }
 0x1e8   : > { %v3059_v34 = vpop.f32.mrf.mxu0  ;;  %v9934_v50 = vpop.f32.mrf.mxu1  ;;  %v6095_v59 = vsel %vm5012_vm0, %v6092_v52, %v6094_v53  ;;  %v6097_v28 = vsel %vm5012_vm0, %v6094_v53, %v6096_v31 }
 0x1e9   : > { %v11951_v11 = vadd.f32 %v3059_v34, %v2670_v18  ;;  %v2674_v34 = vadd.f32 %v2581_v37, %v11740_v38  ;;  %v10581_v38 = vld [vmem:[#allocation4 + $0x58] sm:$0xff]   ;;  %v2677_v37 = vadd.f32 %v2594_v48, %v11752_v29 }
 0x1ea   : > { %v9981_v62 = vpop.f32.mrf.mxu0  ;;  %10280 = vmatmul.mubr.bf16.gmra.mxu0 %v6091_v27  ;;  %v2597_v32 = vpop.f32.mrf.mxu1  ;;  %v5567_v27 = vrot.slane %v10578_v58, 2  ;;  %v6100_v29 = vrot.slane %v10581_v38, 2 }
 0x1eb   : > { %v11956_v4 = vadd.f32 %v9981_v62, %v2675_v54  ;;  %10283 = vmatprep.mubr.bf16.mxu0 %v6093_v0 }
 0x1ec   : > { %v3072_v30 = vpop.f32.mrf.mxu0  ;;  %v9937_v18 = vpop.f32.mrf.mxu1  ;;  %10236 = vmatmul.mubr.bf16.gmra.mxu1 %v5564_v44  ;;  %v5569_v44 = vrot.slane %v10580_v24, 2  ;;  %v5568_v58 = vsel %vm5012_vm0, %v5565_v42, %v5567_v27  ;;  %v10584_v24 = vld [vmem:[#allocation3 + $0x78] sm:$0xff]  }
 0x1ed   : > { %12867 = vst [vmem:[#allocation6_spill] sm:$0xff] %v11956_v4  ;;  %v11961_v13 = vadd.f32 %v3072_v30, %v2673_v26  ;;  %10239 = vmatprep.mubr.bf16.mxu1 %v5566_v41  ;;  %v10582_v41 = vld [vmem:[#allocation3 + $0x70] sm:$0xff]  }
 0x1ee   : > { %v9982_v8 = vpop.f32.mrf.mxu0  ;;  %v2610_v45 = vpop.f32.mrf.mxu1  ;;  %v5570_v52 = vsel %vm5012_vm0, %v5567_v27, %v5569_v44  ;;  %v5571_v42 = vrot.slane %v10582_v41, 2  ;;  %v2683_v27 = vadd.f32 %v9937_v18, %v11773_v20 }
 0x1ef   : > { %v11964_v54 = vadd.f32 %v9982_v8, %v2676_v49  ;;  %v2680_v49 = vadd.f32 %v9934_v50, %v11758_v14  ;;  %v10583_v50 = vld [vmem:[#allocation4 + $0x60] sm:$0xff]  }
 0x1f0   : > { %v3075_v62 = vpop.f32.mrf.mxu0  ;;  %v9938_v0 = vpop.f32.mrf.mxu1  ;;  %v5572_v41 = vsel %vm5012_vm0, %v5569_v44, %v5571_v42 }
 0x1f1   : > { %v11967_v4 = vadd.f32 %v3075_v62, %v2674_v34  ;;  %v6098_v34 = vrot.slane %v10579_v9, 2  ;;  %v2678_v62 = vadd.f32 %v2597_v32, %v11766_v55  ;;  %v2681_v55 = vadd.f32 %v2610_v45, %v11787_v39 }
 0x1f2   : > { %v9985_v26 = vpop.f32.mrf.mxu0  ;;  %10284 = vmatmul.mubr.bf16.gmra.mxu0 %v6095_v59  ;;  %v2613_v30 = vpop.f32.mrf.mxu1 }
 0x1f3   : > { %v11972_v3 = vadd.f32 %v9985_v26, %v2679_v17  ;;  %10287 = vmatprep.mubr.bf16.mxu0 %v6097_v28  ;;  %v5573_v28 = vrot.slane %v10584_v24, 2  ;;  %v6099_v14 = vsel %vm5012_vm0, %v6096_v31, %v6098_v34  ;;  %v6101_v38 = vsel %vm5012_vm0, %v6098_v34, %v6100_v29  ;;  %v11992_v24 = vld [vmem:[#allocation3 + $0x88] sm:$0xff]  }
 0x1f4   : > { %v3088_v25 = vpop.f32.mrf.mxu0  ;;  %v9941_v12 = vpop.f32.mrf.mxu1  ;;  %10240 = vmatmul.mubr.bf16.gmra.mxu1 %v5568_v58 }
 0x1f5   : > { %v11977_v8 = vadd.f32 %v3088_v25, %v2677_v37  ;;  %10243 = vmatprep.mubr.bf16.mxu1 %v5570_v52  ;;  %v10585_v25 = vld [vmem:[#allocation4 + $0x68] sm:$0xff]   ;;  %v10586_v52 = vld [vmem:[#allocation3 + $0x80] sm:$0xff]   ;;  %v5574_v31 = vsel %vm5012_vm0, %v5571_v42, %v5573_v28  ;;  %v5577_v42 = vrot.slane %v11992_v24, 2  ;;  %v12013_v24 = vld [vmem:[#allocation3 + $0x98] sm:$0xff]  }
 0x1f6   : > { %v9986_v53 = vpop.f32.mrf.mxu0  ;;  %v2626_v48 = vpop.f32.mrf.mxu1  ;;  %v6104_v45 = vrot.slane %v10585_v25, 2 }
 0x1f7   : > { %v11980_v17 = vadd.f32 %v9986_v53, %v2680_v49  ;;  %v2684_v49 = vadd.f32 %v9938_v0, %v11798_v22  ;;  %v6102_v53 = vrot.slane %v10583_v50, 2  ;;  %v10587_v0 = vld [vmem:[#allocation4 + $0x70] sm:$0xff]  }
 0x1f8   : > { %v3091_v59 = vpop.f32.mrf.mxu0  ;;  %v9942_v26 = vpop.f32.mrf.mxu1 }
 0x1f9   : > { %v11983_v58 = vadd.f32 %v3091_v59, %v2678_v62  ;;  %v2682_v59 = vadd.f32 %v2613_v30, %v11811_v36  ;;  %v6103_v22 = vsel %vm5012_vm0, %v6100_v29, %v6102_v53  ;;  %v6105_v25 = vsel %vm5012_vm0, %v6102_v53, %v6104_v45  ;;  %v12006_v36 = vld [vmem:[#allocation4 + $0x78] sm:$0xff]  }
 0x1fa   : > { %v9989_v9 = vpop.f32.mrf.mxu0  ;;  %10288 = vmatmul.mubr.bf16.gmra.mxu0 %v6099_v14  ;;  %v2629_v37 = vpop.f32.mrf.mxu1  ;;  %v2685_v30 = vadd.f32 %v2626_v48, %v11828_v63  ;;  %v6106_v63 = vrot.slane %v10587_v0, 2 }
 0x1fb   : > { %v11988_v32 = vadd.f32 %v9989_v9, %v2683_v27  ;;  %10291 = vmatprep.mubr.bf16.mxu0 %v6101_v38  ;;  %v5575_v27 = vrot.slane %v10586_v52, 2  ;;  %v2687_v38 = vadd.f32 %v9941_v12, %v11819_v1  ;;  %v10590_v1 = vld [vmem:[#allocation3 + $0x90] sm:$0xff]  }
 0x1fc   : > { %v3104_v20 = vpop.f32.mrf.mxu0  ;;  %v9945_v18 = vpop.f32.mrf.mxu1  ;;  %10244 = vmatmul.mubr.bf16.gmra.mxu1 %v5572_v41  ;;  %v6107_v0 = vsel %vm5012_vm0, %v6104_v45, %v6106_v63 }
 0x1fd   : > { %v11995_v34 = vadd.f32 %v3104_v20, %v2681_v55  ;;  %10247 = vmatprep.mubr.bf16.mxu1 %v5574_v31  ;;  %v5576_v20 = vsel %vm5012_vm0, %v5573_v28, %v5575_v27  ;;  %v5578_v29 = vsel %vm5012_vm0, %v5575_v27, %v5577_v42 }
 0x1fe   : > { %v9990_v39 = vpop.f32.mrf.mxu0  ;;  %v2642_v62 = vpop.f32.mrf.mxu1 }
 0x1ff   : > { %v11998_v44 = vadd.f32 %v9990_v39, %v2684_v49  ;;  %v2688_v49 = vadd.f32 %v9942_v26, %v11837_v56  ;;  %v5581_v56 = vrot.slane %v12013_v24, 2  ;;  %v2691_v26 = vadd.f32 %v9945_v18, %v11851_v51 }
 0x200   : > { %v3107_v14 = vpop.f32.mrf.mxu0  ;;  %v9946_v9 = vpop.f32.mrf.mxu1 }
 0x201   : > { %v12002_v41 = vadd.f32 %v3107_v14, %v2682_v59  ;;  %v6108_v59 = vrot.slane %v12006_v36, 2  ;;  %v2686_v14 = vadd.f32 %v2629_v37, %v11845_v2  ;;  %v2692_v24 = vadd.f32 %v9946_v9, %v11858_v6  ;;  %v10595_v9 = vld [vmem:[#allocation4 + $0x90] sm:$0xff]  }
 0x202   : > { %v9993_v50 = vpop.f32.mrf.mxu0  ;;  %10292 = vmatmul.mubr.bf16.gmra.mxu0 %v6103_v22  ;;  %v2645_v55 = vpop.f32.mrf.mxu1  ;;  %v5579_v22 = vrot.slane %v10590_v1, 2  ;;  %v2689_v1 = vadd.f32 %v2642_v62, %v11854_v46 }
 0x203   : > { %v12009_v52 = vadd.f32 %v9993_v50, %v2687_v38  ;;  %10295 = vmatprep.mubr.bf16.mxu0 %v6105_v25  ;;  %v6109_v2 = vsel %vm5012_vm0, %v6106_v63, %v6108_v59 }
 0x204   : > { %v3120_v12 = vpop.f32.mrf.mxu0  ;;  %v10017_v31 = vpop.f32.mrf.mxu1  ;;  %10248 = vmatmul.mubr.bf16.gmra.mxu1 %v5576_v20  ;;  %v5580_v18 = vsel %vm5012_vm0, %v5577_v42, %v5579_v22 }
 0x205   : > { %v12016_v53 = vadd.f32 %v3120_v12, %v2685_v30  ;;  %v3689_v39 = vadd.f32 %v10017_v31, %v11892_v10  ;;  %10251 = vmatprep.mubr.bf16.mxu1 %v5578_v29  ;;  %v10591_v30 = vld [vmem:[#allocation4 + $0x80] sm:$0xff]   ;;  %v10594_v31 = vld [vmem:[#allocation3 + $0xa0] ss:$0 sps:$4 sm:$0x33]  }
 0x206   : > { %v9994_v48 = vpop.f32.mrf.mxu0  ;;  %v3544_v28 = vpop.f32.mrf.mxu1  ;;  %v6110_v46 = vrot.slane %v10591_v30, 2 }
 0x207   : > { %v12021_v38 = vadd.f32 %v9994_v48, %v2688_v49  ;;  %v3687_v27 = vadd.f32 %v3544_v28, %v11900_v23  ;;  %v10593_v23 = vld [vmem:[#allocation4 + $0x88] sm:$0xff]  }
 0x208   : > { %v3123_v50 = vpop.f32.mrf.mxu0  ;;  %v10018_v25 = vpop.f32.mrf.mxu1  ;;  %v6112_v48 = vrot.slane %v10593_v23, 2  ;;  %v6111_v6 = vsel %vm5012_vm0, %v6108_v59, %v6110_v46 }
 0x209   : > { %v12026_v10 = vadd.f32 %v3123_v50, %v2686_v14  ;;  %v3690_v36 = vadd.f32 %v10018_v25, %v11904_v21  ;;  %v5582_v21 = vsel %vm5012_vm0, %v5579_v22, %v5581_v56  ;;  %v5583_v50 = vrot.slane %v10594_v31, 2 }
 0x20a   : > { %v9997_v20 = vpop.f32.mrf.mxu0  ;;  %10296 = vmatmul.mubr.bf16.gmra.mxu0 %v6107_v0  ;;  %v3547_v37 = vpop.f32.mrf.mxu1  ;;  %v6113_v30 = vsel %vm5012_vm0, %v6110_v46, %v6112_v48 }
 0x20b   : > { %v12032_v12 = vadd.f32 %v9997_v20, %v2691_v26  ;;  %10299 = vmatprep.mubr.bf16.mxu0 %v6109_v2  ;;  %v3688_v51 = vadd.f32 %v3547_v37, %v11908_v19  ;;  %v2690_v19 = vadd.f32 %v2645_v55, %v11862_v61  ;;  %v10596_v61 = vld [vmem:[#allocation4 + $0x98] sm:$0xff]   ;;  %v5584_v2 = vsel %vm5012_vm0, %v5581_v56, %v5583_v50 }
 0x20c   : > { %v3136_v45 = vpop.f32.mrf.mxu0  ;;  %v10021_v29 = vpop.f32.mrf.mxu1  ;;  %10252 = vmatmul.mubr.bf16.gmra.mxu1 %v5580_v18  ;;  %v6116_v31 = vrot.slane %v10596_v61, 2 }
 0x20d   : > { %v12038_v49 = vadd.f32 %v3136_v45, %v2689_v1  ;;  %v3693_v63 = vadd.f32 %v10021_v29, %v11913_v7  ;;  %10255 = vmatprep.mubr.bf16.mxu1 %v5582_v21  ;;  %v6114_v1 = vrot.slane %v10595_v9, 2 }
 0x20e   : > { %v9998_v62 = vpop.f32.mrf.mxu0  ;;  %v3560_v28 = vpop.f32.mrf.mxu1 }
 0x20f   : > { %v12042_v42 = vadd.f32 %v9998_v62, %v2692_v24  ;;  %v3691_v14 = vadd.f32 %v3560_v28, %v11918_v43  ;;  %v6115_v56 = vsel %vm5012_vm0, %v6112_v48, %v6114_v1 }
 0x210   : > { %v3139_v25 = vpop.f32.mrf.mxu0  ;;  %v10022_v22 = vpop.f32.mrf.mxu1 }
 0x211   : > { %v12045_v26 = vadd.f32 %v3139_v25, %v2690_v19  ;;  %v3694_v7 = vadd.f32 %v10022_v22, %v11921_v60 }
 0x212   : > { %v10069_v0 = vpop.f32.mrf.mxu0  ;;  %10300 = vmatmul.mubr.bf16.gmra.mxu0 %v6111_v6  ;;  %v3563_v20 = vpop.f32.mrf.mxu1 }
 0x213   : > { %v12050_v55 = vadd.f32 %v10069_v0, %v3689_v39  ;;  %10303 = vmatprep.mubr.bf16.mxu0 %v6113_v30  ;;  %v3692_v43 = vadd.f32 %v3563_v20, %v11924_v5 }
 0x214   : > { %v4079_v37 = vpop.f32.mrf.mxu0  ;;  %v10025_v23 = vpop.f32.mrf.mxu1  ;;  %10256 = vmatmul.mubr.bf16.gmra.mxu1 %v5584_v2 }
 0x215   : > { %v12054_v59 = vadd.f32 %v4079_v37, %v3687_v27  ;;  %v3697_v60 = vadd.f32 %v10025_v23, %v11929_v35  ;;  %v10597_v27 = vld [vmem:[#allocation4 + $0xa0] ss:$0 sps:$4 sm:$0x33]   ;;  %v6117_v35 = vsel %vm5012_vm0, %v6114_v1, %v6116_v31 }
 0x216   : > { %v10070_v18 = vpop.f32.mrf.mxu0  ;;  %v3576_v45 = vpop.f32.mrf.mxu1  ;;  %v6118_v48 = vrot.slane %v10597_v27, 2 }
 0x217   : > { %v12057_v29 = vadd.f32 %v10070_v18, %v3690_v36  ;;  %v3695_v39 = vadd.f32 %v3576_v45, %v11934_v47 }
 0x218   : > { %v4082_v21 = vpop.f32.mrf.mxu0  ;;  %v10026_v24 = vpop.f32.mrf.mxu1  ;;  %v6119_v20 = vsel %vm5012_vm0, %v6116_v31, %v6118_v48 }
 0x219   : > { %v12060_v5 = vadd.f32 %v4082_v21, %v3688_v51  ;;  %v3698_v46 = vadd.f32 %v10026_v24, %v11936_v33 }
 0x21a   : > { %v10073_v62 = vpop.f32.mrf.mxu0  ;;  %10304 = vmatmul.mubr.bf16.gmra.mxu0 %v6115_v56  ;;  %v3579_v28 = vpop.f32.mrf.mxu1 }
 0x21b   : > { %v12065_v19 = vadd.f32 %v10073_v62, %v3693_v63  ;;  %10307 = vmatprep.mubr.bf16.mxu0 %v6117_v35  ;;  %v3696_v36 = vadd.f32 %v3579_v28, %v11938_v15 }
 0x21c   : > { %v4095_v47 = vpop.f32.mrf.mxu0  ;;  %v10029_v50 = vpop.f32.mrf.mxu1 }
 0x21d   : > { %v12068_v25 = vadd.f32 %v4095_v47, %v3691_v14  ;;  %v3701_v51 = vadd.f32 %v10029_v50, %v11942_v16 }
 0x21e   : > { %v10074_v22 = vpop.f32.mrf.mxu0  ;;  %v3592_v33 = vpop.f32.mrf.mxu1 }
 0x21f   : > { %v12071_v6 = vadd.f32 %v10074_v22, %v3694_v7  ;;  %v3699_v9 = vadd.f32 %v3592_v33, %v11946_v40  ;;  %v12868_v40 = vld [vmem:[#allocation6_spill] sm:$0xff] }
 0x220   : > { %v4098_v0 = vpop.f32.mrf.mxu0  ;;  %v10030_v30 = vpop.f32.mrf.mxu1 }
 0x221   : > { %v12074_v63 = vadd.f32 %v4098_v0, %v3692_v43  ;;  %v3702_v15 = vadd.f32 %v10030_v30, %v11948_v57 }
 0x222   : > { %v10077_v61 = vpop.f32.mrf.mxu0  ;;  %10308 = vmatmul.mubr.bf16.gmra.mxu0 %v6119_v20  ;;  %v3595_v14 = vpop.f32.mrf.mxu1 }
 0x223   : > { %v12078_v2 = vadd.f32 %v10077_v61, %v3697_v60  ;;  %v3700_v16 = vadd.f32 %v3595_v14, %v11951_v11 }
 0x224   : > { %v4111_v37 = vpop.f32.mrf.mxu0  ;;  %v10033_v7 = vpop.f32.mrf.mxu1 }
 0x225   : > { %v12081_v23 = vadd.f32 %v4111_v37, %v3695_v39  ;;  %v3705_v1 = vadd.f32 %v10033_v7, %v12868_v40 }
 0x226   : > { %v10078_v18 = vpop.f32.mrf.mxu0  ;;  %v3608_v43 = vpop.f32.mrf.mxu1 }
 0x227   : > { %v12084_v45 = vadd.f32 %v10078_v18, %v3698_v46  ;;  %v3703_v31 = vadd.f32 %v3608_v43, %v11961_v13 }
 0x228   : > { %v4114_v57 = vpop.f32.mrf.mxu0  ;;  %v10034_v21 = vpop.f32.mrf.mxu1 }
 0x229   : > { %v12087_v24 = vadd.f32 %v4114_v57, %v3696_v36  ;;  %v3706_v60 = vadd.f32 %v10034_v21, %v11964_v54 }
 0x22a   : > { %v10081_v56 = vpop.f32.mrf.mxu0  ;;  %v3611_v11 = vpop.f32.mrf.mxu1 }
 0x22b   : > { %v12090_v27 = vadd.f32 %v10081_v56, %v3701_v51  ;;  %v3704_v39 = vadd.f32 %v3611_v11, %v11967_v4 }
 0x22c   : > { %v4127_v62 = vpop.f32.mrf.mxu0  ;;  %v10037_v35 = vpop.f32.mrf.mxu1 }
 0x22d   : > { %v12093_v28 = vadd.f32 %v4127_v62, %v3699_v9  ;;  %v3709_v46 = vadd.f32 %v10037_v35, %v11972_v3 }
 0x22e   : > { %v10082_v47 = vpop.f32.mrf.mxu0  ;;  %v3624_v13 = vpop.f32.mrf.mxu1 }
 0x22f   : > { %v12096_v50 = vadd.f32 %v10082_v47, %v3702_v15  ;;  %v3707_v36 = vadd.f32 %v3624_v13, %v11977_v8 }
 0x230   : > { %v4130_v48 = vpop.f32.mrf.mxu0  ;;  %v10038_v54 = vpop.f32.mrf.mxu1 }
 0x231   : > { %v12099_v22 = vadd.f32 %v4130_v48, %v3700_v16  ;;  %v3710_v51 = vadd.f32 %v10038_v54, %v11980_v17 }
 0x232   : > { %v10085_v33 = vpop.f32.mrf.mxu0  ;;  %v3627_v4 = vpop.f32.mrf.mxu1 }
 0x233   : > { %v12102_v0 = vadd.f32 %v10085_v33, %v3705_v1  ;;  %v3708_v9 = vadd.f32 %v3627_v4, %v11983_v58 }
 0x234   : > { %v4143_v30 = vpop.f32.mrf.mxu0  ;;  %v10041_v3 = vpop.f32.mrf.mxu1 }
 0x235   : > { %v12105_v20 = vadd.f32 %v4143_v30, %v3703_v31  ;;  %v3713_v15 = vadd.f32 %v10041_v3, %v11988_v32 }
 0x236   : > { %v10086_v61 = vpop.f32.mrf.mxu0  ;;  %v3640_v8 = vpop.f32.mrf.mxu1 }
 0x237   : > { %v12108_v14 = vadd.f32 %v10086_v61, %v3706_v60  ;;  %v3711_v16 = vadd.f32 %v3640_v8, %v11995_v34 }
 0x238   : > { %v4146_v37 = vpop.f32.mrf.mxu0  ;;  %v10042_v17 = vpop.f32.mrf.mxu1 }
 0x239   : > { %v12111_v7 = vadd.f32 %v4146_v37, %v3704_v39  ;;  %v3714_v40 = vadd.f32 %v10042_v17, %v11998_v44 }
 0x23a   : > { %v10089_v1 = vpop.f32.mrf.mxu0  ;;  %v3643_v58 = vpop.f32.mrf.mxu1 }
 0x23b   : > { %v12114_v18 = vadd.f32 %v10089_v1, %v3709_v46  ;;  %v3712_v43 = vadd.f32 %v3643_v58, %v12002_v41 }
 0x23c   : > { %v4159_v31 = vpop.f32.mrf.mxu0  ;;  %v10045_v32 = vpop.f32.mrf.mxu1 }
 0x23d   : > { %v12117_v57 = vadd.f32 %v4159_v31, %v3707_v36  ;;  %v3717_v21 = vadd.f32 %v10045_v32, %v12009_v52 }
 0x23e   : > { %v10090_v60 = vpop.f32.mrf.mxu0  ;;  %v3656_v34 = vpop.f32.mrf.mxu1 }
 0x23f   : > { %v12120_v56 = vadd.f32 %v10090_v60, %v3710_v51  ;;  %v3715_v11 = vadd.f32 %v3656_v34, %v12016_v53 }
 0x240   : > { %v4162_v39 = vpop.f32.mrf.mxu0  ;;  %v10046_v44 = vpop.f32.mrf.mxu1 }
 0x241   : > { %v12123_v62 = vadd.f32 %v4162_v39, %v3708_v9  ;;  %v3718_v35 = vadd.f32 %v10046_v44, %v12021_v38 }
 0x242   : > { %v10093_v46 = vpop.f32.mrf.mxu0  ;;  %v3659_v41 = vpop.f32.mrf.mxu1 }
 0x243   : > { %v12126_v47 = vadd.f32 %v10093_v46, %v3713_v15  ;;  %v3716_v13 = vadd.f32 %v3659_v41, %v12026_v10 }
 0x244   : > { %v4175_v36 = vpop.f32.mrf.mxu0  ;;  %v10049_v52 = vpop.f32.mrf.mxu1 }
 0x245   : > { %v12129_v48 = vadd.f32 %v4175_v36, %v3711_v16  ;;  %v3721_v54 = vadd.f32 %v10049_v52, %v12032_v12 }
 0x246   : > { %v10094_v51 = vpop.f32.mrf.mxu0  ;;  %v3672_v53 = vpop.f32.mrf.mxu1 }
 0x247   : > { %v12132_v33 = vadd.f32 %v10094_v51, %v3714_v40  ;;  %v3719_v4 = vadd.f32 %v3672_v53, %v12038_v49 }
 0x248   : > { %v4178_v9 = vpop.f32.mrf.mxu0  ;;  %v10050_v38 = vpop.f32.mrf.mxu1 }
 0x249   : > { %v12135_v30 = vadd.f32 %v4178_v9, %v3712_v43  ;;  %v3722_v3 = vadd.f32 %v10050_v38, %v12042_v42 }
 0x24a   : > { %v10097_v15 = vpop.f32.mrf.mxu0  ;;  %v3675_v10 = vpop.f32.mrf.mxu1 }
 0x24b   : > { %v12138_v61 = vadd.f32 %v10097_v15, %v3717_v21  ;;  %v3720_v8 = vadd.f32 %v3675_v10, %v12045_v26 }
 0x24c   : > { %v4191_v16 = vpop.f32.mrf.mxu0  ;;  %v10121_v12 = vpop.f32.mrf.mxu1 }
 0x24d   : > { %v12141_v37 = vadd.f32 %v4191_v16, %v3715_v11  ;;  %v4759_v17 = vadd.f32 %v10121_v12, %v12050_v55 }
 0x24e   : > { %v10098_v40 = vpop.f32.mrf.mxu0  ;;  %v4614_v49 = vpop.f32.mrf.mxu1 }
 0x24f   : > { %v12144_v1 = vadd.f32 %v10098_v40, %v3718_v35  ;;  %v4757_v58 = vadd.f32 %v4614_v49, %v12054_v59 }
 0x250   : > { %v4194_v43 = vpop.f32.mrf.mxu0  ;;  %v10122_v42 = vpop.f32.mrf.mxu1 }
 0x251   : > { %v12147_v31 = vadd.f32 %v4194_v43, %v3716_v13  ;;  %v4760_v32 = vadd.f32 %v10122_v42, %v12057_v29 }
 0x252   : > { %v10101_v21 = vpop.f32.mrf.mxu0  ;;  %v4617_v26 = vpop.f32.mrf.mxu1 }
 0x253   : > { %v12150_v60 = vadd.f32 %v10101_v21, %v3721_v54  ;;  %v4758_v34 = vadd.f32 %v4617_v26, %v12060_v5 }
 0x254   : > { %v4207_v11 = vpop.f32.mrf.mxu0  ;;  %v10125_v55 = vpop.f32.mrf.mxu1 }
 0x255   : > { %v12153_v39 = vadd.f32 %v4207_v11, %v3719_v4  ;;  %v4763_v44 = vadd.f32 %v10125_v55, %v12065_v19 }
 0x256   : > { %v10102_v35 = vpop.f32.mrf.mxu0  ;;  %v4630_v59 = vpop.f32.mrf.mxu1 }
 0x257   : > { %v12156_v46 = vadd.f32 %v10102_v35, %v3722_v3  ;;  %v4761_v41 = vadd.f32 %v4630_v59, %v12068_v25 }
 0x258   : > { %v4210_v13 = vpop.f32.mrf.mxu0  ;;  %v10126_v29 = vpop.f32.mrf.mxu1 }
 0x259   : > { %v12159_v36 = vadd.f32 %v4210_v13, %v3720_v8  ;;  %v4764_v52 = vadd.f32 %v10126_v29, %v12071_v6 }
 0x25a   : > { %v10173_v54 = vpop.f32.mrf.mxu0  ;;  %v4633_v5 = vpop.f32.mrf.mxu1 }
 0x25b   : > { %v12162_v51 = vadd.f32 %v10173_v54, %v4759_v17  ;;  %v4762_v53 = vadd.f32 %v4633_v5, %v12074_v63 }
 0x25c   : > { %v5150_v4 = vpop.f32.mrf.mxu0  ;;  %v10129_v19 = vpop.f32.mrf.mxu1 }
 0x25d   : > { %v12165_v9 = vadd.f32 %v5150_v4, %v4757_v58  ;;  %v4767_v38 = vadd.f32 %v10129_v19, %v12078_v2 }
 0x25e   : > { %v10174_v3 = vpop.f32.mrf.mxu0  ;;  %v4646_v25 = vpop.f32.mrf.mxu1 }
 0x25f   : > { %v12168_v15 = vadd.f32 %v10174_v3, %v4760_v32  ;;  %v4765_v10 = vadd.f32 %v4646_v25, %v12081_v23 }
 0x260   : > { %v5153_v8 = vpop.f32.mrf.mxu0  ;;  %v10130_v6 = vpop.f32.mrf.mxu1 }
 0x261   : > { %v12171_v16 = vadd.f32 %v5153_v8, %v4758_v34  ;;  %v4768_v12 = vadd.f32 %v10130_v6, %v12084_v45 }
 0x262   : > { %v10177_v17 = vpop.f32.mrf.mxu0  ;;  %v4649_v63 = vpop.f32.mrf.mxu1 }
 0x263   : > { %v12174_v40 = vadd.f32 %v10177_v17, %v4763_v44  ;;  %v4766_v49 = vadd.f32 %v4649_v63, %v12087_v24 }
 0x264   : > { %v5166_v58 = vpop.f32.mrf.mxu0  ;;  %v10133_v2 = vpop.f32.mrf.mxu1 }
 0x265   : > { %v12177_v43 = vadd.f32 %v5166_v58, %v4761_v41  ;;  %v4771_v42 = vadd.f32 %v10133_v2, %v12090_v27 }
 0x266   : > { %v10178_v32 = vpop.f32.mrf.mxu0  ;;  %v4662_v23 = vpop.f32.mrf.mxu1 }
 0x267   : > { %v12180_v21 = vadd.f32 %v10178_v32, %v4764_v52  ;;  %v4769_v26 = vadd.f32 %v4662_v23, %v12093_v28 }
 0x268   : > { %v5169_v34 = vpop.f32.mrf.mxu0  ;;  %v10134_v45 = vpop.f32.mrf.mxu1 }
 0x269   : > { %v12183_v11 = vadd.f32 %v5169_v34, %v4762_v53  ;;  %v4772_v55 = vadd.f32 %v10134_v45, %v12096_v50 }
 0x26a   : > { %v10181_v44 = vpop.f32.mrf.mxu0  ;;  %v4665_v24 = vpop.f32.mrf.mxu1 }
 0x26b   : > { %v12186_v35 = vadd.f32 %v10181_v44, %v4767_v38  ;;  %v4770_v59 = vadd.f32 %v4665_v24, %v12099_v22 }
 0x26c   : > { %v5182_v41 = vpop.f32.mrf.mxu0  ;;  %v10137_v27 = vpop.f32.mrf.mxu1 }
 0x26d   : > { %v12189_v13 = vadd.f32 %v5182_v41, %v4765_v10  ;;  %v4775_v29 = vadd.f32 %v10137_v27, %v12102_v0 }
 0x26e   : > { %v10182_v52 = vpop.f32.mrf.mxu0  ;;  %v4678_v28 = vpop.f32.mrf.mxu1 }
 0x26f   : > { %v12192_v54 = vadd.f32 %v10182_v52, %v4768_v12  ;;  %v4773_v5 = vadd.f32 %v4678_v28, %v12105_v20 }
 0x270   : > { %v5185_v53 = vpop.f32.mrf.mxu0  ;;  %v10138_v50 = vpop.f32.mrf.mxu1 }
 0x271   : > { %v12195_v4 = vadd.f32 %v5185_v53, %v4766_v49  ;;  %v4776_v19 = vadd.f32 %v10138_v50, %v12108_v14 }
 0x272   : > { %v10185_v38 = vpop.f32.mrf.mxu0  ;;  %v4681_v22 = vpop.f32.mrf.mxu1 }
 0x273   : > { %v12198_v3 = vadd.f32 %v10185_v38, %v4771_v42  ;;  %v4774_v25 = vadd.f32 %v4681_v22, %v12111_v7 }
 0x274   : > { %v5198_v10 = vpop.f32.mrf.mxu0  ;;  %v10141_v0 = vpop.f32.mrf.mxu1 }
 0x275   : > { %v12201_v8 = vadd.f32 %v5198_v10, %v4769_v26  ;;  %v4779_v6 = vadd.f32 %v10141_v0, %v12114_v18 }
 0x276   : > { %v10186_v12 = vpop.f32.mrf.mxu0  ;;  %v4694_v20 = vpop.f32.mrf.mxu1 }
 0x277   : > { %v12204_v17 = vadd.f32 %v10186_v12, %v4772_v55  ;;  %v4777_v63 = vadd.f32 %v4694_v20, %v12117_v57 }
 0x278   : > { %v5201_v49 = vpop.f32.mrf.mxu0  ;;  %v10142_v14 = vpop.f32.mrf.mxu1 }
 0x279   : > { %v12207_v58 = vadd.f32 %v5201_v49, %v4770_v59  ;;  %v4780_v2 = vadd.f32 %v10142_v14, %v12120_v56 }
 0x27a   : > { %v10189_v42 = vpop.f32.mrf.mxu0  ;;  %v4697_v7 = vpop.f32.mrf.mxu1 }
 0x27b   : > { %v12210_v32 = vadd.f32 %v10189_v42, %v4775_v29  ;;  %v4778_v23 = vadd.f32 %v4697_v7, %v12123_v62 }
 0x27c   : > { %v5214_v26 = vpop.f32.mrf.mxu0  ;;  %v10145_v18 = vpop.f32.mrf.mxu1 }
 0x27d   : > { %v12213_v34 = vadd.f32 %v5214_v26, %v4773_v5  ;;  %v4783_v45 = vadd.f32 %v10145_v18, %v12126_v47 }
 0x27e   : > { %v10190_v55 = vpop.f32.mrf.mxu0  ;;  %v4710_v57 = vpop.f32.mrf.mxu1 }
 0x27f   : > { %v12216_v44 = vadd.f32 %v10190_v55, %v4776_v19  ;;  %v4781_v24 = vadd.f32 %v4710_v57, %v12129_v48 }
 0x280   : > { %v5217_v59 = vpop.f32.mrf.mxu0  ;;  %v10146_v56 = vpop.f32.mrf.mxu1 }
 0x281   : > { %v12219_v41 = vadd.f32 %v5217_v59, %v4774_v25  ;;  %v4784_v27 = vadd.f32 %v10146_v56, %v12132_v33 }
 0x282   : > { %v10193_v29 = vpop.f32.mrf.mxu0  ;;  %v4713_v62 = vpop.f32.mrf.mxu1 }
 0x283   : > { %v12222_v52 = vadd.f32 %v10193_v29, %v4779_v6  ;;  %v4782_v28 = vadd.f32 %v4713_v62, %v12135_v30 }
 0x284   : > { %v5230_v5 = vpop.f32.mrf.mxu0  ;;  %v10149_v47 = vpop.f32.mrf.mxu1 }
 0x285   : > { %v12225_v53 = vadd.f32 %v5230_v5, %v4777_v63  ;;  %v4787_v50 = vadd.f32 %v10149_v47, %v12138_v61  ;;  %v10624_v5 = vmov 1983009808   ;;  %v6511_v47 = vlaneseq }
 0x286   : > { %v10194_v19 = vpop.f32.mrf.mxu0  ;;  %v4726_v48 = vpop.f32.mrf.mxu1 }
 0x287   : > { %v12228_v38 = vadd.f32 %v10194_v19, %v4780_v2  ;;  %v4785_v22 = vadd.f32 %v4726_v48, %v12141_v37 }
 0x288   : > { %v5233_v25 = vpop.f32.mrf.mxu0  ;;  %v10150_v33 = vpop.f32.mrf.mxu1 }
 0x289   : > { %v12231_v10 = vadd.f32 %v5233_v25, %v4778_v23  ;;  %v4788_v0 = vadd.f32 %v10150_v33, %v12144_v1 }
 0x28a   : > { %v10197_v6 = vpop.f32.mrf.mxu0  ;;  %v4729_v30 = vpop.f32.mrf.mxu1 }
 0x28b   : > { %v12234_v12 = vadd.f32 %v10197_v6, %v4783_v45  ;;  %v4786_v20 = vadd.f32 %v4729_v30, %v12147_v31  ;;  %v6512_v6 = vshrl.u32 %v6511_v47, 7 }
 0x28c   : > { %v5246_v63 = vpop.f32.mrf.mxu0  ;;  %v10153_v61 = vpop.f32.mrf.mxu1 }
 0x28d   : > { %v12237_v49 = vadd.f32 %v5246_v63, %v4781_v24  ;;  %v4791_v14 = vadd.f32 %v10153_v61, %v12150_v60 }
 0x28e   : > { %v10198_v2 = vpop.f32.mrf.mxu0  ;;  %v4742_v37 = vpop.f32.mrf.mxu1 }
 0x28f   : > { %v12240_v42 = vadd.f32 %v10198_v2, %v4784_v27  ;;  %v4789_v7 = vadd.f32 %v4742_v37, %v12153_v39 }
 0x290   : > { %v5249_v23 = vpop.f32.mrf.mxu0  ;;  %v10154_v1 = vpop.f32.mrf.mxu1 }
 0x291   : > { %v12243_v26 = vadd.f32 %v5249_v23, %v4782_v28  ;;  %v4792_v18 = vadd.f32 %v10154_v1, %v12156_v46  ;;  %v6509_v46 = vunpack.c.l.s4 %v10624_v5 }
 0x292   : > { %v10201_v45 = vpop.f32.mrf.mxu0  ;;  %v4745_v31 = vpop.f32.mrf.mxu1 }
 0x293   : > { %v12246_v55 = vadd.f32 %v10201_v45, %v4787_v50  ;;  %v4790_v57 = vadd.f32 %v4745_v31, %v12159_v36 }
 0x294   : > { %v5262_v24 = vpop.f32.mrf.mxu0  ;;  %v10225_v60 = vpop.f32.mrf.mxu1 }
 0x295   : > { %v12249_v59 = vadd.f32 %v5262_v24, %v4785_v22  ;;  %v6510_v22 = vunpack.c.0.s8 %v6509_v46 }
 0x296   : > { %v10202_v56 = vpop.f32.mrf.mxu0  ;;  %v5685_v27 = vpop.f32.mrf.mxu1 }
 0x297   : > { %v12251_v29 = vadd.f32 %v10202_v56, %v4788_v0  ;;  %v12264_v37 = vsub.s32 %v6510_v22, %v6512_v6 }
 0x298   : > { %v5265_v39 = vpop.f32.mrf.mxu0  ;;  %v10226_v62 = vpop.f32.mrf.mxu1 }
 0x299   : > { %v12253_v28 = vadd.f32 %v5265_v39, %v4786_v20  ;;  %v5830_v20 = vadd.f32 %v10225_v60, %v12162_v51 }
 0x29a   : > { %v10205_v19 = vpop.f32.mrf.mxu0  ;;  %v5688_v50 = vpop.f32.mrf.mxu1 }
 0x29b   : > { %v12255_v48 = vadd.f32 %v10205_v19, %v4791_v14  ;;  %v5828_v14 = vadd.f32 %v5685_v27, %v12165_v9  ;;  %v5829_v39 = vadd.f32 %v5688_v50, %v12171_v16 }
 0x29c   : > { %v5278_v36 = vpop.f32.mrf.mxu0  ;;  %v10229_v25 = vpop.f32.mrf.mxu1 }
 0x29d   : > { %v12257_v33 = vadd.f32 %v5278_v36, %v4789_v7  ;;  %v5834_v9 = vadd.f32 %v10229_v25, %v12174_v40 }
 0x29e   : > { %v10206_v30 = vpop.f32.mrf.mxu0  ;;  %v5701_v63 = vpop.f32.mrf.mxu1 }
 0x29f   : > { %v12259_v0 = vadd.f32 %v10206_v30, %v4792_v18  ;;  %v5831_v18 = vadd.f32 %v10226_v62, %v12168_v15  ;;  %v5832_v27 = vadd.f32 %v5701_v63, %v12177_v43 }
 0x2a0   : > { %v5281_v61 = vpop.f32.mrf.mxu0  ;;  %v10230_v45 = vpop.f32.mrf.mxu1 }
 0x2a1   : > { %12869 = vst [vmem:[#allocation7_spill] sm:$0xff] %v12259_v0  ;;  %v12262_v2 = vadd.f32 %v5281_v61, %v4790_v57  ;;  %v12275_v19 = vadd.f32 %v10230_v45, %v12180_v21 }
 0x2a2   : > { %v10277_v23 = vpop.f32.mrf.mxu0  ;;  %v5704_v47 = vpop.f32.mrf.mxu1 }
 0x2a3   : > { %12870 = vst [vmem:[#allocation8_spill] sm:$0xff] %v12262_v2  ;;  %v6365_v1 = vadd.f32 %v10277_v23, %v5830_v20  ;;  %v12279_v20 = vadd.f32 %v5704_v47, %v12183_v11 }
 0x2a4   : > { %v6220_v7 = vpop.f32.mrf.mxu0 }
 0x2a5   : > { %v6541_v31 = vcombine.high %v6365_v1, %v6365_v1  ;;  %v6548_v24 = vrot.slane %v6365_v1, %v12264_v37  ;;  %v6363_v56 = vadd.f32 %v6220_v7, %v5828_v14 }
 0x2a6   : > { %v10278_v5 = vpop.f32.mrf.mxu0 }
 0x2a7   : > { %v6555_v51 = vrot.slane %v6541_v31, %v12264_v37  ;;  %v6556_v57 = vcombine.high %v6548_v24, %v6548_v24  ;;  %v6507_v60 = vcombine.high %v6363_v56, %v6363_v56  ;;  %v6514_v46 = vrot.slane %v6363_v56, %v12264_v37 }
 0x2a8   : > { %v6366_v36 = vadd.f32 %v10278_v5, %v5831_v18  ;;  %v6223_v22 = vpop.f32.mrf.mxu0 }
 0x2a9   : > { %v7273_v15 = vcombine.low %v6556_v57, %v6555_v51  ;;  %v7855_v62 = vmul.f32 %v6556_v57, %v6556_v57  ;;  %v7856_v16 = vmul.f32 %v6555_v51, %v6555_v51  ;;  %v6521_v50 = vrot.slane %v6507_v60, %v12264_v37 }
 0x2aa   : > { %v6522_v6 = vcombine.high %v6514_v46, %v6514_v46  ;;  %v6557_v30 = vcombine.high %v6555_v51, %v6555_v51  ;;  %v6558_v61 = vcombine.high %v6366_v36, %v6366_v36  ;;  %v7847_v21 = vmul.f32 %v6514_v46, %v6514_v46  ;;  %v10281_v63 = vpop.f32.mrf.mxu0 }
 0x2ab   : > { %v7281_v40 = vrot.slane %v7273_v15, %v12264_v37  ;;  %v8137_v43 = vcombine.low %v7855_v62, %v7856_v16  ;;  %v6523_v25 = vcombine.high %v6521_v50, %v6521_v50  ;;  %v6565_v1 = vrot.slane %v6366_v36, %v12264_v37 }
 0x2ac   : > { %v7239_v23 = vcombine.low %v6514_v46, %v6522_v6  ;;  %v7848_v14 = vmul.f32 %v6522_v6, %v6522_v6  ;;  %v12284_v45 = vrot.slane %v6558_v61, %v12264_v37  ;;  %v7849_v31 = vmul.f32 %v6521_v50, %v6521_v50  ;;  %v6236_v36 = vpop.f32.mrf.mxu0 }
 0x2ad   : > { %v7240_v7 = vcombine.low %v6521_v50, %v6523_v25  ;;  %v7850_v24 = vmul.f32 %v6523_v25, %v6523_v25  ;;  %v7857_v56 = vmul.f32 %v6557_v30, %v6557_v30  ;;  %v12288_v5 = vcombine.high %v6565_v1, %v6565_v1  ;;  %v10233_v25 = vpop.f32.mrf.mxu1 }
 0x2ae   : > { %v7247_v11 = vrot.slane %v7239_v23, %v12264_v37  ;;  %v8103_v18 = vcombine.low %v7847_v21, %v7848_v14  ;;  %v7274_v51 = vcombine.low %v6557_v30, %v6565_v1  ;;  %v7858_v46 = vmul.f32 %v6565_v1, %v6565_v1 }
 0x2af   : > { %v7254_v57 = vrot.slane %v7240_v7, %v12264_v37  ;;  %v8104_v60 = vcombine.low %v7849_v31, %v7850_v24  ;;  %v12293_v47 = vmul.f32 %v12284_v45, %v12284_v45  ;;  %v12296_v15 = vrot.slane %v8137_v43, %v12264_v37 }
 0x2b0   : > { %v12299_v62 = vrot.slane %v8103_v18, %v12264_v37  ;;  %v7288_v16 = vrot.slane %v7274_v51, %v12264_v37  ;;  %v12304_v50 = vmul.f32 %v12288_v5, %v12288_v5  ;;  %v8138_v61 = vcombine.low %v7857_v56, %v7858_v46 }
 0x2b1   : > { %v7255_v6 = vcombine.low %v7247_v11, %v7254_v57  ;;  %v12312_v30 = vrot.slane %v8104_v60, %v12264_v37  ;;  %v6364_v43 = vadd.f32 %v6223_v22, %v5829_v39  ;;  %v6369_v14 = vadd.f32 %v10281_v63, %v5834_v9 }
 0x2b2   : > { %v12314_v21 = vcombine.low %v7281_v40, %v7288_v16  ;;  %v8154_v23 = vcombine.low %v12304_v50, %v12293_v47  ;;  %v6367_v1 = vadd.f32 %v6236_v36, %v5832_v27  ;;  %v12322_v31 = vrot.slane %v8138_v61, %v12264_v37 }
 0x2b3   : > { %v8119_v7 = vcombine.low %v12299_v62, %v12312_v30  ;;  %9380 = vst [vmem:[%s12309_s17 + $0x19] sm:$0xff] %v7255_v6  ;;  %v6524_v24 = vcombine.high %v6364_v43, %v6364_v43  ;;  %v6531_v11 = vrot.slane %v6364_v43, %v12264_v37  ;;  %v12328_v39 = vadd.f32 %v10233_v25, %v12186_v35  ;;  %v5717_v62 = vpop.f32.mrf.mxu1 }
 0x2b4   : > { %9382 = vst [vmem:[%s12309_s17 + $0x31] sm:$0xff] %v12314_v21  ;;  %v6608_v22 = vcombine.high %v6369_v14, %v6369_v14  ;;  %v6615_v40 = vrot.slane %v6369_v14, %v12264_v37  ;;  %v6575_v9 = vcombine.high %v6367_v1, %v6367_v1  ;;  %v7290_v27 = vcombine.low %v12288_v5, %v12284_v45 }
 0x2b5   : > { %v6538_v56 = vrot.slane %v6524_v24, %v12264_v37  ;;  %v6539_v18 = vcombine.high %v6531_v11, %v6531_v11  ;;  %v7851_v51 = vmul.f32 %v6531_v11, %v6531_v11  ;;  %v6574_v35 = vcombine.high %v12284_v45, %v12284_v45 }
 0x2b6   : > { %v6622_v57 = vrot.slane %v6608_v22, %v12264_v37  ;;  %v6623_v60 = vcombine.high %v6615_v40, %v6615_v40  ;;  %v6582_v16 = vrot.slane %v6367_v1, %v12264_v37  ;;  %v7869_v50 = vmul.f32 %v6615_v40, %v6615_v40 }
 0x2b7   : > { %v6540_v46 = vcombine.high %v6538_v56, %v6538_v56  ;;  %v7256_v47 = vcombine.low %v6531_v11, %v6539_v18  ;;  %v7852_v36 = vmul.f32 %v6539_v18, %v6539_v18  ;;  %v6589_v61 = vrot.slane %v6575_v9, %v12264_v37  ;;  %v10282_v11 = vpop.f32.mrf.mxu0 }
 0x2b8   : > { %v7325_v5 = vcombine.low %v6615_v40, %v6623_v60  ;;  %v7870_v30 = vmul.f32 %v6623_v60, %v6623_v60  ;;  %v7853_v25 = vmul.f32 %v6538_v56, %v6538_v56  ;;  %v6624_v22 = vcombine.high %v6622_v57, %v6622_v57 }
 0x2b9   : > { %v7257_v43 = vcombine.low %v6538_v56, %v6540_v46  ;;  %v7854_v14 = vmul.f32 %v6540_v46, %v6540_v46  ;;  %v8120_v24 = vcombine.low %v7851_v51, %v7852_v36  ;;  %v12342_v2 = vadd.f32 %v5717_v62, %v12189_v13 }
 0x2ba   : > { %v8189_v63 = vcombine.low %v7869_v50, %v7870_v30  ;;  %v6590_v45 = vcombine.high %v6589_v61, %v6589_v61  ;;  %v7264_v18 = vrot.slane %v7256_v47, %v12264_v37  ;;  %v7291_v40 = vcombine.low %v6574_v35, %v6582_v16 }
 0x2bb   : > { %v7271_v1 = vrot.slane %v7257_v43, %v12264_v37  ;;  %v8121_v0 = vcombine.low %v7853_v25, %v7854_v14  ;;  %v8128_v9 = vrot.slane %v8120_v24, %v12264_v37  ;;  %v12348_v56 = vrot.slane %v7325_v5, %v12264_v37  ;;  %v6239_v43 = vpop.f32.mrf.mxu0 }
 0x2bc   : > { %v7298_v51 = vrot.slane %v7290_v27, %v12264_v37  ;;  %v7861_v57 = vmul.f32 %v6574_v35, %v6574_v35  ;;  %v7305_v46 = vrot.slane %v7291_v40, %v12264_v37  ;;  %v7862_v36 = vmul.f32 %v6582_v16, %v6582_v16 }
 0x2bd   : > { %v7272_v60 = vcombine.low %v7264_v18, %v7271_v1  ;;  %v8135_v13 = vrot.slane %v8121_v0, %v12264_v37  ;;  %v7871_v47 = vmul.f32 %v6624_v22, %v6624_v22  ;;  %v7307_v62 = vcombine.low %v6589_v61, %v6590_v45 }
 0x2be   : > { %v7863_v50 = vmul.f32 %v6589_v61, %v6589_v61  ;;  %v7864_v30 = vmul.f32 %v6590_v45, %v6590_v45  ;;  %v7306_v5 = vcombine.low %v7298_v51, %v7305_v46  ;;  %v8155_v24 = vcombine.low %v7861_v57, %v7862_v36  ;;  %v10234_v36 = vpop.f32.mrf.mxu1 }
 0x2bf   : > { %v7815_v25 = vadd.f32 %v7272_v60, %v7255_v6  ;;  %v8136_v14 = vcombine.low %v8128_v9, %v8135_v13  ;;  %9381 = vst [vmem:[%s12309_s17 + $0x21] sm:$0xff] %v7272_v60  ;;  %v12355_v27 = vrot.slane %v8189_v63, %v12264_v37  ;;  %v8162_v35 = vrot.slane %v8154_v23, %v12264_v37  ;;  %v10285_v23 = vpop.f32.mrf.mxu0 }
 0x2c0   : > { %v8171_v0 = vcombine.low %v7863_v50, %v7864_v30  ;;  %v6370_v18 = vadd.f32 %v10282_v11, %v12275_v19  ;;  %v8169_v61 = vrot.slane %v8155_v24, %v12264_v37  ;;  %9383 = vst [vmem:[%s12309_s17 + $0x39] sm:$0xff] %v7306_v5  ;;  %v6368_v6 = vadd.f32 %v6239_v43, %v12279_v20 }
 0x2c1   : > { %v8679_v16 = vadd.f32 %v8136_v14, %v8119_v7  ;;  %v7816_v1 = vadd.f32 %v7815_v25, %v12314_v21  ;;  %v7315_v45 = vrot.slane %v7307_v62, %v12264_v37  ;;  %v12871_v19 = vcombine.low %v12296_v15, %v12322_v31 }
 0x2c2   : > { %v12365_v40 = vrot.slane %v8171_v0, %v12264_v37  ;;  %v6625_v63 = vcombine.high %v6370_v18, %v6370_v18  ;;  %v6632_v9 = vrot.slane %v6370_v18, %v12264_v37  ;;  %v8170_v57 = vcombine.low %v8162_v35, %v8169_v61 }
 0x2c3   : > { %v7817_v51 = vadd.f32 %v7816_v1, %v7306_v5  ;;  %v8680_v21 = vadd.f32 %v8679_v16, %v12871_v19  ;;  %v6591_v7 = vcombine.high %v6368_v6, %v6368_v6  ;;  %v6598_v62 = vrot.slane %v6368_v6, %v12264_v37  ;;  %v5720_v1 = vpop.f32.mrf.mxu1  ;;  %v6252_v19 = vpop.f32.mrf.mxu0 }
 0x2c4   : > { %v12372_v11 = vrot.slane %v6625_v63, %v12264_v37  ;;  %v6640_v20 = vcombine.high %v6632_v9, %v6632_v9  ;;  %v7341_v60 = vcombine.low %v6624_v22, %v6632_v9  ;;  %v7872_v13 = vmul.f32 %v6632_v9, %v6632_v9 }
 0x2c5   : > { %v8681_v46 = vadd.f32 %v8680_v21, %v8170_v57  ;;  %v6605_v50 = vrot.slane %v6591_v7, %v12264_v37  ;;  %v6373_v30 = vadd.f32 %v10285_v23, %v12328_v39  ;;  %v6606_v5 = vcombine.high %v6598_v62, %v6598_v62 }
 0x2c6   : > { %v7342_v43 = vcombine.low %v6640_v20, %v12372_v11  ;;  %v7349_v15 = vrot.slane %v7341_v60, %v12264_v37  ;;  %v7873_v31 = vmul.f32 %v6640_v20, %v6640_v20  ;;  %v7874_v25 = vmul.f32 %v12372_v11, %v12372_v11 }
 0x2c7   : > { %v8205_v14 = vcombine.low %v7871_v47, %v7872_v13  ;;  %v6607_v22 = vcombine.high %v6605_v50, %v6605_v50  ;;  %v7865_v24 = vmul.f32 %v6598_v62, %v6598_v62  ;;  %v7867_v18 = vmul.f32 %v6605_v50, %v6605_v50 }
 0x2c8   : > { %v7356_v35 = vrot.slane %v7342_v43, %v12264_v37  ;;  %v8206_v0 = vcombine.low %v7873_v31, %v7874_v25  ;;  %v6675_v16 = vcombine.high %v6373_v30, %v6373_v30  ;;  %v7308_v61 = vcombine.low %v6598_v62, %v6606_v5  ;;  %v10237_v25 = vpop.f32.mrf.mxu1 }
 0x2c9   : > { %v8213_v39 = vrot.slane %v8205_v14, %v12264_v37  ;;  %v7324_v6 = vcombine.low %v6605_v50, %v6607_v22  ;;  %v7866_v63 = vmul.f32 %v6606_v5, %v6606_v5  ;;  %v7868_v57 = vmul.f32 %v6607_v22, %v6607_v22 }
 0x2ca   : > { %v7357_v9 = vcombine.low %v7349_v15, %v7356_v35  ;;  %v8220_v23 = vrot.slane %v8206_v0, %v12264_v37  ;;  %v6682_v47 = vrot.slane %v6373_v30, %v12264_v37  ;;  %v7322_v21 = vrot.slane %v7308_v61, %v12264_v37  ;;  %v10286_v0 = vpop.f32.mrf.mxu0 }
 0x2cb   : > { %v7332_v7 = vrot.slane %v7324_v6, %v12264_v37  ;;  %v8172_v20 = vcombine.low %v7865_v24, %v7866_v63  ;;  %v6689_v60 = vrot.slane %v6675_v16, %v12264_v37  ;;  %v8188_v62 = vcombine.low %v7867_v18, %v7868_v57 }
 0x2cc   : > { %v8221_v13 = vcombine.low %v8213_v39, %v8220_v23  ;;  %9386 = vst [vmem:[%s12309_s17 + $0x61] sm:$0xff] %v7357_v9  ;;  %v6690_v50 = vcombine.high %v6682_v47, %v6682_v47  ;;  %v7883_v43 = vmul.f32 %v6682_v47, %v6682_v47  ;;  %v7323_v15 = vcombine.low %v7315_v45, %v7322_v21 }
 0x2cd   : > { %v7340_v31 = vcombine.low %v7332_v7, %v12348_v56  ;;  %v8186_v30 = vrot.slane %v8172_v20, %v12264_v37  ;;  %v6691_v14 = vcombine.high %v6689_v60, %v6689_v60  ;;  %v8196_v5 = vrot.slane %v8188_v62, %v12264_v37 }
 0x2ce   : > { %v7392_v22 = vcombine.low %v6682_v47, %v6690_v50  ;;  %v7884_v24 = vmul.f32 %v6690_v50, %v6690_v50  ;;  %v7885_v35 = vmul.f32 %v6689_v60, %v6689_v60  ;;  %v7818_v16 = vadd.f32 %v7817_v51, %v7323_v15  ;;  %9384 = vst [vmem:[%s12309_s17 + $0x49] sm:$0xff] %v7323_v15  ;;  %v5733_v51 = vpop.f32.mrf.mxu1 }
 0x2cf   : > { %v8187_v39 = vcombine.low %v12365_v40, %v8186_v30  ;;  %9385 = vst [vmem:[%s12309_s17 + $0x51] sm:$0xff] %v7340_v31  ;;  %v7393_v18 = vcombine.low %v6689_v60, %v6691_v14  ;;  %v7886_v61 = vmul.f32 %v6691_v14, %v6691_v14  ;;  %v5839_v45 = vadd.f32 %v10234_v36, %v12192_v54 }
 0x2d0   : > { %v8204_v56 = vcombine.low %v8196_v5, %v12355_v27  ;;  %v7400_v6 = vrot.slane %v7392_v22, %v12264_v37  ;;  %v8256_v63 = vcombine.low %v7883_v43, %v7884_v24  ;;  %v7819_v23 = vadd.f32 %v7818_v16, %v7340_v31  ;;  %v6255_v27 = vpop.f32.mrf.mxu0  ;;  %v10238_v15 = vpop.f32.mrf.mxu1 }
 0x2d1   : > { %v8682_v57 = vadd.f32 %v8681_v46, %v8187_v39  ;;  %v7407_v47 = vrot.slane %v7393_v18, %v12264_v37  ;;  %v8257_v21 = vcombine.low %v7885_v35, %v7886_v61  ;;  %v5837_v40 = vadd.f32 %v5720_v1, %v12195_v4 }
 0x2d2   : > { %v12401_v7 = vrot.slane %v8256_v63, %v12264_v37  ;;  %v6371_v20 = vadd.f32 %v6252_v19, %v12342_v2  ;;  %v6641_v54 = vcombine.high %v12372_v11, %v12372_v11  ;;  %v7820_v62 = vadd.f32 %v7819_v23, %v7357_v9 }
 0x2d3   : > { %v8683_v36 = vadd.f32 %v8682_v57, %v8204_v56  ;;  %v12406_v60 = vcombine.low %v7400_v6, %v7407_v47  ;;  %v12409_v46 = vrot.slane %v8257_v21, %v12264_v37  ;;  %v5842_v50 = vadd.f32 %v10237_v25, %v12198_v3  ;;  %v10289_v47 = vpop.f32.mrf.mxu0 }
 0x2d4   : > { %v6642_v43 = vcombine.high %v6371_v20, %v6371_v20  ;;  %v6649_v4 = vrot.slane %v6371_v20, %v12264_v37  ;;  %v6374_v1 = vadd.f32 %v10286_v0, %v5839_v45  ;;  %v7875_v11 = vmul.f32 %v6641_v54, %v6641_v54  ;;  %v5736_v45 = vpop.f32.mrf.mxu1 }
 0x2d5   : > { %v8272_v2 = vcombine.low %v12401_v7, %v12409_v46  ;;  %9389 = vst [vmem:[%s12309_s17 + $0x81] sm:$0xff] %v12406_v60  ;;  %v8684_v19 = vadd.f32 %v8683_v36, %v8221_v13  ;;  %v6372_v31 = vadd.f32 %v6255_v27, %v5837_v40  ;;  %v5840_v35 = vadd.f32 %v5733_v51, %v12201_v8 }
 0x2d6   : > { %v6656_v30 = vrot.slane %v6642_v43, %v12264_v37  ;;  %v6657_v14 = vcombine.high %v6649_v4, %v6649_v4  ;;  %v7358_v5 = vcombine.low %v6641_v54, %v6649_v4  ;;  %v7876_v9 = vmul.f32 %v6649_v4, %v6649_v4 }
 0x2d7   : > { %v6692_v22 = vcombine.high %v6374_v1, %v6374_v1  ;;  %v6699_v3 = vrot.slane %v6374_v1, %v12264_v37  ;;  %v6658_v25 = vcombine.high %v6372_v31, %v6372_v31  ;;  %v6665_v24 = vrot.slane %v6372_v31, %v12264_v37  ;;  %v10241_v31 = vpop.f32.mrf.mxu1 }
 0x2d8   : > { %v7359_v0 = vcombine.low %v6657_v14, %v6656_v30  ;;  %v7877_v16 = vmul.f32 %v6657_v14, %v6657_v14  ;;  %v7878_v39 = vmul.f32 %v6656_v30, %v6656_v30  ;;  %v8222_v18 = vcombine.low %v7875_v11, %v7876_v9 }
 0x2d9   : > { %v6706_v13 = vrot.slane %v6692_v22, %v12264_v37  ;;  %v6707_v61 = vcombine.high %v6699_v3, %v6699_v3  ;;  %v6672_v56 = vrot.slane %v6658_v25, %v12264_v37  ;;  %v7366_v6 = vrot.slane %v7358_v5, %v12264_v37  ;;  %v6268_v22 = vpop.f32.mrf.mxu0 }
 0x2da   : > { %v7373_v63 = vrot.slane %v7359_v0, %v12264_v37  ;;  %v8223_v23 = vcombine.low %v7877_v16, %v7878_v39  ;;  %v6673_v57 = vcombine.high %v6665_v24, %v6665_v24  ;;  %v8230_v8 = vrot.slane %v8222_v18, %v12264_v37 }
 0x2db   : > { %v7409_v21 = vcombine.low %v6707_v61, %v6706_v13  ;;  %v7887_v51 = vmul.f32 %v6707_v61, %v6707_v61  ;;  %v7888_v40 = vmul.f32 %v6706_v13, %v6706_v13  ;;  %v6674_v27 = vcombine.high %v6672_v56, %v6672_v56  ;;  %v5749_v61 = vpop.f32.mrf.mxu1 }
 0x2dc   : > { %v7374_v20 = vcombine.low %v7366_v6, %v7373_v63  ;;  %v8237_v54 = vrot.slane %v8223_v23, %v12264_v37  ;;  %v7375_v36 = vcombine.low %v6665_v24, %v6673_v57  ;;  %v12428_v43 = vadd.f32 %v10238_v15, %v12204_v17 }
 0x2dd   : > { %v8273_v4 = vcombine.low %v7887_v51, %v7888_v40  ;;  %v7879_v1 = vmul.f32 %v6665_v24, %v6665_v24  ;;  %v7880_v11 = vmul.f32 %v6673_v57, %v6673_v57  ;;  %v5841_v5 = vadd.f32 %v5736_v45, %v12207_v58 }
 0x2de   : > { %v7821_v30 = vadd.f32 %v7820_v62, %v7374_v20  ;;  %v8238_v14 = vcombine.low %v8230_v8, %v8237_v54  ;;  %9387 = vst [vmem:[%s12309_s17 + $0x69] sm:$0xff] %v7374_v20  ;;  %v7376_v9 = vcombine.low %v6672_v56, %v6674_v27  ;;  %v7417_v3 = vrot.slane %v7409_v21, %v12264_v37 }
 0x2df   : > { %v7881_v25 = vmul.f32 %v6672_v56, %v6672_v56  ;;  %v7882_v0 = vmul.f32 %v6674_v27, %v6674_v27  ;;  %v8239_v16 = vcombine.low %v7879_v1, %v7880_v11  ;;  %v7383_v17 = vrot.slane %v7375_v36, %v12264_v37 }
 0x2e0   : > { %v8685_v39 = vadd.f32 %v8684_v19, %v8238_v14  ;;  %v7390_v15 = vrot.slane %v7376_v9, %v12264_v37  ;;  %v6377_v24 = vadd.f32 %v10289_v47, %v5842_v50  ;;  %v12436_v62 = vrot.slane %v8273_v4, %v12264_v37  ;;  %v10242_v9 = vpop.f32.mrf.mxu1 }
 0x2e1   : > { %v8240_v18 = vcombine.low %v7881_v25, %v7882_v0  ;;  %v12439_v58 = vadd.f32 %v10241_v31, %v12210_v32  ;;  %v6375_v45 = vadd.f32 %v6268_v22, %v5840_v35  ;;  %v6708_v19 = vcombine.high %v6706_v13, %v6706_v13  ;;  %v10290_v35 = vpop.f32.mrf.mxu0 }
 0x2e2   : > { %v7391_v6 = vcombine.low %v7383_v17, %v7390_v15  ;;  %v6742_v56 = vcombine.high %v6377_v24, %v6377_v24  ;;  %v6749_v63 = vrot.slane %v6377_v24, %v12264_v37  ;;  %v8247_v23 = vrot.slane %v8239_v16, %v12264_v37 }
 0x2e3   : > { %v8254_v57 = vrot.slane %v8240_v18, %v12264_v37  ;;  %v6709_v8 = vcombine.high %v6375_v45, %v6375_v45  ;;  %v6716_v50 = vrot.slane %v6375_v45, %v12264_v37  ;;  %v12448_v51 = vadd.f32 %v5749_v61, %v12213_v34  ;;  %v6271_v16 = vpop.f32.mrf.mxu0 }
 0x2e4   : > { %v7822_v47 = vadd.f32 %v7821_v30, %v7391_v6  ;;  %9388 = vst [vmem:[%s12309_s17 + $0x79] sm:$0xff] %v7391_v6  ;;  %v6756_v21 = vrot.slane %v6742_v56, %v12264_v37  ;;  %v6757_v32 = vcombine.high %v6749_v63, %v6749_v63  ;;  %v7897_v36 = vmul.f32 %v6749_v63, %v6749_v63 }
 0x2e5   : > { %v8255_v40 = vcombine.low %v8247_v23, %v8254_v57  ;;  %v6723_v20 = vrot.slane %v6709_v8, %v12264_v37  ;;  %v6724_v13 = vcombine.high %v6716_v50, %v6716_v50  ;;  %v7410_v54 = vcombine.low %v6708_v19, %v6716_v50 }
 0x2e6   : > { %v6758_v27 = vcombine.high %v6756_v21, %v6756_v21  ;;  %v7898_v4 = vmul.f32 %v6757_v32, %v6757_v32  ;;  %v7889_v1 = vmul.f32 %v6708_v19, %v6708_v19  ;;  %v7444_v31 = vcombine.low %v6749_v63, %v6757_v32 }
 0x2e7   : > { %v8686_v11 = vadd.f32 %v8685_v39, %v8255_v40  ;;  %v7424_v30 = vrot.slane %v7410_v54, %v12264_v37  ;;  %v7890_v14 = vmul.f32 %v6716_v50, %v6716_v50  ;;  %v7899_v34 = vmul.f32 %v6756_v21, %v6756_v21 }
 0x2e8   : > { %v7460_v22 = vcombine.low %v6756_v21, %v6758_v27  ;;  %v7900_v25 = vmul.f32 %v6758_v27, %v6758_v27  ;;  %v8308_v0 = vcombine.low %v7897_v36, %v7898_v4  ;;  %v7891_v15 = vmul.f32 %v6724_v13, %v6724_v13 }
 0x2e9   : > { %v7425_v17 = vcombine.low %v7417_v3, %v7424_v30  ;;  %v7892_v24 = vmul.f32 %v6723_v20, %v6723_v20  ;;  %v8274_v18 = vcombine.low %v7889_v1, %v7890_v14  ;;  %v7426_v45 = vcombine.low %v6724_v13, %v6723_v20 }
 0x2ea   : > { %v8324_v61 = vcombine.low %v7899_v34, %v7900_v25  ;;  %v12453_v6 = vadd.f32 %v10242_v9, %v12216_v44  ;;  %v6378_v39 = vadd.f32 %v10290_v35, %v12428_v43  ;;  %v7458_v56 = vrot.slane %v7444_v31, %v12264_v37  ;;  %v10293_v35 = vpop.f32.mrf.mxu0 }
 0x2eb   : > { %v8288_v63 = vrot.slane %v8274_v18, %v12264_v37  ;;  %v8290_v19 = vcombine.low %v7891_v15, %v7892_v24  ;;  %9390 = vst [vmem:[%s12309_s17 + $0x91] sm:$0xff] %v7425_v17  ;;  %v6376_v23 = vadd.f32 %v6271_v16, %v5841_v5  ;;  %v7468_v57 = vrot.slane %v7460_v22, %v12264_v37  ;;  %v5752_v15 = vpop.f32.mrf.mxu1 }
 0x2ec   : > { %v6759_v3 = vcombine.high %v6378_v39, %v6378_v39  ;;  %v6766_v8 = vrot.slane %v6378_v39, %v12264_v37  ;;  %v6725_v50 = vcombine.high %v6723_v20, %v6723_v20  ;;  %v12462_v21 = vrot.slane %v8308_v0, %v12264_v37  ;;  %v6284_v25 = vpop.f32.mrf.mxu0 }
 0x2ed   : > { %v8289_v44 = vcombine.low %v12436_v62, %v8288_v63  ;;  %v6726_v32 = vcombine.high %v6376_v23, %v6376_v23  ;;  %v6733_v43 = vrot.slane %v6376_v23, %v12264_v37  ;;  %v7434_v5 = vrot.slane %v7426_v45, %v12264_v37 }
 0x2ee   : > { %v6773_v40 = vrot.slane %v6759_v3, %v12264_v37  ;;  %v6774_v13 = vcombine.high %v6766_v8, %v6766_v8  ;;  %v7823_v54 = vadd.f32 %v7822_v47, %v12406_v60  ;;  %v7893_v20 = vmul.f32 %v6725_v50, %v6725_v50 }
 0x2ef   : > { %v6740_v27 = vrot.slane %v6726_v32, %v12264_v37  ;;  %v7427_v36 = vcombine.low %v6725_v50, %v6733_v43  ;;  %v7894_v4 = vmul.f32 %v6733_v43, %v6733_v43  ;;  %v7901_v31 = vmul.f32 %v6766_v8, %v6766_v8  ;;  %v10294_v43 = vpop.f32.mrf.mxu0 }
 0x2f0   : > { %v7461_v1 = vcombine.low %v6766_v8, %v6774_v13  ;;  %v7902_v30 = vmul.f32 %v6774_v13, %v6774_v13  ;;  %v7824_v62 = vadd.f32 %v7823_v54, %v7425_v17  ;;  %v12470_v14 = vcombine.high %v6773_v40, %v6773_v40 }
 0x2f1   : > { %v6741_v9 = vcombine.high %v6740_v27, %v6740_v27  ;;  %v7441_v22 = vrot.slane %v7427_v36, %v12264_v37  ;;  %v8291_v34 = vcombine.low %v7893_v20, %v7894_v4  ;;  %v7895_v60 = vmul.f32 %v6740_v27, %v6740_v27 }
 0x2f2   : > { %v7475_v0 = vrot.slane %v7461_v1, %v12264_v37  ;;  %v8325_v16 = vcombine.low %v7901_v31, %v7902_v30  ;;  %v8298_v47 = vrot.slane %v8290_v19, %v12264_v37  ;;  %v8332_v39 = vrot.slane %v8324_v61, %v12264_v37 }
 0x2f3   : > { %v7442_v24 = vcombine.low %v7434_v5, %v7441_v22  ;;  %v7443_v18 = vcombine.low %v6740_v27, %v6741_v9  ;;  %v7896_v45 = vmul.f32 %v6741_v9, %v6741_v9  ;;  %v8305_v17 = vrot.slane %v8291_v34, %v12264_v37 }
 0x2f4   : > { %v7476_v63 = vcombine.low %v7468_v57, %v7475_v0  ;;  %v8339_v23 = vrot.slane %v8325_v16, %v12264_v37  ;;  %v8687_v3 = vadd.f32 %v8686_v11, %v8272_v2  ;;  %v12485_v13 = vadd.f32 %v5752_v15, %v12219_v41  ;;  %v10245_v11 = vpop.f32.mrf.mxu1 }
 0x2f5   : > { %v7451_v8 = vrot.slane %v7443_v18, %v12264_v37  ;;  %v7825_v50 = vadd.f32 %v7824_v62, %v7442_v24  ;;  %v8306_v19 = vcombine.low %v8298_v47, %v8305_v17  ;;  %v8307_v32 = vcombine.low %v7895_v60, %v7896_v45  ;;  %9391 = vst [vmem:[%s12309_s17 + $0x99] sm:$0xff] %v7442_v24 }
 0x2f6   : > { %v8340_v40 = vcombine.low %v8332_v39, %v8339_v23  ;;  %9393 = vst [vmem:[%s12309_s17 + $0xb1] sm:$0xff] %v7476_v63  ;;  %v8688_v61 = vadd.f32 %v8687_v3, %v8289_v44  ;;  %v6381_v57 = vadd.f32 %v10293_v35, %v12439_v58  ;;  %v7903_v7 = vmul.f32 %v12470_v14, %v12470_v14 }
 0x2f7   : > { %v7459_v46 = vcombine.low %v7451_v8, %v7458_v56  ;;  %v8315_v2 = vrot.slane %v8307_v32, %v12264_v37  ;;  %v6379_v5 = vadd.f32 %v6284_v25, %v12448_v51  ;;  %v6382_v20 = vadd.f32 %v10294_v43, %v12453_v6 }
 0x2f8   : > { %v8689_v54 = vadd.f32 %v8688_v61, %v8306_v19  ;;  %v6809_v27 = vcombine.high %v6381_v57, %v6381_v57  ;;  %v6816_v36 = vrot.slane %v6381_v57, %v12264_v37  ;;  %v12498_v56 = vadd.f32 %v10245_v11, %v12222_v52 }
 0x2f9   : > { %v7826_v41 = vadd.f32 %v7825_v50, %v7459_v46  ;;  %v8323_v44 = vcombine.low %v8315_v2, %v12462_v21  ;;  %9392 = vst [vmem:[%s12309_s17 + $0xa9] sm:$0xff] %v7459_v46  ;;  %v6776_v58 = vcombine.high %v6379_v5, %v6379_v5  ;;  %v6783_v35 = vrot.slane %v6379_v5, %v12264_v37  ;;  %v5765_v46 = vpop.f32.mrf.mxu1 }
 0x2fa   : > { %v6823_v4 = vrot.slane %v6809_v27, %v12264_v37  ;;  %v6824_v1 = vcombine.high %v6816_v36, %v6816_v36  ;;  %v7911_v51 = vmul.f32 %v6816_v36, %v6816_v36  ;;  %v6826_v21 = vcombine.high %v6382_v20, %v6382_v20 }
 0x2fb   : > { %v7827_v31 = vadd.f32 %v7826_v41, %v7476_v63  ;;  %v8690_v30 = vadd.f32 %v8689_v54, %v8323_v44  ;;  %v6790_v62 = vrot.slane %v6776_v58, %v12264_v37  ;;  %v6791_v9 = vcombine.high %v6783_v35, %v6783_v35 }
 0x2fc   : > { %v6825_v6 = vcombine.high %v6823_v4, %v6823_v4  ;;  %v7511_v22 = vcombine.low %v6816_v36, %v6824_v1  ;;  %v7912_v34 = vmul.f32 %v6824_v1, %v6824_v1  ;;  %v7477_v0 = vcombine.low %v12470_v14, %v6783_v35  ;;  %v6287_v14 = vpop.f32.mrf.mxu0 }
 0x2fd   : > { %v8691_v25 = vadd.f32 %v8690_v30, %v8340_v40  ;;  %v7478_v16 = vcombine.low %v6791_v9, %v6790_v62  ;;  %v7904_v60 = vmul.f32 %v6783_v35, %v6783_v35  ;;  %v7913_v47 = vmul.f32 %v6823_v4, %v6823_v4 }
 0x2fe   : > { %v7512_v52 = vcombine.low %v6823_v4, %v6825_v6  ;;  %v7914_v15 = vmul.f32 %v6825_v6, %v6825_v6  ;;  %v8375_v24 = vcombine.low %v7911_v51, %v7912_v34  ;;  %v7485_v18 = vrot.slane %v7477_v0, %v12264_v37  ;;  %v10297_v44 = vpop.f32.mrf.mxu0  ;;  %v10246_v51 = vpop.f32.mrf.mxu1 }
 0x2ff   : > { %v7492_v45 = vrot.slane %v7478_v16, %v12264_v37  ;;  %v7905_v17 = vmul.f32 %v6791_v9, %v6791_v9  ;;  %v7906_v39 = vmul.f32 %v6790_v62, %v6790_v62  ;;  %v7519_v63 = vrot.slane %v7511_v22, %v12264_v37 }
 0x300   : > { %v7526_v23 = vrot.slane %v7512_v52, %v12264_v37  ;;  %v8376_v3 = vcombine.low %v7913_v47, %v7914_v15  ;;  %v8341_v8 = vcombine.low %v7903_v7, %v7904_v60  ;;  %v6833_v32 = vrot.slane %v6382_v20, %v12264_v37  ;;  %v6300_v47 = vpop.f32.mrf.mxu0 }
 0x301   : > { %v7493_v50 = vcombine.low %v7485_v18, %v7492_v45  ;;  %v8342_v19 = vcombine.low %v7905_v17, %v7906_v39  ;;  %v6840_v43 = vrot.slane %v6826_v21, %v12264_v37  ;;  %v12512_v61 = vrot.slane %v8375_v24, %v12264_v37  ;;  %v5768_v17 = vpop.f32.mrf.mxu1 }
 0x302   : > { %v12509_v40 = vcombine.low %v7519_v63, %v7526_v23  ;;  %v12515_v57 = vrot.slane %v8376_v3, %v12264_v37  ;;  %v8349_v2 = vrot.slane %v8341_v8, %v12264_v37  ;;  %v6841_v5 = vcombine.high %v6833_v32, %v6833_v32 }
 0x303   : > { %v7828_v7 = vadd.f32 %v7827_v31, %v7493_v50  ;;  %v8356_v11 = vrot.slane %v8342_v19, %v12264_v37  ;;  %9394 = vst [vmem:[%s12309_s17 + $0xc1] sm:$0xff] %v7493_v50  ;;  %v6842_v54 = vcombine.high %v6840_v43, %v6840_v43  ;;  %v7915_v36 = vmul.f32 %v6833_v32, %v6833_v32 }
 0x304   : > { %v8391_v27 = vcombine.low %v12512_v61, %v12515_v57  ;;  %9396 = vst [vmem:[%s12309_s17 + $0xd9] sm:$0xff] %v12509_v40  ;;  %v7917_v20 = vmul.f32 %v6840_v43, %v6840_v43  ;;  %v6380_v41 = vadd.f32 %v6287_v14, %v12485_v13  ;;  %v7528_v35 = vcombine.low %v6833_v32, %v6841_v5  ;;  %v10298_v32 = vpop.f32.mrf.mxu0 }
 0x305   : > { %v8357_v58 = vcombine.low %v8349_v2, %v8356_v11  ;;  %v7529_v4 = vcombine.low %v6840_v43, %v6842_v54  ;;  %v7916_v1 = vmul.f32 %v6841_v5, %v6841_v5  ;;  %v7918_v31 = vmul.f32 %v6842_v54, %v6842_v54  ;;  %v10249_v5 = vpop.f32.mrf.mxu1 }
 0x306   : > { %v6792_v30 = vcombine.high %v6790_v62, %v6790_v62  ;;  %v6793_v9 = vcombine.high %v6380_v41, %v6380_v41  ;;  %v6800_v6 = vrot.slane %v6380_v41, %v12264_v37  ;;  %v7536_v34 = vrot.slane %v7528_v35, %v12264_v37 }
 0x307   : > { %v8692_v22 = vadd.f32 %v8691_v25, %v8357_v58  ;;  %v7543_v21 = vrot.slane %v7529_v4, %v12264_v37  ;;  %v8392_v0 = vcombine.low %v7915_v36, %v7916_v1  ;;  %v8393_v16 = vcombine.low %v7917_v20, %v7918_v31 }
 0x308   : > { %v6807_v13 = vrot.slane %v6793_v9, %v12264_v37  ;;  %v6808_v60 = vcombine.high %v6800_v6, %v6800_v6  ;;  %v7494_v52 = vcombine.low %v6792_v30, %v6800_v6  ;;  %v5848_v15 = vadd.f32 %v5765_v46, %v12225_v53  ;;  %v6303_v9 = vpop.f32.mrf.mxu0 }
 0x309   : > { %v12530_v24 = vcombine.low %v7536_v34, %v7543_v21  ;;  %v7907_v62 = vmul.f32 %v6792_v30, %v6792_v30  ;;  %v7908_v18 = vmul.f32 %v6800_v6, %v6800_v6  ;;  %v12533_v25 = vrot.slane %v8392_v0, %v12264_v37  ;;  %v5781_v34 = vpop.f32.mrf.mxu1 }
 0x30a   : > { %v12536_v45 = vrot.slane %v8393_v16, %v12264_v37  ;;  %v7495_v39 = vcombine.low %v6808_v60, %v6807_v13  ;;  %v7909_v63 = vmul.f32 %v6808_v60, %v6808_v60  ;;  %v7910_v23 = vmul.f32 %v6807_v13, %v6807_v13 }
 0x30b   : > { %9397 = vst [vmem:[%s12309_s17 + $0xe1] sm:$0xff] %v12530_v24  ;;  %v8358_v3 = vcombine.low %v7907_v62, %v7908_v18  ;;  %v6385_v8 = vadd.f32 %v10297_v44, %v12498_v56  ;;  %v7502_v14 = vrot.slane %v7494_v52, %v12264_v37  ;;  %v6383_v19 = vadd.f32 %v6300_v47, %v5848_v15 }
 0x30c   : > { %v8408_v53 = vcombine.low %v12533_v25, %v12536_v45  ;;  %v7509_v50 = vrot.slane %v7495_v39, %v12264_v37  ;;  %v5851_v43 = vadd.f32 %v10246_v51, %v12228_v38  ;;  %v8359_v46 = vcombine.low %v7909_v63, %v7910_v23 }
 0x30d   : > { %v6877_v2 = vcombine.high %v6385_v8, %v6385_v8  ;;  %v6843_v54 = vcombine.high %v6383_v19, %v6383_v19  ;;  %v6850_v36 = vrot.slane %v6383_v19, %v12264_v37  ;;  %v8366_v56 = vrot.slane %v8358_v3, %v12264_v37 }
 0x30e   : > { %v7510_v11 = vcombine.low %v7502_v14, %v7509_v50  ;;  %v8373_v20 = vrot.slane %v8359_v46, %v12264_v37  ;;  %v6386_v44 = vadd.f32 %v10298_v32, %v5851_v43  ;;  %v5849_v58 = vadd.f32 %v5768_v17, %v12231_v10  ;;  %v10301_v46 = vpop.f32.mrf.mxu0 }
 0x30f   : > { %v6891_v41 = vrot.slane %v6877_v2, %v12264_v37  ;;  %v6857_v38 = vrot.slane %v6843_v54, %v12264_v37  ;;  %v6858_v4 = vcombine.high %v6850_v36, %v6850_v36  ;;  %v12554_v51 = vrot.slane %v6385_v8, %v12264_v37 }
 0x310   : > { %v7829_v35 = vadd.f32 %v7828_v7, %v7510_v11  ;;  %9395 = vst [vmem:[%s12309_s17 + $0xc9] sm:$0xff] %v7510_v11  ;;  %v8374_v1 = vcombine.low %v8366_v56, %v8373_v20  ;;  %v6893_v30 = vcombine.high %v6386_v44, %v6386_v44  ;;  %v6900_v7 = vrot.slane %v6386_v44, %v12264_v37 }
 0x311   : > { %v6892_v31 = vcombine.high %v6891_v41, %v6891_v41  ;;  %v7545_v21 = vcombine.low %v6858_v4, %v6857_v38  ;;  %v7919_v0 = vmul.f32 %v6858_v4, %v6858_v4  ;;  %v7920_v16 = vmul.f32 %v6857_v38, %v6857_v38 }
 0x312   : > { %v7830_v6 = vadd.f32 %v7829_v35, %v12509_v40  ;;  %v8693_v13 = vadd.f32 %v8692_v22, %v8374_v1  ;;  %v7927_v52 = vmul.f32 %v6891_v41, %v6891_v41  ;;  %v6384_v15 = vadd.f32 %v6303_v9, %v5849_v58  ;;  %v10250_v9 = vpop.f32.mrf.mxu1 }
 0x313   : > { %v7928_v10 = vmul.f32 %v6892_v31, %v6892_v31  ;;  %v7579_v60 = vcombine.low %v6891_v41, %v6892_v31  ;;  %v8409_v47 = vcombine.low %v7919_v0, %v7920_v16  ;;  %v5854_v18 = vadd.f32 %v10249_v5, %v12234_v12 }
 0x314   : > { %v8694_v62 = vadd.f32 %v8693_v13, %v8391_v27  ;;  %v5852_v40 = vadd.f32 %v5781_v34, %v12237_v49  ;;  %v6908_v17 = vcombine.high %v6900_v7, %v6900_v7  ;;  %v7926_v39 = vmul.f32 %v12554_v51, %v12554_v51 }
 0x315   : > { %v8443_v22 = vcombine.low %v7927_v52, %v7928_v10  ;;  %v7553_v63 = vrot.slane %v7545_v21, %v12264_v37  ;;  %v12567_v23 = vrot.slane %v6893_v30, %v12264_v37  ;;  %v7929_v8 = vmul.f32 %v6900_v7, %v6900_v7  ;;  %v6316_v30 = vpop.f32.mrf.mxu0 }
 0x316   : > { %v7580_v3 = vcombine.low %v6900_v7, %v6908_v17  ;;  %v7930_v14 = vmul.f32 %v6908_v17, %v6908_v17  ;;  %v6859_v50 = vcombine.high %v6857_v38, %v6857_v38  ;;  %v7587_v61 = vrot.slane %v7579_v60, %v12264_v37 }
 0x317   : > { %v8417_v12 = vrot.slane %v8409_v47, %v12264_v37  ;;  %v6860_v57 = vcombine.high %v6384_v15, %v6384_v15  ;;  %v6867_v49 = vrot.slane %v6384_v15, %v12264_v37  ;;  %v7831_v32 = vadd.f32 %v7830_v6, %v12530_v24  ;;  %v10302_v45 = vpop.f32.mrf.mxu0 }
 0x318   : > { %v7594_v27 = vrot.slane %v7580_v3, %v12264_v37  ;;  %v8444_v19 = vcombine.low %v7929_v8, %v7930_v14  ;;  %v7921_v43 = vmul.f32 %v6859_v50, %v6859_v50  ;;  %v12575_v2 = vrot.slane %v8443_v22, %v12264_v37 }
 0x319   : > { %v12579_v11 = vcombine.high %v12567_v23, %v12567_v23  ;;  %v6874_v5 = vrot.slane %v6860_v57, %v12264_v37  ;;  %v6875_v54 = vcombine.high %v6867_v49, %v6867_v49  ;;  %v7546_v20 = vcombine.low %v6859_v50, %v6867_v49 }
 0x31a   : > { %v7595_v36 = vcombine.low %v7587_v61, %v7594_v27  ;;  %v12583_v56 = vrot.slane %v8444_v19, %v12264_v37  ;;  %v7922_v41 = vmul.f32 %v6867_v49, %v6867_v49  ;;  %v7931_v24 = vmul.f32 %v12567_v23, %v12567_v23 }
 0x31b   : > { %v6876_v44 = vcombine.high %v6874_v5, %v6874_v5  ;;  %v7562_v58 = vcombine.low %v6875_v54, %v6874_v5  ;;  %v7923_v35 = vmul.f32 %v6875_v54, %v6875_v54  ;;  %v7560_v4 = vrot.slane %v7546_v20, %v12264_v37 }
 0x31c   : > { %v8459_v38 = vcombine.low %v12575_v2, %v12583_v56  ;;  %9400 = vst [vmem:[%s12309_s17 + $0x109] sm:$0xff] %v7595_v36  ;;  %v7924_v1 = vmul.f32 %v6874_v5, %v6874_v5  ;;  %v8410_v31 = vcombine.low %v7921_v43, %v7922_v41  ;;  %v7596_v6 = vcombine.low %v12567_v23, %v12579_v11 }
 0x31d   : > { %v7563_v34 = vcombine.low %v6876_v44, %v12554_v51  ;;  %v7925_v21 = vmul.f32 %v6876_v44, %v6876_v44  ;;  %v8695_v0 = vadd.f32 %v8694_v62, %v8408_v53  ;;  %v7932_v16 = vmul.f32 %v12579_v11, %v12579_v11  ;;  %v5784_v53 = vpop.f32.mrf.mxu1 }
 0x31e   : > { %v7561_v13 = vcombine.low %v7553_v63, %v7560_v4  ;;  %v8424_v10 = vrot.slane %v8410_v31, %v12264_v37  ;;  %v8426_v7 = vcombine.low %v7923_v35, %v7924_v1  ;;  %v7570_v60 = vrot.slane %v7562_v58, %v12264_v37 }
 0x31f   : > { %v7577_v52 = vrot.slane %v7563_v34, %v12264_v37  ;;  %v8427_v47 = vcombine.low %v7925_v21, %v7926_v39  ;;  %v6389_v15 = vadd.f32 %v10301_v46, %v5854_v18  ;;  %v6387_v25 = vadd.f32 %v6316_v30, %v5852_v40  ;;  %v10253_v46 = vpop.f32.mrf.mxu1 }
 0x320   : > { %v7832_v17 = vadd.f32 %v7831_v32, %v7561_v13  ;;  %v8425_v51 = vcombine.low %v8417_v12, %v8424_v10  ;;  %v8434_v22 = vrot.slane %v8426_v7, %v12264_v37  ;;  %9398 = vst [vmem:[%s12309_s17 + $0xf1] sm:$0xff] %v7561_v13  ;;  %v8460_v8 = vcombine.low %v7931_v24, %v7932_v16  ;;  %v6319_v32 = vpop.f32.mrf.mxu0 }
 0x321   : > { %v7578_v62 = vcombine.low %v7570_v60, %v7577_v52  ;;  %v8441_v63 = vrot.slane %v8427_v47, %v12264_v37  ;;  %v6944_v23 = vcombine.high %v6389_v15, %v6389_v15  ;;  %v12606_v3 = vrot.slane %v6389_v15, %v12264_v37 }
 0x322   : > { %v8696_v14 = vadd.f32 %v8695_v0, %v8425_v51  ;;  %v6910_v39 = vcombine.high %v6387_v25, %v6387_v25  ;;  %v6917_v18 = vrot.slane %v6387_v25, %v12264_v37  ;;  %v5855_v57 = vadd.f32 %v10250_v9, %v12240_v42  ;;  %v10305_v31 = vpop.f32.mrf.mxu0  ;;  %v5797_v0 = vpop.f32.mrf.mxu1 }
 0x323   : > { %v7833_v50 = vadd.f32 %v7832_v17, %v7578_v62  ;;  %v8442_v61 = vcombine.low %v8434_v22, %v8441_v63  ;;  %9399 = vst [vmem:[%s12309_s17 + $0xf9] sm:$0xff] %v7578_v62  ;;  %v6958_v12 = vrot.slane %v6944_v23, %v12264_v37  ;;  %v6959_v40 = vcombine.high %v12606_v3, %v12606_v3 }
 0x324   : > { %v5853_v49 = vadd.f32 %v5784_v53, %v12243_v26  ;;  %v6924_v27 = vrot.slane %v6910_v39, %v12264_v37  ;;  %v6925_v19 = vcombine.high %v6917_v18, %v6917_v18  ;;  %v7933_v5 = vmul.f32 %v6917_v18, %v6917_v18  ;;  %v10254_v23 = vpop.f32.mrf.mxu1 }
 0x325   : > { %v8697_v43 = vadd.f32 %v8696_v14, %v8442_v61  ;;  %v7631_v2 = vcombine.low %v6959_v40, %v6958_v12  ;;  %v12616_v11 = vmul.f32 %v6959_v40, %v6959_v40  ;;  %v12618_v54 = vmul.f32 %v6958_v12, %v6958_v12 }
 0x326   : > { %v7597_v56 = vcombine.low %v6917_v18, %v6925_v19  ;;  %v7834_v20 = vadd.f32 %v7833_v50, %v7595_v36  ;;  %v7934_v41 = vmul.f32 %v6925_v19, %v6925_v19  ;;  %v7604_v24 = vrot.slane %v7596_v6, %v12264_v37 }
 0x327   : > { %v8468_v42 = vrot.slane %v8460_v8, %v12264_v37  ;;  %v8698_v26 = vadd.f32 %v8697_v43, %v8459_v38  ;;  %v6390_v44 = vadd.f32 %v10302_v45, %v5855_v57  ;;  %v5858_v58 = vadd.f32 %v10253_v46, %v12246_v55 }
 0x328   : > { %v6926_v35 = vcombine.high %v6924_v27, %v6924_v27  ;;  %v7611_v4 = vrot.slane %v7597_v56, %v12264_v37  ;;  %v8461_v1 = vcombine.low %v7933_v5, %v7934_v41  ;;  %v12626_v30 = vmul.f32 %v12606_v3, %v12606_v3  ;;  %v5800_v56 = vpop.f32.mrf.mxu1 }
 0x329   : > { %v6960_v36 = vcombine.high %v6390_v44, %v6390_v44  ;;  %v6967_v9 = vrot.slane %v6390_v44, %v12264_v37  ;;  %v6388_v6 = vadd.f32 %v6319_v32, %v5853_v49  ;;  %v7645_v34 = vrot.slane %v7631_v2, %v12264_v37  ;;  %v6332_v32 = vpop.f32.mrf.mxu0 }
 0x32a   : > { %v8495_v38 = vcombine.low %v12616_v11, %v12618_v54  ;;  %v7612_v55 = vcombine.low %v7604_v24, %v7611_v4  ;;  %v8475_v21 = vrot.slane %v8461_v1, %v12264_v37  ;;  %v6393_v7 = vadd.f32 %v10305_v31, %v5858_v58 }
 0x32b   : > { %v6974_v16 = vrot.slane %v6960_v36, %v12264_v37  ;;  %v6975_v13 = vcombine.high %v6967_v9, %v6967_v9  ;;  %v6927_v10 = vcombine.high %v6388_v6, %v6388_v6  ;;  %v7935_v52 = vmul.f32 %v6926_v35, %v6926_v35  ;;  %v10306_v1 = vpop.f32.mrf.mxu0 }
 0x32c   : > { %v7835_v60 = vadd.f32 %v7834_v20, %v7612_v55  ;;  %v8476_v47 = vcombine.low %v8468_v42, %v8475_v21  ;;  %9401 = vst [vmem:[%s12309_s17 + $0x111] sm:$0xff] %v7612_v55  ;;  %v6934_v15 = vrot.slane %v6388_v6, %v12264_v37  ;;  %v7943_v22 = vmul.f32 %v6967_v9, %v6967_v9 }
 0x32d   : > { %v6976_v17 = vcombine.high %v6974_v16, %v6974_v16  ;;  %v7647_v51 = vcombine.low %v6967_v9, %v6975_v13  ;;  %v7944_v25 = vmul.f32 %v6975_v13, %v6975_v13  ;;  %v6941_v53 = vrot.slane %v6927_v10, %v12264_v37 }
 0x32e   : > { %v8699_v45 = vadd.f32 %v8698_v26, %v8476_v47  ;;  %v6942_v62 = vcombine.high %v6934_v15, %v6934_v15  ;;  %v7613_v63 = vcombine.low %v6926_v35, %v6934_v15  ;;  %v7945_v14 = vmul.f32 %v6974_v16, %v6974_v16 }
 0x32f   : > { %v7648_v8 = vcombine.low %v6974_v16, %v6976_v17  ;;  %v7946_v39 = vmul.f32 %v6976_v17, %v6976_v17  ;;  %v7011_v18 = vcombine.high %v6393_v7, %v6393_v7  ;;  %v7655_v50 = vrot.slane %v7647_v51, %v12264_v37  ;;  %v10257_v16 = vpop.f32.mrf.mxu1 }
 0x330   : > { %v6943_v61 = vcombine.high %v6941_v53, %v6941_v53  ;;  %v7614_v12 = vcombine.low %v6942_v62, %v6941_v53  ;;  %v7936_v40 = vmul.f32 %v6934_v15, %v6934_v15  ;;  %v8511_v49 = vcombine.low %v7943_v22, %v7944_v25 }
 0x331   : > { %v7662_v57 = vrot.slane %v7648_v8, %v12264_v37  ;;  %v7621_v27 = vrot.slane %v7613_v63, %v12264_v37  ;;  %v7937_v19 = vmul.f32 %v6942_v62, %v6942_v62  ;;  %v7938_v2 = vmul.f32 %v6941_v53, %v6941_v53 }
 0x332   : > { %v7628_v43 = vrot.slane %v7614_v12, %v12264_v37  ;;  %v7630_v46 = vcombine.low %v6943_v61, %v12606_v3  ;;  %v7939_v11 = vmul.f32 %v6943_v61, %v6943_v61  ;;  %v8512_v54 = vcombine.low %v7945_v14, %v7946_v39 }
 0x333   : > { %v12642_v5 = vcombine.low %v7655_v50, %v7662_v57  ;;  %v8477_v20 = vcombine.low %v7935_v52, %v7936_v40  ;;  %v12645_v41 = vrot.slane %v6393_v7, %v12264_v37  ;;  %v8478_v26 = vcombine.low %v7937_v19, %v7938_v2  ;;  %v5813_v40 = vpop.f32.mrf.mxu1 }
 0x334   : > { %v7629_v24 = vcombine.low %v7621_v27, %v7628_v43  ;;  %v7638_v42 = vrot.slane %v7630_v46, %v12264_v37  ;;  %v8494_v44 = vcombine.low %v7939_v11, %v12626_v30  ;;  %v8509_v58 = vrot.slane %v8495_v38, %v12264_v37 }
 0x335   : > { %9404 = vst [vmem:[%s12309_s17 + $0x139] sm:$0xff] %v12642_v5  ;;  %v8485_v3 = vrot.slane %v8477_v20, %v12264_v37  ;;  %v7025_v35 = vrot.slane %v7011_v18, %v12264_v37  ;;  %v7026_v4 = vcombine.high %v12645_v41, %v12645_v41  ;;  %v8492_v9 = vrot.slane %v8478_v26, %v12264_v37 }
 0x336   : > { %v7646_v31 = vcombine.low %v7638_v42, %v7645_v34  ;;  %v7836_v36 = vadd.f32 %v7835_v60, %v7629_v24  ;;  %v8502_v6 = vrot.slane %v8494_v44, %v12264_v37  ;;  %9402 = vst [vmem:[%s12309_s17 + $0x121] sm:$0xff] %v7629_v24  ;;  %v5856_v30 = vadd.f32 %v5797_v0, %v12249_v59  ;;  %v6335_v59 = vpop.f32.mrf.mxu0 }
 0x337   : > { %v5859_v38 = vadd.f32 %v10254_v23, %v12251_v29  ;;  %v12662_v55 = vrot.slane %v8512_v54, %v12264_v37  ;;  %v5857_v21 = vadd.f32 %v5800_v56, %v12253_v28  ;;  %v12666_v13 = vrot.slane %v8511_v49, %v12264_v37 }
 0x338   : > { %v7837_v34 = vadd.f32 %v7836_v36, %v7646_v31  ;;  %v8493_v10 = vcombine.low %v8485_v3, %v8492_v9  ;;  %v8510_v7 = vcombine.low %v8502_v6, %v8509_v58  ;;  %9403 = vst [vmem:[%s12309_s17 + $0x129] sm:$0xff] %v7646_v31  ;;  %v7955_v60 = vmul.f32 %v7026_v4, %v7026_v4 }
 0x339   : > { %v7956_v52 = vmul.f32 %v7025_v35, %v7025_v35  ;;  %v6391_v47 = vadd.f32 %v6332_v32, %v5856_v30  ;;  %v6394_v15 = vadd.f32 %v10306_v1, %v5859_v38  ;;  %v12670_v29 = vadd.f32 %v10257_v16, %v12255_v48  ;;  %v10309_v32 = vpop.f32.mrf.mxu0  ;;  %v10258_v1 = vpop.f32.mrf.mxu1 }
 0x33a   : > { %v8700_v0 = vadd.f32 %v8699_v45, %v8493_v10  ;;  %v7698_v17 = vcombine.low %v7026_v4, %v7025_v35  ;;  %v7027_v51 = vcombine.high %v7025_v35, %v7025_v35  ;;  %v8527_v28 = vcombine.low %v12666_v13, %v12662_v55  ;;  %v12872_v13 = vld [vmem:[#allocation7_spill] sm:$0xff] }
 0x33b   : > { %v6977_v22 = vcombine.high %v6391_v47, %v6391_v47  ;;  %v6984_v25 = vrot.slane %v6391_v47, %v12264_v37  ;;  %v7035_v53 = vrot.slane %v6394_v15, %v12264_v37  ;;  %v7028_v63 = vcombine.high %v6394_v15, %v6394_v15  ;;  %v6348_v36 = vpop.f32.mrf.mxu0 }
 0x33c   : > { %v8701_v62 = vadd.f32 %v8700_v0, %v8510_v7  ;;  %v7957_v23 = vmul.f32 %v7027_v51, %v7027_v51  ;;  %v6392_v8 = vadd.f32 %v6335_v59, %v5857_v21  ;;  %v12678_v45 = vmul.f32 %v12645_v41, %v12645_v41 }
 0x33d   : > { %v8562_v48 = vcombine.low %v7955_v60, %v7956_v52  ;;  %v6991_v14 = vrot.slane %v6977_v22, %v12264_v37  ;;  %v6992_v39 = vcombine.high %v6984_v25, %v6984_v25  ;;  %v7947_v18 = vmul.f32 %v6984_v25, %v6984_v25 }
 0x33e   : > { %v7699_v50 = vcombine.low %v7027_v51, %v7035_v53  ;;  %v7706_v61 = vrot.slane %v7698_v17, %v12264_v37  ;;  %v7958_v12 = vmul.f32 %v7035_v53, %v7035_v53  ;;  %v6994_v19 = vcombine.high %v6392_v8, %v6392_v8  ;;  %v10310_v17 = vpop.f32.mrf.mxu0 }
 0x33f   : > { %v6993_v57 = vcombine.high %v6991_v14, %v6991_v14  ;;  %v7664_v49 = vcombine.low %v6984_v25, %v6992_v39  ;;  %v7948_v27 = vmul.f32 %v6992_v39, %v6992_v39  ;;  %v12683_v43 = vrot.slane %v7028_v63, %v12264_v37 }
 0x340   : > { %v7713_v46 = vrot.slane %v7699_v50, %v12264_v37  ;;  %v8563_v2 = vcombine.low %v7957_v23, %v7958_v12  ;;  %v7001_v11 = vrot.slane %v6392_v8, %v12264_v37  ;;  %v7949_v56 = vmul.f32 %v6991_v14, %v6991_v14 }
 0x341   : > { %v7665_v54 = vcombine.low %v6991_v14, %v6993_v57  ;;  %v7950_v20 = vmul.f32 %v6993_v57, %v6993_v57  ;;  %v8528_v24 = vcombine.low %v7947_v18, %v7948_v27  ;;  %v5860_v42 = vadd.f32 %v5813_v40, %v12257_v33 }
 0x342   : > { %v7714_v26 = vcombine.low %v7706_v61, %v7713_v46  ;;  %v8570_v44 = vrot.slane %v8562_v48, %v12264_v37  ;;  %v8577_v58 = vrot.slane %v8563_v2, %v12264_v37  ;;  %v7672_v3 = vrot.slane %v7664_v49, %v12264_v37 }
 0x343   : > { %v7679_v35 = vrot.slane %v7665_v54, %v12264_v37  ;;  %v8529_v4 = vcombine.low %v7949_v56, %v7950_v20  ;;  %v7008_v31 = vrot.slane %v6994_v19, %v12264_v37  ;;  %v8536_v9 = vrot.slane %v8528_v24, %v12264_v37  ;;  %v5816_v24 = vpop.f32.mrf.mxu1 }
 0x344   : > { %v7043_v33 = vcombine.high %v12683_v43, %v12683_v43  ;;  %v8578_v6 = vcombine.low %v8570_v44, %v8577_v58  ;;  %9407 = vst [vmem:[%s12309_s17 + $0x159] sm:$0xff] %v7714_v26  ;;  %v7009_v30 = vcombine.high %v7001_v11, %v7001_v11  ;;  %v7838_v16 = vadd.f32 %v7837_v34, %v12642_v5 }
 0x345   : > { %v7680_v38 = vcombine.low %v7672_v3, %v7679_v35  ;;  %v8543_v55 = vrot.slane %v8529_v4, %v12264_v37  ;;  %v7010_v21 = vcombine.high %v7008_v31, %v7008_v31  ;;  %v5863_v10 = vadd.f32 %v10258_v1, %v12872_v13 }
 0x346   : > { %v7681_v7 = vcombine.low %v7009_v30, %v7008_v31  ;;  %v7951_v60 = vmul.f32 %v7009_v30, %v7009_v30  ;;  %v7952_v52 = vmul.f32 %v7008_v31, %v7008_v31  ;;  %v7960_v51 = vmul.f32 %v7043_v33, %v7043_v33  ;;  %v12873_v30 = vld [vmem:[#allocation8_spill] sm:$0xff] }
 0x347   : > { %v8544_v47 = vcombine.low %v8536_v9, %v8543_v55  ;;  %9405 = vst [vmem:[%s12309_s17 + $0x141] sm:$0xff] %v7680_v38  ;;  %v7682_v15 = vcombine.low %v7010_v21, %v12645_v41  ;;  %v7839_v59 = vadd.f32 %v7838_v16, %v7680_v38  ;;  %v7953_v0 = vmul.f32 %v7010_v21, %v7010_v21 }
 0x348   : > { %v8545_v22 = vcombine.low %v7951_v60, %v7952_v52  ;;  %v8702_v25 = vadd.f32 %v8701_v62, %v8527_v28  ;;  %v6397_v53 = vadd.f32 %v10309_v32, %v12670_v29  ;;  %v7689_v63 = vrot.slane %v7681_v7, %v12264_v37 }
 0x349   : > { %v7696_v5 = vrot.slane %v7682_v15, %v12264_v37  ;;  %v8546_v34 = vcombine.low %v7953_v0, %v12678_v45  ;;  %v6395_v23 = vadd.f32 %v6348_v36, %v5860_v42  ;;  %v6398_v14 = vadd.f32 %v10310_v17, %v5863_v10 }
 0x34a   : > { %v8553_v8 = vrot.slane %v8545_v22, %v12264_v37  ;;  %v8703_v48 = vadd.f32 %v8702_v25, %v8544_v47  ;;  %v7078_v41 = vcombine.high %v6397_v53, %v6397_v53  ;;  %v7959_v29 = vmul.f32 %v12683_v43, %v12683_v43 }
 0x34b   : > { %v7697_v39 = vcombine.low %v7689_v63, %v7696_v5  ;;  %v8560_v18 = vrot.slane %v8546_v34, %v12264_v37  ;;  %v7044_v50 = vcombine.high %v6395_v23, %v6395_v23  ;;  %v7051_v28 = vrot.slane %v6395_v23, %v12264_v37 }
 0x34c   : > { %v7715_v62 = vcombine.low %v12683_v43, %v7043_v33  ;;  %v8579_v40 = vcombine.low %v7959_v29, %v7960_v51  ;;  %v12714_v57 = vrot.slane %v6397_v53, %v12264_v37  ;;  %v12717_v49 = vrot.slane %v7078_v41, %v12264_v37 }
 0x34d   : > { %v7840_v61 = vadd.f32 %v7839_v59, %v7697_v39  ;;  %v8561_v12 = vcombine.low %v8553_v8, %v8560_v18  ;;  %9406 = vst [vmem:[%s12309_s17 + $0x151] sm:$0xff] %v7697_v39  ;;  %v7059_v45 = vcombine.high %v7051_v28, %v7051_v28  ;;  %v7095_v27 = vcombine.high %v6398_v14, %v6398_v14 }
 0x34e   : > { %v12720_v46 = vrot.slane %v7044_v50, %v12264_v37  ;;  %v7961_v11 = vmul.f32 %v7051_v28, %v7051_v28  ;;  %v7723_v54 = vrot.slane %v7715_v62, %v12264_v37  ;;  %v12726_v42 = vcombine.high %v12714_v57, %v12714_v57 }
 0x34f   : > { %v7841_v19 = vadd.f32 %v7840_v61, %v7714_v26  ;;  %v8704_v32 = vadd.f32 %v8703_v48, %v8561_v12  ;;  %v7716_v2 = vcombine.low %v7051_v28, %v7059_v45  ;;  %v7962_v43 = vmul.f32 %v7059_v45, %v7059_v45 }
 0x350   : > { %v7094_v26 = vcombine.high %v12717_v49, %v12717_v49  ;;  %v7102_v58 = vrot.slane %v6398_v14, %v12264_v37  ;;  %v8587_v3 = vrot.slane %v8579_v40, %v12264_v37  ;;  %v12734_v35 = vcombine.high %v12720_v46, %v12720_v46 }
 0x351   : > { %v8705_v56 = vadd.f32 %v8704_v32, %v8578_v6  ;;  %v7730_v20 = vrot.slane %v7716_v2, %v12264_v37  ;;  %v8580_v44 = vcombine.low %v7961_v11, %v7962_v43  ;;  %v7109_v1 = vrot.slane %v7095_v27, %v12264_v37  ;;  %v6351_v6 = vpop.f32.mrf.mxu0 }
 0x352   : > { %v7110_v36 = vcombine.high %v7102_v58, %v7102_v58  ;;  %v7766_v9 = vcombine.low %v7094_v26, %v7102_v58  ;;  %v12738_v33 = vmul.f32 %v7094_v26, %v7094_v26  ;;  %v5861_v38 = vadd.f32 %v5816_v24, %v12873_v30 }
 0x353   : > { %v7731_v4 = vcombine.low %v7723_v54, %v7730_v20  ;;  %v8594_v31 = vrot.slane %v8580_v44, %v12264_v37  ;;  %v7972_v21 = vmul.f32 %v7102_v58, %v7102_v58  ;;  %v7974_v16 = vmul.f32 %v7109_v1, %v7109_v1 }
 0x354   : > { %v12746_v13 = vmul.f32 %v12726_v42, %v12726_v42  ;;  %v7767_v7 = vcombine.low %v7110_v36, %v7109_v1  ;;  %v7973_v60 = vmul.f32 %v7110_v36, %v7110_v36  ;;  %v12750_v52 = vmul.f32 %v12734_v35, %v12734_v35 }
 0x355   : > { %v12741_v55 = vadd.f32 %v7841_v19, %v7731_v4  ;;  %9408 = vst [vmem:[%s12309_s17 + $0x169] sm:$0xff] %v7731_v4  ;;  %v8595_v10 = vcombine.low %v8587_v3, %v8594_v31  ;;  %v8630_v47 = vcombine.low %v12738_v33, %v7972_v21  ;;  %v6396_v15 = vadd.f32 %v6351_v6, %v5861_v38 }
 0x356   : > { %v7774_v0 = vrot.slane %v7766_v9, %v12264_v37  ;;  %v7781_v17 = vrot.slane %v7767_v7, %v12264_v37  ;;  %v8631_v51 = vcombine.low %v7973_v60, %v7974_v16  ;;  %v10625_v22 = vmov 0.0  }
 0x357   : > { %v12753_v59 = vadd.f32 %v8705_v56, %v8595_v10  ;;  %8744 = vst [vmem:[%s12309_s17] sm:$0xff] %v10625_v22  ;;  %8745 = vst [vmem:[%s12309_s17 + $0x8] sm:$0xff] %v10625_v22  ;;  %v7970_v25 = vmul.f32 %v12717_v49, %v12717_v49  ;;  %v7963_v53 = vmul.f32 %v12720_v46, %v12720_v46 }
 0x358   : > { %8746 = vst [vmem:[%s12309_s17 + $0x10] sm:$0x3] %v10625_v22  ;;  %9412 = vst [vmem:[%s12309_s17 + $0x198] sm:$0xff] %v10625_v22  ;;  %v7061_v63 = vcombine.high %v6396_v15, %v6396_v15  ;;  %v7068_v5 = vrot.slane %v6396_v15, %v12264_v37  ;;  %v7732_v34 = vcombine.low %v12720_v46, %v12734_v35 }
 0x359   : > { %9413 = vst [vmem:[%s12309_s17 + $0x1a0] sm:$0xff] %v10625_v22  ;;  %9414 = vst [vmem:[%s12309_s17 + $0x1a8] sm:$0x3] %v10625_v22  ;;  %v7782_v23 = vcombine.low %v7774_v0, %v7781_v17  ;;  %v8638_v8 = vrot.slane %v8630_v47, %v12264_v37  ;;  %v8645_v48 = vrot.slane %v8631_v51, %v12264_v37 }
 0x35a   : > { %9415 = vst [vmem:[%s12309_s17 + $0x18] sm:$0x1] %v10625_v22  ;;  %9416 = vst [vmem:[%s12309_s17 + $0x30] sm:$0x1] %v10625_v22  ;;  %v7075_v41 = vrot.slane %v7061_v63, %v12264_v37  ;;  %v7076_v14 = vcombine.high %v7068_v5, %v7068_v5  ;;  %v7750_v39 = vcombine.low %v12726_v42, %v12717_v49 }
 0x35b   : > { %9417 = vst [vmem:[%s12309_s17 + $0x48] sm:$0x1] %v10625_v22  ;;  %9418 = vst [vmem:[%s12309_s17 + $0x60] sm:$0x1] %v10625_v22  ;;  %v8596_v18 = vcombine.low %v7963_v53, %v12750_v52  ;;  %v8646_v50 = vcombine.low %v8638_v8, %v8645_v48  ;;  %v7965_v62 = vmul.f32 %v7068_v5, %v7068_v5 }
 0x35c   : > { %9419 = vst [vmem:[%s12309_s17 + $0x78] sm:$0x1] %v10625_v22  ;;  %9420 = vst [vmem:[%s12309_s17 + $0x90] sm:$0x1] %v10625_v22  ;;  %v7077_v28 = vcombine.high %v7075_v41, %v7075_v41  ;;  %v7733_v29 = vcombine.low %v7068_v5, %v7076_v14  ;;  %v7966_v61 = vmul.f32 %v7076_v14, %v7076_v14 }
 0x35d   : > { %9421 = vst [vmem:[%s12309_s17 + $0xa8] sm:$0x1] %v10625_v22  ;;  %9422 = vst [vmem:[%s12309_s17 + $0xc0] sm:$0x1] %v10625_v22  ;;  %v7968_v12 = vmul.f32 %v12714_v57, %v12714_v57  ;;  %v8614_v45 = vcombine.low %v12746_v13, %v7970_v25  ;;  %v7740_v40 = vrot.slane %v7732_v34, %v12264_v37 }
 0x35e   : > { %9423 = vst [vmem:[%s12309_s17 + $0xd8] sm:$0x1] %v10625_v22  ;;  %9424 = vst [vmem:[%s12309_s17 + $0xf0] sm:$0x1] %v10625_v22  ;;  %v7747_v27 = vrot.slane %v7733_v29, %v12264_v37  ;;  %v7749_v49 = vcombine.low %v7077_v28, %v12714_v57  ;;  %v7967_v19 = vmul.f32 %v7077_v28, %v7077_v28 }
 0x35f   : > { %9425 = vst [vmem:[%s12309_s17 + $0x108] sm:$0x1] %v10625_v22  ;;  %9426 = vst [vmem:[%s12309_s17 + $0x120] sm:$0x1] %v10625_v22  ;;  %v8597_v32 = vcombine.low %v7965_v62, %v7966_v61  ;;  %v7764_v46 = vrot.slane %v7750_v39, %v12264_v37  ;;  %v8604_v2 = vrot.slane %v8596_v18, %v12264_v37 }
 0x360   : > { %9427 = vst [vmem:[%s12309_s17 + $0x138] sm:$0x1] %v10625_v22  ;;  %9428 = vst [vmem:[%s12309_s17 + $0x150] sm:$0x1] %v10625_v22  ;;  %v7748_v11 = vcombine.low %v7740_v40, %v7747_v27  ;;  %v7757_v43 = vrot.slane %v7749_v49, %v12264_v37  ;;  %v8613_v56 = vcombine.low %v7967_v19, %v7968_v12 }
 0x361   : > { %9429 = vst [vmem:[%s12309_s17 + $0x168] sm:$0x1] %v10625_v22  ;;  %9430 = vst [vmem:[%s12309_s17 + $0x180] sm:$0x1] %v10625_v22  ;;  %v8611_v54 = vrot.slane %v8597_v32, %v12264_v37  ;;  %v8628_v20 = vrot.slane %v8614_v45, %v12264_v37 }
 0x362   : > { %9431 = vst [vmem:[%s12309_s17 + $0x29] sm:$0x1] %v10625_v22  ;;  %9432 = vst [vmem:[%s12309_s17 + $0x41] sm:$0x1] %v10625_v22  ;;  %v7765_v24 = vcombine.low %v7757_v43, %v7764_v46  ;;  %v7843_v42 = vadd.f32 %v12741_v55, %v7748_v11  ;;  %v8621_v44 = vrot.slane %v8613_v56, %v12264_v37 }
 0x363   : > { %9433 = vst [vmem:[%s12309_s17 + $0x59] sm:$0x1] %v10625_v22  ;;  %9434 = vst [vmem:[%s12309_s17 + $0x71] sm:$0x1] %v10625_v22  ;;  %v8612_v57 = vcombine.low %v8604_v2, %v8611_v54 }
 0x364   : > { %9435 = vst [vmem:[%s12309_s17 + $0x89] sm:$0x1] %v10625_v22  ;;  %9436 = vst [vmem:[%s12309_s17 + $0xa1] sm:$0x1] %v10625_v22  ;;  %v7844_v26 = vadd.f32 %v7843_v42, %v7765_v24  ;;  %v8629_v58 = vcombine.low %v8621_v44, %v8628_v20 }
 0x365   : > { %9437 = vst [vmem:[%s12309_s17 + $0xb9] sm:$0x1] %v10625_v22  ;;  %9438 = vst [vmem:[%s12309_s17 + $0xd1] sm:$0x1] %v10625_v22  ;;  %v8707_v3 = vadd.f32 %v12753_v59, %v8612_v57 }
 0x366   : > { %9439 = vst [vmem:[%s12309_s17 + $0xe9] sm:$0x1] %v10625_v22  ;;  %9440 = vst [vmem:[%s12309_s17 + $0x101] sm:$0x1] %v10625_v22  ;;  %v7845_v35 = vadd.f32 %v7844_v26, %v7782_v23 }
 0x367   : > { %9441 = vst [vmem:[%s12309_s17 + $0x119] sm:$0x1] %v10625_v22  ;;  %9442 = vst [vmem:[%s12309_s17 + $0x131] sm:$0x1] %v10625_v22  ;;  %v8708_v4 = vadd.f32 %v8707_v3, %v8629_v58 }
 0x368   : > { %9443 = vst [vmem:[%s12309_s17 + $0x149] sm:$0x1] %v10625_v22  ;;  %9444 = vst [vmem:[%s12309_s17 + $0x161] sm:$0x1] %v10625_v22 }
 0x369   : > { %9445 = vst [vmem:[%s12309_s17 + $0x179] sm:$0x1] %v10625_v22  ;;  %9446 = vst [vmem:[%s12309_s17 + $0x191] sm:$0x1] %v10625_v22  ;;  %v8709_v1 = vadd.f32 %v8708_v4, %v8646_v50 }
 0x36a   : > { %9411 = vst [vmem:[%s12309_s17 + $0x189] sm:$0xff] %v7782_v23  ;;  %9409 = vst [vmem:[%s12309_s17 + $0x171] sm:$0xff] %v7748_v11 }
 0x36b   : > { %9410 = vst [vmem:[%s12309_s17 + $0x181] sm:$0xff] %v7765_v24  ;;  %7846 = vst [vmem:[%s345_s8] sm:$0xff] %v7845_v35 }
 0x36c   : > { %8710 = vst [vmem:[%s352_s22] sm:$0xff] %v8709_v1 }
 0x36d PF: > { %s18_s26 = sadd.s32 1, %s10621_s26   ;;  %s12874_s24 = smov %s10617_s25 }
 0x36e   : > { %p15_p5 = scmp.ge.s32.totalorder %s18_s26, 4   ;;  %s12875_s25 = smov %s12877_s27 }
 0x370   :  { %17 = sbr.rel (!%p15_p5) target bundleno = 2 (0x2), region = 111 }

</bundles_post_ra>
